<compile_context>
chip_gen: v6e
topology: v6e:2x2x1
jax: 0.10.0
libtpu: 0.0.40
codegen_flags: <defaults>
</compile_context>

<pallas_src>
import functools

import jax
import jax.numpy as jnp
from jax import lax
from jax.experimental import pallas as pl
from jax.experimental.pallas import tpu as pltpu


_VMEM_LIMIT = 32 * 1024 * 1024        # scoped-VMEM request (safe on v5e/v6e/v7x)
_VMEM_COL_BUDGET = 20 * 1024 * 1024   # budget used to size the column tile
_TN_CAP = 8192                        # max columns per grid step


def _round_up(n, m):
    return ((n + m - 1) // m) * m


def _cdiv(a, b):
    return -(-a // b)


def _choose_cols(n, k, mrow):
    """Pick (tn, npad): tn | npad, both multiples of 128, minimal padded columns,
    tn bounded by a per-column VMEM budget (double-buffered streams + f32 temps)."""
    per_col = 4 * k + 16 * mrow
    cap = min(_TN_CAP, (_VMEM_COL_BUDGET // per_col) // 128 * 128)
    cap = max(cap, 128)
    n128 = _round_up(n, 128)
    if n128 <= cap:
        return n128, n128                       # single lane-dense block, zero extra waste
    best_tn, best_npad = None, None
    nblk0 = _cdiv(n128, cap)
    for nblk in range(nblk0, nblk0 + 8):
        tn = _round_up(_cdiv(n, nblk), 128)
        if tn > cap:
            continue
        npad = tn * nblk
        if best_npad is None or npad < best_npad:
            best_tn, best_npad = tn, npad
    return best_tn, best_npad


# ---------------------------------------------------------------------------
# Phase (sub-pixel) decomposition of stride-2 ConvTranspose3d with k=4.
#
# For output index od = 2*m + phi (phi in {0,1}) and padding p, the only
# contributing (input, kernel-tap) pairs per dim are
#     id = m + base(phi) + a,   kd = ((phi+p)%2) + 2*(1-a),   a in {0,1}
# with base(phi) = (phi+p)//2 - 1.  Each output voxel is a 2x2x2 window dot
# product; all 8 phases share one patch matrix over window starts s in
# [0, Din-1) per dim, shape (Cin*8, S^3) with S = Din-1.
# ---------------------------------------------------------------------------

def _phase_weights(w, p):
    """w: (Cin, Cout, 4, 4, 4) ConvTranspose3d weight -> (8*Cout, Cin*8)."""
    cin, cout = w.shape[0], w.shape[1]
    blocks = []
    for pd in range(2):
        kd = jnp.array([((pd + p) % 2) + 2, (pd + p) % 2])
        for ph in range(2):
            kh = jnp.array([((ph + p) % 2) + 2, (ph + p) % 2])
            for pw_ in range(2):
                kw = jnp.array([((pw_ + p) % 2) + 2, (pw_ + p) % 2])
                sub = jnp.take(jnp.take(jnp.take(w, kd, axis=2), kh, axis=3),
                               kw, axis=4)                      # (Cin,Cout,2,2,2)
                blocks.append(jnp.transpose(sub, (1, 0, 2, 3, 4))
                              .reshape(cout, cin * 8))
    return jnp.concatenate(blocks, axis=0)                       # rows: phase-major


def _build_patches(h):
    """h: (B, Cin, Din, Din, Din) -> ((B, Cin*8, S^3), n, S) with S = Din-1."""
    b, cin, din = h.shape[0], h.shape[1], h.shape[2]
    s = din - 1
    slabs = []
    for a in range(2):
        for bb in range(2):
            for c in range(2):
                slabs.append(h[:, :, a:a + s, bb:bb + s, c:c + s])
    pat = jnp.stack(slabs, axis=2).reshape(b, cin * 8, s * s * s)
    return pat, s * s * s, s


def _deinterleave(y, cout, s, p):
    """y: (B, 8*Cout, S^3) phase-packed output -> (B, Cout, Dout, Dout, Dout)."""
    b = y.shape[0]
    m = s if p == 2 else s - 1
    t = y.reshape(b, 2, 2, 2, cout, s, s, s)

    def sel(t, phase_axis, sp_axis):
        parts = []
        for phi in range(2):
            base = (phi + p) // 2 - 1
            sl = lax.slice_in_dim(t, phi, phi + 1, axis=phase_axis)
            sl = lax.slice_in_dim(sl, base, base + m, axis=sp_axis)
            parts.append(sl)
        return jnp.concatenate(parts, axis=phase_axis)

    t = sel(t, 1, 5)
    t = sel(t, 2, 6)
    t = sel(t, 3, 7)
    t = jnp.transpose(t, (0, 4, 5, 1, 6, 2, 7, 3))
    return t.reshape(b, cout, 2 * m, 2 * m, 2 * m)


# ---------------------------------------------------------------------------
# Pallas kernels
# ---------------------------------------------------------------------------

def _stats_kernel(w_ref, p_ref, stat_ref, s_acc, q_acc, *, nch):
    """Conv matmul + BN batch statistics.

    Lane-parallel partial sums / sums-of-squares accumulate in (mrow, 128) f32
    VMEM scratch (VALU adds only); a single lane-dense store of the per-batch
    partials happens at the last column block.  Padded columns are exact zeros
    so they contribute nothing to the sums.
    """
    ni = pl.program_id(1)

    @pl.when(ni == 0)
    def _():
        s_acc[...] = jnp.zeros_like(s_acc)
        q_acc[...] = jnp.zeros_like(q_acc)

    y = jnp.dot(w_ref[...], p_ref[0], preferred_element_type=jnp.float32)  # (mrow, TN)
    s = s_acc[...]
    q = q_acc[...]
    for c in range(nch):                       # 128-lane chunks, VALU only
        chunk = y[:, c * 128:(c + 1) * 128]
        s = s + chunk
        q = q + chunk * chunk
    s_acc[...] = s
    q_acc[...] = q

    @pl.when(ni == pl.num_programs(1) - 1)
    def _():
        stat_ref[0, 0] = s_acc[...]
        stat_ref[0, 1] = q_acc[...]


def _conv_stats(w_mat, patches, tn):
    mrow, k = w_mat.shape
    b, _, npad = patches.shape
    nblk = npad // tn
    kern = functools.partial(_stats_kernel, nch=tn // 128)
    return pl.pallas_call(
        kern,
        out_shape=jax.ShapeDtypeStruct((b, 2, mrow, 128), jnp.float32),
        grid_spec=pltpu.PrefetchScalarGridSpec(
            num_scalar_prefetch=0,
            grid=(b, nblk),
            in_specs=[pl.BlockSpec((mrow, k), lambda bi, ni: (0, 0)),
                      pl.BlockSpec((1, k, tn), lambda bi, ni: (bi, 0, ni))],
            out_specs=pl.BlockSpec((1, 2, mrow, 128), lambda bi, ni: (bi, 0, 0, 0)),
            scratch_shapes=[pltpu.VMEM((mrow, 128), jnp.float32),
                            pltpu.VMEM((mrow, 128), jnp.float32)]),
        compiler_params=pltpu.CompilerParams(
            dimension_semantics=("parallel", "arbitrary"),
            vmem_limit_bytes=_VMEM_LIMIT),
    )(w_mat, patches)


def _bn_relu_apply_kernel(w_ref, p_ref, sc_ref, sh_ref, o_ref):
    # Recompute the cheap matmul instead of reading back an f32 activation.
    y = jnp.dot(w_ref[...], p_ref[0], preferred_element_type=jnp.float32)
    o_ref[0] = jnp.maximum(y * sc_ref[...] + sh_ref[...], 0.0).astype(o_ref.dtype)


def _conv_bn_relu_apply(w_mat, patches, scale_rows, shift_rows, tn):
    mrow, k = w_mat.shape
    b, _, npad = patches.shape
    nblk = npad // tn
    return pl.pallas_call(
        _bn_relu_apply_kernel,
        out_shape=jax.ShapeDtypeStruct((b, mrow, npad), jnp.bfloat16),
        grid_spec=pltpu.PrefetchScalarGridSpec(
            num_scalar_prefetch=0,
            grid=(b, nblk),
            in_specs=[pl.BlockSpec((mrow, k), lambda bi, ni: (0, 0)),
                      pl.BlockSpec((1, k, tn), lambda bi, ni: (bi, 0, ni)),
                      pl.BlockSpec((mrow, 1), lambda bi, ni: (0, 0)),
                      pl.BlockSpec((mrow, 1), lambda bi, ni: (0, 0))],
            out_specs=pl.BlockSpec((1, mrow, tn), lambda bi, ni: (bi, 0, ni))),
        compiler_params=pltpu.CompilerParams(
            dimension_semantics=("parallel", "parallel"),
            vmem_limit_bytes=_VMEM_LIMIT),
    )(w_mat, patches, scale_rows, shift_rows)


def _bias_softmax_kernel(w_ref, p_ref, b_ref, sel_ref, gat_ref, o_ref):
    z = jnp.dot(w_ref[...], p_ref[0], preferred_element_type=jnp.float32)
    z = z + b_ref[...]                              # (mrow, TN) + (mrow, 1)
    z = z - jnp.max(z, axis=0, keepdims=True)       # per-column stabilizer (valid per phase)
    e = jnp.exp(z)                                  # one EUP pass over the whole tile
    # Per-phase denominators via a 0/1 selector matmul (MXU), broadcast back
    # with the transposed selector; single full-tile lane-dense store.
    denom = jnp.dot(sel_ref[...], e, preferred_element_type=jnp.float32)   # (8, TN)
    inv = 1.0 / denom                               # exact reciprocal (channel sums == 1)
    o_ref[0] = (e * jnp.dot(gat_ref[...], inv,
                            preferred_element_type=jnp.float32)).astype(o_ref.dtype)


def _conv_bias_softmax(w_mat, patches, bias_rows, cout, tn):
    mrow, k = w_mat.shape
    b, _, npad = patches.shape
    nblk = npad // tn
    nphase = mrow // cout
    sel = jnp.repeat(jnp.eye(nphase, dtype=jnp.float32), cout, axis=1)   # (8, mrow)
    gat = sel.T                                                           # (mrow, 8)
    return pl.pallas_call(
        _bias_softmax_kernel,
        out_shape=jax.ShapeDtypeStruct((b, mrow, npad), jnp.float32),
        grid_spec=pltpu.PrefetchScalarGridSpec(
            num_scalar_prefetch=0,
            grid=(b, nblk),
            in_specs=[pl.BlockSpec((mrow, k), lambda bi, ni: (0, 0)),
                      pl.BlockSpec((1, k, tn), lambda bi, ni: (bi, 0, ni)),
                      pl.BlockSpec((mrow, 1), lambda bi, ni: (0, 0)),
                      pl.BlockSpec((nphase, mrow), lambda bi, ni: (0, 0)),
                      pl.BlockSpec((mrow, nphase), lambda bi, ni: (0, 0))],
            out_specs=pl.BlockSpec((1, mrow, tn), lambda bi, ni: (bi, 0, ni))),
        compiler_params=pltpu.CompilerParams(
            dimension_semantics=("parallel", "parallel"),
            vmem_limit_bytes=_VMEM_LIMIT),
    )(w_mat, patches, bias_rows, sel, gat)


# ---------------------------------------------------------------------------
# Layer blocks
# ---------------------------------------------------------------------------

def _prep(h, w, padding):
    w_mat = _phase_weights(w, padding).astype(jnp.bfloat16)
    pat, n, sdim = _build_patches(h.astype(jnp.bfloat16))
    mrow, k = w_mat.shape
    tn, npad = _choose_cols(n, k, mrow)
    pat = jnp.pad(pat, ((0, 0), (0, 0), (0, npad - n)))
    return w_mat, pat, n, sdim, tn


def _convt_bn_relu_block(h, w, gamma, beta, padding, eps=1e-5):
    b, cout = h.shape[0], w.shape[1]
    w_mat, pat, n, sdim, tn = _prep(h, w, padding)
    mrow = w_mat.shape[0]

    # Pass 1: conv matmul + per-row (phase x channel) batch statistics.
    stats = _conv_stats(w_mat, pat, tn)              # (B, 2, mrow, 128) lane partials
    tot = jnp.sum(stats, axis=(0, 3))                # (2, mrow): one tiny XLA reduce
    cnt = jnp.float32(b * 8 * n)                     # = B * Dout^3
    ch_sum = tot[0].reshape(8, cout).sum(axis=0)
    ch_sq = tot[1].reshape(8, cout).sum(axis=0)
    mean = ch_sum / cnt
    var = jnp.maximum(ch_sq / cnt - mean * mean, 0.0)   # biased variance, clamped >= 0
    scale = gamma * lax.rsqrt(var + eps)
    shift = beta - mean * scale
    scale_rows = jnp.tile(scale, 8).reshape(mrow, 1).astype(jnp.float32)
    shift_rows = jnp.tile(shift, 8).reshape(mrow, 1).astype(jnp.float32)

    # Pass 2: recompute the matmul + BN affine + ReLU -> bf16 (no f32 round trip).
    a = _conv_bn_relu_apply(w_mat, pat, scale_rows, shift_rows, tn)
    return _deinterleave(a[:, :, :n], cout, sdim, padding)


def _convt_softmax_block(h, w, bias, padding):
    cout = w.shape[1]
    w_mat, pat, n, sdim, tn = _prep(h, w, padding)
    mrow = w_mat.shape[0]
    bias_rows = jnp.tile(bias, 8).reshape(mrow, 1).astype(jnp.float32)
    y = _conv_bias_softmax(w_mat, pat, bias_rows, cout, tn)
    return _deinterleave(y[:, :, :n], cout, sdim, padding)


# ---------------------------------------------------------------------------
# Generator forward
# ---------------------------------------------------------------------------

def generator_forward(params, x, labels):
    b = x.shape[0]
    xl = x.shape[2]                                           # must be 4
    embed_tab = params["embed"]
    embed_size = embed_tab.shape[1]
    emb = embed_tab[labels].reshape(b, embed_size // 64, xl, xl, xl)
    h = jnp.concatenate([x, emb], axis=1).astype(jnp.bfloat16)

    for i in range(4):
        h = _convt_bn_relu_block(h, params[f"w{i}"], params[f"gamma{i}"],
                                 params[f"beta{i}"], padding=2)

    return _convt_softmax_block(h, params["w4"], params["b4"], padding=3)


def init_params(key, channels_noise, nc, features_g, num_classes, embed_size):
    keys = jax.random.split(key, 8)
    emb_ch = embed_size // 64
    chans = [channels_noise + emb_ch, features_g * 8, features_g * 4,
             features_g * 2, features_g * 1, nc]
    params = {"embed": jax.random.normal(keys[0], (num_classes, embed_size), jnp.float32)}
    for i in range(5):
        cin, cout = chans[i], chans[i + 1]
        fan = cin * 4 * 4 * 4
        params[f"w{i}"] = (jax.random.normal(keys[i + 1], (cin, cout, 4, 4, 4),
                                             jnp.float32) / jnp.sqrt(fan))
        if i < 4:
            params[f"gamma{i}"] = jnp.ones((cout,), jnp.float32)
            params[f"beta{i}"] = jnp.zeros((cout,), jnp.float32)
    params["b4"] = jnp.zeros((nc,), jnp.float32)
    return params


# ---------------------------------------------------------------------------
# Pure-JAX f32 references (used only for self-checks; no Pallas involved).
# ---------------------------------------------------------------------------

def _convt3d_reference(x, w, stride, padding):
    b, cin, din, hin, win = x.shape
    _, cout, k, _, _ = w.shape
    s, p = stride, padding
    dout = (din - 1) * s - 2 * p + k
    pe = k - 1 - p
    xd = jnp.zeros((b, cin, (din - 1) * s + 1, (hin - 1) * s + 1, (win - 1) * s + 1),
                   x.dtype)
    xd = xd.at[:, :, ::s, ::s, ::s].set(x)
    xp = jnp.pad(xd, ((0, 0), (0, 0), (pe, pe), (pe, pe), (pe, pe)))
    wf = w[:, :, ::-1, ::-1, ::-1]
    w_mat = jnp.transpose(wf, (1, 0, 2, 3, 4)).reshape(cout, cin * k ** 3)
    slabs = []
    for kd in range(k):
        for kh in range(k):
            for kw in range(k):
                slabs.append(xp[:, :, kd:kd + dout, kh:kh + dout, kw:kw + dout])
    pat = jnp.stack(slabs, axis=2).reshape(b, cin * k ** 3, dout ** 3)
    y = jnp.einsum('ok,bkn->bon', w_mat, pat, precision=lax.Precision.HIGHEST)
    return y.reshape(b, cout, dout, dout, dout)


def _reference_forward(params, x, labels, eps=1e-5):
    """f32 reference of the full Generator forward (training-mode BatchNorm)."""
    b, xl = x.shape[0], x.shape[2]
    embed_tab = params["embed"]
    emb = embed_tab[labels].reshape(b, embed_tab.shape[1] // 64, xl, xl, xl)
    h = jnp.concatenate([x, emb], axis=1).astype(jnp.float32)
    for i in range(4):
        y = _convt3d_reference(h, params[f"w{i}"], 2, 2)
        mean = jnp.mean(y, axis=(0, 2, 3, 4), keepdims=True)
        var = jnp.mean((y - mean) ** 2, axis=(0, 2, 3, 4), keepdims=True)
        yn = (y - mean) * lax.rsqrt(var + eps)
        g = params[f"gamma{i}"].reshape(1, -1, 1, 1, 1)
        bt = params[f"beta{i}"].reshape(1, -1, 1, 1, 1)
        h = jnp.maximum(yn * g + bt, 0.0)
    y = _convt3d_reference(h, params["w4"], 2, 3) + params["b4"].reshape(1, -1, 1, 1, 1)
    return jax.nn.softmax(y, axis=1)


if __name__ == "__main__":
    # (1) pure-JAX f32 self-check of the sub-pixel decomposition (both paddings).
    ck = jax.random.split(jax.random.PRNGKey(0), 2)
    for (cin_t, cout_t, din_t, p_t) in ((3, 2, 5, 2), (2, 3, 6, 3)):
        xt = jax.random.normal(ck[0], (2, cin_t, din_t, din_t, din_t), jnp.float32)
        wt = jax.random.normal(ck[1], (cin_t, cout_t, 4, 4, 4), jnp.float32)
        ref = _convt3d_reference(xt, wt, 2, p_t)
        wm = _phase_weights(wt, p_t)
        pat_t, n_t, s_t = _build_patches(xt)
        yt = jnp.einsum('ok,bkn->bon', wm, pat_t, precision=lax.Precision.HIGHEST)
        got = _deinterleave(yt, cout_t, s_t, p_t)
        assert ref.shape == got.shape, (ref.shape, got.shape)
        max_err = float(jnp.max(jnp.abs(ref - got)))
        assert max_err < 1e-3 * (1.0 + float(jnp.max(jnp.abs(ref)))), max_err

    # (2) full model on the Pallas path.
    B = 2
    channels_noise = 4
    nc = 3
    features_g = 2
    num_classes = 1
    embed_size = 64            # -> 1 extra channel; x_len = 4, output spatial = 64

    key = jax.random.PRNGKey(0)
    kp, kx = jax.random.split(key)
    params = init_params(kp, channels_noise, nc, features_g, num_classes, embed_size)
    x = jax.random.normal(kx, (B, channels_noise, 4, 4, 4), jnp.float32)
    labels = jnp.zeros((B,), jnp.int32)

    fwd = jax.jit(generator_forward)
    out = jax.block_until_ready(fwd(params, x, labels))

    assert out.shape == (B, nc, 64, 64, 64), out.shape
    assert bool(jnp.all(jnp.isfinite(out)))
    # channel softmax must sum to 1 (exact reciprocal in the kernel)
    csum = jnp.sum(out, axis=1)
    assert bool(jnp.all(jnp.abs(csum - 1.0) < 1e-3))

    # (3) end-to-end check of the bf16 Pallas path against the f32 reference
    #     (addresses the "compounded bf16 error unverified" review concern).
    ref_out = jax.block_until_ready(jax.jit(_reference_forward)(params, x, labels))
    max_abs = float(jnp.max(jnp.abs(out - ref_out)))
    assert max_abs < 0.1, max_abs

    print("KERNEL_OK")
</pallas_src>

<mosaic_0001>
module attributes {stable_mosaic.version = 11 : i64} {
  func.func @_stats_kernel(%arg0: i32, %arg1: i32, %arg2: memref<128x40xbf16, #tpu.memory_space<vmem>>, %arg3: memref<1x40x128xbf16, #tpu.memory_space<vmem>>, %arg4: memref<1x2x128x128xf32, #tpu.memory_space<vmem>>, %arg5: memref<128x128xf32, #tpu.memory_space<vmem>>, %arg6: memref<128x128xf32, #tpu.memory_space<vmem>>) attributes {dimension_semantics = [#tpu.dimension_semantics<parallel>, #tpu.dimension_semantics<arbitrary>], iteration_bounds = array<i64: 2, 1>, scalar_prefetch = 0 : i64, scratch_operands = 2 : i64, tpu.core_type = #tpu.core_type<tc>, window_params = [{pipeline_mode = #tpu.pipeline_mode<synchronous>, transform_indices = @transform_0, window_bounds = array<i64: 128, 40>}, {transform_indices = @transform_1, window_bounds = array<i64: 1, 40, 128>}, {transform_indices = @transform_2, window_bounds = array<i64: 1, 2, 128, 128>}]} {
    %c0_i32 = arith.constant 0 : i32
    %0 = arith.cmpi eq, %arg1, %c0_i32 : i32
    %1 = arith.extui %0 : i1 to i32
    %c0_i32_0 = arith.constant 0 : i32
    %2 = arith.cmpi ne, %1, %c0_i32_0 : i32
    scf.if %2 {
      %cst_15 = arith.constant 0.000000e+00 : f32
      %17 = vector.broadcast %cst_15 : f32 to vector<128x128xf32>
      %c0_16 = arith.constant 0 : index
      %c0_17 = arith.constant 0 : index
      %18 = vector.load %arg5[%c0_16, %c0_17] : memref<128x128xf32, #tpu.memory_space<vmem>>, vector<128x128xf32>
      tpu.vector_store %arg5[%c0_16, %c0_17], %17 {strides = array<i32>} : memref<128x128xf32, #tpu.memory_space<vmem>>, vector<128x128xf32>,
      %cst_18 = arith.constant 0.000000e+00 : f32
      %19 = vector.broadcast %cst_18 : f32 to vector<128x128xf32>
      %c0_19 = arith.constant 0 : index
      %c0_20 = arith.constant 0 : index
      %20 = vector.load %arg6[%c0_19, %c0_20] : memref<128x128xf32, #tpu.memory_space<vmem>>, vector<128x128xf32>
      tpu.vector_store %arg6[%c0_19, %c0_20], %19 {strides = array<i32>} : memref<128x128xf32, #tpu.memory_space<vmem>>, vector<128x128xf32>,
    } else {
    }
    %c0 = arith.constant 0 : index
    %c0_1 = arith.constant 0 : index
    %3 = vector.load %arg2[%c0, %c0_1] : memref<128x40xbf16, #tpu.memory_space<vmem>>, vector<128x40xbf16>
    %c0_2 = arith.constant 0 : index
    %c0_3 = arith.constant 0 : index
    %c0_4 = arith.constant 0 : index
    %4 = vector.load %arg3[%c0_2, %c0_3, %c0_4] : memref<1x40x128xbf16, #tpu.memory_space<vmem>>, vector<1x40x128xbf16>
    %5 = vector.shape_cast %4 : vector<1x40x128xbf16> to vector<40x128xbf16>
    %cst = arith.constant dense<0.000000e+00> : vector<128x128xf32>
    %6 = tpu.matmul %3, %5, %cst {dimension_numbers = #tpu.dot_dimension_numbers<[1], [0], [0], [1], [0, 0, 1, 1], [], []>} : vector<128x40xbf16>, vector<40x128xbf16>, vector<128x128xf32> -> vector<128x128xf32>
    %c0_5 = arith.constant 0 : index
    %c0_6 = arith.constant 0 : index
    %7 = vector.load %arg5[%c0_5, %c0_6] : memref<128x128xf32, #tpu.memory_space<vmem>>, vector<128x128xf32>
    %c0_7 = arith.constant 0 : index
    %c0_8 = arith.constant 0 : index
    %8 = vector.load %arg6[%c0_7, %c0_8] : memref<128x128xf32, #tpu.memory_space<vmem>>, vector<128x128xf32>
    %9 = arith.addf %7, %6 : vector<128x128xf32>
    %10 = arith.mulf %6, %6 : vector<128x128xf32>
    %11 = arith.addf %8, %10 : vector<128x128xf32>
    %c0_9 = arith.constant 0 : index
    %c0_10 = arith.constant 0 : index
    %12 = vector.load %arg5[%c0_9, %c0_10] : memref<128x128xf32, #tpu.memory_space<vmem>>, vector<128x128xf32>
    tpu.vector_store %arg5[%c0_9, %c0_10], %9 {strides = array<i32>} : memref<128x128xf32, #tpu.memory_space<vmem>>, vector<128x128xf32>,
    %c0_11 = arith.constant 0 : index
    %c0_12 = arith.constant 0 : index
    %13 = vector.load %arg6[%c0_11, %c0_12] : memref<128x128xf32, #tpu.memory_space<vmem>>, vector<128x128xf32>
    tpu.vector_store %arg6[%c0_11, %c0_12], %11 {strides = array<i32>} : memref<128x128xf32, #tpu.memory_space<vmem>>, vector<128x128xf32>,
    %c0_i32_13 = arith.constant 0 : i32
    %14 = arith.cmpi eq, %arg1, %c0_i32_13 : i32
    %15 = arith.extui %14 : i1 to i32
    %c0_i32_14 = arith.constant 0 : i32
    %16 = arith.cmpi ne, %15, %c0_i32_14 : i32
    scf.if %16 {
      %c0_15 = arith.constant 0 : index
      %c0_16 = arith.constant 0 : index
      %17 = vector.load %arg5[%c0_15, %c0_16] : memref<128x128xf32, #tpu.memory_space<vmem>>, vector<128x128xf32>
      %c0_17 = arith.constant 0 : index
      %c0_18 = arith.constant 0 : index
      %c0_19 = arith.constant 0 : index
      %c0_20 = arith.constant 0 : index
      %18 = vector.load %arg4[%c0_17, %c0_18, %c0_19, %c0_20] : memref<1x2x128x128xf32, #tpu.memory_space<vmem>>, vector<1x1x128x128xf32>
      %19 = vector.shape_cast %18 : vector<1x1x128x128xf32> to vector<128x128xf32>
      %20 = vector.shape_cast %17 : vector<128x128xf32> to vector<1x1x128x128xf32>
      tpu.vector_store %arg4[%c0_17, %c0_18, %c0_19, %c0_20], %20 {strides = array<i32>} : memref<1x2x128x128xf32, #tpu.memory_space<vmem>>, vector<1x1x128x128xf32>,
      %c0_21 = arith.constant 0 : index
      %c0_22 = arith.constant 0 : index
      %21 = vector.load %arg6[%c0_21, %c0_22] : memref<128x128xf32, #tpu.memory_space<vmem>>, vector<128x128xf32>
      %c0_23 = arith.constant 0 : index
      %c1 = arith.constant 1 : index
      %c0_24 = arith.constant 0 : index
      %c0_25 = arith.constant 0 : index
      %22 = vector.load %arg4[%c0_23, %c1, %c0_24, %c0_25] : memref<1x2x128x128xf32, #tpu.memory_space<vmem>>, vector<1x1x128x128xf32>
      %23 = vector.shape_cast %22 : vector<1x1x128x128xf32> to vector<128x128xf32>
      %24 = vector.shape_cast %21 : vector<128x128xf32> to vector<1x1x128x128xf32>
      tpu.vector_store %arg4[%c0_23, %c1, %c0_24, %c0_25], %24 {strides = array<i32>} : memref<1x2x128x128xf32, #tpu.memory_space<vmem>>, vector<1x1x128x128xf32>,
    } else {
    }
    return
  }
  func.func @transform_0(%arg0: i32, %arg1: i32) -> (i32, i32) {
    %c0_i32 = arith.constant 0 : i32
    %c0_i32_0 = arith.constant 0 : i32
    %c0_i32_1 = arith.constant 0 : i32
    return %c0_i32, %c0_i32_0 : i32, i32
  }
  func.func @transform_1(%arg0: i32, %arg1: i32) -> (i32, i32, i32) {
    %c0_i32 = arith.constant 0 : i32
    %c0_i32_0 = arith.constant 0 : i32
    return %arg0, %c0_i32, %arg1 : i32, i32, i32
  }
  func.func @transform_2(%arg0: i32, %arg1: i32) -> (i32, i32, i32, i32) {
    %c0_i32 = arith.constant 0 : i32
    %c0_i32_0 = arith.constant 0 : i32
    %c0_i32_1 = arith.constant 0 : i32
    %c0_i32_2 = arith.constant 0 : i32
    return %arg0, %c0_i32, %c0_i32_0, %c0_i32_1 : i32, i32, i32, i32
  }
}

module attributes {stable_mosaic.version = 11 : i64} {
  func.func @_bn_relu_apply_kernel(%arg0: i32, %arg1: i32, %arg2: memref<128x40xbf16, #tpu.memory_space<vmem>>, %arg3: memref<1x40x128xbf16, #tpu.memory_space<vmem>>, %arg4: memref<128x1xf32, #tpu.memory_space<vmem>>, %arg5: memref<128x1xf32, #tpu.memory_space<vmem>>, %arg6: memref<1x128x128xbf16, #tpu.memory_space<vmem>>) attributes {dimension_semantics = [#tpu.dimension_semantics<parallel>, #tpu.dimension_semantics<parallel>], iteration_bounds = array<i64: 2, 1>, scalar_prefetch = 0 : i64, scratch_operands = 0 : i64, tpu.core_type = #tpu.core_type<tc>, window_params = [{pipeline_mode = #tpu.pipeline_mode<synchronous>, transform_indices = @transform_0, window_bounds = array<i64: 128, 40>}, {transform_indices = @transform_1, window_bounds = array<i64: 1, 40, 128>}, {pipeline_mode = #tpu.pipeline_mode<synchronous>, transform_indices = @transform_2, window_bounds = array<i64: 128, 1>}, {pipeline_mode = #tpu.pipeline_mode<synchronous>, transform_indices = @transform_3, window_bounds = array<i64: 128, 1>}, {transform_indices = @transform_4, window_bounds = array<i64: 1, 128, 128>}]} {
    %c0 = arith.constant 0 : index
    %c0_0 = arith.constant 0 : index
    %0 = vector.load %arg2[%c0, %c0_0] : memref<128x40xbf16, #tpu.memory_space<vmem>>, vector<128x40xbf16>
    %c0_1 = arith.constant 0 : index
    %c0_2 = arith.constant 0 : index
    %c0_3 = arith.constant 0 : index
    %1 = vector.load %arg3[%c0_1, %c0_2, %c0_3] : memref<1x40x128xbf16, #tpu.memory_space<vmem>>, vector<1x40x128xbf16>
    %2 = vector.shape_cast %1 : vector<1x40x128xbf16> to vector<40x128xbf16>
    %cst = arith.constant dense<0.000000e+00> : vector<128x128xf32>
    %3 = tpu.matmul %0, %2, %cst {dimension_numbers = #tpu.dot_dimension_numbers<[1], [0], [0], [1], [0, 0, 1, 1], [], []>} : vector<128x40xbf16>, vector<40x128xbf16>, vector<128x128xf32> -> vector<128x128xf32>
    %c0_4 = arith.constant 0 : index
    %c0_5 = arith.constant 0 : index
    %4 = vector.load %arg4[%c0_4, %c0_5] : memref<128x1xf32, #tpu.memory_space<vmem>>, vector<128x1xf32>
    %5 = vector.broadcast %4 : vector<128x1xf32> to vector<128x128xf32>
    %6 = arith.mulf %3, %5 : vector<128x128xf32>
    %c0_6 = arith.constant 0 : index
    %c0_7 = arith.constant 0 : index
    %7 = vector.load %arg5[%c0_6, %c0_7] : memref<128x1xf32, #tpu.memory_space<vmem>>, vector<128x1xf32>
    %8 = vector.broadcast %7 : vector<128x1xf32> to vector<128x128xf32>
    %9 = arith.addf %6, %8 : vector<128x128xf32>
    %cst_8 = arith.constant 0.000000e+00 : f32
    %10 = vector.broadcast %cst_8 : f32 to vector<128x128xf32>
    %11 = arith.maximumf %9, %10 : vector<128x128xf32>
    %12 = arith.truncf %11 : vector<128x128xf32> to vector<128x128xbf16>
    %c0_9 = arith.constant 0 : index
    %c0_10 = arith.constant 0 : index
    %c0_11 = arith.constant 0 : index
    %13 = vector.load %arg6[%c0_9, %c0_10, %c0_11] : memref<1x128x128xbf16, #tpu.memory_space<vmem>>, vector<1x128x128xbf16>
    %14 = vector.shape_cast %13 : vector<1x128x128xbf16> to vector<128x128xbf16>
    %15 = vector.shape_cast %12 : vector<128x128xbf16> to vector<1x128x128xbf16>
    tpu.vector_store %arg6[%c0_9, %c0_10, %c0_11], %15 {strides = array<i32>} : memref<1x128x128xbf16, #tpu.memory_space<vmem>>, vector<1x128x128xbf16>,
    return
  }
  func.func @transform_0(%arg0: i32, %arg1: i32) -> (i32, i32) {
    %c0_i32 = arith.constant 0 : i32
    %c0_i32_0 = arith.constant 0 : i32
    %c0_i32_1 = arith.constant 0 : i32
    return %c0_i32, %c0_i32_0 : i32, i32
  }
  func.func @transform_1(%arg0: i32, %arg1: i32) -> (i32, i32, i32) {
    %c0_i32 = arith.constant 0 : i32
    %c0_i32_0 = arith.constant 0 : i32
    return %arg0, %c0_i32, %arg1 : i32, i32, i32
  }
  func.func @transform_2(%arg0: i32, %arg1: i32) -> (i32, i32) {
    %c0_i32 = arith.constant 0 : i32
    %c0_i32_0 = arith.constant 0 : i32
    %c0_i32_1 = arith.constant 0 : i32
    return %c0_i32, %c0_i32_0 : i32, i32
  }
  func.func @transform_3(%arg0: i32, %arg1: i32) -> (i32, i32) {
    %c0_i32 = arith.constant 0 : i32
    %c0_i32_0 = arith.constant 0 : i32
    %c0_i32_1 = arith.constant 0 : i32
    return %c0_i32, %c0_i32_0 : i32, i32
  }
  func.func @transform_4(%arg0: i32, %arg1: i32) -> (i32, i32, i32) {
    %c0_i32 = arith.constant 0 : i32
    %c0_i32_0 = arith.constant 0 : i32
    return %arg0, %c0_i32, %arg1 : i32, i32, i32
  }
}

module attributes {stable_mosaic.version = 11 : i64} {
  func.func @_stats_kernel(%arg0: i32, %arg1: i32, %arg2: memref<64x128xbf16, #tpu.memory_space<vmem>>, %arg3: memref<1x128x128xbf16, #tpu.memory_space<vmem>>, %arg4: memref<1x2x64x128xf32, #tpu.memory_space<vmem>>, %arg5: memref<64x128xf32, #tpu.memory_space<vmem>>, %arg6: memref<64x128xf32, #tpu.memory_space<vmem>>) attributes {dimension_semantics = [#tpu.dimension_semantics<parallel>, #tpu.dimension_semantics<arbitrary>], iteration_bounds = array<i64: 2, 1>, scalar_prefetch = 0 : i64, scratch_operands = 2 : i64, tpu.core_type = #tpu.core_type<tc>, window_params = [{pipeline_mode = #tpu.pipeline_mode<synchronous>, transform_indices = @transform_0, window_bounds = array<i64: 64, 128>}, {transform_indices = @transform_1, window_bounds = array<i64: 1, 128, 128>}, {transform_indices = @transform_2, window_bounds = array<i64: 1, 2, 64, 128>}]} {
    %c0_i32 = arith.constant 0 : i32
    %0 = arith.cmpi eq, %arg1, %c0_i32 : i32
    %1 = arith.extui %0 : i1 to i32
    %c0_i32_0 = arith.constant 0 : i32
    %2 = arith.cmpi ne, %1, %c0_i32_0 : i32
    scf.if %2 {
      %cst_15 = arith.constant 0.000000e+00 : f32
      %17 = vector.broadcast %cst_15 : f32 to vector<64x128xf32>
      %c0_16 = arith.constant 0 : index
      %c0_17 = arith.constant 0 : index
      %18 = vector.load %arg5[%c0_16, %c0_17] : memref<64x128xf32, #tpu.memory_space<vmem>>, vector<64x128xf32>
      tpu.vector_store %arg5[%c0_16, %c0_17], %17 {strides = array<i32>} : memref<64x128xf32, #tpu.memory_space<vmem>>, vector<64x128xf32>,
      %cst_18 = arith.constant 0.000000e+00 : f32
      %19 = vector.broadcast %cst_18 : f32 to vector<64x128xf32>
      %c0_19 = arith.constant 0 : index
      %c0_20 = arith.constant 0 : index
      %20 = vector.load %arg6[%c0_19, %c0_20] : memref<64x128xf32, #tpu.memory_space<vmem>>, vector<64x128xf32>
      tpu.vector_store %arg6[%c0_19, %c0_20], %19 {strides = array<i32>} : memref<64x128xf32, #tpu.memory_space<vmem>>, vector<64x128xf32>,
    } else {
    }
    %c0 = arith.constant 0 : index
    %c0_1 = arith.constant 0 : index
    %3 = vector.load %arg2[%c0, %c0_1] : memref<64x128xbf16, #tpu.memory_space<vmem>>, vector<64x128xbf16>
    %c0_2 = arith.constant 0 : index
    %c0_3 = arith.constant 0 : index
    %c0_4 = arith.constant 0 : index
    %4 = vector.load %arg3[%c0_2, %c0_3, %c0_4] : memref<1x128x128xbf16, #tpu.memory_space<vmem>>, vector<1x128x128xbf16>
    %5 = vector.shape_cast %4 : vector<1x128x128xbf16> to vector<128x128xbf16>
    %cst = arith.constant dense<0.000000e+00> : vector<64x128xf32>
    %6 = tpu.matmul %3, %5, %cst {dimension_numbers = #tpu.dot_dimension_numbers<[1], [0], [0], [1], [0, 0, 1, 1], [], []>} : vector<64x128xbf16>, vector<128x128xbf16>, vector<64x128xf32> -> vector<64x128xf32>
    %c0_5 = arith.constant 0 : index
    %c0_6 = arith.constant 0 : index
    %7 = vector.load %arg5[%c0_5, %c0_6] : memref<64x128xf32, #tpu.memory_space<vmem>>, vector<64x128xf32>
    %c0_7 = arith.constant 0 : index
    %c0_8 = arith.constant 0 : index
    %8 = vector.load %arg6[%c0_7, %c0_8] : memref<64x128xf32, #tpu.memory_space<vmem>>, vector<64x128xf32>
    %9 = arith.addf %7, %6 : vector<64x128xf32>
    %10 = arith.mulf %6, %6 : vector<64x128xf32>
    %11 = arith.addf %8, %10 : vector<64x128xf32>
    %c0_9 = arith.constant 0 : index
    %c0_10 = arith.constant 0 : index
    %12 = vector.load %arg5[%c0_9, %c0_10] : memref<64x128xf32, #tpu.memory_space<vmem>>, vector<64x128xf32>
    tpu.vector_store %arg5[%c0_9, %c0_10], %9 {strides = array<i32>} : memref<64x128xf32, #tpu.memory_space<vmem>>, vector<64x128xf32>,
    %c0_11 = arith.constant 0 : index
    %c0_12 = arith.constant 0 : index
    %13 = vector.load %arg6[%c0_11, %c0_12] : memref<64x128xf32, #tpu.memory_space<vmem>>, vector<64x128xf32>
    tpu.vector_store %arg6[%c0_11, %c0_12], %11 {strides = array<i32>} : memref<64x128xf32, #tpu.memory_space<vmem>>, vector<64x128xf32>,
    %c0_i32_13 = arith.constant 0 : i32
    %14 = arith.cmpi eq, %arg1, %c0_i32_13 : i32
    %15 = arith.extui %14 : i1 to i32
    %c0_i32_14 = arith.constant 0 : i32
    %16 = arith.cmpi ne, %15, %c0_i32_14 : i32
    scf.if %16 {
      %c0_15 = arith.constant 0 : index
      %c0_16 = arith.constant 0 : index
      %17 = vector.load %arg5[%c0_15, %c0_16] : memref<64x128xf32, #tpu.memory_space<vmem>>, vector<64x128xf32>
      %c0_17 = arith.constant 0 : index
      %c0_18 = arith.constant 0 : index
      %c0_19 = arith.constant 0 : index
      %c0_20 = arith.constant 0 : index
      %18 = vector.load %arg4[%c0_17, %c0_18, %c0_19, %c0_20] : memref<1x2x64x128xf32, #tpu.memory_space<vmem>>, vector<1x1x64x128xf32>
      %19 = vector.shape_cast %18 : vector<1x1x64x128xf32> to vector<64x128xf32>
      %20 = vector.shape_cast %17 : vector<64x128xf32> to vector<1x1x64x128xf32>
      tpu.vector_store %arg4[%c0_17, %c0_18, %c0_19, %c0_20], %20 {strides = array<i32>} : memref<1x2x64x128xf32, #tpu.memory_space<vmem>>, vector<1x1x64x128xf32>,
      %c0_21 = arith.constant 0 : index
      %c0_22 = arith.constant 0 : index
      %21 = vector.load %arg6[%c0_21, %c0_22] : memref<64x128xf32, #tpu.memory_space<vmem>>, vector<64x128xf32>
      %c0_23 = arith.constant 0 : index
      %c1 = arith.constant 1 : index
      %c0_24 = arith.constant 0 : index
      %c0_25 = arith.constant 0 : index
      %22 = vector.load %arg4[%c0_23, %c1, %c0_24, %c0_25] : memref<1x2x64x128xf32, #tpu.memory_space<vmem>>, vector<1x1x64x128xf32>
      %23 = vector.shape_cast %22 : vector<1x1x64x128xf32> to vector<64x128xf32>
      %24 = vector.shape_cast %21 : vector<64x128xf32> to vector<1x1x64x128xf32>
      tpu.vector_store %arg4[%c0_23, %c1, %c0_24, %c0_25], %24 {strides = array<i32>} : memref<1x2x64x128xf32, #tpu.memory_space<vmem>>, vector<1x1x64x128xf32>,
    } else {
    }
    return
  }
  func.func @transform_0(%arg0: i32, %arg1: i32) -> (i32, i32) {
    %c0_i32 = arith.constant 0 : i32
    %c0_i32_0 = arith.constant 0 : i32
    %c0_i32_1 = arith.constant 0 : i32
    return %c0_i32, %c0_i32_0 : i32, i32
  }
  func.func @transform_1(%arg0: i32, %arg1: i32) -> (i32, i32, i32) {
    %c0_i32 = arith.constant 0 : i32
    %c0_i32_0 = arith.constant 0 : i32
    return %arg0, %c0_i32, %arg1 : i32, i32, i32
  }
  func.func @transform_2(%arg0: i32, %arg1: i32) -> (i32, i32, i32, i32) {
    %c0_i32 = arith.constant 0 : i32
    %c0_i32_0 = arith.constant 0 : i32
    %c0_i32_1 = arith.constant 0 : i32
    %c0_i32_2 = arith.constant 0 : i32
    return %arg0, %c0_i32, %c0_i32_0, %c0_i32_1 : i32, i32, i32, i32
  }
}

module attributes {stable_mosaic.version = 11 : i64} {
  func.func @_bn_relu_apply_kernel(%arg0: i32, %arg1: i32, %arg2: memref<64x128xbf16, #tpu.memory_space<vmem>>, %arg3: memref<1x128x128xbf16, #tpu.memory_space<vmem>>, %arg4: memref<64x1xf32, #tpu.memory_space<vmem>>, %arg5: memref<64x1xf32, #tpu.memory_space<vmem>>, %arg6: memref<1x64x128xbf16, #tpu.memory_space<vmem>>) attributes {dimension_semantics = [#tpu.dimension_semantics<parallel>, #tpu.dimension_semantics<parallel>], iteration_bounds = array<i64: 2, 1>, scalar_prefetch = 0 : i64, scratch_operands = 0 : i64, tpu.core_type = #tpu.core_type<tc>, window_params = [{pipeline_mode = #tpu.pipeline_mode<synchronous>, transform_indices = @transform_0, window_bounds = array<i64: 64, 128>}, {transform_indices = @transform_1, window_bounds = array<i64: 1, 128, 128>}, {pipeline_mode = #tpu.pipeline_mode<synchronous>, transform_indices = @transform_2, window_bounds = array<i64: 64, 1>}, {pipeline_mode = #tpu.pipeline_mode<synchronous>, transform_indices = @transform_3, window_bounds = array<i64: 64, 1>}, {transform_indices = @transform_4, window_bounds = array<i64: 1, 64, 128>}]} {
    %c0 = arith.constant 0 : index
    %c0_0 = arith.constant 0 : index
    %0 = vector.load %arg2[%c0, %c0_0] : memref<64x128xbf16, #tpu.memory_space<vmem>>, vector<64x128xbf16>
    %c0_1 = arith.constant 0 : index
    %c0_2 = arith.constant 0 : index
    %c0_3 = arith.constant 0 : index
    %1 = vector.load %arg3[%c0_1, %c0_2, %c0_3] : memref<1x128x128xbf16, #tpu.memory_space<vmem>>, vector<1x128x128xbf16>
    %2 = vector.shape_cast %1 : vector<1x128x128xbf16> to vector<128x128xbf16>
    %cst = arith.constant dense<0.000000e+00> : vector<64x128xf32>
    %3 = tpu.matmul %0, %2, %cst {dimension_numbers = #tpu.dot_dimension_numbers<[1], [0], [0], [1], [0, 0, 1, 1], [], []>} : vector<64x128xbf16>, vector<128x128xbf16>, vector<64x128xf32> -> vector<64x128xf32>
    %c0_4 = arith.constant 0 : index
    %c0_5 = arith.constant 0 : index
    %4 = vector.load %arg4[%c0_4, %c0_5] : memref<64x1xf32, #tpu.memory_space<vmem>>, vector<64x1xf32>
    %5 = vector.broadcast %4 : vector<64x1xf32> to vector<64x128xf32>
    %6 = arith.mulf %3, %5 : vector<64x128xf32>
    %c0_6 = arith.constant 0 : index
    %c0_7 = arith.constant 0 : index
    %7 = vector.load %arg5[%c0_6, %c0_7] : memref<64x1xf32, #tpu.memory_space<vmem>>, vector<64x1xf32>
    %8 = vector.broadcast %7 : vector<64x1xf32> to vector<64x128xf32>
    %9 = arith.addf %6, %8 : vector<64x128xf32>
    %cst_8 = arith.constant 0.000000e+00 : f32
    %10 = vector.broadcast %cst_8 : f32 to vector<64x128xf32>
    %11 = arith.maximumf %9, %10 : vector<64x128xf32>
    %12 = arith.truncf %11 : vector<64x128xf32> to vector<64x128xbf16>
    %c0_9 = arith.constant 0 : index
    %c0_10 = arith.constant 0 : index
    %c0_11 = arith.constant 0 : index
    %13 = vector.load %arg6[%c0_9, %c0_10, %c0_11] : memref<1x64x128xbf16, #tpu.memory_space<vmem>>, vector<1x64x128xbf16>
    %14 = vector.shape_cast %13 : vector<1x64x128xbf16> to vector<64x128xbf16>
    %15 = vector.shape_cast %12 : vector<64x128xbf16> to vector<1x64x128xbf16>
    tpu.vector_store %arg6[%c0_9, %c0_10, %c0_11], %15 {strides = array<i32>} : memref<1x64x128xbf16, #tpu.memory_space<vmem>>, vector<1x64x128xbf16>,
    return
  }
  func.func @transform_0(%arg0: i32, %arg1: i32) -> (i32, i32) {
    %c0_i32 = arith.constant 0 : i32
    %c0_i32_0 = arith.constant 0 : i32
    %c0_i32_1 = arith.constant 0 : i32
    return %c0_i32, %c0_i32_0 : i32, i32
  }
  func.func @transform_1(%arg0: i32, %arg1: i32) -> (i32, i32, i32) {
    %c0_i32 = arith.constant 0 : i32
    %c0_i32_0 = arith.constant 0 : i32
    return %arg0, %c0_i32, %arg1 : i32, i32, i32
  }
  func.func @transform_2(%arg0: i32, %arg1: i32) -> (i32, i32) {
    %c0_i32 = arith.constant 0 : i32
    %c0_i32_0 = arith.constant 0 : i32
    %c0_i32_1 = arith.constant 0 : i32
    return %c0_i32, %c0_i32_0 : i32, i32
  }
  func.func @transform_3(%arg0: i32, %arg1: i32) -> (i32, i32) {
    %c0_i32 = arith.constant 0 : i32
    %c0_i32_0 = arith.constant 0 : i32
    %c0_i32_1 = arith.constant 0 : i32
    return %c0_i32, %c0_i32_0 : i32, i32
  }
  func.func @transform_4(%arg0: i32, %arg1: i32) -> (i32, i32, i32) {
    %c0_i32 = arith.constant 0 : i32
    %c0_i32_0 = arith.constant 0 : i32
    return %arg0, %c0_i32, %arg1 : i32, i32, i32
  }
}

module attributes {stable_mosaic.version = 11 : i64} {
  func.func @_stats_kernel(%arg0: i32, %arg1: i32, %arg2: memref<32x64xbf16, #tpu.memory_space<vmem>>, %arg3: memref<1x64x768xbf16, #tpu.memory_space<vmem>>, %arg4: memref<1x2x32x128xf32, #tpu.memory_space<vmem>>, %arg5: memref<32x128xf32, #tpu.memory_space<vmem>>, %arg6: memref<32x128xf32, #tpu.memory_space<vmem>>) attributes {dimension_semantics = [#tpu.dimension_semantics<parallel>, #tpu.dimension_semantics<arbitrary>], iteration_bounds = array<i64: 2, 1>, scalar_prefetch = 0 : i64, scratch_operands = 2 : i64, tpu.core_type = #tpu.core_type<tc>, window_params = [{pipeline_mode = #tpu.pipeline_mode<synchronous>, transform_indices = @transform_0, window_bounds = array<i64: 32, 64>}, {transform_indices = @transform_1, window_bounds = array<i64: 1, 64, 768>}, {transform_indices = @transform_2, window_bounds = array<i64: 1, 2, 32, 128>}]} {
    %c0_i32 = arith.constant 0 : i32
    %0 = arith.cmpi eq, %arg1, %c0_i32 : i32
    %1 = arith.extui %0 : i1 to i32
    %c0_i32_0 = arith.constant 0 : i32
    %2 = arith.cmpi ne, %1, %c0_i32_0 : i32
    scf.if %2 {
      %cst_15 = arith.constant 0.000000e+00 : f32
      %38 = vector.broadcast %cst_15 : f32 to vector<32x128xf32>
      %c0_16 = arith.constant 0 : index
      %c0_17 = arith.constant 0 : index
      %39 = vector.load %arg5[%c0_16, %c0_17] : memref<32x128xf32, #tpu.memory_space<vmem>>, vector<32x128xf32>
      tpu.vector_store %arg5[%c0_16, %c0_17], %38 {strides = array<i32>} : memref<32x128xf32, #tpu.memory_space<vmem>>, vector<32x128xf32>,
      %cst_18 = arith.constant 0.000000e+00 : f32
      %40 = vector.broadcast %cst_18 : f32 to vector<32x128xf32>
      %c0_19 = arith.constant 0 : index
      %c0_20 = arith.constant 0 : index
      %41 = vector.load %arg6[%c0_19, %c0_20] : memref<32x128xf32, #tpu.memory_space<vmem>>, vector<32x128xf32>
      tpu.vector_store %arg6[%c0_19, %c0_20], %40 {strides = array<i32>} : memref<32x128xf32, #tpu.memory_space<vmem>>, vector<32x128xf32>,
    } else {
    }
    %c0 = arith.constant 0 : index
    %c0_1 = arith.constant 0 : index
    %3 = vector.load %arg2[%c0, %c0_1] : memref<32x64xbf16, #tpu.memory_space<vmem>>, vector<32x64xbf16>
    %c0_2 = arith.constant 0 : index
    %c0_3 = arith.constant 0 : index
    %c0_4 = arith.constant 0 : index
    %4 = vector.load %arg3[%c0_2, %c0_3, %c0_4] : memref<1x64x768xbf16, #tpu.memory_space<vmem>>, vector<1x64x768xbf16>
    %5 = vector.shape_cast %4 : vector<1x64x768xbf16> to vector<64x768xbf16>
    %cst = arith.constant dense<0.000000e+00> : vector<32x768xf32>
    %6 = tpu.matmul %3, %5, %cst {dimension_numbers = #tpu.dot_dimension_numbers<[1], [0], [0], [1], [0, 0, 1, 1], [], []>} : vector<32x64xbf16>, vector<64x768xbf16>, vector<32x768xf32> -> vector<32x768xf32>
    %c0_5 = arith.constant 0 : index
    %c0_6 = arith.constant 0 : index
    %7 = vector.load %arg5[%c0_5, %c0_6] : memref<32x128xf32, #tpu.memory_space<vmem>>, vector<32x128xf32>
    %c0_7 = arith.constant 0 : index
    %c0_8 = arith.constant 0 : index
    %8 = vector.load %arg6[%c0_7, %c0_8] : memref<32x128xf32, #tpu.memory_space<vmem>>, vector<32x128xf32>
    %9 = vector.extract_strided_slice %6 {offsets = [0, 0], sizes = [32, 128], strides = [1, 1]} : vector<32x768xf32> to vector<32x128xf32>
    %10 = arith.addf %7, %9 : vector<32x128xf32>
    %11 = arith.mulf %9, %9 : vector<32x128xf32>
    %12 = arith.addf %8, %11 : vector<32x128xf32>
    %13 = vector.extract_strided_slice %6 {offsets = [0, 128], sizes = [32, 128], strides = [1, 1]} : vector<32x768xf32> to vector<32x128xf32>
    %14 = arith.addf %10, %13 : vector<32x128xf32>
    %15 = arith.mulf %13, %13 : vector<32x128xf32>
    %16 = arith.addf %12, %15 : vector<32x128xf32>
    %17 = vector.extract_strided_slice %6 {offsets = [0, 256], sizes = [32, 128], strides = [1, 1]} : vector<32x768xf32> to vector<32x128xf32>
    %18 = arith.addf %14, %17 : vector<32x128xf32>
    %19 = arith.mulf %17, %17 : vector<32x128xf32>
    %20 = arith.addf %16, %19 : vector<32x128xf32>
    %21 = vector.extract_strided_slice %6 {offsets = [0, 384], sizes = [32, 128], strides = [1, 1]} : vector<32x768xf32> to vector<32x128xf32>
    %22 = arith.addf %18, %21 : vector<32x128xf32>
    %23 = arith.mulf %21, %21 : vector<32x128xf32>
    %24 = arith.addf %20, %23 : vector<32x128xf32>
    %25 = vector.extract_strided_slice %6 {offsets = [0, 512], sizes = [32, 128], strides = [1, 1]} : vector<32x768xf32> to vector<32x128xf32>
    %26 = arith.addf %22, %25 : vector<32x128xf32>
    %27 = arith.mulf %25, %25 : vector<32x128xf32>
    %28 = arith.addf %24, %27 : vector<32x128xf32>
    %29 = vector.extract_strided_slice %6 {offsets = [0, 640], sizes = [32, 128], strides = [1, 1]} : vector<32x768xf32> to vector<32x128xf32>
    %30 = arith.addf %26, %29 : vector<32x128xf32>
    %31 = arith.mulf %29, %29 : vector<32x128xf32>
    %32 = arith.addf %28, %31 : vector<32x128xf32>
    %c0_9 = arith.constant 0 : index
    %c0_10 = arith.constant 0 : index
    %33 = vector.load %arg5[%c0_9, %c0_10] : memref<32x128xf32, #tpu.memory_space<vmem>>, vector<32x128xf32>
    tpu.vector_store %arg5[%c0_9, %c0_10], %30 {strides = array<i32>} : memref<32x128xf32, #tpu.memory_space<vmem>>, vector<32x128xf32>,
    %c0_11 = arith.constant 0 : index
    %c0_12 = arith.constant 0 : index
    %34 = vector.load %arg6[%c0_11, %c0_12] : memref<32x128xf32, #tpu.memory_space<vmem>>, vector<32x128xf32>
    tpu.vector_store %arg6[%c0_11, %c0_12], %32 {strides = array<i32>} : memref<32x128xf32, #tpu.memory_space<vmem>>, vector<32x128xf32>,
    %c0_i32_13 = arith.constant 0 : i32
    %35 = arith.cmpi eq, %arg1, %c0_i32_13 : i32
    %36 = arith.extui %35 : i1 to i32
    %c0_i32_14 = arith.constant 0 : i32
    %37 = arith.cmpi ne, %36, %c0_i32_14 : i32
    scf.if %37 {
      %c0_15 = arith.constant 0 : index
      %c0_16 = arith.constant 0 : index
      %38 = vector.load %arg5[%c0_15, %c0_16] : memref<32x128xf32, #tpu.memory_space<vmem>>, vector<32x128xf32>
      %c0_17 = arith.constant 0 : index
      %c0_18 = arith.constant 0 : index
      %c0_19 = arith.constant 0 : index
      %c0_20 = arith.constant 0 : index
      %39 = vector.load %arg4[%c0_17, %c0_18, %c0_19, %c0_20] : memref<1x2x32x128xf32, #tpu.memory_space<vmem>>, vector<1x1x32x128xf32>
      %40 = vector.shape_cast %39 : vector<1x1x32x128xf32> to vector<32x128xf32>
      %41 = vector.shape_cast %38 : vector<32x128xf32> to vector<1x1x32x128xf32>
      tpu.vector_store %arg4[%c0_17, %c0_18, %c0_19, %c0_20], %41 {strides = array<i32>} : memref<1x2x32x128xf32, #tpu.memory_space<vmem>>, vector<1x1x32x128xf32>,
      %c0_21 = arith.constant 0 : index
      %c0_22 = arith.constant 0 : index
      %42 = vector.load %arg6[%c0_21, %c0_22] : memref<32x128xf32, #tpu.memory_space<vmem>>, vector<32x128xf32>
      %c0_23 = arith.constant 0 : index
      %c1 = arith.constant 1 : index
      %c0_24 = arith.constant 0 : index
      %c0_25 = arith.constant 0 : index
      %43 = vector.load %arg4[%c0_23, %c1, %c0_24, %c0_25] : memref<1x2x32x128xf32, #tpu.memory_space<vmem>>, vector<1x1x32x128xf32>
      %44 = vector.shape_cast %43 : vector<1x1x32x128xf32> to vector<32x128xf32>
      %45 = vector.shape_cast %42 : vector<32x128xf32> to vector<1x1x32x128xf32>
      tpu.vector_store %arg4[%c0_23, %c1, %c0_24, %c0_25], %45 {strides = array<i32>} : memref<1x2x32x128xf32, #tpu.memory_space<vmem>>, vector<1x1x32x128xf32>,
    } else {
    }
    return
  }
  func.func @transform_0(%arg0: i32, %arg1: i32) -> (i32, i32) {
    %c0_i32 = arith.constant 0 : i32
    %c0_i32_0 = arith.constant 0 : i32
    %c0_i32_1 = arith.constant 0 : i32
    return %c0_i32, %c0_i32_0 : i32, i32
  }
  func.func @transform_1(%arg0: i32, %arg1: i32) -> (i32, i32, i32) {
    %c0_i32 = arith.constant 0 : i32
    %c0_i32_0 = arith.constant 0 : i32
    return %arg0, %c0_i32, %arg1 : i32, i32, i32
  }
  func.func @transform_2(%arg0: i32, %arg1: i32) -> (i32, i32, i32, i32) {
    %c0_i32 = arith.constant 0 : i32
    %c0_i32_0 = arith.constant 0 : i32
    %c0_i32_1 = arith.constant 0 : i32
    %c0_i32_2 = arith.constant 0 : i32
    return %arg0, %c0_i32, %c0_i32_0, %c0_i32_1 : i32, i32, i32, i32
  }
}

module attributes {stable_mosaic.version = 11 : i64} {
  func.func @_bn_relu_apply_kernel(%arg0: i32, %arg1: i32, %arg2: memref<32x64xbf16, #tpu.memory_space<vmem>>, %arg3: memref<1x64x768xbf16, #tpu.memory_space<vmem>>, %arg4: memref<32x1xf32, #tpu.memory_space<vmem>>, %arg5: memref<32x1xf32, #tpu.memory_space<vmem>>, %arg6: memref<1x32x768xbf16, #tpu.memory_space<vmem>>) attributes {dimension_semantics = [#tpu.dimension_semantics<parallel>, #tpu.dimension_semantics<parallel>], iteration_bounds = array<i64: 2, 1>, scalar_prefetch = 0 : i64, scratch_operands = 0 : i64, tpu.core_type = #tpu.core_type<tc>, window_params = [{pipeline_mode = #tpu.pipeline_mode<synchronous>, transform_indices = @transform_0, window_bounds = array<i64: 32, 64>}, {transform_indices = @transform_1, window_bounds = array<i64: 1, 64, 768>}, {pipeline_mode = #tpu.pipeline_mode<synchronous>, transform_indices = @transform_2, window_bounds = array<i64: 32, 1>}, {pipeline_mode = #tpu.pipeline_mode<synchronous>, transform_indices = @transform_3, window_bounds = array<i64: 32, 1>}, {transform_indices = @transform_4, window_bounds = array<i64: 1, 32, 768>}]} {
    %c0 = arith.constant 0 : index
    %c0_0 = arith.constant 0 : index
    %0 = vector.load %arg2[%c0, %c0_0] : memref<32x64xbf16, #tpu.memory_space<vmem>>, vector<32x64xbf16>
    %c0_1 = arith.constant 0 : index
    %c0_2 = arith.constant 0 : index
    %c0_3 = arith.constant 0 : index
    %1 = vector.load %arg3[%c0_1, %c0_2, %c0_3] : memref<1x64x768xbf16, #tpu.memory_space<vmem>>, vector<1x64x768xbf16>
    %2 = vector.shape_cast %1 : vector<1x64x768xbf16> to vector<64x768xbf16>
    %cst = arith.constant dense<0.000000e+00> : vector<32x768xf32>
    %3 = tpu.matmul %0, %2, %cst {dimension_numbers = #tpu.dot_dimension_numbers<[1], [0], [0], [1], [0, 0, 1, 1], [], []>} : vector<32x64xbf16>, vector<64x768xbf16>, vector<32x768xf32> -> vector<32x768xf32>
    %c0_4 = arith.constant 0 : index
    %c0_5 = arith.constant 0 : index
    %4 = vector.load %arg4[%c0_4, %c0_5] : memref<32x1xf32, #tpu.memory_space<vmem>>, vector<32x1xf32>
    %5 = vector.broadcast %4 : vector<32x1xf32> to vector<32x768xf32>
    %6 = arith.mulf %3, %5 : vector<32x768xf32>
    %c0_6 = arith.constant 0 : index
    %c0_7 = arith.constant 0 : index
    %7 = vector.load %arg5[%c0_6, %c0_7] : memref<32x1xf32, #tpu.memory_space<vmem>>, vector<32x1xf32>
    %8 = vector.broadcast %7 : vector<32x1xf32> to vector<32x768xf32>
    %9 = arith.addf %6, %8 : vector<32x768xf32>
    %cst_8 = arith.constant 0.000000e+00 : f32
    %10 = vector.broadcast %cst_8 : f32 to vector<32x768xf32>
    %11 = arith.maximumf %9, %10 : vector<32x768xf32>
    %12 = arith.truncf %11 : vector<32x768xf32> to vector<32x768xbf16>
    %c0_9 = arith.constant 0 : index
    %c0_10 = arith.constant 0 : index
    %c0_11 = arith.constant 0 : index
    %13 = vector.load %arg6[%c0_9, %c0_10, %c0_11] : memref<1x32x768xbf16, #tpu.memory_space<vmem>>, vector<1x32x768xbf16>
    %14 = vector.shape_cast %13 : vector<1x32x768xbf16> to vector<32x768xbf16>
    %15 = vector.shape_cast %12 : vector<32x768xbf16> to vector<1x32x768xbf16>
    tpu.vector_store %arg6[%c0_9, %c0_10, %c0_11], %15 {strides = array<i32>} : memref<1x32x768xbf16, #tpu.memory_space<vmem>>, vector<1x32x768xbf16>,
    return
  }
  func.func @transform_0(%arg0: i32, %arg1: i32) -> (i32, i32) {
    %c0_i32 = arith.constant 0 : i32
    %c0_i32_0 = arith.constant 0 : i32
    %c0_i32_1 = arith.constant 0 : i32
    return %c0_i32, %c0_i32_0 : i32, i32
  }
  func.func @transform_1(%arg0: i32, %arg1: i32) -> (i32, i32, i32) {
    %c0_i32 = arith.constant 0 : i32
    %c0_i32_0 = arith.constant 0 : i32
    return %arg0, %c0_i32, %arg1 : i32, i32, i32
  }
  func.func @transform_2(%arg0: i32, %arg1: i32) -> (i32, i32) {
    %c0_i32 = arith.constant 0 : i32
    %c0_i32_0 = arith.constant 0 : i32
    %c0_i32_1 = arith.constant 0 : i32
    return %c0_i32, %c0_i32_0 : i32, i32
  }
  func.func @transform_3(%arg0: i32, %arg1: i32) -> (i32, i32) {
    %c0_i32 = arith.constant 0 : i32
    %c0_i32_0 = arith.constant 0 : i32
    %c0_i32_1 = arith.constant 0 : i32
    return %c0_i32, %c0_i32_0 : i32, i32
  }
  func.func @transform_4(%arg0: i32, %arg1: i32) -> (i32, i32, i32) {
    %c0_i32 = arith.constant 0 : i32
    %c0_i32_0 = arith.constant 0 : i32
    return %arg0, %c0_i32, %arg1 : i32, i32, i32
  }
}

module attributes {stable_mosaic.version = 11 : i64} {
  func.func @_stats_kernel(%arg0: i32, %arg1: i32, %arg2: memref<16x32xbf16, #tpu.memory_space<vmem>>, %arg3: memref<1x32x4992xbf16, #tpu.memory_space<vmem>>, %arg4: memref<1x2x16x128xf32, #tpu.memory_space<vmem>>, %arg5: memref<16x128xf32, #tpu.memory_space<vmem>>, %arg6: memref<16x128xf32, #tpu.memory_space<vmem>>) attributes {dimension_semantics = [#tpu.dimension_semantics<parallel>, #tpu.dimension_semantics<arbitrary>], iteration_bounds = array<i64: 2, 1>, scalar_prefetch = 0 : i64, scratch_operands = 2 : i64, tpu.core_type = #tpu.core_type<tc>, window_params = [{pipeline_mode = #tpu.pipeline_mode<synchronous>, transform_indices = @transform_0, window_bounds = array<i64: 16, 32>}, {transform_indices = @transform_1, window_bounds = array<i64: 1, 32, 4992>}, {transform_indices = @transform_2, window_bounds = array<i64: 1, 2, 16, 128>}]} {
    %c0_i32 = arith.constant 0 : i32
    %0 = arith.cmpi eq, %arg1, %c0_i32 : i32
    %1 = arith.extui %0 : i1 to i32
    %c0_i32_0 = arith.constant 0 : i32
    %2 = arith.cmpi ne, %1, %c0_i32_0 : i32
    scf.if %2 {
      %cst_15 = arith.constant 0.000000e+00 : f32
      %170 = vector.broadcast %cst_15 : f32 to vector<16x128xf32>
      %c0_16 = arith.constant 0 : index
      %c0_17 = arith.constant 0 : index
      %171 = vector.load %arg5[%c0_16, %c0_17] : memref<16x128xf32, #tpu.memory_space<vmem>>, vector<16x128xf32>
      tpu.vector_store %arg5[%c0_16, %c0_17], %170 {strides = array<i32>} : memref<16x128xf32, #tpu.memory_space<vmem>>, vector<16x128xf32>,
      %cst_18 = arith.constant 0.000000e+00 : f32
      %172 = vector.broadcast %cst_18 : f32 to vector<16x128xf32>
      %c0_19 = arith.constant 0 : index
      %c0_20 = arith.constant 0 : index
      %173 = vector.load %arg6[%c0_19, %c0_20] : memref<16x128xf32, #tpu.memory_space<vmem>>, vector<16x128xf32>
      tpu.vector_store %arg6[%c0_19, %c0_20], %172 {strides = array<i32>} : memref<16x128xf32, #tpu.memory_space<vmem>>, vector<16x128xf32>,
    } else {
    }
    %c0 = arith.constant 0 : index
    %c0_1 = arith.constant 0 : index
    %3 = vector.load %arg2[%c0, %c0_1] : memref<16x32xbf16, #tpu.memory_space<vmem>>, vector<16x32xbf16>
    %c0_2 = arith.constant 0 : index
    %c0_3 = arith.constant 0 : index
    %c0_4 = arith.constant 0 : index
    %4 = vector.load %arg3[%c0_2, %c0_3, %c0_4] : memref<1x32x4992xbf16, #tpu.memory_space<vmem>>, vector<1x32x4992xbf16>
    %5 = vector.shape_cast %4 : vector<1x32x4992xbf16> to vector<32x4992xbf16>
    %cst = arith.constant dense<0.000000e+00> : vector<16x4992xf32>
    %6 = tpu.matmul %3, %5, %cst {dimension_numbers = #tpu.dot_dimension_numbers<[1], [0], [0], [1], [0, 0, 1, 1], [], []>} : vector<16x32xbf16>, vector<32x4992xbf16>, vector<16x4992xf32> -> vector<16x4992xf32>
    %c0_5 = arith.constant 0 : index
    %c0_6 = arith.constant 0 : index
    %7 = vector.load %arg5[%c0_5, %c0_6] : memref<16x128xf32, #tpu.memory_space<vmem>>, vector<16x128xf32>
    %c0_7 = arith.constant 0 : index
    %c0_8 = arith.constant 0 : index
    %8 = vector.load %arg6[%c0_7, %c0_8] : memref<16x128xf32, #tpu.memory_space<vmem>>, vector<16x128xf32>
    %9 = vector.extract_strided_slice %6 {offsets = [0, 0], sizes = [16, 128], strides = [1, 1]} : vector<16x4992xf32> to vector<16x128xf32>
    %10 = arith.addf %7, %9 : vector<16x128xf32>
    %11 = arith.mulf %9, %9 : vector<16x128xf32>
    %12 = arith.addf %8, %11 : vector<16x128xf32>
    %13 = vector.extract_strided_slice %6 {offsets = [0, 128], sizes = [16, 128], strides = [1, 1]} : vector<16x4992xf32> to vector<16x128xf32>
    %14 = arith.addf %10, %13 : vector<16x128xf32>
    %15 = arith.mulf %13, %13 : vector<16x128xf32>
    %16 = arith.addf %12, %15 : vector<16x128xf32>
    %17 = vector.extract_strided_slice %6 {offsets = [0, 256], sizes = [16, 128], strides = [1, 1]} : vector<16x4992xf32> to vector<16x128xf32>
    %18 = arith.addf %14, %17 : vector<16x128xf32>
    %19 = arith.mulf %17, %17 : vector<16x128xf32>
    %20 = arith.addf %16, %19 : vector<16x128xf32>
    %21 = vector.extract_strided_slice %6 {offsets = [0, 384], sizes = [16, 128], strides = [1, 1]} : vector<16x4992xf32> to vector<16x128xf32>
    %22 = arith.addf %18, %21 : vector<16x128xf32>
    %23 = arith.mulf %21, %21 : vector<16x128xf32>
    %24 = arith.addf %20, %23 : vector<16x128xf32>
    %25 = vector.extract_strided_slice %6 {offsets = [0, 512], sizes = [16, 128], strides = [1, 1]} : vector<16x4992xf32> to vector<16x128xf32>
    %26 = arith.addf %22, %25 : vector<16x128xf32>
    %27 = arith.mulf %25, %25 : vector<16x128xf32>
    %28 = arith.addf %24, %27 : vector<16x128xf32>
    %29 = vector.extract_strided_slice %6 {offsets = [0, 640], sizes = [16, 128], strides = [1, 1]} : vector<16x4992xf32> to vector<16x128xf32>
    %30 = arith.addf %26, %29 : vector<16x128xf32>
    %31 = arith.mulf %29, %29 : vector<16x128xf32>
    %32 = arith.addf %28, %31 : vector<16x128xf32>
    %33 = vector.extract_strided_slice %6 {offsets = [0, 768], sizes = [16, 128], strides = [1, 1]} : vector<16x4992xf32> to vector<16x128xf32>
    %34 = arith.addf %30, %33 : vector<16x128xf32>
    %35 = arith.mulf %33, %33 : vector<16x128xf32>
    %36 = arith.addf %32, %35 : vector<16x128xf32>
    %37 = vector.extract_strided_slice %6 {offsets = [0, 896], sizes = [16, 128], strides = [1, 1]} : vector<16x4992xf32> to vector<16x128xf32>
    %38 = arith.addf %34, %37 : vector<16x128xf32>
    %39 = arith.mulf %37, %37 : vector<16x128xf32>
    %40 = arith.addf %36, %39 : vector<16x128xf32>
    %41 = vector.extract_strided_slice %6 {offsets = [0, 1024], sizes = [16, 128], strides = [1, 1]} : vector<16x4992xf32> to vector<16x128xf32>
    %42 = arith.addf %38, %41 : vector<16x128xf32>
    %43 = arith.mulf %41, %41 : vector<16x128xf32>
    %44 = arith.addf %40, %43 : vector<16x128xf32>
    %45 = vector.extract_strided_slice %6 {offsets = [0, 1152], sizes = [16, 128], strides = [1, 1]} : vector<16x4992xf32> to vector<16x128xf32>
    %46 = arith.addf %42, %45 : vector<16x128xf32>
    %47 = arith.mulf %45, %45 : vector<16x128xf32>
    %48 = arith.addf %44, %47 : vector<16x128xf32>
    %49 = vector.extract_strided_slice %6 {offsets = [0, 1280], sizes = [16, 128], strides = [1, 1]} : vector<16x4992xf32> to vector<16x128xf32>
    %50 = arith.addf %46, %49 : vector<16x128xf32>
    %51 = arith.mulf %49, %49 : vector<16x128xf32>
    %52 = arith.addf %48, %51 : vector<16x128xf32>
    %53 = vector.extract_strided_slice %6 {offsets = [0, 1408], sizes = [16, 128], strides = [1, 1]} : vector<16x4992xf32> to vector<16x128xf32>
    %54 = arith.addf %50, %53 : vector<16x128xf32>
    %55 = arith.mulf %53, %53 : vector<16x128xf32>
    %56 = arith.addf %52, %55 : vector<16x128xf32>
    %57 = vector.extract_strided_slice %6 {offsets = [0, 1536], sizes = [16, 128], strides = [1, 1]} : vector<16x4992xf32> to vector<16x128xf32>
    %58 = arith.addf %54, %57 : vector<16x128xf32>
    %59 = arith.mulf %57, %57 : vector<16x128xf32>
    %60 = arith.addf %56, %59 : vector<16x128xf32>
    %61 = vector.extract_strided_slice %6 {offsets = [0, 1664], sizes = [16, 128], strides = [1, 1]} : vector<16x4992xf32> to vector<16x128xf32>
    %62 = arith.addf %58, %61 : vector<16x128xf32>
    %63 = arith.mulf %61, %61 : vector<16x128xf32>
    %64 = arith.addf %60, %63 : vector<16x128xf32>
    %65 = vector.extract_strided_slice %6 {offsets = [0, 1792], sizes = [16, 128], strides = [1, 1]} : vector<16x4992xf32> to vector<16x128xf32>
    %66 = arith.addf %62, %65 : vector<16x128xf32>
    %67 = arith.mulf %65, %65 : vector<16x128xf32>
    %68 = arith.addf %64, %67 : vector<16x128xf32>
    %69 = vector.extract_strided_slice %6 {offsets = [0, 1920], sizes = [16, 128], strides = [1, 1]} : vector<16x4992xf32> to vector<16x128xf32>
    %70 = arith.addf %66, %69 : vector<16x128xf32>
    %71 = arith.mulf %69, %69 : vector<16x128xf32>
    %72 = arith.addf %68, %71 : vector<16x128xf32>
    %73 = vector.extract_strided_slice %6 {offsets = [0, 2048], sizes = [16, 128], strides = [1, 1]} : vector<16x4992xf32> to vector<16x128xf32>
    %74 = arith.addf %70, %73 : vector<16x128xf32>
    %75 = arith.mulf %73, %73 : vector<16x128xf32>
    %76 = arith.addf %72, %75 : vector<16x128xf32>
    %77 = vector.extract_strided_slice %6 {offsets = [0, 2176], sizes = [16, 128], strides = [1, 1]} : vector<16x4992xf32> to vector<16x128xf32>
    %78 = arith.addf %74, %77 : vector<16x128xf32>
    %79 = arith.mulf %77, %77 : vector<16x128xf32>
    %80 = arith.addf %76, %79 : vector<16x128xf32>
    %81 = vector.extract_strided_slice %6 {offsets = [0, 2304], sizes = [16, 128], strides = [1, 1]} : vector<16x4992xf32> to vector<16x128xf32>
    %82 = arith.addf %78, %81 : vector<16x128xf32>
    %83 = arith.mulf %81, %81 : vector<16x128xf32>
    %84 = arith.addf %80, %83 : vector<16x128xf32>
    %85 = vector.extract_strided_slice %6 {offsets = [0, 2432], sizes = [16, 128], strides = [1, 1]} : vector<16x4992xf32> to vector<16x128xf32>
    %86 = arith.addf %82, %85 : vector<16x128xf32>
    %87 = arith.mulf %85, %85 : vector<16x128xf32>
    %88 = arith.addf %84, %87 : vector<16x128xf32>
    %89 = vector.extract_strided_slice %6 {offsets = [0, 2560], sizes = [16, 128], strides = [1, 1]} : vector<16x4992xf32> to vector<16x128xf32>
    %90 = arith.addf %86, %89 : vector<16x128xf32>
    %91 = arith.mulf %89, %89 : vector<16x128xf32>
    %92 = arith.addf %88, %91 : vector<16x128xf32>
    %93 = vector.extract_strided_slice %6 {offsets = [0, 2688], sizes = [16, 128], strides = [1, 1]} : vector<16x4992xf32> to vector<16x128xf32>
    %94 = arith.addf %90, %93 : vector<16x128xf32>
    %95 = arith.mulf %93, %93 : vector<16x128xf32>
    %96 = arith.addf %92, %95 : vector<16x128xf32>
    %97 = vector.extract_strided_slice %6 {offsets = [0, 2816], sizes = [16, 128], strides = [1, 1]} : vector<16x4992xf32> to vector<16x128xf32>
    %98 = arith.addf %94, %97 : vector<16x128xf32>
    %99 = arith.mulf %97, %97 : vector<16x128xf32>
    %100 = arith.addf %96, %99 : vector<16x128xf32>
    %101 = vector.extract_strided_slice %6 {offsets = [0, 2944], sizes = [16, 128], strides = [1, 1]} : vector<16x4992xf32> to vector<16x128xf32>
    %102 = arith.addf %98, %101 : vector<16x128xf32>
    %103 = arith.mulf %101, %101 : vector<16x128xf32>
    %104 = arith.addf %100, %103 : vector<16x128xf32>
    %105 = vector.extract_strided_slice %6 {offsets = [0, 3072], sizes = [16, 128], strides = [1, 1]} : vector<16x4992xf32> to vector<16x128xf32>
    %106 = arith.addf %102, %105 : vector<16x128xf32>
    %107 = arith.mulf %105, %105 : vector<16x128xf32>
    %108 = arith.addf %104, %107 : vector<16x128xf32>
    %109 = vector.extract_strided_slice %6 {offsets = [0, 3200], sizes = [16, 128], strides = [1, 1]} : vector<16x4992xf32> to vector<16x128xf32>
    %110 = arith.addf %106, %109 : vector<16x128xf32>
    %111 = arith.mulf %109, %109 : vector<16x128xf32>
    %112 = arith.addf %108, %111 : vector<16x128xf32>
    %113 = vector.extract_strided_slice %6 {offsets = [0, 3328], sizes = [16, 128], strides = [1, 1]} : vector<16x4992xf32> to vector<16x128xf32>
    %114 = arith.addf %110, %113 : vector<16x128xf32>
    %115 = arith.mulf %113, %113 : vector<16x128xf32>
    %116 = arith.addf %112, %115 : vector<16x128xf32>
    %117 = vector.extract_strided_slice %6 {offsets = [0, 3456], sizes = [16, 128], strides = [1, 1]} : vector<16x4992xf32> to vector<16x128xf32>
    %118 = arith.addf %114, %117 : vector<16x128xf32>
    %119 = arith.mulf %117, %117 : vector<16x128xf32>
    %120 = arith.addf %116, %119 : vector<16x128xf32>
    %121 = vector.extract_strided_slice %6 {offsets = [0, 3584], sizes = [16, 128], strides = [1, 1]} : vector<16x4992xf32> to vector<16x128xf32>
    %122 = arith.addf %118, %121 : vector<16x128xf32>
    %123 = arith.mulf %121, %121 : vector<16x128xf32>
    %124 = arith.addf %120, %123 : vector<16x128xf32>
    %125 = vector.extract_strided_slice %6 {offsets = [0, 3712], sizes = [16, 128], strides = [1, 1]} : vector<16x4992xf32> to vector<16x128xf32>
    %126 = arith.addf %122, %125 : vector<16x128xf32>
    %127 = arith.mulf %125, %125 : vector<16x128xf32>
    %128 = arith.addf %124, %127 : vector<16x128xf32>
    %129 = vector.extract_strided_slice %6 {offsets = [0, 3840], sizes = [16, 128], strides = [1, 1]} : vector<16x4992xf32> to vector<16x128xf32>
    %130 = arith.addf %126, %129 : vector<16x128xf32>
    %131 = arith.mulf %129, %129 : vector<16x128xf32>
    %132 = arith.addf %128, %131 : vector<16x128xf32>
    %133 = vector.extract_strided_slice %6 {offsets = [0, 3968], sizes = [16, 128], strides = [1, 1]} : vector<16x4992xf32> to vector<16x128xf32>
    %134 = arith.addf %130, %133 : vector<16x128xf32>
    %135 = arith.mulf %133, %133 : vector<16x128xf32>
    %136 = arith.addf %132, %135 : vector<16x128xf32>
    %137 = vector.extract_strided_slice %6 {offsets = [0, 4096], sizes = [16, 128], strides = [1, 1]} : vector<16x4992xf32> to vector<16x128xf32>
    %138 = arith.addf %134, %137 : vector<16x128xf32>
    %139 = arith.mulf %137, %137 : vector<16x128xf32>
    %140 = arith.addf %136, %139 : vector<16x128xf32>
    %141 = vector.extract_strided_slice %6 {offsets = [0, 4224], sizes = [16, 128], strides = [1, 1]} : vector<16x4992xf32> to vector<16x128xf32>
    %142 = arith.addf %138, %141 : vector<16x128xf32>
    %143 = arith.mulf %141, %141 : vector<16x128xf32>
    %144 = arith.addf %140, %143 : vector<16x128xf32>
    %145 = vector.extract_strided_slice %6 {offsets = [0, 4352], sizes = [16, 128], strides = [1, 1]} : vector<16x4992xf32> to vector<16x128xf32>
    %146 = arith.addf %142, %145 : vector<16x128xf32>
    %147 = arith.mulf %145, %145 : vector<16x128xf32>
    %148 = arith.addf %144, %147 : vector<16x128xf32>
    %149 = vector.extract_strided_slice %6 {offsets = [0, 4480], sizes = [16, 128], strides = [1, 1]} : vector<16x4992xf32> to vector<16x128xf32>
    %150 = arith.addf %146, %149 : vector<16x128xf32>
    %151 = arith.mulf %149, %149 : vector<16x128xf32>
    %152 = arith.addf %148, %151 : vector<16x128xf32>
    %153 = vector.extract_strided_slice %6 {offsets = [0, 4608], sizes = [16, 128], strides = [1, 1]} : vector<16x4992xf32> to vector<16x128xf32>
    %154 = arith.addf %150, %153 : vector<16x128xf32>
    %155 = arith.mulf %153, %153 : vector<16x128xf32>
    %156 = arith.addf %152, %155 : vector<16x128xf32>
    %157 = vector.extract_strided_slice %6 {offsets = [0, 4736], sizes = [16, 128], strides = [1, 1]} : vector<16x4992xf32> to vector<16x128xf32>
    %158 = arith.addf %154, %157 : vector<16x128xf32>
    %159 = arith.mulf %157, %157 : vector<16x128xf32>
    %160 = arith.addf %156, %159 : vector<16x128xf32>
    %161 = vector.extract_strided_slice %6 {offsets = [0, 4864], sizes = [16, 128], strides = [1, 1]} : vector<16x4992xf32> to vector<16x128xf32>
    %162 = arith.addf %158, %161 : vector<16x128xf32>
    %163 = arith.mulf %161, %161 : vector<16x128xf32>
    %164 = arith.addf %160, %163 : vector<16x128xf32>
    %c0_9 = arith.constant 0 : index
    %c0_10 = arith.constant 0 : index
    %165 = vector.load %arg5[%c0_9, %c0_10] : memref<16x128xf32, #tpu.memory_space<vmem>>, vector<16x128xf32>
    tpu.vector_store %arg5[%c0_9, %c0_10], %162 {strides = array<i32>} : memref<16x128xf32, #tpu.memory_space<vmem>>, vector<16x128xf32>,
    %c0_11 = arith.constant 0 : index
    %c0_12 = arith.constant 0 : index
    %166 = vector.load %arg6[%c0_11, %c0_12] : memref<16x128xf32, #tpu.memory_space<vmem>>, vector<16x128xf32>
    tpu.vector_store %arg6[%c0_11, %c0_12], %164 {strides = array<i32>} : memref<16x128xf32, #tpu.memory_space<vmem>>, vector<16x128xf32>,
    %c0_i32_13 = arith.constant 0 : i32
    %167 = arith.cmpi eq, %arg1, %c0_i32_13 : i32
    %168 = arith.extui %167 : i1 to i32
    %c0_i32_14 = arith.constant 0 : i32
    %169 = arith.cmpi ne, %168, %c0_i32_14 : i32
    scf.if %169 {
      %c0_15 = arith.constant 0 : index
      %c0_16 = arith.constant 0 : index
      %170 = vector.load %arg5[%c0_15, %c0_16] : memref<16x128xf32, #tpu.memory_space<vmem>>, vector<16x128xf32>
      %c0_17 = arith.constant 0 : index
      %c0_18 = arith.constant 0 : index
      %c0_19 = arith.constant 0 : index
      %c0_20 = arith.constant 0 : index
      %171 = vector.load %arg4[%c0_17, %c0_18, %c0_19, %c0_20] : memref<1x2x16x128xf32, #tpu.memory_space<vmem>>, vector<1x1x16x128xf32>
      %172 = vector.shape_cast %171 : vector<1x1x16x128xf32> to vector<16x128xf32>
      %173 = vector.shape_cast %170 : vector<16x128xf32> to vector<1x1x16x128xf32>
      tpu.vector_store %arg4[%c0_17, %c0_18, %c0_19, %c0_20], %173 {strides = array<i32>} : memref<1x2x16x128xf32, #tpu.memory_space<vmem>>, vector<1x1x16x128xf32>,
      %c0_21 = arith.constant 0 : index
      %c0_22 = arith.constant 0 : index
      %174 = vector.load %arg6[%c0_21, %c0_22] : memref<16x128xf32, #tpu.memory_space<vmem>>, vector<16x128xf32>
      %c0_23 = arith.constant 0 : index
      %c1 = arith.constant 1 : index
      %c0_24 = arith.constant 0 : index
      %c0_25 = arith.constant 0 : index
      %175 = vector.load %arg4[%c0_23, %c1, %c0_24, %c0_25] : memref<1x2x16x128xf32, #tpu.memory_space<vmem>>, vector<1x1x16x128xf32>
      %176 = vector.shape_cast %175 : vector<1x1x16x128xf32> to vector<16x128xf32>
      %177 = vector.shape_cast %174 : vector<16x128xf32> to vector<1x1x16x128xf32>
      tpu.vector_store %arg4[%c0_23, %c1, %c0_24, %c0_25], %177 {strides = array<i32>} : memref<1x2x16x128xf32, #tpu.memory_space<vmem>>, vector<1x1x16x128xf32>,
    } else {
    }
    return
  }
  func.func @transform_0(%arg0: i32, %arg1: i32) -> (i32, i32) {
    %c0_i32 = arith.constant 0 : i32
    %c0_i32_0 = arith.constant 0 : i32
    %c0_i32_1 = arith.constant 0 : i32
    return %c0_i32, %c0_i32_0 : i32, i32
  }
  func.func @transform_1(%arg0: i32, %arg1: i32) -> (i32, i32, i32) {
    %c0_i32 = arith.constant 0 : i32
    %c0_i32_0 = arith.constant 0 : i32
    return %arg0, %c0_i32, %arg1 : i32, i32, i32
  }
  func.func @transform_2(%arg0: i32, %arg1: i32) -> (i32, i32, i32, i32) {
    %c0_i32 = arith.constant 0 : i32
    %c0_i32_0 = arith.constant 0 : i32
    %c0_i32_1 = arith.constant 0 : i32
    %c0_i32_2 = arith.constant 0 : i32
    return %arg0, %c0_i32, %c0_i32_0, %c0_i32_1 : i32, i32, i32, i32
  }
}

module attributes {stable_mosaic.version = 11 : i64} {
  func.func @_bn_relu_apply_kernel(%arg0: i32, %arg1: i32, %arg2: memref<16x32xbf16, #tpu.memory_space<vmem>>, %arg3: memref<1x32x4992xbf16, #tpu.memory_space<vmem>>, %arg4: memref<16x1xf32, #tpu.memory_space<vmem>>, %arg5: memref<16x1xf32, #tpu.memory_space<vmem>>, %arg6: memref<1x16x4992xbf16, #tpu.memory_space<vmem>>) attributes {dimension_semantics = [#tpu.dimension_semantics<parallel>, #tpu.dimension_semantics<parallel>], iteration_bounds = array<i64: 2, 1>, scalar_prefetch = 0 : i64, scratch_operands = 0 : i64, tpu.core_type = #tpu.core_type<tc>, window_params = [{pipeline_mode = #tpu.pipeline_mode<synchronous>, transform_indices = @transform_0, window_bounds = array<i64: 16, 32>}, {transform_indices = @transform_1, window_bounds = array<i64: 1, 32, 4992>}, {pipeline_mode = #tpu.pipeline_mode<synchronous>, transform_indices = @transform_2, window_bounds = array<i64: 16, 1>}, {pipeline_mode = #tpu.pipeline_mode<synchronous>, transform_indices = @transform_3, window_bounds = array<i64: 16, 1>}, {transform_indices = @transform_4, window_bounds = array<i64: 1, 16, 4992>}]} {
    %c0 = arith.constant 0 : index
    %c0_0 = arith.constant 0 : index
    %0 = vector.load %arg2[%c0, %c0_0] : memref<16x32xbf16, #tpu.memory_space<vmem>>, vector<16x32xbf16>
    %c0_1 = arith.constant 0 : index
    %c0_2 = arith.constant 0 : index
    %c0_3 = arith.constant 0 : index
    %1 = vector.load %arg3[%c0_1, %c0_2, %c0_3] : memref<1x32x4992xbf16, #tpu.memory_space<vmem>>, vector<1x32x4992xbf16>
    %2 = vector.shape_cast %1 : vector<1x32x4992xbf16> to vector<32x4992xbf16>
    %cst = arith.constant dense<0.000000e+00> : vector<16x4992xf32>
    %3 = tpu.matmul %0, %2, %cst {dimension_numbers = #tpu.dot_dimension_numbers<[1], [0], [0], [1], [0, 0, 1, 1], [], []>} : vector<16x32xbf16>, vector<32x4992xbf16>, vector<16x4992xf32> -> vector<16x4992xf32>
    %c0_4 = arith.constant 0 : index
    %c0_5 = arith.constant 0 : index
    %4 = vector.load %arg4[%c0_4, %c0_5] : memref<16x1xf32, #tpu.memory_space<vmem>>, vector<16x1xf32>
    %5 = vector.broadcast %4 : vector<16x1xf32> to vector<16x4992xf32>
    %6 = arith.mulf %3, %5 : vector<16x4992xf32>
    %c0_6 = arith.constant 0 : index
    %c0_7 = arith.constant 0 : index
    %7 = vector.load %arg5[%c0_6, %c0_7] : memref<16x1xf32, #tpu.memory_space<vmem>>, vector<16x1xf32>
    %8 = vector.broadcast %7 : vector<16x1xf32> to vector<16x4992xf32>
    %9 = arith.addf %6, %8 : vector<16x4992xf32>
    %cst_8 = arith.constant 0.000000e+00 : f32
    %10 = vector.broadcast %cst_8 : f32 to vector<16x4992xf32>
    %11 = arith.maximumf %9, %10 : vector<16x4992xf32>
    %12 = arith.truncf %11 : vector<16x4992xf32> to vector<16x4992xbf16>
    %c0_9 = arith.constant 0 : index
    %c0_10 = arith.constant 0 : index
    %c0_11 = arith.constant 0 : index
    %13 = vector.load %arg6[%c0_9, %c0_10, %c0_11] : memref<1x16x4992xbf16, #tpu.memory_space<vmem>>, vector<1x16x4992xbf16>
    %14 = vector.shape_cast %13 : vector<1x16x4992xbf16> to vector<16x4992xbf16>
    %15 = vector.shape_cast %12 : vector<16x4992xbf16> to vector<1x16x4992xbf16>
    tpu.vector_store %arg6[%c0_9, %c0_10, %c0_11], %15 {strides = array<i32>} : memref<1x16x4992xbf16, #tpu.memory_space<vmem>>, vector<1x16x4992xbf16>,
    return
  }
  func.func @transform_0(%arg0: i32, %arg1: i32) -> (i32, i32) {
    %c0_i32 = arith.constant 0 : i32
    %c0_i32_0 = arith.constant 0 : i32
    %c0_i32_1 = arith.constant 0 : i32
    return %c0_i32, %c0_i32_0 : i32, i32
  }
  func.func @transform_1(%arg0: i32, %arg1: i32) -> (i32, i32, i32) {
    %c0_i32 = arith.constant 0 : i32
    %c0_i32_0 = arith.constant 0 : i32
    return %arg0, %c0_i32, %arg1 : i32, i32, i32
  }
  func.func @transform_2(%arg0: i32, %arg1: i32) -> (i32, i32) {
    %c0_i32 = arith.constant 0 : i32
    %c0_i32_0 = arith.constant 0 : i32
    %c0_i32_1 = arith.constant 0 : i32
    return %c0_i32, %c0_i32_0 : i32, i32
  }
  func.func @transform_3(%arg0: i32, %arg1: i32) -> (i32, i32) {
    %c0_i32 = arith.constant 0 : i32
    %c0_i32_0 = arith.constant 0 : i32
    %c0_i32_1 = arith.constant 0 : i32
    return %c0_i32, %c0_i32_0 : i32, i32
  }
  func.func @transform_4(%arg0: i32, %arg1: i32) -> (i32, i32, i32) {
    %c0_i32 = arith.constant 0 : i32
    %c0_i32_0 = arith.constant 0 : i32
    return %arg0, %c0_i32, %arg1 : i32, i32, i32
  }
}

module attributes {stable_mosaic.version = 11 : i64} {
  func.func @_bias_softmax_kernel(%arg0: i32, %arg1: i32, %arg2: memref<24x16xbf16, #tpu.memory_space<vmem>>, %arg3: memref<1x16x6016xbf16, #tpu.memory_space<vmem>>, %arg4: memref<24x1xf32, #tpu.memory_space<vmem>>, %arg5: memref<8x24xf32, #tpu.memory_space<vmem>>, %arg6: memref<24x8xf32, #tpu.memory_space<vmem>>, %arg7: memref<1x24x6016xf32, #tpu.memory_space<vmem>>) attributes {dimension_semantics = [#tpu.dimension_semantics<parallel>, #tpu.dimension_semantics<parallel>], iteration_bounds = array<i64: 2, 6>, scalar_prefetch = 0 : i64, scratch_operands = 0 : i64, tpu.core_type = #tpu.core_type<tc>, window_params = [{pipeline_mode = #tpu.pipeline_mode<synchronous>, transform_indices = @transform_0, window_bounds = array<i64: 24, 16>}, {transform_indices = @transform_1, window_bounds = array<i64: 1, 16, 6016>}, {pipeline_mode = #tpu.pipeline_mode<synchronous>, transform_indices = @transform_2, window_bounds = array<i64: 24, 1>}, {pipeline_mode = #tpu.pipeline_mode<synchronous>, transform_indices = @transform_3, window_bounds = array<i64: 8, 24>}, {pipeline_mode = #tpu.pipeline_mode<synchronous>, transform_indices = @transform_4, window_bounds = array<i64: 24, 8>}, {transform_indices = @transform_5, window_bounds = array<i64: 1, 24, 6016>}]} {
    %c0 = arith.constant 0 : index
    %c0_0 = arith.constant 0 : index
    %0 = vector.load %arg2[%c0, %c0_0] : memref<24x16xbf16, #tpu.memory_space<vmem>>, vector<24x16xbf16>
    %c0_1 = arith.constant 0 : index
    %c0_2 = arith.constant 0 : index
    %c0_3 = arith.constant 0 : index
    %1 = vector.load %arg3[%c0_1, %c0_2, %c0_3] : memref<1x16x6016xbf16, #tpu.memory_space<vmem>>, vector<1x16x6016xbf16>
    %2 = vector.shape_cast %1 : vector<1x16x6016xbf16> to vector<16x6016xbf16>
    %cst = arith.constant dense<0.000000e+00> : vector<24x6016xf32>
    %3 = tpu.matmul %0, %2, %cst {dimension_numbers = #tpu.dot_dimension_numbers<[1], [0], [0], [1], [0, 0, 1, 1], [], []>} : vector<24x16xbf16>, vector<16x6016xbf16>, vector<24x6016xf32> -> vector<24x6016xf32>
    %c0_4 = arith.constant 0 : index
    %c0_5 = arith.constant 0 : index
    %4 = vector.load %arg4[%c0_4, %c0_5] : memref<24x1xf32, #tpu.memory_space<vmem>>, vector<24x1xf32>
    %5 = vector.broadcast %4 : vector<24x1xf32> to vector<24x6016xf32>
    %6 = arith.addf %3, %5 : vector<24x6016xf32>
    %cst_6 = arith.constant dense<0xFF800000> : vector<6016xf32>
    %7 = vector.multi_reduction <maximumf>, %6, %cst_6 [0] : vector<24x6016xf32> to vector<6016xf32>
    %8 = vector.shape_cast %7 : vector<6016xf32> to vector<1x6016xf32>
    %9 = vector.broadcast %8 : vector<1x6016xf32> to vector<24x6016xf32>
    %10 = arith.subf %6, %9 : vector<24x6016xf32>
    %11 = math.exp %10 : vector<24x6016xf32>
    %c0_7 = arith.constant 0 : index
    %c0_8 = arith.constant 0 : index
    %12 = vector.load %arg5[%c0_7, %c0_8] : memref<8x24xf32, #tpu.memory_space<vmem>>, vector<8x24xf32>
    %cst_9 = arith.constant dense<0.000000e+00> : vector<8x6016xf32>
    %13 = tpu.matmul %12, %11, %cst_9 {dimension_numbers = #tpu.dot_dimension_numbers<[1], [0], [0], [1], [0, 0, 1, 1], [], []>} : vector<8x24xf32>, vector<24x6016xf32>, vector<8x6016xf32> -> vector<8x6016xf32>
    %cst_10 = arith.constant 1.000000e+00 : f32
    %14 = vector.broadcast %cst_10 : f32 to vector<8x6016xf32>
    %15 = arith.divf %14, %13 : vector<8x6016xf32>
    %c0_11 = arith.constant 0 : index
    %c0_12 = arith.constant 0 : index
    %16 = vector.load %arg6[%c0_11, %c0_12] : memref<24x8xf32, #tpu.memory_space<vmem>>, vector<24x8xf32>
    %cst_13 = arith.constant dense<0.000000e+00> : vector<24x6016xf32>
    %17 = tpu.matmul %16, %15, %cst_13 {dimension_numbers = #tpu.dot_dimension_numbers<[1], [0], [0], [1], [0, 0, 1, 1], [], []>} : vector<24x8xf32>, vector<8x6016xf32>, vector<24x6016xf32> -> vector<24x6016xf32>
    %18 = arith.mulf %11, %17 : vector<24x6016xf32>
    %c0_14 = arith.constant 0 : index
    %c0_15 = arith.constant 0 : index
    %c0_16 = arith.constant 0 : index
    %19 = vector.load %arg7[%c0_14, %c0_15, %c0_16] : memref<1x24x6016xf32, #tpu.memory_space<vmem>>, vector<1x24x6016xf32>
    %20 = vector.shape_cast %19 : vector<1x24x6016xf32> to vector<24x6016xf32>
    %21 = vector.shape_cast %18 : vector<24x6016xf32> to vector<1x24x6016xf32>
    tpu.vector_store %arg7[%c0_14, %c0_15, %c0_16], %21 {strides = array<i32>} : memref<1x24x6016xf32, #tpu.memory_space<vmem>>, vector<1x24x6016xf32>,
    return
  }
  func.func @transform_0(%arg0: i32, %arg1: i32) -> (i32, i32) {
    %c0_i32 = arith.constant 0 : i32
    %c0_i32_0 = arith.constant 0 : i32
    %c0_i32_1 = arith.constant 0 : i32
    return %c0_i32, %c0_i32_0 : i32, i32
  }
  func.func @transform_1(%arg0: i32, %arg1: i32) -> (i32, i32, i32) {
    %c0_i32 = arith.constant 0 : i32
    %c0_i32_0 = arith.constant 0 : i32
    return %arg0, %c0_i32, %arg1 : i32, i32, i32
  }
  func.func @transform_2(%arg0: i32, %arg1: i32) -> (i32, i32) {
    %c0_i32 = arith.constant 0 : i32
    %c0_i32_0 = arith.constant 0 : i32
    %c0_i32_1 = arith.constant 0 : i32
    return %c0_i32, %c0_i32_0 : i32, i32
  }
  func.func @transform_3(%arg0: i32, %arg1: i32) -> (i32, i32) {
    %c0_i32 = arith.constant 0 : i32
    %c0_i32_0 = arith.constant 0 : i32
    %c0_i32_1 = arith.constant 0 : i32
    return %c0_i32, %c0_i32_0 : i32, i32
  }
  func.func @transform_4(%arg0: i32, %arg1: i32) -> (i32, i32) {
    %c0_i32 = arith.constant 0 : i32
    %c0_i32_0 = arith.constant 0 : i32
    %c0_i32_1 = arith.constant 0 : i32
    return %c0_i32, %c0_i32_0 : i32, i32
  }
  func.func @transform_5(%arg0: i32, %arg1: i32) -> (i32, i32, i32) {
    %c0_i32 = arith.constant 0 : i32
    %c0_i32_0 = arith.constant 0 : i32
    return %arg0, %c0_i32, %arg1 : i32, i32, i32
  }
}

</mosaic_0001>

<bundles_post_ra>
// kernel: tile.88
= control target key start
LH: loop header
LB: loop body
LE: loop exit
PB: predicated region body
PF: predicated region fallthrough
CT: control target
= control target key end

     0   :  { %2 = vsyncpa [#allocation1], 0  ;;  %s42_s6 = smov [#allocation0]   ;;  %s59_s0 = inlined_call_operand.hbm [shape: f32[3], index: 0, kind: input, shape index: {}]   ;;  %s60_s1 = inlined_call_operand.vmem [shape: f32[8,3], index: 1, kind: output, shape index: {}]  }
   0x1   :  { %s9_s7 = sshll.u32 %s42_s6, 4  ;;  %s10_s7 = int_to_ptr.vmem [resolvable:$true] %s9_s7 }
   0x2   :  { %s28_s8 = scalar_lea.vmem %s10_s7, 16  ;;  %s32_s9 = scalar_lea.vmem %s10_s7, 32 }
   0x3   :  { %p29_p0 = scmp.ne.s32.totalorder %s10_s7, %s28_s8  ;;  %p33_p1 = scmp.lt.s32.totalorder %s10_s7, %s10_s7 }
   0x4   :  { %p34_p2 = scmp.lt.s32.totalorder %s32_s9, %s28_s8 }
   0x6   :  { %p35_p3 = por %p34_p2, %p33_p1 }
   0x8   :  { %p36_p4 = pnand %p35_p3, %p29_p0 }
   0xa   :  { %39 = shalt.err (!%p36_p4)
}
   0xb   :  { %12 = dma.hbm_to_vmem [thread:$0]  %s59_s0, 16, %s10_s7, [#allocation1]  }
   0xc   :  { %40 = dma.done.wait [#allocation1], 16  }
   0xd   :  { %41 = vsyncadd [#allocation1], 4294967280  ;;  %v16_v0 = vld [vmem:[#allocation0] ss:$0 sm:$0xff] }
   0xe   :  { %17 = vst [vmem:[%s60_s1] sm:$0xff] %v16_v0 }
   0xf   :  { %18 = vsyncpa [#allocation1], 1 }

// kernel: tile.8
= control target key start
LH: loop header
LB: loop body
LE: loop exit
PB: predicated region body
PF: predicated region fallthrough
CT: control target
= control target key end

     0   :  { %vm3_vm0 = vcmask 7168   ;;  %s22_s10 = smov 126   ;;  %s45_s0 = inlined_call_operand.vmem [shape: f32[8,3], index: 0, kind: input, shape index: {}]   ;;  %s46_s1 = inlined_call_operand.vmem [shape: f32[24,1], index: 1, kind: output, shape index: {}]  }
   0x1   :  { %v5_v0 = vld [vmem:[%s45_s0] sm:$0xff]   ;;  %s21_s0 = smov 127  }
   0x2   :  { %6 = vrot.lane.b32.xlu0 %v5_v0, %s21_s0  ;;  %4 = vst.msk [vmem:[%s46_s1] ss:$3 sm:$0xff] %vm3_vm0, %v5_v0  }
   0x6   :  { %12 = vrot.lane.b32.xlu0 %v5_v0, %s22_s10 }
  0x74   :  { %v7_v1 = vpop.permute.xlu0 %6  }
  0x75   :  { %17 = vst.msk [vmem:[%s46_s1 + $0x1] ss:$3 sm:$0xff] %vm3_vm0, %v7_v1  }
  0x78   :  { %v13_v2 = vpop.permute.xlu0 %12  }
  0x79   :  { %18 = vst.msk [vmem:[%s46_s1 + $0x2] ss:$3 sm:$0xff] %vm3_vm0, %v13_v2  }

// kernel: squeeze.8
= control target key start
LH: loop header
LB: loop body
LE: loop exit
PB: predicated region body
PF: predicated region fallthrough
CT: control target
= control target key end

     0   :  { %s67_s8 = smov 80   ;;  %vm8_vm0 = vcmask 130048   ;;  %s68_s11 = smov 96   ;;  %s118_s0 = inlined_call_operand.vmem [shape: f32[128], index: 0, kind: input, shape index: {}]   ;;  %s119_s1 = inlined_call_operand.vmem [shape: f32[8,16], index: 1, kind: output, shape index: {}]  }
   0x1   :  { %v5_v0 = vld [vmem:[%s118_s0] sm:$0x1]  ;;  %s66_s0 = smov 112   ;;  %s69_s12 = smov 64  }
   0x2   :  { %6 = vst [vmem:[#allocation0] sm:$0x1] %v5_v0  ;;  %s70_s13 = smov 48   ;;  %s71_s14 = smov 32  }
   0x3   :  { %s72_s15 = smov 16  }
   0x9   :  { %v10_v1 = vld [vmem:[#allocation0] sm:$0x1]  }
   0xa   :  { %v22_v2 = vld [vmem:[#allocation0] sm:$0x1]   ;;  %11 = vrot.lane.b32.xlu0 %v10_v1, %s66_s0 }
   0xb   :  { %23 = vrot.lane.b32.xlu1 %v22_v2, %s67_s8  ;;  %v16_v3 = vld [vmem:[#allocation0] sm:$0x1]  }
   0xc   :  { %v28_v4 = vld [vmem:[#allocation0] sm:$0x1]  }
   0xd   :  { %v7_v5 = vld [vmem:[#allocation0] sm:$0x1]  }
   0xe   :  { %9 = vst.msk [vmem:[%s119_s1] sm:$0x1] %vm8_vm0, %v7_v5   ;;  %17 = vrot.lane.b32.xlu0 %v16_v3, %s68_s11  ;;  %v34_v6 = vld [vmem:[#allocation0] sm:$0x1]  }
   0xf   :  { %29 = vrot.lane.b32.xlu1 %v28_v4, %s69_s12  ;;  %v40_v7 = vld [vmem:[#allocation0] sm:$0x1]  }
  0x10   :  { %v46_v8 = vld [vmem:[#allocation0] sm:$0x1]  }
  0x12   :  { %35 = vrot.lane.b32.xlu0 %v34_v6, %s70_s13 }
  0x13   :  { %41 = vrot.lane.b32.xlu1 %v40_v7, %s71_s14 }
  0x16   :  { %47 = vrot.lane.b32.xlu0 %v46_v8, %s72_s15 }
  0x7c   :  { %v12_v9 = vpop.permute.xlu0 %11  }
  0x7d   :  { %v24_v10 = vpop.permute.xlu1 %23   ;;  %52 = vst.msk [vmem:[%s119_s1 + $0x1] sm:$0x1] %vm8_vm0, %v12_v9  }
  0x7e   :  { %54 = vst.msk [vmem:[%s119_s1 + $0x3] sm:$0x1] %vm8_vm0, %v24_v10  }
  0x80   :  { %v18_v11 = vpop.permute.xlu0 %17  }
  0x81   :  { %v30_v12 = vpop.permute.xlu1 %29   ;;  %53 = vst.msk [vmem:[%s119_s1 + $0x2] sm:$0x1] %vm8_vm0, %v18_v11  }
  0x82   :  { %55 = vst.msk [vmem:[%s119_s1 + $0x4] sm:$0x1] %vm8_vm0, %v30_v12  }
  0x84   :  { %v36_v13 = vpop.permute.xlu0 %35  }
  0x85   :  { %v42_v14 = vpop.permute.xlu1 %41   ;;  %56 = vst.msk [vmem:[%s119_s1 + $0x5] sm:$0x1] %vm8_vm0, %v36_v13  }
  0x86   :  { %57 = vst.msk [vmem:[%s119_s1 + $0x6] sm:$0x1] %vm8_vm0, %v42_v14  }
  0x88   :  { %v48_v15 = vpop.permute.xlu0 %47  }
  0x89   :  { %58 = vst.msk [vmem:[%s119_s1 + $0x7] sm:$0x1] %vm8_vm0, %v48_v15  }

// kernel: tile.53
= control target key start
LH: loop header
LB: loop body
LE: loop exit
PB: predicated region body
PF: predicated region fallthrough
CT: control target
= control target key end

     0   :  { %s22_s0 = inlined_call_operand.vmem [shape: f32[16], index: 0, kind: input, shape index: {}]   ;;  %s23_s1 = inlined_call_operand.vmem [shape: f32[8,16], index: 1, kind: output, shape index: {}]  }
   0x1   :  { %v4_v0 = vld [vmem:[%s22_s0] ss:$0 sm:$0xff] }
   0x2   :  { %5 = vst [vmem:[%s23_s1] sm:$0xff] %v4_v0 }

// kernel: tile.0
= control target key start
LH: loop header
LB: loop body
LE: loop exit
PB: predicated region body
PF: predicated region fallthrough
CT: control target
= control target key end

     0   :  { %vm3_vm0 = vcmask 7168   ;;  %s264_s8 = smov 125   ;;  %s265_s17 = smov 126   ;;  %s547_s0 = inlined_call_operand.vmem [shape: f32[8,16], index: 0, kind: input, shape index: {}]   ;;  %s548_s1 = inlined_call_operand.vmem [shape: f32[128,1], index: 1, kind: output, shape index: {}]  }
   0x1   :  { %v8_v0 = vld [vmem:[%s547_s0] sm:$0xff]   ;;  %s263_s0 = smov 127   ;;  %s266_s18 = smov 124  }
   0x2   :  { %9 = vrot.lane.b32.xlu0 %v8_v0, %s263_s0  ;;  %33 = vrot.lane.b32.xlu1 %v8_v0, %s264_s8  ;;  %4 = vst.msk [vmem:[%s548_s1] ss:$16 sm:$0x3] %vm3_vm0, %v8_v0   ;;  %5 = vst.msk [vmem:[%s548_s1] ss:$16 sm:$0xc] %vm3_vm0, %v8_v0  }
   0x3   :  { %6 = vst.msk [vmem:[%s548_s1] ss:$16 sm:$0x30] %vm3_vm0, %v8_v0   ;;  %7 = vst.msk [vmem:[%s548_s1] ss:$16 sm:$0xc0] %vm3_vm0, %v8_v0  }
   0x4   :  { %s267_s19 = smov 123   ;;  %s268_s20 = smov 122  }
   0x5   :  { %s269_s21 = smov 121   ;;  %s270_s22 = smov 120  }
   0x6   :  { %21 = vrot.lane.b32.xlu0 %v8_v0, %s265_s17  ;;  %45 = vrot.lane.b32.xlu1 %v8_v0, %s266_s18  ;;  %s271_s23 = smov 119   ;;  %s272_s24 = smov 118  }
   0x7   :  { %s273_s25 = smov 117   ;;  %s274_s26 = smov 116  }
   0x8   :  { %s275_s27 = smov 115   ;;  %s276_s28 = smov 114  }
   0x9   :  { %s277_s29 = smov 113  }
   0xa   :  { %57 = vrot.lane.b32.xlu0 %v8_v0, %s267_s19  ;;  %69 = vrot.lane.b32.xlu1 %v8_v0, %s268_s20 }
   0xe   :  { %81 = vrot.lane.b32.xlu0 %v8_v0, %s269_s21  ;;  %93 = vrot.lane.b32.xlu1 %v8_v0, %s270_s22 }
  0x12   :  { %105 = vrot.lane.b32.xlu0 %v8_v0, %s271_s23  ;;  %117 = vrot.lane.b32.xlu1 %v8_v0, %s272_s24 }
  0x16   :  { %129 = vrot.lane.b32.xlu0 %v8_v0, %s273_s25  ;;  %141 = vrot.lane.b32.xlu1 %v8_v0, %s274_s26 }
  0x1a   :  { %153 = vrot.lane.b32.xlu0 %v8_v0, %s275_s27  ;;  %165 = vrot.lane.b32.xlu1 %v8_v0, %s276_s28 }
  0x1e   :  { %177 = vrot.lane.b32.xlu0 %v8_v0, %s277_s29 }
  0x74   :  { %v10_v1 = vpop.permute.xlu0 %9   ;;  %v34_v2 = vpop.permute.xlu1 %33  }
  0x75   :  { %188 = vst.msk [vmem:[%s548_s1 + $0x1] ss:$16 sm:$0x3] %vm3_vm0, %v10_v1   ;;  %189 = vst.msk [vmem:[%s548_s1 + $0x1] ss:$16 sm:$0xc] %vm3_vm0, %v10_v1  }
  0x76   :  { %190 = vst.msk [vmem:[%s548_s1 + $0x1] ss:$16 sm:$0x30] %vm3_vm0, %v10_v1   ;;  %191 = vst.msk [vmem:[%s548_s1 + $0x1] ss:$16 sm:$0xc0] %vm3_vm0, %v10_v1  }
  0x77   :  { %196 = vst.msk [vmem:[%s548_s1 + $0x3] ss:$16 sm:$0x3] %vm3_vm0, %v34_v2   ;;  %197 = vst.msk [vmem:[%s548_s1 + $0x3] ss:$16 sm:$0xc] %vm3_vm0, %v34_v2  }
  0x78   :  { %198 = vst.msk [vmem:[%s548_s1 + $0x3] ss:$16 sm:$0x30] %vm3_vm0, %v34_v2   ;;  %199 = vst.msk [vmem:[%s548_s1 + $0x3] ss:$16 sm:$0xc0] %vm3_vm0, %v34_v2   ;;  %v22_v3 = vpop.permute.xlu0 %21   ;;  %v46_v4 = vpop.permute.xlu1 %45  }
  0x79   :  { %192 = vst.msk [vmem:[%s548_s1 + $0x2] ss:$16 sm:$0x3] %vm3_vm0, %v22_v3   ;;  %193 = vst.msk [vmem:[%s548_s1 + $0x2] ss:$16 sm:$0xc] %vm3_vm0, %v22_v3  }
  0x7a   :  { %194 = vst.msk [vmem:[%s548_s1 + $0x2] ss:$16 sm:$0x30] %vm3_vm0, %v22_v3   ;;  %195 = vst.msk [vmem:[%s548_s1 + $0x2] ss:$16 sm:$0xc0] %vm3_vm0, %v22_v3  }
  0x7b   :  { %200 = vst.msk [vmem:[%s548_s1 + $0x4] ss:$16 sm:$0x3] %vm3_vm0, %v46_v4   ;;  %201 = vst.msk [vmem:[%s548_s1 + $0x4] ss:$16 sm:$0xc] %vm3_vm0, %v46_v4  }
  0x7c   :  { %202 = vst.msk [vmem:[%s548_s1 + $0x4] ss:$16 sm:$0x30] %vm3_vm0, %v46_v4   ;;  %203 = vst.msk [vmem:[%s548_s1 + $0x4] ss:$16 sm:$0xc0] %vm3_vm0, %v46_v4   ;;  %v58_v5 = vpop.permute.xlu0 %57   ;;  %v70_v6 = vpop.permute.xlu1 %69  }
  0x7d   :  { %204 = vst.msk [vmem:[%s548_s1 + $0x5] ss:$16 sm:$0x3] %vm3_vm0, %v58_v5   ;;  %205 = vst.msk [vmem:[%s548_s1 + $0x5] ss:$16 sm:$0xc] %vm3_vm0, %v58_v5  }
  0x7e   :  { %206 = vst.msk [vmem:[%s548_s1 + $0x5] ss:$16 sm:$0x30] %vm3_vm0, %v58_v5   ;;  %207 = vst.msk [vmem:[%s548_s1 + $0x5] ss:$16 sm:$0xc0] %vm3_vm0, %v58_v5  }
  0x7f   :  { %208 = vst.msk [vmem:[%s548_s1 + $0x6] ss:$16 sm:$0x3] %vm3_vm0, %v70_v6   ;;  %209 = vst.msk [vmem:[%s548_s1 + $0x6] ss:$16 sm:$0xc] %vm3_vm0, %v70_v6  }
  0x80   :  { %210 = vst.msk [vmem:[%s548_s1 + $0x6] ss:$16 sm:$0x30] %vm3_vm0, %v70_v6   ;;  %211 = vst.msk [vmem:[%s548_s1 + $0x6] ss:$16 sm:$0xc0] %vm3_vm0, %v70_v6   ;;  %v82_v7 = vpop.permute.xlu0 %81   ;;  %v94_v8 = vpop.permute.xlu1 %93  }
  0x81   :  { %212 = vst.msk [vmem:[%s548_s1 + $0x7] ss:$16 sm:$0x3] %vm3_vm0, %v82_v7   ;;  %213 = vst.msk [vmem:[%s548_s1 + $0x7] ss:$16 sm:$0xc] %vm3_vm0, %v82_v7  }
  0x82   :  { %214 = vst.msk [vmem:[%s548_s1 + $0x7] ss:$16 sm:$0x30] %vm3_vm0, %v82_v7   ;;  %215 = vst.msk [vmem:[%s548_s1 + $0x7] ss:$16 sm:$0xc0] %vm3_vm0, %v82_v7  }
  0x83   :  { %216 = vst.msk [vmem:[%s548_s1 + $0x8] ss:$16 sm:$0x3] %vm3_vm0, %v94_v8   ;;  %217 = vst.msk [vmem:[%s548_s1 + $0x8] ss:$16 sm:$0xc] %vm3_vm0, %v94_v8  }
  0x84   :  { %218 = vst.msk [vmem:[%s548_s1 + $0x8] ss:$16 sm:$0x30] %vm3_vm0, %v94_v8   ;;  %219 = vst.msk [vmem:[%s548_s1 + $0x8] ss:$16 sm:$0xc0] %vm3_vm0, %v94_v8   ;;  %v106_v9 = vpop.permute.xlu0 %105   ;;  %v118_v10 = vpop.permute.xlu1 %117  }
  0x85   :  { %220 = vst.msk [vmem:[%s548_s1 + $0x9] ss:$16 sm:$0x3] %vm3_vm0, %v106_v9   ;;  %221 = vst.msk [vmem:[%s548_s1 + $0x9] ss:$16 sm:$0xc] %vm3_vm0, %v106_v9  }
  0x86   :  { %222 = vst.msk [vmem:[%s548_s1 + $0x9] ss:$16 sm:$0x30] %vm3_vm0, %v106_v9   ;;  %223 = vst.msk [vmem:[%s548_s1 + $0x9] ss:$16 sm:$0xc0] %vm3_vm0, %v106_v9  }
  0x87   :  { %224 = vst.msk [vmem:[%s548_s1 + $0xa] ss:$16 sm:$0x3] %vm3_vm0, %v118_v10   ;;  %225 = vst.msk [vmem:[%s548_s1 + $0xa] ss:$16 sm:$0xc] %vm3_vm0, %v118_v10  }
  0x88   :  { %226 = vst.msk [vmem:[%s548_s1 + $0xa] ss:$16 sm:$0x30] %vm3_vm0, %v118_v10   ;;  %227 = vst.msk [vmem:[%s548_s1 + $0xa] ss:$16 sm:$0xc0] %vm3_vm0, %v118_v10   ;;  %v130_v11 = vpop.permute.xlu0 %129   ;;  %v142_v12 = vpop.permute.xlu1 %141  }
  0x89   :  { %228 = vst.msk [vmem:[%s548_s1 + $0xb] ss:$16 sm:$0x3] %vm3_vm0, %v130_v11   ;;  %229 = vst.msk [vmem:[%s548_s1 + $0xb] ss:$16 sm:$0xc] %vm3_vm0, %v130_v11  }
  0x8a   :  { %230 = vst.msk [vmem:[%s548_s1 + $0xb] ss:$16 sm:$0x30] %vm3_vm0, %v130_v11   ;;  %231 = vst.msk [vmem:[%s548_s1 + $0xb] ss:$16 sm:$0xc0] %vm3_vm0, %v130_v11  }
  0x8b   :  { %232 = vst.msk [vmem:[%s548_s1 + $0xc] ss:$16 sm:$0x3] %vm3_vm0, %v142_v12   ;;  %233 = vst.msk [vmem:[%s548_s1 + $0xc] ss:$16 sm:$0xc] %vm3_vm0, %v142_v12  }
  0x8c   :  { %234 = vst.msk [vmem:[%s548_s1 + $0xc] ss:$16 sm:$0x30] %vm3_vm0, %v142_v12   ;;  %235 = vst.msk [vmem:[%s548_s1 + $0xc] ss:$16 sm:$0xc0] %vm3_vm0, %v142_v12   ;;  %v154_v13 = vpop.permute.xlu0 %153   ;;  %v166_v14 = vpop.permute.xlu1 %165  }
  0x8d   :  { %236 = vst.msk [vmem:[%s548_s1 + $0xd] ss:$16 sm:$0x3] %vm3_vm0, %v154_v13   ;;  %237 = vst.msk [vmem:[%s548_s1 + $0xd] ss:$16 sm:$0xc] %vm3_vm0, %v154_v13  }
  0x8e   :  { %238 = vst.msk [vmem:[%s548_s1 + $0xd] ss:$16 sm:$0x30] %vm3_vm0, %v154_v13   ;;  %239 = vst.msk [vmem:[%s548_s1 + $0xd] ss:$16 sm:$0xc0] %vm3_vm0, %v154_v13  }
  0x8f   :  { %240 = vst.msk [vmem:[%s548_s1 + $0xe] ss:$16 sm:$0x3] %vm3_vm0, %v166_v14   ;;  %241 = vst.msk [vmem:[%s548_s1 + $0xe] ss:$16 sm:$0xc] %vm3_vm0, %v166_v14  }
  0x90   :  { %242 = vst.msk [vmem:[%s548_s1 + $0xe] ss:$16 sm:$0x30] %vm3_vm0, %v166_v14   ;;  %243 = vst.msk [vmem:[%s548_s1 + $0xe] ss:$16 sm:$0xc0] %vm3_vm0, %v166_v14   ;;  %v178_v15 = vpop.permute.xlu0 %177  }
  0x91   :  { %244 = vst.msk [vmem:[%s548_s1 + $0xf] ss:$16 sm:$0x3] %vm3_vm0, %v178_v15   ;;  %245 = vst.msk [vmem:[%s548_s1 + $0xf] ss:$16 sm:$0xc] %vm3_vm0, %v178_v15  }
  0x92   :  { %246 = vst.msk [vmem:[%s548_s1 + $0xf] ss:$16 sm:$0x30] %vm3_vm0, %v178_v15   ;;  %247 = vst.msk [vmem:[%s548_s1 + $0xf] ss:$16 sm:$0xc0] %vm3_vm0, %v178_v15  }

// kernel: generator_forward.9
= control target key start
LH: loop header
LB: loop body
LE: loop exit
PB: predicated region body
PF: predicated region fallthrough
CT: control target
= control target key end

     0   :  { %s817_s9 = smov 0   ;;  %s819_s10 = smov 0   ;;  %s920_s0 = inlined_call_operand.vmem [shape: bf16[128,40], index: 0, kind: input, shape index: {}]   ;;  %s921_s1 = inlined_call_operand.vmem [shape: bf16[2,40,128], index: 1, kind: input, shape index: {}]   ;;  %s922_s2 = inlined_call_operand.vmem [shape: f32[2,2,128,128], index: 2, kind: output, shape index: {}]  }
   0x1   :  { %s821_s11 = smov 0  }
   0x2 LB: > { %s24_s12 = sadd.s32 1, %s796_s10  ;;  %p659_p0 = scmp.ge.s32.totalorder %s800_s11, 1  ;;  %s800_s11 = sphi %s821_s11, %s12_s11   ;;  %s796_s10 = sphi %s819_s10, %s924_s10   ;;  %s792_s9 = sphi %s817_s9, %s923_s9  }
   0x3   : > { %p26_p1 = scmp.ge.s32.totalorder %s24_s12, 2  ;;  %p129_p2 = scmp.lt.s32.totalorder %s800_s11, 3 }
   0x5   : > { %s926_s12 = smov (%p26_p1, %s24_s12), 0  ;;  %p130_p3 = pnand %p659_p0, %p129_p2 }
   0x6   : > { %p154_p4 = scmp.lt.s32.totalorder (!%p130_p3), %s792_s9, 1 }
   0x7   : > { %133 = sbr.rel (%p130_p3) target bundleno = 239 (0xef), region = 28 }
   0xc   : > { %v770_v0 = vld [vmem:[%s920_s0] sm:$0xff]   ;;  %vm280_vm0 = vcmask 326656   ;;  %s928_s9 = smov (!%p154_p4, %s792_s9), 1  ;;  %vm305_vm1 = vcmask 1043456   ;;  %v772_v6 = vld [vmem:[%s920_s0 + $0x8] sm:$0xff]   ;;  %v774_v8 = vld [vmem:[%s920_s0 + $0x10] sm:$0xff]  }
   0xd   : > { %v771_v1 = vld [vmem:[%s920_s0 + $0x20] sm:$0xff]   ;;  %718 = vmatprep.mubr.msk.bf16.mxu0 %vm280_vm0, %v770_v0  ;;  %s742_s17 = smul.u32 20, %s928_s9  ;;  %v773_v7 = vld [vmem:[%s920_s0 + $0x28] sm:$0xff]   ;;  %v775_v9 = vld [vmem:[%s920_s0 + $0x30] sm:$0xff]   ;;  %s700_s5 = sshll.u32 %s928_s9, 8 }
   0xe   : > { %726 = vmatprep.mubr.msk.bf16.mxu1 %vm280_vm0, %v771_v1  ;;  %v776_v10 = vld [vmem:[%s920_s0 + $0x18] sm:$0xff]   ;;  %s877_s8 = scalar_lea.vmem %s922_s2, %s700_s5 }
   0xf   : > { %s161_s20 = scalar_lea.vmem %s921_s1, %s742_s17  ;;  %v777_v11 = vld [vmem:[%s920_s0 + $0x38] sm:$0xff]  }
  0x10   : > { %v767_v2 = vld [vmem:[%s161_s20 + $0x10] ss:$0 sps:$4 sm:$0xff]   ;;  %v768_v3 = vld [vmem:[%s161_s20 + $0x8] sm:$0xff]   ;;  %v769_v5 = vld [vmem:[%s161_s20] sm:$0xff]  }
  0x11   : > { %740 = vmatprep.subr.msk.bf16.mxu0 %vm305_vm1, %v767_v2  ;;  %741 = vmatprep.subr.msk.bf16.mxu1 %vm305_vm1, %v767_v2  ;;  %v307_v4 = vsel %vm305_vm1, %v767_v2, 0 }
  0x12   : > { %713 = vmatpush3.bf16.msra.mxu0 %v307_v4  ;;  %737 = vmatpush3.bf16.msra.mxu1 %v307_v4 }
  0x13   : > { %714 = vmatprep.subr.bf16.mxu0 %v768_v3  ;;  %735 = vmatprep.subr.bf16.mxu1 %v768_v3 }
  0x16   : > { %715 = vmatpush3.bf16.msra.mxu0 %v768_v3  ;;  %738 = vmatpush3.bf16.msra.mxu1 %v768_v3 }
  0x17   : > { %716 = vmatprep.subr.bf16.mxu0 %v769_v5  ;;  %736 = vmatprep.subr.bf16.mxu1 %v769_v5 }
  0x1a   : > { %717 = vmatpush3.bf16.msra.mxu0 %v769_v5  ;;  %739 = vmatpush3.bf16.msra.mxu1 %v769_v5 }
  0x1d   : > { %719 = vmatmul.mubr.msk.bf16.vlgmr.msra.gmra.mxu0 %vm280_vm0, %v772_v6  ;;  %727 = vmatmul.mubr.msk.bf16.vlgmr.msra.gmra.mxu1 %vm280_vm0, %v773_v7 }
  0x1e   : > { %722 = vmatprep.mubr.msk.bf16.mxu0 %vm280_vm0, %v774_v8  ;;  %730 = vmatprep.mubr.msk.bf16.mxu1 %vm280_vm0, %v775_v9 }
  0x25   : > { %723 = vmatmul.mubr.msk.bf16.gmra.mxu0 %vm280_vm0, %v776_v10  ;;  %731 = vmatmul.mubr.msk.bf16.gmra.mxu1 %vm280_vm0, %v777_v11 }
  0xdd   : > { %v720_v12 = vpop.f32.mrf.mxu0  ;;  %v728_v13 = vpop.f32.mrf.mxu1 }
  0xde   : > { %v456_v14 = vmul.f32 %v720_v12, %v720_v12  ;;  %539 = vst [vmem:[%s877_s8 + $0x10] sm:$0xff] %v720_v12  ;;  %v464_v15 = vmul.f32 %v728_v13, %v728_v13  ;;  %547 = vst [vmem:[%s877_s8 + $0x50] sm:$0xff] %v728_v13 }
  0xdf   : > { %v343_v16 = vpop.f32.mrf.mxu0  ;;  %v375_v17 = vpop.f32.mrf.mxu1 }
  0xe0   : > { %684 = vst [vmem:[%s877_s8 + $0x90] sm:$0xff] %v456_v14  ;;  %692 = vst [vmem:[%s877_s8 + $0xd0] sm:$0xff] %v464_v15  ;;  %v454_v18 = vmul.f32 %v343_v16, %v343_v16  ;;  %v462_v19 = vmul.f32 %v375_v17, %v375_v17 }
  0xe1   : > { %537 = vst [vmem:[%s877_s8] sm:$0xff] %v343_v16  ;;  %545 = vst [vmem:[%s877_s8 + $0x40] sm:$0xff] %v375_v17  ;;  %v721_v20 = vpop.f32.mrf.mxu0  ;;  %v729_v21 = vpop.f32.mrf.mxu1 }
  0xe2   : > { %682 = vst [vmem:[%s877_s8 + $0x80] sm:$0xff] %v454_v18  ;;  %690 = vst [vmem:[%s877_s8 + $0xc0] sm:$0xff] %v462_v19  ;;  %v457_v22 = vmul.f32 %v721_v20, %v721_v20  ;;  %v465_v23 = vmul.f32 %v729_v21, %v729_v21 }
  0xe3   : > { %540 = vst [vmem:[%s877_s8 + $0x18] sm:$0xff] %v721_v20  ;;  %548 = vst [vmem:[%s877_s8 + $0x58] sm:$0xff] %v729_v21  ;;  %v346_v24 = vpop.f32.mrf.mxu0  ;;  %v378_v25 = vpop.f32.mrf.mxu1 }
  0xe4   : > { %685 = vst [vmem:[%s877_s8 + $0x98] sm:$0xff] %v457_v22  ;;  %693 = vst [vmem:[%s877_s8 + $0xd8] sm:$0xff] %v465_v23  ;;  %v455_v26 = vmul.f32 %v346_v24, %v346_v24  ;;  %v463_v27 = vmul.f32 %v378_v25, %v378_v25 }
  0xe5   : > { %538 = vst [vmem:[%s877_s8 + $0x8] sm:$0xff] %v346_v24  ;;  %546 = vst [vmem:[%s877_s8 + $0x48] sm:$0xff] %v378_v25  ;;  %v724_v28 = vpop.f32.mrf.mxu0  ;;  %v732_v29 = vpop.f32.mrf.mxu1 }
  0xe6   : > { %683 = vst [vmem:[%s877_s8 + $0x88] sm:$0xff] %v455_v26  ;;  %691 = vst [vmem:[%s877_s8 + $0xc8] sm:$0xff] %v463_v27  ;;  %v460_v30 = vmul.f32 %v724_v28, %v724_v28  ;;  %v468_v31 = vmul.f32 %v732_v29, %v732_v29 }
  0xe7   : > { %543 = vst [vmem:[%s877_s8 + $0x30] sm:$0xff] %v724_v28  ;;  %551 = vst [vmem:[%s877_s8 + $0x70] sm:$0xff] %v732_v29  ;;  %v359_v32 = vpop.f32.mrf.mxu0  ;;  %v391_v33 = vpop.f32.mrf.mxu1 }
  0xe8   : > { %688 = vst [vmem:[%s877_s8 + $0xb0] sm:$0xff] %v460_v30  ;;  %696 = vst [vmem:[%s877_s8 + $0xf0] sm:$0xff] %v468_v31  ;;  %v458_v34 = vmul.f32 %v359_v32, %v359_v32  ;;  %v466_v35 = vmul.f32 %v391_v33, %v391_v33 }
  0xe9   : > { %541 = vst [vmem:[%s877_s8 + $0x20] sm:$0xff] %v359_v32  ;;  %549 = vst [vmem:[%s877_s8 + $0x60] sm:$0xff] %v391_v33  ;;  %v725_v36 = vpop.f32.mrf.mxu0  ;;  %v733_v37 = vpop.f32.mrf.mxu1 }
  0xea   : > { %686 = vst [vmem:[%s877_s8 + $0xa0] sm:$0xff] %v458_v34  ;;  %694 = vst [vmem:[%s877_s8 + $0xe0] sm:$0xff] %v466_v35  ;;  %v461_v38 = vmul.f32 %v725_v36, %v725_v36  ;;  %v469_v39 = vmul.f32 %v733_v37, %v733_v37 }
  0xeb   : > { %544 = vst [vmem:[%s877_s8 + $0x38] sm:$0xff] %v725_v36  ;;  %552 = vst [vmem:[%s877_s8 + $0x78] sm:$0xff] %v733_v37  ;;  %v362_v40 = vpop.f32.mrf.mxu0  ;;  %v394_v41 = vpop.f32.mrf.mxu1 }
  0xec   : > { %689 = vst [vmem:[%s877_s8 + $0xb8] sm:$0xff] %v461_v38  ;;  %697 = vst [vmem:[%s877_s8 + $0xf8] sm:$0xff] %v469_v39  ;;  %v459_v42 = vmul.f32 %v362_v40, %v362_v40  ;;  %v467_v43 = vmul.f32 %v394_v41, %v394_v41 }
  0xed   : > { %542 = vst [vmem:[%s877_s8 + $0x28] sm:$0xff] %v362_v40  ;;  %550 = vst [vmem:[%s877_s8 + $0x68] sm:$0xff] %v394_v41 }
  0xee   : > { %687 = vst [vmem:[%s877_s8 + $0xa8] sm:$0xff] %v459_v42  ;;  %695 = vst [vmem:[%s877_s8 + $0xe8] sm:$0xff] %v467_v43 }
  0xef PF: > { %s12_s11 = sadd.s32 1, %s800_s11   ;;  %s923_s9 = smov %s796_s10 }
  0xf0   : > { %p9_p5 = scmp.ge.s32.totalorder %s12_s11, 4   ;;  %s924_s10 = smov %s926_s12 }
  0xf2   :  { %11 = sbr.rel (!%p9_p5) target bundleno = 2 (0x2), region = 67 }

// kernel: generator_forward.10
= control target key start
LH: loop header
LB: loop body
LE: loop exit
PB: predicated region body
PF: predicated region fallthrough
CT: control target
= control target key end

     0   :  { %s1074_s15 = smov 0   ;;  %s1076_s16 = smov 0   ;;  %s1273_s0 = inlined_call_operand.vmem [shape: bf16[128,40], index: 0, kind: input, shape index: {}]   ;;  %s1274_s1 = inlined_call_operand.vmem [shape: bf16[2,40,128], index: 1, kind: input, shape index: {}]   ;;  %s1275_s2 = inlined_call_operand.vmem [shape: f32[128,1], index: 2, kind: input, shape index: {}]   ;;  %s1276_s3 = inlined_call_operand.vmem [shape: f32[128,1], index: 3, kind: input, shape index: {}]   ;;  %s1277_s4 = inlined_call_operand.vmem [shape: bf16[2,128,128], index: 4, kind: output, shape index: {}]  }
   0x1   :  { %s1078_s17 = smov 0  }
   0x2 LB: > { %s26_s18 = sadd.s32 1, %s1042_s16  ;;  %p839_p0 = scmp.ge.s32.totalorder %s1046_s17, 1  ;;  %s1046_s17 = sphi %s1078_s17, %s14_s17   ;;  %s1042_s16 = sphi %s1076_s16, %s1279_s16   ;;  %s1038_s15 = sphi %s1074_s15, %s1278_s15  }
   0x3   : > { %p28_p1 = scmp.ge.s32.totalorder %s26_s18, 2  ;;  %p181_p2 = scmp.lt.s32.totalorder %s1046_s17, 3 }
   0x5   : > { %s1281_s18 = smov (%p28_p1, %s26_s18), 0  ;;  %p182_p3 = pnand %p839_p0, %p181_p2 }
   0x6   : > { %p213_p4 = scmp.lt.s32.totalorder (!%p182_p3), %s1038_s15, 1 }
   0x7   : > { %185 = sbr.rel (%p182_p3) target bundleno = 247 (0xf7), region = 36 }
   0xc   : > { %v434_v0 = vld [vmem:[%s1275_s2 + $0x10] sm:$0xff]  ;;  %v432_v1 = vld [vmem:[%s1275_s2] sm:$0xff]  ;;  %v1048_v2 = vmov 0   ;;  %v435_v3 = vld [vmem:[%s1275_s2 + $0x18] sm:$0xff]  ;;  %s1283_s15 = smov (!%p213_p4, %s1038_s15), 1  ;;  %vm306_vm0 = vcmask 326656  }
   0xd   : > { %1012 = vset.pattern.permute.xlu1 %v1048_v2  ;;  %1011 = vset.pattern.permute.xlu0 %v1048_v2  ;;  %v433_v4 = vld [vmem:[%s1275_s2 + $0x8] sm:$0xff]  ;;  %s985_s27 = smul.u32 20, %s1283_s15  ;;  %v1016_v5 = vld [vmem:[%s1273_s0] sm:$0xff]   ;;  %vm331_vm1 = vcmask 1043456   ;;  %v439_v12 = vld [vmem:[%s1275_s2 + $0x38] sm:$0xff]  ;;  %s880_s11 = sshll.u32 %s1283_s15, 6 }
   0xe   : > { %460 = vperm.xlu1 %1012, %v434_v0   ;;  %450 = vperm.xlu0 %1011, %v432_v1   ;;  %v1017_v6 = vld [vmem:[%s1273_s0 + $0x20] sm:$0xff]   ;;  %v437_v7 = vld [vmem:[%s1275_s2 + $0x28] sm:$0xff]  ;;  %v438_v13 = vld [vmem:[%s1275_s2 + $0x30] sm:$0xff]  ;;  %s1246_s14 = scalar_lea.vmem %s1277_s4, %s880_s11 }
   0xf   : > { %v436_v8 = vld [vmem:[%s1275_s2 + $0x20] sm:$0xff]  ;;  %s220_s12 = scalar_lea.vmem %s1274_s1, %s985_s27  ;;  %961 = vmatprep.mubr.msk.bf16.mxu0 %vm306_vm0, %v1016_v5  ;;  %969 = vmatprep.mubr.msk.bf16.mxu1 %vm306_vm0, %v1017_v6  ;;  %v441_v15 = vld [vmem:[%s1275_s2 + $0x48] sm:$0xff]  ;;  %v443_v17 = vld [vmem:[%s1275_s2 + $0x58] sm:$0xff] }
  0x10   : > { %v1013_v9 = vld [vmem:[%s220_s12 + $0x10] ss:$0 sps:$4 sm:$0xff]   ;;  %v1014_v10 = vld [vmem:[%s220_s12 + $0x8] sm:$0xff]   ;;  %v1015_v14 = vld [vmem:[%s220_s12] sm:$0xff]  }
  0x11   : > { %983 = vmatprep.subr.msk.bf16.mxu0 %vm331_vm1, %v1013_v9  ;;  %984 = vmatprep.subr.msk.bf16.mxu1 %vm331_vm1, %v1013_v9  ;;  %v333_v11 = vsel %vm331_vm1, %v1013_v9, 0  ;;  %v440_v16 = vld [vmem:[%s1275_s2 + $0x40] sm:$0xff]  ;;  %v442_v18 = vld [vmem:[%s1275_s2 + $0x50] sm:$0xff]  ;;  %v1018_v19 = vld [vmem:[%s1273_s0 + $0x8] sm:$0xff]  }
  0x12   : > { %465 = vperm.xlu1 %1012, %v435_v3   ;;  %455 = vperm.xlu0 %1011, %v433_v4   ;;  %v1019_v20 = vld [vmem:[%s1273_s0 + $0x28] sm:$0xff]   ;;  %v1020_v21 = vld [vmem:[%s1273_s0 + $0x10] sm:$0xff]   ;;  %v444_v24 = vld [vmem:[%s1275_s2 + $0x60] sm:$0xff] }
  0x13   : > { %956 = vmatpush3.bf16.msra.mxu0 %v333_v11  ;;  %980 = vmatpush3.bf16.msra.mxu1 %v333_v11  ;;  %v1021_v22 = vld [vmem:[%s1273_s0 + $0x30] sm:$0xff]   ;;  %v445_v23 = vld [vmem:[%s1275_s2 + $0x68] sm:$0xff]  ;;  %v447_v25 = vld [vmem:[%s1275_s2 + $0x78] sm:$0xff] }
  0x14   : > { %957 = vmatprep.subr.bf16.mxu0 %v1014_v10  ;;  %978 = vmatprep.subr.bf16.mxu1 %v1014_v10  ;;  %v446_v26 = vld [vmem:[%s1275_s2 + $0x70] sm:$0xff]  ;;  %v1022_v27 = vld [vmem:[%s1273_s0 + $0x18] sm:$0xff]   ;;  %v545_v29 = vld [vmem:[%s1276_s3 + $0x8] sm:$0xff] }
  0x15   : > { %v1023_v28 = vld [vmem:[%s1273_s0 + $0x38] sm:$0xff]   ;;  %v544_v30 = vld [vmem:[%s1276_s3] sm:$0xff]  ;;  %v546_v32 = vld [vmem:[%s1276_s3 + $0x10] sm:$0xff] }
  0x16   : > { %475 = vperm.xlu1 %1012, %v437_v7   ;;  %470 = vperm.xlu0 %1011, %v436_v8   ;;  %v547_v31 = vld [vmem:[%s1276_s3 + $0x18] sm:$0xff]  ;;  %v549_v33 = vld [vmem:[%s1276_s3 + $0x28] sm:$0xff]  ;;  %v548_v34 = vld [vmem:[%s1276_s3 + $0x20] sm:$0xff] }
  0x17   : > { %958 = vmatpush3.bf16.msra.mxu0 %v1014_v10  ;;  %981 = vmatpush3.bf16.msra.mxu1 %v1014_v10  ;;  %v551_v35 = vld [vmem:[%s1276_s3 + $0x38] sm:$0xff]  ;;  %v550_v36 = vld [vmem:[%s1276_s3 + $0x30] sm:$0xff]  ;;  %v553_v37 = vld [vmem:[%s1276_s3 + $0x48] sm:$0xff] }
  0x18   : > { %959 = vmatprep.subr.bf16.mxu0 %v1015_v14  ;;  %979 = vmatprep.subr.bf16.mxu1 %v1015_v14  ;;  %v552_v38 = vld [vmem:[%s1276_s3 + $0x40] sm:$0xff]  ;;  %v555_v39 = vld [vmem:[%s1276_s3 + $0x58] sm:$0xff]  ;;  %v554_v40 = vld [vmem:[%s1276_s3 + $0x50] sm:$0xff] }
  0x19   : > { %v557_v41 = vld [vmem:[%s1276_s3 + $0x68] sm:$0xff]  ;;  %v556_v42 = vld [vmem:[%s1276_s3 + $0x60] sm:$0xff]  ;;  %v559_v43 = vld [vmem:[%s1276_s3 + $0x78] sm:$0xff] }
  0x1a   : > { %485 = vperm.xlu1 %1012, %v439_v12   ;;  %480 = vperm.xlu0 %1011, %v438_v13   ;;  %v558_v44 = vld [vmem:[%s1276_s3 + $0x70] sm:$0xff] }
  0x1b   : > { %960 = vmatpush3.bf16.msra.mxu0 %v1015_v14  ;;  %982 = vmatpush3.bf16.msra.mxu1 %v1015_v14 }
  0x1e   : > { %495 = vperm.xlu1 %1012, %v441_v15   ;;  %490 = vperm.xlu0 %1011, %v440_v16  }
  0x1f   : > { %962 = vmatmul.mubr.msk.bf16.vlgmr.msra.gmra.mxu0 %vm306_vm0, %v1018_v19  ;;  %970 = vmatmul.mubr.msk.bf16.vlgmr.msra.gmra.mxu1 %vm306_vm0, %v1019_v20 }
  0x20   : > { %965 = vmatprep.mubr.msk.bf16.mxu0 %vm306_vm0, %v1020_v21  ;;  %973 = vmatprep.mubr.msk.bf16.mxu1 %vm306_vm0, %v1021_v22 }
  0x22   : > { %505 = vperm.xlu1 %1012, %v443_v17   ;;  %500 = vperm.xlu0 %1011, %v442_v18  }
  0x26   : > { %515 = vperm.xlu1 %1012, %v445_v23   ;;  %510 = vperm.xlu0 %1011, %v444_v24  }
  0x27   : > { %966 = vmatmul.mubr.msk.bf16.gmra.mxu0 %vm306_vm0, %v1022_v27  ;;  %974 = vmatmul.mubr.msk.bf16.gmra.mxu1 %vm306_vm0, %v1023_v28 }
  0x2a   : > { %525 = vperm.xlu1 %1012, %v447_v25   ;;  %520 = vperm.xlu0 %1011, %v446_v26  }
  0x2e   : > { %567 = vperm.xlu1 %1012, %v545_v29   ;;  %562 = vperm.xlu0 %1011, %v544_v30  }
  0x32   : > { %577 = vperm.xlu1 %1012, %v547_v31   ;;  %572 = vperm.xlu0 %1011, %v546_v32  }
  0x36   : > { %587 = vperm.xlu1 %1012, %v549_v33   ;;  %582 = vperm.xlu0 %1011, %v548_v34  }
  0x3a   : > { %597 = vperm.xlu1 %1012, %v551_v35   ;;  %592 = vperm.xlu0 %1011, %v550_v36  }
  0x3e   : > { %607 = vperm.xlu1 %1012, %v553_v37   ;;  %602 = vperm.xlu0 %1011, %v552_v38  }
  0x42   : > { %617 = vperm.xlu1 %1012, %v555_v39   ;;  %612 = vperm.xlu0 %1011, %v554_v40  }
  0x46   : > { %627 = vperm.xlu1 %1012, %v557_v41   ;;  %622 = vperm.xlu0 %1011, %v556_v42  }
  0x4a   : > { %637 = vperm.xlu1 %1012, %v559_v43   ;;  %632 = vperm.xlu0 %1011, %v558_v44  }
  0x89   : > { %v451_v45 = vpop.permute.xlu0 %450  ;;  %v461_v46 = vpop.permute.xlu1 %460 }
  0x8d   : > { %v456_v47 = vpop.permute.xlu0 %455  ;;  %v466_v48 = vpop.permute.xlu1 %465 }
  0x91   : > { %v1226_v49 = vpop.permute.xlu0 %470  ;;  %v1228_v50 = vpop.permute.xlu1 %475 }
  0x95   : > { %v481_v51 = vpop.permute.xlu0 %480  ;;  %v1230_v52 = vpop.permute.xlu1 %485 }
  0x99   : > { %v491_v53 = vpop.permute.xlu0 %490  ;;  %v496_v54 = vpop.permute.xlu1 %495 }
  0x9d   : > { %v501_v55 = vpop.permute.xlu0 %500  ;;  %v506_v56 = vpop.permute.xlu1 %505 }
  0xa1   : > { %v511_v57 = vpop.permute.xlu0 %510  ;;  %v1232_v58 = vpop.permute.xlu1 %515 }
  0xa5   : > { %v521_v59 = vpop.permute.xlu0 %520  ;;  %v1234_v60 = vpop.permute.xlu1 %525 }
  0xa9   : > { %v563_v61 = vpop.permute.xlu0 %562  ;;  %v568_v62 = vpop.permute.xlu1 %567 }
  0xad   : > { %v573_v63 = vpop.permute.xlu0 %572  ;;  %v578_v0 = vpop.permute.xlu1 %577 }
  0xb1   : > { %v1236_v1 = vpop.permute.xlu0 %582  ;;  %v1238_v2 = vpop.permute.xlu1 %587 }
  0xb5   : > { %v593_v3 = vpop.permute.xlu0 %592  ;;  %v1240_v4 = vpop.permute.xlu1 %597 }
  0xb9   : > { %v603_v5 = vpop.permute.xlu0 %602  ;;  %v608_v6 = vpop.permute.xlu1 %607 }
  0xbd   : > { %v613_v9 = vpop.permute.xlu0 %612  ;;  %v618_v14 = vpop.permute.xlu1 %617 }
  0xc1   : > { %v623_v25 = vpop.permute.xlu0 %622  ;;  %v628_v34 = vpop.permute.xlu1 %627 }
  0xdf   : > { %v963_v7 = vpop.f32.mrf.mxu0  ;;  %v971_v8 = vpop.f32.mrf.mxu1 }
  0xe0   : > { %v530_v10 = vmul.f32 %v963_v7, %v461_v46  ;;  %v538_v11 = vmul.f32 %v971_v8, %v501_v55 }
  0xe1   : > { %v369_v12 = vpop.f32.mrf.mxu0  ;;  %v401_v13 = vpop.f32.mrf.mxu1 }
  0xe2   : > { %v528_v15 = vmul.f32 %v451_v45, %v369_v12  ;;  %v536_v16 = vmul.f32 %v491_v53, %v401_v13  ;;  %v642_v19 = vadd.f32 %v573_v63, %v530_v10  ;;  %v650_v20 = vadd.f32 %v613_v9, %v538_v11  ;;  %v638_v10 = vpop.permute.xlu1 %637 }
  0xe3   : > { %v964_v17 = vpop.f32.mrf.mxu0  ;;  %v972_v18 = vpop.f32.mrf.mxu1 }
  0xe4   : > { %v531_v21 = vmul.f32 %v964_v17, %v466_v48  ;;  %v539_v22 = vmul.f32 %v972_v18, %v506_v56  ;;  %v640_v26 = vadd.f32 %v563_v61, %v528_v15  ;;  %v648_v27 = vadd.f32 %v603_v5, %v536_v16  ;;  %v633_v61 = vpop.permute.xlu0 %632 }
  0xe5   : > { %v372_v23 = vpop.f32.mrf.mxu0  ;;  %v404_v24 = vpop.f32.mrf.mxu1  ;;  %v658_v35 = vmax.f32 %v642_v19, 0.0  ;;  %v666_v36 = vmax.f32 %v650_v20, 0.0 }
  0xe6   : > { %v529_v28 = vmul.f32 %v456_v47, %v372_v23  ;;  %v537_v29 = vmul.f32 %v496_v54, %v404_v24  ;;  %v643_v30 = vadd.f32 %v578_v0, %v531_v21  ;;  %v651_v31 = vadd.f32 %v618_v14, %v539_v22 }
  0xe7   : > { %v967_v32 = vpop.f32.mrf.mxu0  ;;  %v975_v33 = vpop.f32.mrf.mxu1  ;;  %v656_v45 = vmax.f32 %v640_v26, 0.0  ;;  %v664_v46 = vmax.f32 %v648_v27, 0.0 }
  0xe8   : > { %v641_v37 = vadd.f32 %v568_v62, %v529_v28  ;;  %v649_v38 = vadd.f32 %v608_v6, %v537_v29  ;;  %v659_v39 = vmax.f32 %v643_v30, 0.0  ;;  %v667_v40 = vmax.f32 %v651_v31, 0.0 }
  0xe9   : > { %v534_v41 = vmul.f32 %v967_v32, %v481_v51  ;;  %v542_v42 = vmul.f32 %v975_v33, %v521_v59  ;;  %v385_v43 = vpop.f32.mrf.mxu0  ;;  %v417_v44 = vpop.f32.mrf.mxu1 }
  0xea   : > { %v657_v47 = vmax.f32 %v641_v37, 0.0  ;;  %v665_v48 = vmax.f32 %v649_v38, 0.0  ;;  %v905_v53 = vpack.c.bf16 %v659_v39, %v658_v35  ;;  %v925_v54 = vpack.c.bf16 %v667_v40, %v666_v36 }
  0xeb   : > { %v532_v55 = vmul.f32 %v1226_v49, %v385_v43  ;;  %v540_v51 = vmul.f32 %v511_v57, %v417_v44  ;;  %v968_v56 = vpop.f32.mrf.mxu0  ;;  %v976_v59 = vpop.f32.mrf.mxu1  ;;  %v646_v0 = vadd.f32 %v593_v3, %v534_v41  ;;  %v654_v5 = vadd.f32 %v633_v61, %v542_v42 }
  0xec   : > { %v900_v62 = vpack.c.bf16 %v657_v47, %v656_v45  ;;  %v920_v63 = vpack.c.bf16 %v665_v48, %v664_v46  ;;  %937 = vst [vmem:[%s1246_s14 + $0x8] sm:$0xff] %v905_v53   ;;  %941 = vst [vmem:[%s1246_s14 + $0x28] sm:$0xff] %v925_v54   ;;  %v535_v6 = vmul.f32 %v968_v56, %v1230_v52 }
  0xed   : > { %v543_v7 = vmul.f32 %v976_v59, %v1234_v60  ;;  %v388_v8 = vpop.f32.mrf.mxu0  ;;  %v420_v9 = vpop.f32.mrf.mxu1  ;;  %v644_v49 = vadd.f32 %v1236_v1, %v532_v55  ;;  %v652_v57 = vadd.f32 %v623_v25, %v540_v51  ;;  %v662_v14 = vmax.f32 %v646_v0, 0.0 }
  0xee   : > { %901 = vst [vmem:[%s1246_s14] sm:$0xff] %v900_v62   ;;  %940 = vst [vmem:[%s1246_s14 + $0x20] sm:$0xff] %v920_v63   ;;  %v533_v11 = vmul.f32 %v1228_v50, %v388_v8  ;;  %v541_v12 = vmul.f32 %v1232_v58, %v420_v9  ;;  %v647_v13 = vadd.f32 %v1240_v4, %v535_v6  ;;  %v670_v15 = vmax.f32 %v654_v5, 0.0 }
  0xef   : > { %v655_v3 = vadd.f32 %v638_v10, %v543_v7  ;;  %v660_v1 = vmax.f32 %v644_v49, 0.0  ;;  %v668_v18 = vmax.f32 %v652_v57, 0.0 }
  0xf0   : > { %v645_v52 = vadd.f32 %v1238_v2, %v533_v11  ;;  %v653_v60 = vadd.f32 %v628_v34, %v541_v12  ;;  %v663_v16 = vmax.f32 %v647_v13, 0.0 }
  0xf1   : > { %v671_v17 = vmax.f32 %v655_v3, 0.0 }
  0xf2   : > { %v661_v19 = vmax.f32 %v645_v52, 0.0  ;;  %v669_v50 = vmax.f32 %v653_v60, 0.0  ;;  %v915_v20 = vpack.c.bf16 %v663_v16, %v662_v14 }
  0xf3   : > { %v935_v58 = vpack.c.bf16 %v671_v17, %v670_v15 }
  0xf4   : > { %v910_v21 = vpack.c.bf16 %v661_v19, %v660_v1  ;;  %v930_v4 = vpack.c.bf16 %v669_v50, %v668_v18  ;;  %939 = vst [vmem:[%s1246_s14 + $0x18] sm:$0xff] %v915_v20  }
  0xf5   : > { %943 = vst [vmem:[%s1246_s14 + $0x38] sm:$0xff] %v935_v58  }
  0xf6   : > { %938 = vst [vmem:[%s1246_s14 + $0x10] sm:$0xff] %v910_v21   ;;  %942 = vst [vmem:[%s1246_s14 + $0x30] sm:$0xff] %v930_v4  }
  0xf7 PF: > { %s14_s17 = sadd.s32 1, %s1046_s17   ;;  %s1278_s15 = smov %s1042_s16 }
  0xf8   : > { %p11_p5 = scmp.ge.s32.totalorder %s14_s17, 4   ;;  %s1279_s16 = smov %s1281_s18 }
  0xfa   :  { %13 = sbr.rel (!%p11_p5) target bundleno = 2 (0x2), region = 66 }

// kernel: squeeze.10
= control target key start
LH: loop header
LB: loop body
LE: loop exit
PB: predicated region body
PF: predicated region fallthrough
CT: control target
= control target key end

     0   :  { %s67_s8 = smov 104   ;;  %vm8_vm0 = vcmask 64512   ;;  %s68_s11 = smov 112   ;;  %s118_s0 = inlined_call_operand.vmem [shape: f32[64], index: 0, kind: input, shape index: {}]   ;;  %s119_s1 = inlined_call_operand.vmem [shape: f32[8,8], index: 1, kind: output, shape index: {}]  }
   0x1   :  { %v5_v0 = vld [vmem:[%s118_s0] sm:$0x1]  ;;  %s66_s0 = smov 120   ;;  %s69_s12 = smov 96  }
   0x2   :  { %6 = vst [vmem:[#allocation0] sm:$0x1] %v5_v0  ;;  %s70_s13 = smov 88   ;;  %s71_s14 = smov 80  }
   0x3   :  { %s72_s15 = smov 72  }
   0x9   :  { %v10_v1 = vld [vmem:[#allocation0] sm:$0x1]  }
   0xa   :  { %v22_v2 = vld [vmem:[#allocation0] sm:$0x1]   ;;  %11 = vrot.lane.b32.xlu0 %v10_v1, %s66_s0 }
   0xb   :  { %23 = vrot.lane.b32.xlu1 %v22_v2, %s67_s8  ;;  %v16_v3 = vld [vmem:[#allocation0] sm:$0x1]  }
   0xc   :  { %v28_v4 = vld [vmem:[#allocation0] sm:$0x1]  }
   0xd   :  { %v7_v5 = vld [vmem:[#allocation0] sm:$0x1]  }
   0xe   :  { %9 = vst.msk [vmem:[%s119_s1] sm:$0x1] %vm8_vm0, %v7_v5   ;;  %17 = vrot.lane.b32.xlu0 %v16_v3, %s68_s11  ;;  %v34_v6 = vld [vmem:[#allocation0] sm:$0x1]  }
   0xf   :  { %29 = vrot.lane.b32.xlu1 %v28_v4, %s69_s12  ;;  %v40_v7 = vld [vmem:[#allocation0] sm:$0x1]  }
  0x10   :  { %v46_v8 = vld [vmem:[#allocation0] sm:$0x1]  }
  0x12   :  { %35 = vrot.lane.b32.xlu0 %v34_v6, %s70_s13 }
  0x13   :  { %41 = vrot.lane.b32.xlu1 %v40_v7, %s71_s14 }
  0x16   :  { %47 = vrot.lane.b32.xlu0 %v46_v8, %s72_s15 }
  0x7c   :  { %v12_v9 = vpop.permute.xlu0 %11  }
  0x7d   :  { %v24_v10 = vpop.permute.xlu1 %23   ;;  %52 = vst.msk [vmem:[%s119_s1 + $0x1] sm:$0x1] %vm8_vm0, %v12_v9  }
  0x7e   :  { %54 = vst.msk [vmem:[%s119_s1 + $0x3] sm:$0x1] %vm8_vm0, %v24_v10  }
  0x80   :  { %v18_v11 = vpop.permute.xlu0 %17  }
  0x81   :  { %v30_v12 = vpop.permute.xlu1 %29   ;;  %53 = vst.msk [vmem:[%s119_s1 + $0x2] sm:$0x1] %vm8_vm0, %v18_v11  }
  0x82   :  { %55 = vst.msk [vmem:[%s119_s1 + $0x4] sm:$0x1] %vm8_vm0, %v30_v12  }
  0x84   :  { %v36_v13 = vpop.permute.xlu0 %35  }
  0x85   :  { %v42_v14 = vpop.permute.xlu1 %41   ;;  %56 = vst.msk [vmem:[%s119_s1 + $0x5] sm:$0x1] %vm8_vm0, %v36_v13  }
  0x86   :  { %57 = vst.msk [vmem:[%s119_s1 + $0x6] sm:$0x1] %vm8_vm0, %v42_v14  }
  0x88   :  { %v48_v15 = vpop.permute.xlu0 %47  }
  0x89   :  { %58 = vst.msk [vmem:[%s119_s1 + $0x7] sm:$0x1] %vm8_vm0, %v48_v15  }

// kernel: tile.63
= control target key start
LH: loop header
LB: loop body
LE: loop exit
PB: predicated region body
PF: predicated region fallthrough
CT: control target
= control target key end

     0   :  { %s22_s0 = inlined_call_operand.vmem [shape: f32[8], index: 0, kind: input, shape index: {}]   ;;  %s23_s1 = inlined_call_operand.vmem [shape: f32[8,8], index: 1, kind: output, shape index: {}]  }
   0x1   :  { %v4_v0 = vld [vmem:[%s22_s0] ss:$0 sm:$0xff] }
   0x2   :  { %5 = vst [vmem:[%s23_s1] sm:$0xff] %v4_v0 }

// kernel: tile.2
= control target key start
LH: loop header
LB: loop body
LE: loop exit
PB: predicated region body
PF: predicated region fallthrough
CT: control target
= control target key end

     0   :  { %vm3_vm0 = vcmask 7168   ;;  %s84_s8 = smov 125   ;;  %s85_s13 = smov 126   ;;  %s167_s0 = inlined_call_operand.vmem [shape: f32[8,8], index: 0, kind: input, shape index: {}]   ;;  %s168_s1 = inlined_call_operand.vmem [shape: f32[64,1], index: 1, kind: output, shape index: {}]  }
   0x1   :  { %v6_v0 = vld [vmem:[%s167_s0] sm:$0xff]   ;;  %s83_s0 = smov 127   ;;  %s86_s14 = smov 124  }
   0x2   :  { %7 = vrot.lane.b32.xlu0 %v6_v0, %s83_s0  ;;  %23 = vrot.lane.b32.xlu1 %v6_v0, %s84_s8  ;;  %4 = vst.msk [vmem:[%s168_s1] ss:$8 sm:$0xf] %vm3_vm0, %v6_v0   ;;  %5 = vst.msk [vmem:[%s168_s1] ss:$8 sm:$0xf0] %vm3_vm0, %v6_v0  }
   0x3   :  { %s87_s15 = smov 123   ;;  %s88_s16 = smov 122  }
   0x4   :  { %s89_s17 = smov 121  }
   0x6   :  { %15 = vrot.lane.b32.xlu0 %v6_v0, %s85_s13  ;;  %31 = vrot.lane.b32.xlu1 %v6_v0, %s86_s14 }
   0xa   :  { %39 = vrot.lane.b32.xlu0 %v6_v0, %s87_s15  ;;  %47 = vrot.lane.b32.xlu1 %v6_v0, %s88_s16 }
   0xe   :  { %55 = vrot.lane.b32.xlu0 %v6_v0, %s89_s17 }
  0x74   :  { %v8_v1 = vpop.permute.xlu0 %7   ;;  %v24_v2 = vpop.permute.xlu1 %23  }
  0x75   :  { %62 = vst.msk [vmem:[%s168_s1 + $0x1] ss:$8 sm:$0xf] %vm3_vm0, %v8_v1   ;;  %63 = vst.msk [vmem:[%s168_s1 + $0x1] ss:$8 sm:$0xf0] %vm3_vm0, %v8_v1  }
  0x76   :  { %66 = vst.msk [vmem:[%s168_s1 + $0x3] ss:$8 sm:$0xf] %vm3_vm0, %v24_v2   ;;  %67 = vst.msk [vmem:[%s168_s1 + $0x3] ss:$8 sm:$0xf0] %vm3_vm0, %v24_v2  }
  0x78   :  { %v16_v3 = vpop.permute.xlu0 %15   ;;  %v32_v4 = vpop.permute.xlu1 %31  }
  0x79   :  { %64 = vst.msk [vmem:[%s168_s1 + $0x2] ss:$8 sm:$0xf] %vm3_vm0, %v16_v3   ;;  %65 = vst.msk [vmem:[%s168_s1 + $0x2] ss:$8 sm:$0xf0] %vm3_vm0, %v16_v3  }
  0x7a   :  { %68 = vst.msk [vmem:[%s168_s1 + $0x4] ss:$8 sm:$0xf] %vm3_vm0, %v32_v4   ;;  %69 = vst.msk [vmem:[%s168_s1 + $0x4] ss:$8 sm:$0xf0] %vm3_vm0, %v32_v4  }
  0x7c   :  { %v40_v5 = vpop.permute.xlu0 %39   ;;  %v48_v6 = vpop.permute.xlu1 %47  }
  0x7d   :  { %70 = vst.msk [vmem:[%s168_s1 + $0x5] ss:$8 sm:$0xf] %vm3_vm0, %v40_v5   ;;  %71 = vst.msk [vmem:[%s168_s1 + $0x5] ss:$8 sm:$0xf0] %vm3_vm0, %v40_v5  }
  0x7e   :  { %72 = vst.msk [vmem:[%s168_s1 + $0x6] ss:$8 sm:$0xf] %vm3_vm0, %v48_v6   ;;  %73 = vst.msk [vmem:[%s168_s1 + $0x6] ss:$8 sm:$0xf0] %vm3_vm0, %v48_v6  }
  0x80   :  { %v56_v7 = vpop.permute.xlu0 %55  }
  0x81   :  { %74 = vst.msk [vmem:[%s168_s1 + $0x7] ss:$8 sm:$0xf] %vm3_vm0, %v56_v7   ;;  %75 = vst.msk [vmem:[%s168_s1 + $0x7] ss:$8 sm:$0xf0] %vm3_vm0, %v56_v7  }

// kernel: generator_forward.11
= control target key start
LH: loop header
LB: loop body
LE: loop exit
PB: predicated region body
PF: predicated region fallthrough
CT: control target
= control target key end

     0   :  { %s670_s9 = smov 0   ;;  %s672_s10 = smov 0   ;;  %s747_s0 = inlined_call_operand.vmem [shape: bf16[64,128], index: 0, kind: input, shape index: {}]   ;;  %s748_s1 = inlined_call_operand.vmem [shape: bf16[2,128,128], index: 1, kind: input, shape index: {}]   ;;  %s749_s2 = inlined_call_operand.vmem [shape: f32[2,2,64,128], index: 2, kind: output, shape index: {}]  }
   0x1   :  { %s674_s11 = smov 0  }
   0x2 LB: > { %s24_s12 = sadd.s32 1, %s649_s10  ;;  %p514_p0 = scmp.ge.s32.totalorder %s653_s11, 1  ;;  %s653_s11 = sphi %s674_s11, %s12_s11   ;;  %s649_s10 = sphi %s672_s10, %s751_s10   ;;  %s645_s9 = sphi %s670_s9, %s750_s9  }
   0x3   : > { %p26_p1 = scmp.ge.s32.totalorder %s24_s12, 2  ;;  %p129_p2 = scmp.lt.s32.totalorder %s653_s11, 3 }
   0x5   : > { %s753_s12 = smov (%p26_p1, %s24_s12), 0  ;;  %p130_p3 = pnand %p514_p0, %p129_p2 }
   0x6   : > { %p154_p4 = scmp.lt.s32.totalorder (!%p130_p3), %s645_s9, 1 }
   0x7   : > { %133 = sbr.rel (%p130_p3) target bundleno = 250 (0xfa), region = 28 }
   0xc   : > { %v627_v0 = vld [vmem:[%s747_s0] sm:$0xff]   ;;  %v628_v1 = vld [vmem:[%s747_s0 + $0x10] sm:$0xff]   ;;  %s755_s9 = smov (!%p154_p4, %s645_s9), 1  ;;  %v629_v10 = vld [vmem:[%s747_s0 + $0x8] sm:$0xff]  }
   0xd   : > { %571 = vmatprep.mubr.bf16.mxu0 %v627_v0  ;;  %575 = vmatprep.mubr.bf16.mxu1 %v628_v1  ;;  %s541_s17 = sshll.u32 %s755_s9, 6  ;;  %v630_v11 = vld [vmem:[%s747_s0 + $0x18] sm:$0xff]   ;;  %s542_s25 = sshll.u32 %s755_s9, 7 }
   0xe   : > { %s700_s20 = scalar_lea.vmem %s748_s1, %s541_s17  ;;  %s720_s28 = scalar_lea.vmem %s749_s2, %s542_s25 }
   0xf   : > { %v619_v2 = vld [vmem:[%s700_s20 + $0x38] sm:$0xff]   ;;  %v620_v3 = vld [vmem:[%s700_s20 + $0x30] sm:$0xff]   ;;  %v621_v4 = vld [vmem:[%s700_s20 + $0x28] sm:$0xff]  }
  0x10   : > { %555 = vmatprep.subr.bf16.mxu0 %v619_v2  ;;  %579 = vmatprep.subr.bf16.mxu1 %v619_v2  ;;  %v622_v5 = vld [vmem:[%s700_s20 + $0x20] sm:$0xff]   ;;  %v623_v6 = vld [vmem:[%s700_s20 + $0x18] sm:$0xff]   ;;  %v624_v7 = vld [vmem:[%s700_s20 + $0x10] sm:$0xff]  }
  0x11   : > { %556 = vmatpush3.bf16.msra.mxu0 %v619_v2  ;;  %587 = vmatpush3.bf16.msra.mxu1 %v619_v2  ;;  %v625_v8 = vld [vmem:[%s700_s20 + $0x8] sm:$0xff]   ;;  %v626_v9 = vld [vmem:[%s700_s20] sm:$0xff]  }
  0x12   : > { %557 = vmatprep.subr.bf16.mxu0 %v620_v3  ;;  %580 = vmatprep.subr.bf16.mxu1 %v620_v3 }
  0x15   : > { %558 = vmatpush3.bf16.msra.mxu0 %v620_v3  ;;  %588 = vmatpush3.bf16.msra.mxu1 %v620_v3 }
  0x16   : > { %559 = vmatprep.subr.bf16.mxu0 %v621_v4  ;;  %581 = vmatprep.subr.bf16.mxu1 %v621_v4 }
  0x19   : > { %560 = vmatpush3.bf16.msra.mxu0 %v621_v4  ;;  %589 = vmatpush3.bf16.msra.mxu1 %v621_v4 }
  0x1a   : > { %561 = vmatprep.subr.bf16.mxu0 %v622_v5  ;;  %582 = vmatprep.subr.bf16.mxu1 %v622_v5 }
  0x1d   : > { %562 = vmatpush3.bf16.msra.mxu0 %v622_v5  ;;  %590 = vmatpush3.bf16.msra.mxu1 %v622_v5 }
  0x1e   : > { %563 = vmatprep.subr.bf16.mxu0 %v623_v6  ;;  %583 = vmatprep.subr.bf16.mxu1 %v623_v6 }
  0x21   : > { %564 = vmatpush3.bf16.msra.mxu0 %v623_v6  ;;  %591 = vmatpush3.bf16.msra.mxu1 %v623_v6 }
  0x22   : > { %565 = vmatprep.subr.bf16.mxu0 %v624_v7  ;;  %584 = vmatprep.subr.bf16.mxu1 %v624_v7 }
  0x25   : > { %566 = vmatpush3.bf16.msra.mxu0 %v624_v7  ;;  %592 = vmatpush3.bf16.msra.mxu1 %v624_v7 }
  0x26   : > { %567 = vmatprep.subr.bf16.mxu0 %v625_v8  ;;  %585 = vmatprep.subr.bf16.mxu1 %v625_v8 }
  0x29   : > { %568 = vmatpush3.bf16.msra.mxu0 %v625_v8  ;;  %593 = vmatpush3.bf16.msra.mxu1 %v625_v8 }
  0x2a   : > { %569 = vmatprep.subr.bf16.mxu0 %v626_v9  ;;  %586 = vmatprep.subr.bf16.mxu1 %v626_v9 }
  0x2d   : > { %570 = vmatpush3.bf16.msra.mxu0 %v626_v9  ;;  %594 = vmatpush3.bf16.msra.mxu1 %v626_v9 }
  0x30   : > { %572 = vmatmul.mubr.bf16.vlgmr.msra.gmra.mxu0 %v629_v10  ;;  %576 = vmatmul.mubr.bf16.vlgmr.msra.gmra.mxu1 %v630_v11 }
  0xf0   : > { %v573_v12 = vpop.f32.mrf.mxu0  ;;  %v577_v13 = vpop.f32.mrf.mxu1 }
  0xf1   : > { %v375_v14 = vmul.f32 %v573_v12, %v573_v12  ;;  %418 = vst [vmem:[%s720_s28 + $0x10] sm:$0xff] %v573_v12  ;;  %v379_v15 = vmul.f32 %v577_v13, %v577_v13  ;;  %422 = vst [vmem:[%s720_s28 + $0x30] sm:$0xff] %v577_v13 }
  0xf2   : > { %v318_v16 = vpop.f32.mrf.mxu0  ;;  %v334_v17 = vpop.f32.mrf.mxu1 }
  0xf3   : > { %533 = vst [vmem:[%s720_s28 + $0x50] sm:$0xff] %v375_v14  ;;  %537 = vst [vmem:[%s720_s28 + $0x70] sm:$0xff] %v379_v15  ;;  %v373_v18 = vmul.f32 %v318_v16, %v318_v16  ;;  %v377_v19 = vmul.f32 %v334_v17, %v334_v17 }
  0xf4   : > { %416 = vst [vmem:[%s720_s28] sm:$0xff] %v318_v16  ;;  %420 = vst [vmem:[%s720_s28 + $0x20] sm:$0xff] %v334_v17  ;;  %v574_v20 = vpop.f32.mrf.mxu0  ;;  %v578_v21 = vpop.f32.mrf.mxu1 }
  0xf5   : > { %531 = vst [vmem:[%s720_s28 + $0x40] sm:$0xff] %v373_v18  ;;  %535 = vst [vmem:[%s720_s28 + $0x60] sm:$0xff] %v377_v19  ;;  %v376_v22 = vmul.f32 %v574_v20, %v574_v20  ;;  %v380_v23 = vmul.f32 %v578_v21, %v578_v21 }
  0xf6   : > { %419 = vst [vmem:[%s720_s28 + $0x18] sm:$0xff] %v574_v20  ;;  %423 = vst [vmem:[%s720_s28 + $0x38] sm:$0xff] %v578_v21  ;;  %v321_v24 = vpop.f32.mrf.mxu0  ;;  %v337_v25 = vpop.f32.mrf.mxu1 }
  0xf7   : > { %534 = vst [vmem:[%s720_s28 + $0x58] sm:$0xff] %v376_v22  ;;  %538 = vst [vmem:[%s720_s28 + $0x78] sm:$0xff] %v380_v23  ;;  %v374_v26 = vmul.f32 %v321_v24, %v321_v24  ;;  %v378_v27 = vmul.f32 %v337_v25, %v337_v25 }
  0xf8   : > { %417 = vst [vmem:[%s720_s28 + $0x8] sm:$0xff] %v321_v24  ;;  %421 = vst [vmem:[%s720_s28 + $0x28] sm:$0xff] %v337_v25 }
  0xf9   : > { %532 = vst [vmem:[%s720_s28 + $0x48] sm:$0xff] %v374_v26  ;;  %536 = vst [vmem:[%s720_s28 + $0x68] sm:$0xff] %v378_v27 }
  0xfa PF: > { %s12_s11 = sadd.s32 1, %s653_s11   ;;  %s750_s9 = smov %s649_s10 }
  0xfb   : > { %p9_p5 = scmp.ge.s32.totalorder %s12_s11, 4   ;;  %s751_s10 = smov %s753_s12 }
  0xfd   :  { %11 = sbr.rel (!%p9_p5) target bundleno = 2 (0x2), region = 67 }

// kernel: generator_forward.12
= control target key start
LH: loop header
LB: loop body
LE: loop exit
PB: predicated region body
PF: predicated region fallthrough
CT: control target
= control target key end

     0   :  { %s839_s15 = smov 0   ;;  %s841_s16 = smov 0   ;;  %s946_s0 = inlined_call_operand.vmem [shape: bf16[64,128], index: 0, kind: input, shape index: {}]   ;;  %s947_s1 = inlined_call_operand.vmem [shape: bf16[2,128,128], index: 1, kind: input, shape index: {}]   ;;  %s948_s2 = inlined_call_operand.vmem [shape: f32[64,1], index: 2, kind: input, shape index: {}]   ;;  %s949_s3 = inlined_call_operand.vmem [shape: f32[64,1], index: 3, kind: input, shape index: {}]   ;;  %s950_s4 = inlined_call_operand.vmem [shape: bf16[2,64,128], index: 4, kind: output, shape index: {}]  }
   0x1   :  { %s843_s17 = smov 0  }
   0x2 LB: > { %s26_s18 = sadd.s32 1, %s807_s16  ;;  %p638_p0 = scmp.ge.s32.totalorder %s811_s17, 1  ;;  %s811_s17 = sphi %s843_s17, %s14_s17   ;;  %s807_s16 = sphi %s841_s16, %s952_s16   ;;  %s803_s15 = sphi %s839_s15, %s951_s15  }
   0x3   : > { %p28_p1 = scmp.ge.s32.totalorder %s26_s18, 2  ;;  %p181_p2 = scmp.lt.s32.totalorder %s811_s17, 3 }
   0x5   : > { %s954_s18 = smov (%p28_p1, %s26_s18), 0  ;;  %p182_p3 = pnand %p638_p0, %p181_p2 }
   0x6   : > { %p213_p4 = scmp.lt.s32.totalorder (!%p182_p3), %s803_s15, 1 }
   0x7   : > { %185 = sbr.rel (%p182_p3) target bundleno = 256 (0x100), region = 36 }
   0xc   : > { %v785_v0 = vld [vmem:[%s946_s0] sm:$0xff]   ;;  %v786_v1 = vld [vmem:[%s946_s0 + $0x10] sm:$0xff]   ;;  %s956_s15 = smov (!%p213_p4, %s803_s15), 1  ;;  %v813_v2 = vmov 0   ;;  %v394_v6 = vld [vmem:[%s948_s2 + $0x18] sm:$0xff] }
   0xd   : > { %726 = vmatprep.mubr.bf16.mxu0 %v785_v0  ;;  %776 = vset.pattern.permute.xlu1 %v813_v2  ;;  %s665_s23 = sshll.u32 %s956_s15, 6  ;;  %v393_v3 = vld [vmem:[%s948_s2 + $0x10] sm:$0xff]  ;;  %v391_v4 = vld [vmem:[%s948_s2] sm:$0xff]  ;;  %v392_v8 = vld [vmem:[%s948_s2 + $0x8] sm:$0xff]  ;;  %s666_s19 = sshll.u32 %s956_s15, 5 }
   0xe   : > { %730 = vmatprep.mubr.bf16.mxu1 %v786_v1  ;;  %775 = vset.pattern.permute.xlu0 %v813_v2  ;;  %s875_s30 = scalar_lea.vmem %s947_s1, %s665_s23  ;;  %v396_v10 = vld [vmem:[%s948_s2 + $0x28] sm:$0xff]  ;;  %v395_v11 = vld [vmem:[%s948_s2 + $0x20] sm:$0xff]  ;;  %v398_v13 = vld [vmem:[%s948_s2 + $0x38] sm:$0xff]  ;;  %s228_s22 = scalar_lea.vmem %s950_s4, %s666_s19 }
   0xf   : > { %411 = vperm.xlu1 %776, %v393_v3   ;;  %401 = vperm.xlu0 %775, %v391_v4   ;;  %v777_v5 = vld [vmem:[%s875_s30 + $0x38] sm:$0xff]   ;;  %v778_v7 = vld [vmem:[%s875_s30 + $0x30] sm:$0xff]   ;;  %v779_v9 = vld [vmem:[%s875_s30 + $0x28] sm:$0xff]  }
  0x10   : > { %710 = vmatprep.subr.bf16.mxu0 %v777_v5  ;;  %734 = vmatprep.subr.bf16.mxu1 %v777_v5  ;;  %v780_v12 = vld [vmem:[%s875_s30 + $0x20] sm:$0xff]   ;;  %v397_v14 = vld [vmem:[%s948_s2 + $0x30] sm:$0xff]  ;;  %v781_v15 = vld [vmem:[%s875_s30 + $0x18] sm:$0xff]  }
  0x11   : > { %711 = vmatpush3.bf16.msra.mxu0 %v777_v5  ;;  %742 = vmatpush3.bf16.msra.mxu1 %v777_v5  ;;  %v448_v16 = vld [vmem:[%s949_s3 + $0x8] sm:$0xff]  ;;  %v447_v17 = vld [vmem:[%s949_s3] sm:$0xff]  ;;  %v782_v18 = vld [vmem:[%s875_s30 + $0x10] sm:$0xff]  }
  0x12   : > { %712 = vmatprep.subr.bf16.mxu0 %v778_v7  ;;  %735 = vmatprep.subr.bf16.mxu1 %v778_v7  ;;  %v450_v19 = vld [vmem:[%s949_s3 + $0x18] sm:$0xff]  ;;  %v449_v20 = vld [vmem:[%s949_s3 + $0x10] sm:$0xff]  ;;  %v783_v21 = vld [vmem:[%s875_s30 + $0x8] sm:$0xff]  }
  0x13   : > { %416 = vperm.xlu1 %776, %v394_v6   ;;  %406 = vperm.xlu0 %775, %v392_v8   ;;  %v452_v22 = vld [vmem:[%s949_s3 + $0x28] sm:$0xff]  ;;  %v451_v23 = vld [vmem:[%s949_s3 + $0x20] sm:$0xff]  ;;  %v454_v25 = vld [vmem:[%s949_s3 + $0x38] sm:$0xff] }
  0x14   : > { %v784_v24 = vld [vmem:[%s875_s30] sm:$0xff]   ;;  %v453_v26 = vld [vmem:[%s949_s3 + $0x30] sm:$0xff]  ;;  %v787_v27 = vld [vmem:[%s946_s0 + $0x8] sm:$0xff]  }
  0x15   : > { %713 = vmatpush3.bf16.msra.mxu0 %v778_v7  ;;  %743 = vmatpush3.bf16.msra.mxu1 %v778_v7  ;;  %v788_v28 = vld [vmem:[%s946_s0 + $0x18] sm:$0xff]  }
  0x16   : > { %714 = vmatprep.subr.bf16.mxu0 %v779_v9  ;;  %736 = vmatprep.subr.bf16.mxu1 %v779_v9 }
  0x17   : > { %426 = vperm.xlu1 %776, %v396_v10   ;;  %421 = vperm.xlu0 %775, %v395_v11  }
  0x19   : > { %715 = vmatpush3.bf16.msra.mxu0 %v779_v9  ;;  %744 = vmatpush3.bf16.msra.mxu1 %v779_v9 }
  0x1a   : > { %716 = vmatprep.subr.bf16.mxu0 %v780_v12  ;;  %737 = vmatprep.subr.bf16.mxu1 %v780_v12 }
  0x1b   : > { %436 = vperm.xlu1 %776, %v398_v13   ;;  %431 = vperm.xlu0 %775, %v397_v14  }
  0x1d   : > { %717 = vmatpush3.bf16.msra.mxu0 %v780_v12  ;;  %745 = vmatpush3.bf16.msra.mxu1 %v780_v12 }
  0x1e   : > { %718 = vmatprep.subr.bf16.mxu0 %v781_v15  ;;  %738 = vmatprep.subr.bf16.mxu1 %v781_v15 }
  0x1f   : > { %462 = vperm.xlu1 %776, %v448_v16   ;;  %457 = vperm.xlu0 %775, %v447_v17  }
  0x21   : > { %719 = vmatpush3.bf16.msra.mxu0 %v781_v15  ;;  %746 = vmatpush3.bf16.msra.mxu1 %v781_v15 }
  0x22   : > { %720 = vmatprep.subr.bf16.mxu0 %v782_v18  ;;  %739 = vmatprep.subr.bf16.mxu1 %v782_v18 }
  0x23   : > { %472 = vperm.xlu1 %776, %v450_v19   ;;  %467 = vperm.xlu0 %775, %v449_v20  }
  0x25   : > { %721 = vmatpush3.bf16.msra.mxu0 %v782_v18  ;;  %747 = vmatpush3.bf16.msra.mxu1 %v782_v18 }
  0x26   : > { %722 = vmatprep.subr.bf16.mxu0 %v783_v21  ;;  %740 = vmatprep.subr.bf16.mxu1 %v783_v21 }
  0x27   : > { %482 = vperm.xlu1 %776, %v452_v22   ;;  %477 = vperm.xlu0 %775, %v451_v23  }
  0x29   : > { %723 = vmatpush3.bf16.msra.mxu0 %v783_v21  ;;  %748 = vmatpush3.bf16.msra.mxu1 %v783_v21 }
  0x2a   : > { %724 = vmatprep.subr.bf16.mxu0 %v784_v24  ;;  %741 = vmatprep.subr.bf16.mxu1 %v784_v24 }
  0x2b   : > { %492 = vperm.xlu1 %776, %v454_v25   ;;  %487 = vperm.xlu0 %775, %v453_v26  }
  0x2d   : > { %725 = vmatpush3.bf16.msra.mxu0 %v784_v24  ;;  %749 = vmatpush3.bf16.msra.mxu1 %v784_v24 }
  0x30   : > { %727 = vmatmul.mubr.bf16.vlgmr.msra.gmra.mxu0 %v787_v27  ;;  %731 = vmatmul.mubr.bf16.vlgmr.msra.gmra.mxu1 %v788_v28 }
  0x8a   : > { %v402_v29 = vpop.permute.xlu0 %401  ;;  %v412_v30 = vpop.permute.xlu1 %411 }
  0x8e   : > { %v407_v31 = vpop.permute.xlu0 %406  ;;  %v417_v32 = vpop.permute.xlu1 %416 }
  0x92   : > { %v422_v33 = vpop.permute.xlu0 %421  ;;  %v427_v34 = vpop.permute.xlu1 %426 }
  0x96   : > { %v432_v35 = vpop.permute.xlu0 %431  ;;  %v437_v36 = vpop.permute.xlu1 %436 }
  0x9a   : > { %v458_v37 = vpop.permute.xlu0 %457  ;;  %v463_v38 = vpop.permute.xlu1 %462 }
  0x9e   : > { %v468_v39 = vpop.permute.xlu0 %467  ;;  %v473_v40 = vpop.permute.xlu1 %472 }
  0xa2   : > { %v478_v41 = vpop.permute.xlu0 %477  ;;  %v483_v44 = vpop.permute.xlu1 %482 }
  0xa6   : > { %v488_v53 = vpop.permute.xlu0 %487  ;;  %v493_v60 = vpop.permute.xlu1 %492 }
  0xf0   : > { %v728_v42 = vpop.f32.mrf.mxu0  ;;  %v732_v43 = vpop.f32.mrf.mxu1 }
  0xf1   : > { %v441_v45 = vmul.f32 %v728_v42, %v412_v30  ;;  %v445_v46 = vmul.f32 %v732_v43, %v432_v35 }
  0xf2   : > { %v360_v47 = vpop.f32.mrf.mxu0  ;;  %v376_v48 = vpop.f32.mrf.mxu1 }
  0xf3   : > { %v439_v49 = vmul.f32 %v402_v29, %v360_v47  ;;  %v443_v50 = vmul.f32 %v422_v33, %v376_v48  ;;  %v497_v54 = vadd.f32 %v468_v39, %v441_v45  ;;  %v501_v55 = vadd.f32 %v488_v53, %v445_v46 }
  0xf4   : > { %v729_v51 = vpop.f32.mrf.mxu0  ;;  %v733_v52 = vpop.f32.mrf.mxu1 }
  0xf5   : > { %v442_v56 = vmul.f32 %v729_v51, %v417_v32  ;;  %v446_v57 = vmul.f32 %v733_v52, %v437_v36  ;;  %v495_v61 = vadd.f32 %v458_v37, %v439_v49  ;;  %v499_v62 = vadd.f32 %v478_v41, %v443_v50 }
  0xf6   : > { %v363_v58 = vpop.f32.mrf.mxu0  ;;  %v379_v59 = vpop.f32.mrf.mxu1  ;;  %v505_v5 = vmax.f32 %v497_v54, 0.0  ;;  %v509_v6 = vmax.f32 %v501_v55, 0.0 }
  0xf7   : > { %v440_v63 = vmul.f32 %v407_v31, %v363_v58  ;;  %v444_v0 = vmul.f32 %v427_v34, %v379_v59  ;;  %v498_v1 = vadd.f32 %v473_v40, %v442_v56  ;;  %v502_v2 = vadd.f32 %v493_v60, %v446_v57 }
  0xf8   : > { %v503_v9 = vmax.f32 %v495_v61, 0.0  ;;  %v507_v10 = vmax.f32 %v499_v62, 0.0 }
  0xf9   : > { %v496_v3 = vadd.f32 %v463_v38, %v440_v63  ;;  %v500_v4 = vadd.f32 %v483_v44, %v444_v0  ;;  %v506_v7 = vmax.f32 %v498_v1, 0.0  ;;  %v510_v8 = vmax.f32 %v502_v2, 0.0 }
  0xfb   : > { %v504_v11 = vmax.f32 %v496_v3, 0.0  ;;  %v508_v12 = vmax.f32 %v500_v4, 0.0  ;;  %v683_v13 = vpack.c.bf16 %v506_v7, %v505_v5  ;;  %v693_v14 = vpack.c.bf16 %v510_v8, %v509_v6 }
  0xfd   : > { %v678_v15 = vpack.c.bf16 %v504_v11, %v503_v9  ;;  %v688_v16 = vpack.c.bf16 %v508_v12, %v507_v10  ;;  %695 = vst [vmem:[%s228_s22 + $0x8] sm:$0xff] %v683_v13   ;;  %697 = vst [vmem:[%s228_s22 + $0x18] sm:$0xff] %v693_v14  }
  0xff   : > { %679 = vst [vmem:[%s228_s22] sm:$0xff] %v678_v15   ;;  %696 = vst [vmem:[%s228_s22 + $0x10] sm:$0xff] %v688_v16  }
 0x100 PF: > { %s14_s17 = sadd.s32 1, %s811_s17   ;;  %s951_s15 = smov %s807_s16 }
 0x101   : > { %p11_p5 = scmp.ge.s32.totalorder %s14_s17, 4   ;;  %s952_s16 = smov %s954_s18 }
 0x103   :  { %13 = sbr.rel (!%p11_p5) target bundleno = 2 (0x2), region = 66 }

// kernel: squeeze.12
= control target key start
LH: loop header
LB: loop body
LE: loop exit
PB: predicated region body
PF: predicated region fallthrough
CT: control target
= control target key end

     0   :  { %s67_s8 = smov 116   ;;  %vm8_vm0 = vcmask 31744   ;;  %s68_s11 = smov 120   ;;  %s118_s0 = inlined_call_operand.vmem [shape: f32[32], index: 0, kind: input, shape index: {}]   ;;  %s119_s1 = inlined_call_operand.vmem [shape: f32[8,4], index: 1, kind: output, shape index: {}]  }
   0x1   :  { %v5_v0 = vld [vmem:[%s118_s0] sm:$0x1]  ;;  %s66_s0 = smov 124   ;;  %s69_s12 = smov 112  }
   0x2   :  { %6 = vst [vmem:[#allocation0] sm:$0x1] %v5_v0  ;;  %s70_s13 = smov 108   ;;  %s71_s14 = smov 104  }
   0x3   :  { %s72_s15 = smov 100  }
   0x9   :  { %v10_v1 = vld [vmem:[#allocation0] sm:$0x1]  }
   0xa   :  { %v22_v2 = vld [vmem:[#allocation0] sm:$0x1]   ;;  %11 = vrot.lane.b32.xlu0 %v10_v1, %s66_s0 }
   0xb   :  { %23 = vrot.lane.b32.xlu1 %v22_v2, %s67_s8  ;;  %v16_v3 = vld [vmem:[#allocation0] sm:$0x1]  }
   0xc   :  { %v28_v4 = vld [vmem:[#allocation0] sm:$0x1]  }
   0xd   :  { %v7_v5 = vld [vmem:[#allocation0] sm:$0x1]  }
   0xe   :  { %9 = vst.msk [vmem:[%s119_s1] sm:$0x1] %vm8_vm0, %v7_v5   ;;  %17 = vrot.lane.b32.xlu0 %v16_v3, %s68_s11  ;;  %v34_v6 = vld [vmem:[#allocation0] sm:$0x1]  }
   0xf   :  { %29 = vrot.lane.b32.xlu1 %v28_v4, %s69_s12  ;;  %v40_v7 = vld [vmem:[#allocation0] sm:$0x1]  }
  0x10   :  { %v46_v8 = vld [vmem:[#allocation0] sm:$0x1]  }
  0x12   :  { %35 = vrot.lane.b32.xlu0 %v34_v6, %s70_s13 }
  0x13   :  { %41 = vrot.lane.b32.xlu1 %v40_v7, %s71_s14 }
  0x16   :  { %47 = vrot.lane.b32.xlu0 %v46_v8, %s72_s15 }
  0x7c   :  { %v12_v9 = vpop.permute.xlu0 %11  }
  0x7d   :  { %v24_v10 = vpop.permute.xlu1 %23   ;;  %52 = vst.msk [vmem:[%s119_s1 + $0x1] sm:$0x1] %vm8_vm0, %v12_v9  }
  0x7e   :  { %54 = vst.msk [vmem:[%s119_s1 + $0x3] sm:$0x1] %vm8_vm0, %v24_v10  }
  0x80   :  { %v18_v11 = vpop.permute.xlu0 %17  }
  0x81   :  { %v30_v12 = vpop.permute.xlu1 %29   ;;  %53 = vst.msk [vmem:[%s119_s1 + $0x2] sm:$0x1] %vm8_vm0, %v18_v11  }
  0x82   :  { %55 = vst.msk [vmem:[%s119_s1 + $0x4] sm:$0x1] %vm8_vm0, %v30_v12  }
  0x84   :  { %v36_v13 = vpop.permute.xlu0 %35  }
  0x85   :  { %v42_v14 = vpop.permute.xlu1 %41   ;;  %56 = vst.msk [vmem:[%s119_s1 + $0x5] sm:$0x1] %vm8_vm0, %v36_v13  }
  0x86   :  { %57 = vst.msk [vmem:[%s119_s1 + $0x6] sm:$0x1] %vm8_vm0, %v42_v14  }
  0x88   :  { %v48_v15 = vpop.permute.xlu0 %47  }
  0x89   :  { %58 = vst.msk [vmem:[%s119_s1 + $0x7] sm:$0x1] %vm8_vm0, %v48_v15  }

// kernel: generator_forward.13
= control target key start
LH: loop header
LB: loop body
LE: loop exit
PB: predicated region body
PF: predicated region fallthrough
CT: control target
= control target key end

     0   :  { %s845_s9 = smov 0   ;;  %s847_s10 = smov 0   ;;  %s936_s0 = inlined_call_operand.vmem [shape: bf16[32,64], index: 0, kind: input, shape index: {}]   ;;  %s937_s1 = inlined_call_operand.vmem [shape: bf16[2,64,768], index: 1, kind: input, shape index: {}]   ;;  %s938_s2 = inlined_call_operand.vmem [shape: f32[2,2,32,128], index: 2, kind: output, shape index: {}]  }
   0x1   :  { %s849_s11 = smov 0  }
   0x2 LB: > { %s24_s12 = sadd.s32 1, %s823_s10  ;;  %p690_p0 = scmp.ge.s32.totalorder %s827_s11, 1  ;;  %s827_s11 = sphi %s849_s11, %s12_s11   ;;  %s823_s10 = sphi %s847_s10, %s940_s10   ;;  %s819_s9 = sphi %s845_s9, %s939_s9  }
   0x3   : > { %p26_p1 = scmp.ge.s32.totalorder %s24_s12, 2  ;;  %p131_p2 = scmp.lt.s32.totalorder %s827_s11, 3 }
   0x5   : > { %s942_s12 = smov (%p26_p1, %s24_s12), 0  ;;  %p132_p3 = pnand %p690_p0, %p131_p2 }
   0x6   : > { %p158_p4 = scmp.lt.s32.totalorder (!%p132_p3), %s819_s9, 1 }
   0x7   : > { %135 = sbr.rel (%p132_p3) target bundleno = 254 (0xfe), region = 28 }
   0xc   : > { %v829_v0 = vmov 0   ;;  %s944_s9 = smov (!%p158_p4, %s819_s9), 1  ;;  %v791_v18 = vld [vmem:[%s936_s0] sm:$0xff]   ;;  %vm343_vm0 = vcmask 523264   ;;  %v798_v23 = vld [vmem:[%s936_s0 + $0x8] sm:$0xff]  }
   0xd   : > { %382 = vmatprep.mubr.bf16.mxu0 %v829_v0  ;;  %435 = vmatprep.mubr.bf16.mxu1 %v829_v0  ;;  %s741_s13 = smul.u32 192, %s944_s9  ;;  %s732_s21 = sshll.u32 %s944_s9, 6 }
   0xe   : > { %s917_s24 = scalar_lea.vmem %s938_s2, %s732_s21 }
   0xf   : > { %s871_s16 = scalar_lea.vmem %s937_s1, %s741_s13 }
  0x10   : > { %v767_v1 = vld [vmem:[%s871_s16 + $0x94] ss:$24 sps:$4 sm:$0xff]   ;;  %v771_v3 = vld [vmem:[%s871_s16 + $0x90] ss:$24 sps:$4 sm:$0xff]   ;;  %v773_v5 = vld [vmem:[%s871_s16 + $0x64] ss:$24 sps:$4 sm:$0xff]  }
  0x11   : > { %v769_v2 = vld [vmem:[%s871_s16 + $0x9c] ss:$24 sps:$4 sm:$0xff]   ;;  %358 = vmatprep.subr.bf16.mxu0 %v767_v1  ;;  %v772_v4 = vld [vmem:[%s871_s16 + $0x98] ss:$24 sps:$4 sm:$0xff]   ;;  %v775_v6 = vld [vmem:[%s871_s16 + $0x6c] ss:$24 sps:$4 sm:$0xff]  }
  0x12   : > { %411 = vmatprep.subr.bf16.mxu1 %v769_v2  ;;  %359 = vmatpush1.bf16.msra.mxu0 %v771_v3  ;;  %v777_v7 = vld [vmem:[%s871_s16 + $0x60] ss:$24 sps:$4 sm:$0xff]   ;;  %v779_v9 = vld [vmem:[%s871_s16 + $0x34] ss:$24 sps:$4 sm:$0xff]   ;;  %v783_v11 = vld [vmem:[%s871_s16 + $0x30] ss:$24 sps:$4 sm:$0xff]  }
  0x13   : > { %412 = vmatpush1.bf16.msra.mxu1 %v772_v4  ;;  %360 = vmatprep.subr.bf16.mxu0 %v773_v5  ;;  %v778_v8 = vld [vmem:[%s871_s16 + $0x68] ss:$24 sps:$4 sm:$0xff]   ;;  %v781_v10 = vld [vmem:[%s871_s16 + $0x3c] ss:$24 sps:$4 sm:$0xff]   ;;  %v784_v12 = vld [vmem:[%s871_s16 + $0x38] ss:$24 sps:$4 sm:$0xff]  }
  0x14   : > { %413 = vmatprep.subr.bf16.mxu1 %v775_v6  ;;  %v785_v13 = vld [vmem:[%s871_s16 + $0x4] ss:$24 sps:$4 sm:$0xff]   ;;  %v789_v15 = vld [vmem:[%s871_s16] ss:$24 sps:$4 sm:$0xff]   ;;  %v797_v20 = vld [vmem:[%s871_s16 + $0x74] ss:$24 sps:$4 sm:$0xff]  }
  0x15   : > { %v787_v14 = vld [vmem:[%s871_s16 + $0xc] ss:$24 sps:$4 sm:$0xff]   ;;  %v790_v16 = vld [vmem:[%s871_s16 + $0x8] ss:$24 sps:$4 sm:$0xff]  }
  0x16   : > { %361 = vmatpush1.bf16.msra.mxu0 %v777_v7  ;;  %v794_v17 = vld [vmem:[%s871_s16 + $0xa4] ss:$24 sps:$4 sm:$0xff]   ;;  %v792_v19 = vld [vmem:[%s871_s16 + $0xa0] ss:$24 sps:$4 sm:$0xff]   ;;  %v795_v21 = vld [vmem:[%s871_s16 + $0x70] ss:$24 sps:$4 sm:$0xff]  }
  0x17   : > { %414 = vmatpush1.bf16.msra.mxu1 %v778_v8  ;;  %362 = vmatprep.subr.bf16.mxu0 %v779_v9  ;;  %v801_v22 = vld [vmem:[%s871_s16 + $0x44] ss:$24 sps:$4 sm:$0xff]   ;;  %v799_v24 = vld [vmem:[%s871_s16 + $0x40] ss:$24 sps:$4 sm:$0xff]   ;;  %v804_v25 = vld [vmem:[%s871_s16 + $0x14] ss:$24 sps:$4 sm:$0xff]  }
  0x18   : > { %415 = vmatprep.subr.bf16.mxu1 %v781_v10  ;;  %v802_v26 = vld [vmem:[%s871_s16 + $0x10] ss:$24 sps:$4 sm:$0xff]  }
  0x1a   : > { %363 = vmatpush1.bf16.msra.mxu0 %v783_v11 }
  0x1b   : > { %416 = vmatpush1.bf16.msra.mxu1 %v784_v12  ;;  %364 = vmatprep.subr.bf16.mxu0 %v785_v13 }
  0x1c   : > { %417 = vmatprep.subr.bf16.mxu1 %v787_v14 }
  0x1e   : > { %365 = vmatpush1.bf16.msra.mxu0 %v789_v15 }
  0x1f   : > { %418 = vmatpush1.bf16.msra.mxu1 %v790_v16  ;;  %464 = vmatprep.subr.bf16.mxu0 %v794_v17 }
  0x20   : > { %733 = vmatprep.subr.bf16.mxu1 %v794_v17 }
  0x21   : > { %720 = vmatmul.mubr.msk.bf16.vlgmr.msra.gmra.mxu0 %vm343_vm0, %v791_v18 }
  0x22   : > { %722 = vmatmul.mubr.msk.bf16.vlgmr.msra.gmra.mxu1 %vm343_vm0, %v791_v18  ;;  %465 = vmatpush1.bf16.msra.mxu0 %v792_v19 }
  0x23   : > { %737 = vmatpush1.bf16.msra.mxu1 %v792_v19  ;;  %466 = vmatprep.subr.bf16.mxu0 %v797_v20 }
  0x24   : > { %734 = vmatprep.subr.bf16.mxu1 %v797_v20  ;;  %392 = vmatprep.mubr.bf16.mxu0 %v829_v0 }
  0x25   : > { %445 = vmatprep.mubr.bf16.mxu1 %v829_v0 }
  0x26   : > { %467 = vmatpush1.bf16.msra.mxu0 %v795_v21 }
  0x27   : > { %738 = vmatpush1.bf16.msra.mxu1 %v795_v21  ;;  %468 = vmatprep.subr.bf16.mxu0 %v801_v22 }
  0x28   : > { %735 = vmatprep.subr.bf16.mxu1 %v801_v22 }
  0x29   : > { %721 = vmatmul.mubr.msk.bf16.gmra.mxu0 %vm343_vm0, %v798_v23 }
  0x2a   : > { %723 = vmatmul.mubr.msk.bf16.gmra.mxu1 %vm343_vm0, %v798_v23  ;;  %469 = vmatpush1.bf16.msra.mxu0 %v799_v24 }
  0x2b   : > { %739 = vmatpush1.bf16.msra.mxu1 %v799_v24  ;;  %470 = vmatprep.subr.bf16.mxu0 %v804_v25 }
  0x2c   : > { %736 = vmatprep.subr.bf16.mxu1 %v804_v25  ;;  %488 = vmatprep.mubr.bf16.mxu0 %v829_v0 }
  0x2d   : > { %498 = vmatprep.mubr.bf16.mxu1 %v829_v0 }
  0x2e   : > { %471 = vmatpush1.bf16.msra.mxu0 %v802_v26 }
  0x2f   : > { %740 = vmatpush1.bf16.msra.mxu1 %v802_v26 }
  0x31   : > { %724 = vmatmul.mubr.msk.bf16.vlgmr.msra.gmra.mxu0 %vm343_vm0, %v791_v18 }
  0x32   : > { %725 = vmatmul.mubr.msk.bf16.vlgmr.msra.gmra.mxu1 %vm343_vm0, %v798_v23 }
  0xe1   : > { %v384_v27 = vpop.f32.mrf.mxu0 }
  0xe2   : > { %v437_v28 = vpop.f32.mrf.mxu1  ;;  %v521_v34 = vmul.f32 %v384_v27, %v384_v27 }
  0xe3   : > { %v386_v29 = vpop.f32.mrf.mxu0  ;;  %v545_v45 = vmul.f32 %v437_v28, %v437_v28 }
  0xe4   : > { %v439_v30 = vpop.f32.mrf.mxu1  ;;  %v533_v31 = vmul.f32 %v386_v29, %v386_v29  ;;  %v529_v35 = vadd.f32 %v386_v29, %v384_v27 }
  0xe5   : > { %v388_v32 = vpop.f32.mrf.mxu0  ;;  %v557_v58 = vmul.f32 %v439_v30, %v439_v30 }
  0xe6   : > { %v441_v33 = vpop.f32.mrf.mxu1  ;;  %v522_v38 = vmul.f32 %v388_v32, %v388_v32  ;;  %v537_v40 = vadd.f32 %v533_v31, %v521_v34  ;;  %v541_v46 = vadd.f32 %v529_v35, %v437_v28 }
  0xe7   : > { %v390_v36 = vpop.f32.mrf.mxu0  ;;  %v546_v47 = vmul.f32 %v441_v33, %v441_v33 }
  0xe8   : > { %v443_v37 = vpop.f32.mrf.mxu1  ;;  %v534_v39 = vmul.f32 %v390_v36, %v390_v36  ;;  %v530_v41 = vadd.f32 %v390_v36, %v388_v32  ;;  %v549_v53 = vadd.f32 %v545_v45, %v537_v40  ;;  %v553_v62 = vadd.f32 %v541_v46, %v439_v30 }
  0xe9   : > { %v394_v42 = vpop.f32.mrf.mxu0  ;;  %v558_v63 = vmul.f32 %v443_v37, %v443_v37 }
  0xea   : > { %v447_v43 = vpop.f32.mrf.mxu1  ;;  %v538_v44 = vadd.f32 %v534_v39, %v522_v38  ;;  %v523_v50 = vmul.f32 %v394_v42, %v394_v42  ;;  %v542_v54 = vadd.f32 %v530_v41, %v441_v33  ;;  %v561_v8 = vadd.f32 %v557_v58, %v549_v53 }
  0xeb   : > { %v396_v48 = vpop.f32.mrf.mxu0  ;;  %v547_v59 = vmul.f32 %v447_v43, %v447_v43 }
  0xec   : > { %v449_v49 = vpop.f32.mrf.mxu1  ;;  %v531_v51 = vadd.f32 %v396_v48, %v394_v42  ;;  %v535_v52 = vmul.f32 %v396_v48, %v396_v48  ;;  %v550_v55 = vadd.f32 %v546_v47, %v538_v44  ;;  %v554_v9 = vadd.f32 %v542_v54, %v443_v37 }
  0xed   : > { %v398_v56 = vpop.f32.mrf.mxu0  ;;  %v559_v0 = vmul.f32 %v449_v49, %v449_v49 }
  0xee   : > { %v451_v57 = vpop.f32.mrf.mxu1  ;;  %v539_v60 = vadd.f32 %v535_v52, %v523_v50  ;;  %v543_v61 = vadd.f32 %v531_v51, %v447_v43  ;;  %v524_v1 = vmul.f32 %v398_v56, %v398_v56  ;;  %v562_v10 = vadd.f32 %v558_v63, %v550_v55 }
  0xef   : > { %v400_v2 = vpop.f32.mrf.mxu0  ;;  %v548_v11 = vmul.f32 %v451_v57, %v451_v57 }
  0xf0   : > { %v453_v3 = vpop.f32.mrf.mxu1  ;;  %v551_v4 = vadd.f32 %v547_v59, %v539_v60  ;;  %v555_v5 = vadd.f32 %v543_v61, %v449_v49  ;;  %v532_v6 = vadd.f32 %v400_v2, %v398_v56  ;;  %v536_v7 = vmul.f32 %v400_v2, %v400_v2 }
  0xf1   : > { %v490_v12 = vpop.f32.mrf.mxu0  ;;  %v560_v18 = vmul.f32 %v453_v3, %v453_v3 }
  0xf2   : > { %v500_v13 = vpop.f32.mrf.mxu1  ;;  %v563_v14 = vadd.f32 %v559_v0, %v551_v4  ;;  %v540_v15 = vadd.f32 %v536_v7, %v524_v1  ;;  %v544_v16 = vadd.f32 %v532_v6, %v451_v57  ;;  %v565_v17 = vadd.f32 %v553_v62, %v490_v12 }
  0xf3   : > { %v569_v19 = vmul.f32 %v490_v12, %v490_v12  ;;  %v567_v20 = vadd.f32 %v555_v5, %v500_v13  ;;  %v571_v21 = vmul.f32 %v500_v13, %v500_v13  ;;  %v492_v22 = vpop.f32.mrf.mxu0 }
  0xf4   : > { %v502_v23 = vpop.f32.mrf.mxu1  ;;  %v552_v24 = vadd.f32 %v548_v11, %v540_v15  ;;  %v556_v25 = vadd.f32 %v544_v16, %v453_v3  ;;  %v577_v26 = vadd.f32 %v565_v17, %v492_v22  ;;  %v581_v27 = vmul.f32 %v492_v22, %v492_v22 }
  0xf5   : > { %v573_v28 = vadd.f32 %v569_v19, %v561_v8  ;;  %v575_v29 = vadd.f32 %v571_v21, %v563_v14  ;;  %v579_v30 = vadd.f32 %v567_v20, %v502_v23  ;;  %v583_v31 = vmul.f32 %v502_v23, %v502_v23  ;;  %v494_v32 = vpop.f32.mrf.mxu0 }
  0xf6   : > { %v504_v33 = vpop.f32.mrf.mxu1  ;;  %v564_v34 = vadd.f32 %v560_v18, %v552_v24  ;;  %604 = vst [vmem:[%s917_s24] sm:$0xff] %v577_v26  ;;  %v566_v35 = vadd.f32 %v554_v9, %v494_v32  ;;  %v570_v36 = vmul.f32 %v494_v32, %v494_v32 }
  0xf7   : > { %v568_v37 = vadd.f32 %v556_v25, %v504_v33  ;;  %v585_v38 = vadd.f32 %v581_v27, %v573_v28  ;;  %v587_v39 = vadd.f32 %v583_v31, %v575_v29  ;;  %606 = vst [vmem:[%s917_s24 + $0x10] sm:$0xff] %v579_v30  ;;  %v572_v40 = vmul.f32 %v504_v33, %v504_v33  ;;  %v496_v41 = vpop.f32.mrf.mxu0 }
  0xf8   : > { %v506_v42 = vpop.f32.mrf.mxu1  ;;  %v574_v43 = vadd.f32 %v570_v36, %v562_v10  ;;  %v578_v44 = vadd.f32 %v566_v35, %v496_v41  ;;  %v582_v45 = vmul.f32 %v496_v41, %v496_v41 }
  0xf9   : > { %v580_v46 = vadd.f32 %v568_v37, %v506_v42  ;;  %726 = vst [vmem:[%s917_s24 + $0x20] sm:$0xff] %v585_v38  ;;  %728 = vst [vmem:[%s917_s24 + $0x30] sm:$0xff] %v587_v39  ;;  %v576_v47 = vadd.f32 %v572_v40, %v564_v34  ;;  %v584_v48 = vmul.f32 %v506_v42, %v506_v42 }
  0xfa   : > { %v586_v49 = vadd.f32 %v582_v45, %v574_v43  ;;  %605 = vst [vmem:[%s917_s24 + $0x8] sm:$0xff] %v578_v44 }
  0xfb   : > { %607 = vst [vmem:[%s917_s24 + $0x18] sm:$0xff] %v580_v46  ;;  %v588_v50 = vadd.f32 %v584_v48, %v576_v47 }
  0xfc   : > { %727 = vst [vmem:[%s917_s24 + $0x28] sm:$0xff] %v586_v49 }
  0xfd   : > { %729 = vst [vmem:[%s917_s24 + $0x38] sm:$0xff] %v588_v50 }
  0xfe PF: > { %s12_s11 = sadd.s32 1, %s827_s11   ;;  %s939_s9 = smov %s823_s10 }
  0xff   : > { %p9_p5 = scmp.ge.s32.totalorder %s12_s11, 4   ;;  %s940_s10 = smov %s942_s12 }
 0x101   :  { %11 = sbr.rel (!%p9_p5) target bundleno = 2 (0x2), region = 67 }

// kernel: tile.73
= control target key start
LH: loop header
LB: loop body
LE: loop exit
PB: predicated region body
PF: predicated region fallthrough
CT: control target
= control target key end

     0   :  { %s22_s0 = inlined_call_operand.vmem [shape: f32[4], index: 0, kind: input, shape index: {}]   ;;  %s23_s1 = inlined_call_operand.vmem [shape: f32[8,4], index: 1, kind: output, shape index: {}]  }
   0x1   :  { %v4_v0 = vld [vmem:[%s22_s0] ss:$0 sm:$0xff] }
   0x2   :  { %5 = vst [vmem:[%s23_s1] sm:$0xff] %v4_v0 }

// kernel: tile.4
= control target key start
LH: loop header
LB: loop body
LE: loop exit
PB: predicated region body
PF: predicated region fallthrough
CT: control target
= control target key end

     0   :  { %vm3_vm0 = vcmask 7168   ;;  %s30_s8 = smov 125   ;;  %s31_s11 = smov 126   ;;  %s57_s0 = inlined_call_operand.vmem [shape: f32[8,4], index: 0, kind: input, shape index: {}]   ;;  %s58_s1 = inlined_call_operand.vmem [shape: f32[32,1], index: 1, kind: output, shape index: {}]  }
   0x1   :  { %v5_v0 = vld [vmem:[%s57_s0] sm:$0xff]   ;;  %s29_s0 = smov 127  }
   0x2   :  { %6 = vrot.lane.b32.xlu0 %v5_v0, %s29_s0  ;;  %18 = vrot.lane.b32.xlu1 %v5_v0, %s30_s8  ;;  %4 = vst.msk [vmem:[%s58_s1] ss:$4 sm:$0xff] %vm3_vm0, %v5_v0  }
   0x6   :  { %12 = vrot.lane.b32.xlu0 %v5_v0, %s31_s11 }
  0x74   :  { %v7_v1 = vpop.permute.xlu0 %6   ;;  %v19_v2 = vpop.permute.xlu1 %18  }
  0x75   :  { %23 = vst.msk [vmem:[%s58_s1 + $0x1] ss:$4 sm:$0xff] %vm3_vm0, %v7_v1   ;;  %25 = vst.msk [vmem:[%s58_s1 + $0x3] ss:$4 sm:$0xff] %vm3_vm0, %v19_v2  }
  0x78   :  { %v13_v3 = vpop.permute.xlu0 %12  }
  0x79   :  { %24 = vst.msk [vmem:[%s58_s1 + $0x2] ss:$4 sm:$0xff] %vm3_vm0, %v13_v3  }

// kernel: generator_forward.14
= control target key start
LH: loop header
LB: loop body
LE: loop exit
PB: predicated region body
PF: predicated region fallthrough
CT: control target
= control target key end

     0   :  { %s1043_s15 = smov 0   ;;  %s1045_s16 = smov 0   ;;  %s1212_s0 = inlined_call_operand.vmem [shape: bf16[32,64], index: 0, kind: input, shape index: {}]   ;;  %s1213_s1 = inlined_call_operand.vmem [shape: bf16[2,64,768], index: 1, kind: input, shape index: {}]   ;;  %s1214_s2 = inlined_call_operand.vmem [shape: f32[32,1], index: 2, kind: input, shape index: {}]   ;;  %s1215_s3 = inlined_call_operand.vmem [shape: f32[32,1], index: 3, kind: input, shape index: {}]   ;;  %s1216_s4 = inlined_call_operand.vmem [shape: bf16[2,32,768], index: 4, kind: output, shape index: {}]  }
   0x1   :  { %s1047_s17 = smov 0  }
   0x2 LB: > { %s26_s18 = sadd.s32 1, %s1011_s16  ;;  %p857_p0 = scmp.ge.s32.totalorder %s1015_s17, 1  ;;  %s1015_s17 = sphi %s1047_s17, %s14_s17   ;;  %s1011_s16 = sphi %s1045_s16, %s1218_s16   ;;  %s1007_s15 = sphi %s1043_s15, %s1217_s15  }
   0x3   : > { %p28_p1 = scmp.ge.s32.totalorder %s26_s18, 2  ;;  %p183_p2 = scmp.lt.s32.totalorder %s1015_s17, 3 }
   0x5   : > { %s1220_s18 = smov (%p28_p1, %s26_s18), 0  ;;  %p184_p3 = pnand %p857_p0, %p183_p2 }
   0x6   : > { %p218_p4 = scmp.lt.s32.totalorder (!%p184_p3), %s1007_s15, 1 }
   0x7   : > { %187 = sbr.rel (%p184_p3) target bundleno = 259 (0x103), region = 36 }
   0xc   : > { %v1017_v0 = vmov 0   ;;  %s1222_s15 = smov (!%p218_p4, %s1007_s15), 1  ;;  %v562_v1 = vld [vmem:[%s1214_s2] sm:$0xff]  ;;  %v564_v2 = vld [vmem:[%s1214_s2 + $0x10] sm:$0xff]  ;;  %v563_v3 = vld [vmem:[%s1214_s2 + $0x8] sm:$0xff]  ;;  %vm396_vm0 = vcmask 523264  }
   0xd   : > { %435 = vmatprep.mubr.bf16.mxu0 %v1017_v0  ;;  %488 = vmatprep.mubr.bf16.mxu1 %v1017_v0  ;;  %s926_s23 = smul.u32 192, %s1222_s15  ;;  %v565_v4 = vld [vmem:[%s1214_s2 + $0x18] sm:$0xff]  ;;  %v610_v6 = vld [vmem:[%s1215_s3] sm:$0xff]  ;;  %v611_v8 = vld [vmem:[%s1215_s3 + $0x8] sm:$0xff] }
   0xe   : > { %953 = vset.pattern.permute.xlu0 %v1017_v0  ;;  %954 = vset.pattern.permute.xlu1 %v1017_v0  ;;  %v612_v15 = vld [vmem:[%s1215_s3 + $0x10] sm:$0xff]  ;;  %v613_v16 = vld [vmem:[%s1215_s3 + $0x18] sm:$0xff]  ;;  %v979_v26 = vld [vmem:[%s1212_s0] sm:$0xff]   ;;  %s927_s21 = smul.u32 96, %s1222_s15 }
   0xf   : > { %568 = vperm.xlu0 %953, %v562_v1   ;;  %578 = vperm.xlu1 %954, %v564_v2   ;;  %s1083_s30 = scalar_lea.vmem %s1213_s1, %s926_s23  ;;  %v986_v31 = vld [vmem:[%s1212_s0 + $0x8] sm:$0xff]  }
  0x10   : > { %v955_v5 = vld [vmem:[%s1083_s30 + $0x94] ss:$24 sps:$4 sm:$0xff]   ;;  %v959_v9 = vld [vmem:[%s1083_s30 + $0x90] ss:$24 sps:$4 sm:$0xff]   ;;  %v961_v11 = vld [vmem:[%s1083_s30 + $0x64] ss:$24 sps:$4 sm:$0xff]   ;;  %s1165_s23 = scalar_lea.vmem %s1216_s4, %s927_s21 }
  0x11   : > { %v957_v7 = vld [vmem:[%s1083_s30 + $0x9c] ss:$24 sps:$4 sm:$0xff]   ;;  %411 = vmatprep.subr.bf16.mxu0 %v955_v5  ;;  %v960_v10 = vld [vmem:[%s1083_s30 + $0x98] ss:$24 sps:$4 sm:$0xff]   ;;  %v963_v12 = vld [vmem:[%s1083_s30 + $0x6c] ss:$24 sps:$4 sm:$0xff]  }
  0x12   : > { %464 = vmatprep.subr.bf16.mxu1 %v957_v7  ;;  %412 = vmatpush1.bf16.msra.mxu0 %v959_v9  ;;  %v965_v13 = vld [vmem:[%s1083_s30 + $0x60] ss:$24 sps:$4 sm:$0xff]   ;;  %v967_v17 = vld [vmem:[%s1083_s30 + $0x34] ss:$24 sps:$4 sm:$0xff]   ;;  %v971_v19 = vld [vmem:[%s1083_s30 + $0x30] ss:$24 sps:$4 sm:$0xff]  }
  0x13   : > { %573 = vperm.xlu0 %953, %v563_v3   ;;  %583 = vperm.xlu1 %954, %v565_v4   ;;  %v966_v14 = vld [vmem:[%s1083_s30 + $0x68] ss:$24 sps:$4 sm:$0xff]   ;;  %v969_v18 = vld [vmem:[%s1083_s30 + $0x3c] ss:$24 sps:$4 sm:$0xff]   ;;  %v972_v20 = vld [vmem:[%s1083_s30 + $0x38] ss:$24 sps:$4 sm:$0xff]  }
  0x14   : > { %465 = vmatpush1.bf16.msra.mxu1 %v960_v10  ;;  %413 = vmatprep.subr.bf16.mxu0 %v961_v11  ;;  %v973_v21 = vld [vmem:[%s1083_s30 + $0x4] ss:$24 sps:$4 sm:$0xff]   ;;  %v977_v23 = vld [vmem:[%s1083_s30] ss:$24 sps:$4 sm:$0xff]   ;;  %v985_v28 = vld [vmem:[%s1083_s30 + $0x74] ss:$24 sps:$4 sm:$0xff]  }
  0x15   : > { %466 = vmatprep.subr.bf16.mxu1 %v963_v12  ;;  %v975_v22 = vld [vmem:[%s1083_s30 + $0xc] ss:$24 sps:$4 sm:$0xff]   ;;  %v978_v24 = vld [vmem:[%s1083_s30 + $0x8] ss:$24 sps:$4 sm:$0xff]  }
  0x16   : > { %414 = vmatpush1.bf16.msra.mxu0 %v965_v13  ;;  %v982_v25 = vld [vmem:[%s1083_s30 + $0xa4] ss:$24 sps:$4 sm:$0xff]   ;;  %v980_v27 = vld [vmem:[%s1083_s30 + $0xa0] ss:$24 sps:$4 sm:$0xff]   ;;  %v983_v29 = vld [vmem:[%s1083_s30 + $0x70] ss:$24 sps:$4 sm:$0xff]  }
  0x17   : > { %616 = vperm.xlu0 %953, %v610_v6   ;;  %621 = vperm.xlu1 %954, %v611_v8   ;;  %v989_v30 = vld [vmem:[%s1083_s30 + $0x44] ss:$24 sps:$4 sm:$0xff]   ;;  %v987_v32 = vld [vmem:[%s1083_s30 + $0x40] ss:$24 sps:$4 sm:$0xff]   ;;  %v992_v33 = vld [vmem:[%s1083_s30 + $0x14] ss:$24 sps:$4 sm:$0xff]  }
  0x18   : > { %467 = vmatpush1.bf16.msra.mxu1 %v966_v14  ;;  %415 = vmatprep.subr.bf16.mxu0 %v967_v17  ;;  %v990_v34 = vld [vmem:[%s1083_s30 + $0x10] ss:$24 sps:$4 sm:$0xff]  }
  0x19   : > { %468 = vmatprep.subr.bf16.mxu1 %v969_v18 }
  0x1a   : > { %416 = vmatpush1.bf16.msra.mxu0 %v971_v19 }
  0x1b   : > { %626 = vperm.xlu0 %953, %v612_v15   ;;  %631 = vperm.xlu1 %954, %v613_v16  }
  0x1c   : > { %469 = vmatpush1.bf16.msra.mxu1 %v972_v20  ;;  %417 = vmatprep.subr.bf16.mxu0 %v973_v21 }
  0x1d   : > { %470 = vmatprep.subr.bf16.mxu1 %v975_v22 }
  0x1e   : > { %418 = vmatpush1.bf16.msra.mxu0 %v977_v23 }
  0x1f   : > { %517 = vmatprep.subr.bf16.mxu0 %v982_v25 }
  0x20   : > { %471 = vmatpush1.bf16.msra.mxu1 %v978_v24 }
  0x21   : > { %918 = vmatprep.subr.bf16.mxu1 %v982_v25  ;;  %886 = vmatmul.mubr.msk.bf16.vlgmr.msra.gmra.mxu0 %vm396_vm0, %v979_v26 }
  0x22   : > { %518 = vmatpush1.bf16.msra.mxu0 %v980_v27  ;;  %445 = vmatprep.mubr.bf16.mxu0 %v1017_v0 }
  0x23   : > { %888 = vmatmul.mubr.msk.bf16.vlgmr.msra.gmra.mxu1 %vm396_vm0, %v979_v26  ;;  %519 = vmatprep.subr.bf16.mxu0 %v985_v28 }
  0x24   : > { %922 = vmatpush1.bf16.msra.mxu1 %v980_v27  ;;  %498 = vmatprep.mubr.bf16.mxu1 %v1017_v0 }
  0x25   : > { %919 = vmatprep.subr.bf16.mxu1 %v985_v28 }
  0x26   : > { %520 = vmatpush1.bf16.msra.mxu0 %v983_v29 }
  0x27   : > { %521 = vmatprep.subr.bf16.mxu0 %v989_v30 }
  0x28   : > { %923 = vmatpush1.bf16.msra.mxu1 %v983_v29 }
  0x29   : > { %920 = vmatprep.subr.bf16.mxu1 %v989_v30  ;;  %887 = vmatmul.mubr.msk.bf16.gmra.mxu0 %vm396_vm0, %v986_v31 }
  0x2a   : > { %522 = vmatpush1.bf16.msra.mxu0 %v987_v32  ;;  %541 = vmatprep.mubr.bf16.mxu0 %v1017_v0 }
  0x2b   : > { %889 = vmatmul.mubr.msk.bf16.gmra.mxu1 %vm396_vm0, %v986_v31  ;;  %523 = vmatprep.subr.bf16.mxu0 %v992_v33 }
  0x2c   : > { %924 = vmatpush1.bf16.msra.mxu1 %v987_v32  ;;  %551 = vmatprep.mubr.bf16.mxu1 %v1017_v0 }
  0x2d   : > { %921 = vmatprep.subr.bf16.mxu1 %v992_v33 }
  0x2e   : > { %524 = vmatpush1.bf16.msra.mxu0 %v990_v34 }
  0x30   : > { %925 = vmatpush1.bf16.msra.mxu1 %v990_v34 }
  0x31   : > { %890 = vmatmul.mubr.msk.bf16.vlgmr.msra.gmra.mxu0 %vm396_vm0, %v979_v26 }
  0x33   : > { %891 = vmatmul.mubr.msk.bf16.vlgmr.msra.gmra.mxu1 %vm396_vm0, %v986_v31 }
  0x8a   : > { %v1137_v35 = vpop.permute.xlu0 %568  ;;  %v1139_v36 = vpop.permute.xlu1 %578 }
  0x8e   : > { %v1141_v37 = vpop.permute.xlu0 %573  ;;  %v1143_v38 = vpop.permute.xlu1 %583 }
  0x92   : > { %v1145_v39 = vpop.permute.xlu0 %616  ;;  %v1156_v54 = vpop.permute.xlu1 %621 }
  0x96   : > { %v627_v9 = vpop.permute.xlu0 %626 }
  0xe1   : > { %v437_v40 = vpop.f32.mrf.mxu0 }
  0xe2   : > { %v586_v42 = vmul.f32 %v1137_v35, %v437_v40 }
  0xe3   : > { %v490_v41 = vpop.f32.mrf.mxu1  ;;  %v439_v44 = vpop.f32.mrf.mxu0 }
  0xe4   : > { %v588_v43 = vmul.f32 %v1137_v35, %v490_v41  ;;  %v587_v46 = vmul.f32 %v1137_v35, %v439_v44  ;;  %v634_v48 = vadd.f32 %v1145_v39, %v586_v42  ;;  %v632_v41 = vpop.permute.xlu1 %631 }
  0xe5   : > { %v492_v45 = vpop.f32.mrf.mxu1  ;;  %v441_v50 = vpop.f32.mrf.mxu0 }
  0xe6   : > { %v589_v47 = vmul.f32 %v1137_v35, %v492_v45  ;;  %v636_v49 = vadd.f32 %v1145_v39, %v588_v43  ;;  %v635_v52 = vadd.f32 %v1145_v39, %v587_v46  ;;  %v658_v55 = vmax.f32 %v634_v48, 0.0 }
  0xe7   : > { %v494_v51 = vpop.f32.mrf.mxu1  ;;  %v592_v57 = vmul.f32 %v1141_v37, %v441_v50  ;;  %v443_v59 = vpop.f32.mrf.mxu0 }
  0xe8   : > { %v637_v53 = vadd.f32 %v1145_v39, %v589_v47  ;;  %v660_v56 = vmax.f32 %v636_v49, 0.0  ;;  %v594_v58 = vmul.f32 %v1141_v37, %v494_v51  ;;  %v659_v61 = vmax.f32 %v635_v52, 0.0 }
  0xe9   : > { %v496_v60 = vpop.f32.mrf.mxu1  ;;  %v593_v63 = vmul.f32 %v1141_v37, %v443_v59  ;;  %v640_v1 = vadd.f32 %v1156_v54, %v592_v57  ;;  %v447_v3 = vpop.f32.mrf.mxu0 }
  0xea   : > { %v661_v62 = vmax.f32 %v637_v53, 0.0  ;;  %v595_v0 = vmul.f32 %v1141_v37, %v496_v60  ;;  %v642_v2 = vadd.f32 %v1156_v54, %v594_v58  ;;  %v906_v5 = vpack.c.bf16 %v659_v61, %v658_v55 }
  0xeb   : > { %v500_v4 = vpop.f32.mrf.mxu1  ;;  %v641_v7 = vadd.f32 %v1156_v54, %v593_v63  ;;  %v664_v10 = vmax.f32 %v640_v1, 0.0  ;;  %v598_v12 = vmul.f32 %v1139_v36, %v447_v3  ;;  %v449_v14 = vpop.f32.mrf.mxu0 }
  0xec   : > { %v907_v6 = vpack.c.bf16 %v661_v62, %v660_v56  ;;  %v643_v8 = vadd.f32 %v1156_v54, %v595_v0  ;;  %v666_v11 = vmax.f32 %v642_v2, 0.0  ;;  %v600_v13 = vmul.f32 %v1139_v36, %v500_v4  ;;  %754 = vst [vmem:[%s1165_s23] sm:$0xff] %v906_v5 }
  0xed   : > { %v502_v15 = vpop.f32.mrf.mxu1  ;;  %v665_v16 = vmax.f32 %v641_v7, 0.0  ;;  %v599_v18 = vmul.f32 %v1139_v36, %v449_v14  ;;  %v646_v20 = vadd.f32 %v627_v9, %v598_v12  ;;  %v451_v22 = vpop.f32.mrf.mxu0 }
  0xee   : > { %755 = vst [vmem:[%s1165_s23 + $0x8] sm:$0xff] %v907_v6  ;;  %v667_v17 = vmax.f32 %v643_v8, 0.0  ;;  %v601_v19 = vmul.f32 %v1139_v36, %v502_v15  ;;  %v648_v21 = vadd.f32 %v627_v9, %v600_v13  ;;  %v604_v30 = vmul.f32 %v1143_v38, %v451_v22 }
  0xef   : > { %v504_v23 = vpop.f32.mrf.mxu1  ;;  %v909_v24 = vpack.c.bf16 %v665_v16, %v664_v10  ;;  %v647_v26 = vadd.f32 %v627_v9, %v599_v18  ;;  %v670_v28 = vmax.f32 %v646_v20, 0.0  ;;  %v453_v32 = vpop.f32.mrf.mxu0 }
  0xf0   : > { %v910_v25 = vpack.c.bf16 %v667_v17, %v666_v11  ;;  %v649_v27 = vadd.f32 %v627_v9, %v601_v19  ;;  %v672_v29 = vmax.f32 %v648_v21, 0.0  ;;  %v606_v31 = vmul.f32 %v1143_v38, %v504_v23 }
  0xf1   : > { %v506_v33 = vpop.f32.mrf.mxu1  ;;  %757 = vst [vmem:[%s1165_s23 + $0x18] sm:$0xff] %v909_v24  ;;  %v671_v34 = vmax.f32 %v647_v26, 0.0  ;;  %v605_v42 = vmul.f32 %v1143_v38, %v453_v32  ;;  %v652_v44 = vadd.f32 %v632_v41, %v604_v30  ;;  %v543_v46 = vpop.f32.mrf.mxu0 }
  0xf2   : > { %758 = vst [vmem:[%s1165_s23 + $0x20] sm:$0xff] %v910_v25  ;;  %v673_v40 = vmax.f32 %v649_v27, 0.0  ;;  %v607_v43 = vmul.f32 %v1143_v38, %v506_v33  ;;  %v654_v45 = vadd.f32 %v632_v41, %v606_v31  ;;  %v590_v55 = vmul.f32 %v1137_v35, %v543_v46 }
  0xf3   : > { %v553_v47 = vpop.f32.mrf.mxu1  ;;  %v912_v48 = vpack.c.bf16 %v671_v34, %v670_v28  ;;  %v653_v50 = vadd.f32 %v632_v41, %v605_v42  ;;  %v676_v52 = vmax.f32 %v652_v44, 0.0  ;;  %v545_v57 = vpop.f32.mrf.mxu0 }
  0xf4   : > { %v913_v49 = vpack.c.bf16 %v673_v40, %v672_v29  ;;  %v655_v51 = vadd.f32 %v632_v41, %v607_v43  ;;  %v678_v53 = vmax.f32 %v654_v45, 0.0  ;;  %v602_v56 = vmul.f32 %v1139_v36, %v553_v47 }
  0xf5   : > { %v555_v58 = vpop.f32.mrf.mxu1  ;;  %760 = vst [vmem:[%s1165_s23 + $0x30] sm:$0xff] %v912_v48  ;;  %v677_v59 = vmax.f32 %v653_v50, 0.0  ;;  %v591_v61 = vmul.f32 %v1137_v35, %v545_v57  ;;  %v638_v63 = vadd.f32 %v1145_v39, %v590_v55  ;;  %v547_v1 = vpop.f32.mrf.mxu0 }
  0xf6   : > { %761 = vst [vmem:[%s1165_s23 + $0x38] sm:$0xff] %v913_v49  ;;  %v679_v60 = vmax.f32 %v655_v51, 0.0  ;;  %v603_v62 = vmul.f32 %v1139_v36, %v555_v58  ;;  %v650_v0 = vadd.f32 %v627_v9, %v602_v56  ;;  %v596_v10 = vmul.f32 %v1141_v37, %v547_v1 }
  0xf7   : > { %v557_v2 = vpop.f32.mrf.mxu1  ;;  %v915_v3 = vpack.c.bf16 %v677_v59, %v676_v52  ;;  %v639_v5 = vadd.f32 %v1145_v39, %v591_v61  ;;  %v662_v7 = vmax.f32 %v638_v63, 0.0  ;;  %v549_v36 = vpop.f32.mrf.mxu0 }
  0xf8   : > { %v916_v4 = vpack.c.bf16 %v679_v60, %v678_v53  ;;  %v651_v6 = vadd.f32 %v627_v9, %v603_v62  ;;  %v674_v8 = vmax.f32 %v650_v0, 0.0  ;;  %v608_v35 = vmul.f32 %v1143_v38, %v557_v2 }
  0xf9   : > { %v559_v11 = vpop.f32.mrf.mxu1  ;;  %763 = vst [vmem:[%s1165_s23 + $0x48] sm:$0xff] %v915_v3  ;;  %v663_v12 = vmax.f32 %v639_v5, 0.0  ;;  %v597_v14 = vmul.f32 %v1141_v37, %v549_v36  ;;  %v644_v9 = vadd.f32 %v1156_v54, %v596_v10 }
  0xfa   : > { %764 = vst [vmem:[%s1165_s23 + $0x50] sm:$0xff] %v916_v4  ;;  %v675_v13 = vmax.f32 %v651_v6, 0.0  ;;  %v609_v39 = vmul.f32 %v1143_v38, %v559_v11  ;;  %v656_v15 = vadd.f32 %v632_v41, %v608_v35 }
  0xfb   : > { %v908_v16 = vpack.c.bf16 %v663_v12, %v662_v7  ;;  %v645_v18 = vadd.f32 %v1156_v54, %v597_v14  ;;  %v668_v20 = vmax.f32 %v644_v9, 0.0 }
  0xfc   : > { %v914_v17 = vpack.c.bf16 %v675_v13, %v674_v8  ;;  %v657_v19 = vadd.f32 %v632_v41, %v609_v39  ;;  %v680_v21 = vmax.f32 %v656_v15, 0.0 }
  0xfd   : > { %756 = vst [vmem:[%s1165_s23 + $0x10] sm:$0xff] %v908_v16  ;;  %v669_v22 = vmax.f32 %v645_v18, 0.0 }
  0xfe   : > { %762 = vst [vmem:[%s1165_s23 + $0x40] sm:$0xff] %v914_v17  ;;  %v681_v23 = vmax.f32 %v657_v19, 0.0 }
  0xff   : > { %v911_v24 = vpack.c.bf16 %v669_v22, %v668_v20 }
 0x100   : > { %v917_v37 = vpack.c.bf16 %v681_v23, %v680_v21 }
 0x101   : > { %759 = vst [vmem:[%s1165_s23 + $0x28] sm:$0xff] %v911_v24 }
 0x102   : > { %765 = vst [vmem:[%s1165_s23 + $0x58] sm:$0xff] %v917_v37 }
 0x103 PF: > { %s14_s17 = sadd.s32 1, %s1015_s17   ;;  %s1217_s15 = smov %s1011_s16 }
 0x104   : > { %p11_p5 = scmp.ge.s32.totalorder %s14_s17, 4   ;;  %s1218_s16 = smov %s1220_s18 }
 0x106   :  { %13 = sbr.rel (!%p11_p5) target bundleno = 2 (0x2), region = 66 }

// kernel: generator_forward.15
= control target key start
LH: loop header
LB: loop body
LE: loop exit
PB: predicated region body
PF: predicated region fallthrough
CT: control target
= control target key end

     0   :  { %s2155_s9 = smov 0   ;;  %s2157_s10 = smov 0   ;;  %s2336_s0 = inlined_call_operand.vmem [shape: bf16[16,32], index: 0, kind: input, shape index: {}]   ;;  %s2337_s1 = inlined_call_operand.vmem [shape: bf16[2,32,4992], index: 1, kind: input, shape index: {}]   ;;  %s2338_s2 = inlined_call_operand.vmem [shape: f32[2,2,16,128], index: 2, kind: output, shape index: {}]  }
   0x1   :  { %s2159_s11 = smov 0  }
   0x2 LB: > { %s24_s12 = sadd.s32 1, %s2131_s10  ;;  %p1849_p0 = scmp.ge.s32.totalorder %s2135_s11, 1  ;;  %s2135_s11 = sphi %s2159_s11, %s12_s11   ;;  %s2131_s10 = sphi %s2157_s10, %s2340_s10   ;;  %s2127_s9 = sphi %s2155_s9, %s2339_s9  }
   0x3   : > { %p26_p1 = scmp.ge.s32.totalorder %s24_s12, 2  ;;  %p131_p2 = scmp.lt.s32.totalorder %s2135_s11, 3 }
   0x5   : > { %s2342_s12 = smov (%p26_p1, %s24_s12), 0  ;;  %p132_p3 = pnand %p1849_p0, %p131_p2 }
   0x6   : > { %p158_p4 = scmp.lt.s32.totalorder (!%p132_p3), %s2127_s9, 1 }
   0x7   : > { %135 = sbr.rel (%p132_p3) target bundleno = 303 (0x12f), region = 28 }
   0xc   : > { %v2137_v0 = vmov 0   ;;  %s2344_s9 = smov (!%p158_p4, %s2127_s9), 1  ;;  %v2194_v9 = vld [vmem:[%s2336_s0] sm:$0xff]   ;;  %vm660_vm0 = vcmask 261120   ;;  %vm2139_vm1 = vmmov 0  }
   0xd   : > { %696 = vmatprep.mubr.bf16.mxu0 %v2137_v0  ;;  %739 = vmatprep.mubr.bf16.mxu1 %v2137_v0  ;;  %s1968_s13 = smul.u32 624, %s2344_s9  ;;  %s1956_s19 = sshll.u32 %s2344_s9, 5 }
   0xe   : > { %s171_s22 = scalar_lea.vmem %s2338_s2, %s1956_s19 }
   0xf   : > { %s2181_s16 = scalar_lea.vmem %s2337_s1, %s1968_s13 }
  0x10   : > { %v1996_v1 = vld [vmem:[%s2181_s16 + $0x13c] ss:$156 sps:$4 sm:$0xff]   ;;  %v1998_v2 = vld [vmem:[%s2181_s16 + $0x144] ss:$156 sps:$4 sm:$0xff]   ;;  %v2004_v6 = vld [vmem:[%s2181_s16 + $0xc] ss:$156 sps:$4 sm:$0xff]  }
  0x11   : > { %676 = vmatprep.subr.bf16.mxu0 %v1996_v1  ;;  %v2000_v3 = vld [vmem:[%s2181_s16 + $0x138] ss:$156 sps:$4 sm:$0xff]   ;;  %v2001_v4 = vld [vmem:[%s2181_s16 + $0x140] ss:$156 sps:$4 sm:$0xff]   ;;  %719 = vmatprep.subr.bf16.mxu1 %v1998_v2  ;;  %v2007_v8 = vld [vmem:[%s2181_s16 + $0x8] ss:$156 sps:$4 sm:$0xff]  }
  0x12   : > { %v2002_v5 = vld [vmem:[%s2181_s16 + $0x4] ss:$156 sps:$4 sm:$0xff]   ;;  %677 = vmatpush1.bf16.msra.mxu0 %v2000_v3  ;;  %720 = vmatpush1.bf16.msra.mxu1 %v2001_v4  ;;  %v2011_v10 = vld [vmem:[%s2181_s16 + $0x14c] ss:$156 sps:$4 sm:$0xff]   ;;  %v2014_v12 = vld [vmem:[%s2181_s16 + $0x154] ss:$156 sps:$4 sm:$0xff]  }
  0x13   : > { %v2006_v7 = vld [vmem:[%s2181_s16] ss:$156 sps:$4 sm:$0xff]   ;;  %678 = vmatprep.subr.bf16.mxu0 %v2002_v5  ;;  %721 = vmatprep.subr.bf16.mxu1 %v2004_v6  ;;  %v2009_v11 = vld [vmem:[%s2181_s16 + $0x148] ss:$156 sps:$4 sm:$0xff]   ;;  %v2012_v13 = vld [vmem:[%s2181_s16 + $0x150] ss:$156 sps:$4 sm:$0xff]  }
  0x14   : > { %v2017_v14 = vld [vmem:[%s2181_s16 + $0x14] ss:$156 sps:$4 sm:$0xff]   ;;  %v2020_v15 = vld [vmem:[%s2181_s16 + $0x1c] ss:$156 sps:$4 sm:$0xff]   ;;  %v2026_v19 = vld [vmem:[%s2181_s16 + $0x164] ss:$156 sps:$4 sm:$0xff]  }
  0x15   : > { %v2015_v16 = vld [vmem:[%s2181_s16 + $0x10] ss:$156 sps:$4 sm:$0xff]   ;;  %v2018_v17 = vld [vmem:[%s2181_s16 + $0x18] ss:$156 sps:$4 sm:$0xff]   ;;  %v2024_v21 = vld [vmem:[%s2181_s16 + $0x160] ss:$156 sps:$4 sm:$0xff]  }
  0x16   : > { %679 = vmatpush1.bf16.msra.mxu0 %v2006_v7  ;;  %722 = vmatpush1.bf16.msra.mxu1 %v2007_v8  ;;  %v2023_v18 = vld [vmem:[%s2181_s16 + $0x15c] ss:$156 sps:$4 sm:$0xff]   ;;  %v2029_v22 = vld [vmem:[%s2181_s16 + $0x24] ss:$156 sps:$4 sm:$0xff]   ;;  %v2032_v23 = vld [vmem:[%s2181_s16 + $0x2c] ss:$156 sps:$4 sm:$0xff]  }
  0x17   : > { %762 = vmatprep.subr.bf16.mxu0 %v2011_v10  ;;  %805 = vmatprep.subr.bf16.mxu1 %v2014_v12  ;;  %v2021_v20 = vld [vmem:[%s2181_s16 + $0x158] ss:$156 sps:$4 sm:$0xff]   ;;  %v2027_v24 = vld [vmem:[%s2181_s16 + $0x20] ss:$156 sps:$4 sm:$0xff]   ;;  %v2030_v25 = vld [vmem:[%s2181_s16 + $0x28] ss:$156 sps:$4 sm:$0xff]  }
  0x18   : > { %v2035_v26 = vld [vmem:[%s2181_s16 + $0x16c] ss:$156 sps:$4 sm:$0xff]   ;;  %v2038_v27 = vld [vmem:[%s2181_s16 + $0x174] ss:$156 sps:$4 sm:$0xff]   ;;  %v2044_v31 = vld [vmem:[%s2181_s16 + $0x3c] ss:$156 sps:$4 sm:$0xff]  }
  0x19   : > { %1932 = vmatmul.mubr.msk.bf16.vlgmr.msra.gmra.mxu0 %vm660_vm0, %v2194_v9  ;;  %1933 = vmatmul.mubr.msk.bf16.vlgmr.msra.gmra.mxu1 %vm660_vm0, %v2194_v9  ;;  %v2033_v28 = vld [vmem:[%s2181_s16 + $0x168] ss:$156 sps:$4 sm:$0xff]   ;;  %v2036_v29 = vld [vmem:[%s2181_s16 + $0x170] ss:$156 sps:$4 sm:$0xff]   ;;  %v2042_v33 = vld [vmem:[%s2181_s16 + $0x38] ss:$156 sps:$4 sm:$0xff]  }
  0x1a   : > { %763 = vmatpush1.bf16.msra.mxu0 %v2009_v11  ;;  %806 = vmatpush1.bf16.msra.mxu1 %v2012_v13  ;;  %v2041_v30 = vld [vmem:[%s2181_s16 + $0x34] ss:$156 sps:$4 sm:$0xff]   ;;  %v2047_v34 = vld [vmem:[%s2181_s16 + $0x17c] ss:$156 sps:$4 sm:$0xff]   ;;  %v2050_v35 = vld [vmem:[%s2181_s16 + $0x184] ss:$156 sps:$4 sm:$0xff]  }
  0x1b   : > { %764 = vmatprep.subr.bf16.mxu0 %v2017_v14  ;;  %807 = vmatprep.subr.bf16.mxu1 %v2020_v15  ;;  %v2039_v32 = vld [vmem:[%s2181_s16 + $0x30] ss:$156 sps:$4 sm:$0xff]   ;;  %v2045_v36 = vld [vmem:[%s2181_s16 + $0x178] ss:$156 sps:$4 sm:$0xff]   ;;  %v2048_v37 = vld [vmem:[%s2181_s16 + $0x180] ss:$156 sps:$4 sm:$0xff]  }
  0x1c   : > { %782 = vmatprep.mubr.bf16.mxu0 %v2137_v0  ;;  %825 = vmatprep.mubr.bf16.mxu1 %v2137_v0  ;;  %v2053_v38 = vld [vmem:[%s2181_s16 + $0x44] ss:$156 sps:$4 sm:$0xff]   ;;  %v2056_v39 = vld [vmem:[%s2181_s16 + $0x4c] ss:$156 sps:$4 sm:$0xff]   ;;  %v2062_v43 = vld [vmem:[%s2181_s16 + $0x194] ss:$156 sps:$4 sm:$0xff]  }
  0x1d   : > { %v2051_v40 = vld [vmem:[%s2181_s16 + $0x40] ss:$156 sps:$4 sm:$0xff]   ;;  %v2054_v41 = vld [vmem:[%s2181_s16 + $0x48] ss:$156 sps:$4 sm:$0xff]   ;;  %v2060_v45 = vld [vmem:[%s2181_s16 + $0x190] ss:$156 sps:$4 sm:$0xff]  }
  0x1e   : > { %765 = vmatpush1.bf16.msra.mxu0 %v2015_v16  ;;  %808 = vmatpush1.bf16.msra.mxu1 %v2018_v17  ;;  %v2059_v42 = vld [vmem:[%s2181_s16 + $0x18c] ss:$156 sps:$4 sm:$0xff]   ;;  %v2065_v46 = vld [vmem:[%s2181_s16 + $0x54] ss:$156 sps:$4 sm:$0xff]   ;;  %v2068_v47 = vld [vmem:[%s2181_s16 + $0x5c] ss:$156 sps:$4 sm:$0xff]  }
  0x1f   : > { %848 = vmatprep.subr.bf16.mxu0 %v2023_v18  ;;  %891 = vmatprep.subr.bf16.mxu1 %v2026_v19  ;;  %v2057_v44 = vld [vmem:[%s2181_s16 + $0x188] ss:$156 sps:$4 sm:$0xff]   ;;  %v2063_v48 = vld [vmem:[%s2181_s16 + $0x50] ss:$156 sps:$4 sm:$0xff]   ;;  %v2066_v49 = vld [vmem:[%s2181_s16 + $0x58] ss:$156 sps:$4 sm:$0xff]  }
  0x20   : > { %v2071_v50 = vld [vmem:[%s2181_s16 + $0x19c] ss:$156 sps:$4 sm:$0xff]   ;;  %v2074_v51 = vld [vmem:[%s2181_s16 + $0x1a4] ss:$156 sps:$4 sm:$0xff]   ;;  %v2080_v55 = vld [vmem:[%s2181_s16 + $0x6c] ss:$156 sps:$4 sm:$0xff]  }
  0x21   : > { %1934 = vmatmul.mubr.msk.bf16.vlgmr.msra.gmra.mxu0 %vm660_vm0, %v2194_v9  ;;  %1935 = vmatmul.mubr.msk.bf16.vlgmr.msra.gmra.mxu1 %vm660_vm0, %v2194_v9  ;;  %v2069_v52 = vld [vmem:[%s2181_s16 + $0x198] ss:$156 sps:$4 sm:$0xff]   ;;  %v2072_v53 = vld [vmem:[%s2181_s16 + $0x1a0] ss:$156 sps:$4 sm:$0xff]   ;;  %v2078_v57 = vld [vmem:[%s2181_s16 + $0x68] ss:$156 sps:$4 sm:$0xff]  }
  0x22   : > { %849 = vmatpush1.bf16.msra.mxu0 %v2021_v20  ;;  %892 = vmatpush1.bf16.msra.mxu1 %v2024_v21  ;;  %v2077_v54 = vld [vmem:[%s2181_s16 + $0x64] ss:$156 sps:$4 sm:$0xff]   ;;  %v2083_v58 = vld [vmem:[%s2181_s16 + $0x1ac] ss:$156 sps:$4 sm:$0xff]   ;;  %v2086_v59 = vld [vmem:[%s2181_s16 + $0x1b4] ss:$156 sps:$4 sm:$0xff]  }
  0x23   : > { %850 = vmatprep.subr.bf16.mxu0 %v2029_v22  ;;  %893 = vmatprep.subr.bf16.mxu1 %v2032_v23  ;;  %v2075_v56 = vld [vmem:[%s2181_s16 + $0x60] ss:$156 sps:$4 sm:$0xff]   ;;  %v2081_v60 = vld [vmem:[%s2181_s16 + $0x1a8] ss:$156 sps:$4 sm:$0xff]   ;;  %v2084_v61 = vld [vmem:[%s2181_s16 + $0x1b0] ss:$156 sps:$4 sm:$0xff]  }
  0x24   : > { %868 = vmatprep.mubr.bf16.mxu0 %v2137_v0  ;;  %911 = vmatprep.mubr.bf16.mxu1 %v2137_v0  ;;  %v2089_v62 = vld [vmem:[%s2181_s16 + $0x74] ss:$156 sps:$4 sm:$0xff]   ;;  %v2092_v63 = vld [vmem:[%s2181_s16 + $0x7c] ss:$156 sps:$4 sm:$0xff]   ;;  %v2098_v4 = vld [vmem:[%s2181_s16 + $0x1c4] ss:$156 sps:$4 sm:$0xff]  }
  0x25   : > { %v2087_v1 = vld [vmem:[%s2181_s16 + $0x70] ss:$156 sps:$4 sm:$0xff]   ;;  %v2090_v2 = vld [vmem:[%s2181_s16 + $0x78] ss:$156 sps:$4 sm:$0xff]   ;;  %v2096_v6 = vld [vmem:[%s2181_s16 + $0x1c0] ss:$156 sps:$4 sm:$0xff]  }
  0x26   : > { %851 = vmatpush1.bf16.msra.mxu0 %v2027_v24  ;;  %894 = vmatpush1.bf16.msra.mxu1 %v2030_v25  ;;  %v2095_v3 = vld [vmem:[%s2181_s16 + $0x1bc] ss:$156 sps:$4 sm:$0xff]   ;;  %v2101_v7 = vld [vmem:[%s2181_s16 + $0x84] ss:$156 sps:$4 sm:$0xff]   ;;  %v2104_v8 = vld [vmem:[%s2181_s16 + $0x8c] ss:$156 sps:$4 sm:$0xff]  }
  0x27   : > { %934 = vmatprep.subr.bf16.mxu0 %v2035_v26  ;;  %977 = vmatprep.subr.bf16.mxu1 %v2038_v27  ;;  %v2093_v5 = vld [vmem:[%s2181_s16 + $0x1b8] ss:$156 sps:$4 sm:$0xff]   ;;  %v2099_v10 = vld [vmem:[%s2181_s16 + $0x80] ss:$156 sps:$4 sm:$0xff]   ;;  %v2102_v11 = vld [vmem:[%s2181_s16 + $0x88] ss:$156 sps:$4 sm:$0xff]  }
  0x28   : > { %v2107_v12 = vld [vmem:[%s2181_s16 + $0x1cc] ss:$156 sps:$4 sm:$0xff]   ;;  %v2138_v15 = vmov 0.0   ;;  %v2111_v16 = vld [vmem:[%s2181_s16 + $0x94] ss:$156 sps:$4 sm:$0xff]  }
  0x29   : > { %1936 = vmatmul.mubr.msk.bf16.vlgmr.msra.gmra.mxu0 %vm660_vm0, %v2194_v9  ;;  %1937 = vmatmul.mubr.msk.bf16.vlgmr.msra.gmra.mxu1 %vm660_vm0, %v2194_v9  ;;  %v2105_v13 = vld [vmem:[%s2181_s16 + $0x1c8] ss:$156 sps:$4 sm:$0xff]   ;;  %v2108_v14 = vld [vmem:[%s2181_s16 + $0x1d0] ss:$156 sps:$4 sm:$0xff]   ;;  %v2112_v18 = vld [vmem:[%s2181_s16 + $0x98] ss:$156 sps:$4 sm:$0xff]  }
  0x2a   : > { %935 = vmatpush1.bf16.msra.mxu0 %v2033_v28  ;;  %978 = vmatpush1.bf16.msra.mxu1 %v2036_v29  ;;  %v2109_v17 = vld [vmem:[%s2181_s16 + $0x90] ss:$156 sps:$4 sm:$0xff]  }
  0x2b   : > { %936 = vmatprep.subr.bf16.mxu0 %v2041_v30  ;;  %979 = vmatprep.subr.bf16.mxu1 %v2044_v31 }
  0x2c   : > { %954 = vmatprep.mubr.bf16.mxu0 %v2137_v0  ;;  %997 = vmatprep.mubr.bf16.mxu1 %v2137_v0 }
  0x2e   : > { %937 = vmatpush1.bf16.msra.mxu0 %v2039_v32  ;;  %980 = vmatpush1.bf16.msra.mxu1 %v2042_v33 }
  0x2f   : > { %1020 = vmatprep.subr.bf16.mxu0 %v2047_v34  ;;  %1063 = vmatprep.subr.bf16.mxu1 %v2050_v35 }
  0x31   : > { %1938 = vmatmul.mubr.msk.bf16.vlgmr.msra.gmra.mxu0 %vm660_vm0, %v2194_v9  ;;  %1939 = vmatmul.mubr.msk.bf16.vlgmr.msra.gmra.mxu1 %vm660_vm0, %v2194_v9 }
  0x32   : > { %1021 = vmatpush1.bf16.msra.mxu0 %v2045_v36  ;;  %1064 = vmatpush1.bf16.msra.mxu1 %v2048_v37 }
  0x33   : > { %1022 = vmatprep.subr.bf16.mxu0 %v2053_v38  ;;  %1065 = vmatprep.subr.bf16.mxu1 %v2056_v39 }
  0x34   : > { %1040 = vmatprep.mubr.bf16.mxu0 %v2137_v0  ;;  %1083 = vmatprep.mubr.bf16.mxu1 %v2137_v0 }
  0x36   : > { %1023 = vmatpush1.bf16.msra.mxu0 %v2051_v40  ;;  %1066 = vmatpush1.bf16.msra.mxu1 %v2054_v41 }
  0x37   : > { %1106 = vmatprep.subr.bf16.mxu0 %v2059_v42  ;;  %1149 = vmatprep.subr.bf16.mxu1 %v2062_v43 }
  0x39   : > { %1940 = vmatmul.mubr.msk.bf16.vlgmr.msra.gmra.mxu0 %vm660_vm0, %v2194_v9  ;;  %1941 = vmatmul.mubr.msk.bf16.vlgmr.msra.gmra.mxu1 %vm660_vm0, %v2194_v9 }
  0x3a   : > { %1107 = vmatpush1.bf16.msra.mxu0 %v2057_v44  ;;  %1150 = vmatpush1.bf16.msra.mxu1 %v2060_v45 }
  0x3b   : > { %1108 = vmatprep.subr.bf16.mxu0 %v2065_v46  ;;  %1151 = vmatprep.subr.bf16.mxu1 %v2068_v47 }
  0x3c   : > { %1126 = vmatprep.mubr.bf16.mxu0 %v2137_v0  ;;  %1169 = vmatprep.mubr.bf16.mxu1 %v2137_v0 }
  0x3e   : > { %1109 = vmatpush1.bf16.msra.mxu0 %v2063_v48  ;;  %1152 = vmatpush1.bf16.msra.mxu1 %v2066_v49 }
  0x3f   : > { %1192 = vmatprep.subr.bf16.mxu0 %v2071_v50  ;;  %1235 = vmatprep.subr.bf16.mxu1 %v2074_v51 }
  0x41   : > { %1942 = vmatmul.mubr.msk.bf16.vlgmr.msra.gmra.mxu0 %vm660_vm0, %v2194_v9  ;;  %1943 = vmatmul.mubr.msk.bf16.vlgmr.msra.gmra.mxu1 %vm660_vm0, %v2194_v9 }
  0x42   : > { %1193 = vmatpush1.bf16.msra.mxu0 %v2069_v52  ;;  %1236 = vmatpush1.bf16.msra.mxu1 %v2072_v53 }
  0x43   : > { %1194 = vmatprep.subr.bf16.mxu0 %v2077_v54  ;;  %1237 = vmatprep.subr.bf16.mxu1 %v2080_v55 }
  0x44   : > { %1212 = vmatprep.mubr.bf16.mxu0 %v2137_v0  ;;  %1255 = vmatprep.mubr.bf16.mxu1 %v2137_v0 }
  0x46   : > { %1195 = vmatpush1.bf16.msra.mxu0 %v2075_v56  ;;  %1238 = vmatpush1.bf16.msra.mxu1 %v2078_v57 }
  0x47   : > { %1278 = vmatprep.subr.bf16.mxu0 %v2083_v58  ;;  %1321 = vmatprep.subr.bf16.mxu1 %v2086_v59 }
  0x49   : > { %1944 = vmatmul.mubr.msk.bf16.vlgmr.msra.gmra.mxu0 %vm660_vm0, %v2194_v9  ;;  %1945 = vmatmul.mubr.msk.bf16.vlgmr.msra.gmra.mxu1 %vm660_vm0, %v2194_v9 }
  0x4a   : > { %1279 = vmatpush1.bf16.msra.mxu0 %v2081_v60  ;;  %1322 = vmatpush1.bf16.msra.mxu1 %v2084_v61 }
  0x4b   : > { %1280 = vmatprep.subr.bf16.mxu0 %v2089_v62  ;;  %1323 = vmatprep.subr.bf16.mxu1 %v2092_v63 }
  0x4c   : > { %1298 = vmatprep.mubr.bf16.mxu0 %v2137_v0  ;;  %1341 = vmatprep.mubr.bf16.mxu1 %v2137_v0 }
  0x4e   : > { %1281 = vmatpush1.bf16.msra.mxu0 %v2087_v1  ;;  %1324 = vmatpush1.bf16.msra.mxu1 %v2090_v2 }
  0x4f   : > { %1364 = vmatprep.subr.bf16.mxu0 %v2095_v3  ;;  %1407 = vmatprep.subr.bf16.mxu1 %v2098_v4 }
  0x51   : > { %1946 = vmatmul.mubr.msk.bf16.vlgmr.msra.gmra.mxu0 %vm660_vm0, %v2194_v9  ;;  %1947 = vmatmul.mubr.msk.bf16.vlgmr.msra.gmra.mxu1 %vm660_vm0, %v2194_v9 }
  0x52   : > { %1365 = vmatpush1.bf16.msra.mxu0 %v2093_v5  ;;  %1408 = vmatpush1.bf16.msra.mxu1 %v2096_v6 }
  0x53   : > { %1366 = vmatprep.subr.bf16.mxu0 %v2101_v7  ;;  %1409 = vmatprep.subr.bf16.mxu1 %v2104_v8 }
  0x54   : > { %1384 = vmatprep.mubr.bf16.mxu0 %v2137_v0  ;;  %1427 = vmatprep.mubr.bf16.mxu1 %v2137_v0 }
  0x56   : > { %1367 = vmatpush1.bf16.msra.mxu0 %v2099_v10  ;;  %1410 = vmatpush1.bf16.msra.mxu1 %v2102_v11 }
  0x57   : > { %1450 = vmatprep.subr.bf16.mxu0 %v2107_v12  ;;  %1960 = vmatprep.subr.bf16.mxu1 %v2138_v15 }
  0x59   : > { %1948 = vmatmul.mubr.msk.bf16.vlgmr.msra.gmra.mxu0 %vm660_vm0, %v2194_v9  ;;  %1949 = vmatmul.mubr.msk.bf16.vlgmr.msra.gmra.mxu1 %vm660_vm0, %v2194_v9 }
  0x5a   : > { %1451 = vmatpush1.bf16.msra.mxu0 %v2105_v13  ;;  %1961 = vmatpush3.bf16.msra.mxu1 %v2108_v14 }
  0x5b   : > { %1452 = vmatprep.subr.bf16.mxu0 %v2111_v16  ;;  %1962 = vmatprep.subr.bf16.mxu1 %v2138_v15 }
  0x5c   : > { %1470 = vmatprep.mubr.bf16.mxu0 %v2137_v0  ;;  %1964 = vmatprep.mubr.msk.bf16.mxu1 %vm2139_vm1, %v2138_v15 }
  0x5e   : > { %1453 = vmatpush1.bf16.msra.mxu0 %v2109_v17  ;;  %1963 = vmatpush3.bf16.msra.mxu1 %v2112_v18 }
  0x61   : > { %1950 = vmatmul.mubr.msk.bf16.vlgmr.msra.gmra.mxu0 %vm660_vm0, %v2194_v9  ;;  %1965 = vmatmul.mubr.msk.bf16.vlgmr.msra.gmra.mxu1 %vm660_vm0, %v2194_v9 }
  0xd9   : > { %v698_v19 = vpop.f32.mrf.mxu0  ;;  %v741_v20 = vpop.f32.mrf.mxu1 }
  0xda   : > { %v1528_v23 = vmul.f32 %v698_v19, %v698_v19  ;;  %v1540_v24 = vmul.f32 %v741_v20, %v741_v20 }
  0xdb   : > { %v700_v21 = vpop.f32.mrf.mxu0  ;;  %v743_v22 = vpop.f32.mrf.mxu1 }
  0xdc   : > { %v1532_v25 = vadd.f32 %v700_v21, %v698_v19  ;;  %v1534_v26 = vmul.f32 %v700_v21, %v700_v21  ;;  %v1546_v30 = vmul.f32 %v743_v22, %v743_v22 }
  0xdd   : > { %v702_v27 = vpop.f32.mrf.mxu0  ;;  %v745_v0 = vpop.f32.mrf.mxu1 }
  0xde   : > { %v1536_v28 = vadd.f32 %v1534_v26, %v1528_v23  ;;  %v1538_v29 = vadd.f32 %v1532_v25, %v741_v20  ;;  %v1529_v31 = vmul.f32 %v702_v27, %v702_v27  ;;  %v1541_v37 = vmul.f32 %v745_v0, %v745_v0 }
  0xdf   : > { %v704_v32 = vpop.f32.mrf.mxu0  ;;  %v747_v33 = vpop.f32.mrf.mxu1 }
  0xe0   : > { %v1542_v34 = vadd.f32 %v1540_v24, %v1536_v28  ;;  %v1544_v35 = vadd.f32 %v1538_v29, %v743_v22  ;;  %v1533_v36 = vadd.f32 %v704_v32, %v702_v27  ;;  %v1535_v9 = vmul.f32 %v704_v32, %v704_v32 }
  0xe1   : > { %v784_v38 = vpop.f32.mrf.mxu0  ;;  %v827_v39 = vpop.f32.mrf.mxu1  ;;  %v1547_v44 = vmul.f32 %v747_v33, %v747_v33 }
  0xe2   : > { %v1548_v40 = vadd.f32 %v1546_v30, %v1542_v34  ;;  %v1537_v41 = vadd.f32 %v1535_v9, %v1529_v31  ;;  %v1539_v42 = vadd.f32 %v1533_v36, %v745_v0  ;;  %v1550_v43 = vadd.f32 %v1544_v35, %v784_v38 }
  0xe3   : > { %v1552_v45 = vmul.f32 %v784_v38, %v784_v38  ;;  %v786_v46 = vpop.f32.mrf.mxu0  ;;  %v829_v47 = vpop.f32.mrf.mxu1  ;;  %v1564_v53 = vmul.f32 %v827_v39, %v827_v39 }
  0xe4   : > { %v1543_v48 = vadd.f32 %v1541_v37, %v1537_v41  ;;  %v1545_v49 = vadd.f32 %v1539_v42, %v747_v33  ;;  %v1556_v50 = vadd.f32 %v1550_v43, %v786_v46  ;;  %v1558_v51 = vmul.f32 %v786_v46, %v786_v46 }
  0xe5   : > { %v1554_v52 = vadd.f32 %v1552_v45, %v1548_v40  ;;  %v788_v54 = vpop.f32.mrf.mxu0  ;;  %v831_v55 = vpop.f32.mrf.mxu1  ;;  %v1570_v5 = vmul.f32 %v829_v47, %v829_v47 }
  0xe6   : > { %v1549_v56 = vadd.f32 %v1547_v44, %v1543_v48  ;;  %v1562_v57 = vadd.f32 %v1556_v50, %v827_v39  ;;  %v1551_v58 = vadd.f32 %v1545_v49, %v788_v54  ;;  %v1553_v59 = vmul.f32 %v788_v54, %v788_v54 }
  0xe7   : > { %v1560_v60 = vadd.f32 %v1558_v51, %v1554_v52  ;;  %v790_v61 = vpop.f32.mrf.mxu0  ;;  %v833_v62 = vpop.f32.mrf.mxu1  ;;  %v1565_v6 = vmul.f32 %v831_v55, %v831_v55 }
  0xe8   : > { %v1568_v63 = vadd.f32 %v1562_v57, %v829_v47  ;;  %v1555_v1 = vadd.f32 %v1553_v59, %v1549_v56  ;;  %v1557_v2 = vadd.f32 %v1551_v58, %v790_v61  ;;  %v1559_v3 = vmul.f32 %v790_v61, %v790_v61 }
  0xe9   : > { %v1566_v4 = vadd.f32 %v1564_v53, %v1560_v60  ;;  %v870_v7 = vpop.f32.mrf.mxu0  ;;  %v913_v8 = vpop.f32.mrf.mxu1  ;;  %v1571_v15 = vmul.f32 %v833_v62, %v833_v62 }
  0xea   : > { %v1561_v10 = vadd.f32 %v1559_v3, %v1555_v1  ;;  %v1563_v11 = vadd.f32 %v1557_v2, %v831_v55  ;;  %v1574_v12 = vadd.f32 %v1568_v63, %v870_v7  ;;  %v1576_v13 = vmul.f32 %v870_v7, %v870_v7 }
  0xeb   : > { %v1572_v14 = vadd.f32 %v1570_v5, %v1566_v4  ;;  %v872_v16 = vpop.f32.mrf.mxu0  ;;  %v915_v17 = vpop.f32.mrf.mxu1  ;;  %v1588_v23 = vmul.f32 %v913_v8, %v913_v8 }
  0xec   : > { %v1567_v18 = vadd.f32 %v1565_v6, %v1561_v10  ;;  %v1569_v19 = vadd.f32 %v1563_v11, %v833_v62  ;;  %v1580_v20 = vadd.f32 %v1574_v12, %v872_v16  ;;  %v1582_v21 = vmul.f32 %v872_v16, %v872_v16 }
  0xed   : > { %v1578_v22 = vadd.f32 %v1576_v13, %v1572_v14  ;;  %v874_v24 = vpop.f32.mrf.mxu0  ;;  %v917_v25 = vpop.f32.mrf.mxu1  ;;  %v1594_v9 = vmul.f32 %v915_v17, %v915_v17 }
  0xee   : > { %v1573_v26 = vadd.f32 %v1571_v15, %v1567_v18  ;;  %v1586_v27 = vadd.f32 %v1580_v20, %v913_v8  ;;  %v1575_v0 = vadd.f32 %v1569_v19, %v874_v24  ;;  %v1577_v28 = vmul.f32 %v874_v24, %v874_v24 }
  0xef   : > { %v1584_v29 = vadd.f32 %v1582_v21, %v1578_v22  ;;  %v876_v30 = vpop.f32.mrf.mxu0  ;;  %v919_v31 = vpop.f32.mrf.mxu1  ;;  %v1589_v37 = vmul.f32 %v917_v25, %v917_v25 }
  0xf0   : > { %v1592_v32 = vadd.f32 %v1586_v27, %v915_v17  ;;  %v1579_v33 = vadd.f32 %v1577_v28, %v1573_v26  ;;  %v1581_v34 = vadd.f32 %v1575_v0, %v876_v30  ;;  %v1583_v35 = vmul.f32 %v876_v30, %v876_v30 }
  0xf1   : > { %v1590_v36 = vadd.f32 %v1588_v23, %v1584_v29  ;;  %v956_v38 = vpop.f32.mrf.mxu0  ;;  %v999_v39 = vpop.f32.mrf.mxu1  ;;  %v1595_v45 = vmul.f32 %v919_v31, %v919_v31 }
  0xf2   : > { %v1585_v40 = vadd.f32 %v1583_v35, %v1579_v33  ;;  %v1587_v41 = vadd.f32 %v1581_v34, %v917_v25  ;;  %v1598_v42 = vadd.f32 %v1592_v32, %v956_v38  ;;  %v1600_v43 = vmul.f32 %v956_v38, %v956_v38 }
  0xf3   : > { %v1596_v44 = vadd.f32 %v1594_v9, %v1590_v36  ;;  %v958_v46 = vpop.f32.mrf.mxu0  ;;  %v1001_v47 = vpop.f32.mrf.mxu1  ;;  %v1612_v53 = vmul.f32 %v999_v39, %v999_v39 }
  0xf4   : > { %v1591_v48 = vadd.f32 %v1589_v37, %v1585_v40  ;;  %v1593_v49 = vadd.f32 %v1587_v41, %v919_v31  ;;  %v1604_v50 = vadd.f32 %v1598_v42, %v958_v46  ;;  %v1606_v51 = vmul.f32 %v958_v46, %v958_v46 }
  0xf5   : > { %v1602_v52 = vadd.f32 %v1600_v43, %v1596_v44  ;;  %v960_v54 = vpop.f32.mrf.mxu0  ;;  %v1003_v55 = vpop.f32.mrf.mxu1  ;;  %v1618_v5 = vmul.f32 %v1001_v47, %v1001_v47 }
  0xf6   : > { %v1597_v56 = vadd.f32 %v1595_v45, %v1591_v48  ;;  %v1610_v57 = vadd.f32 %v1604_v50, %v999_v39  ;;  %v1599_v58 = vadd.f32 %v1593_v49, %v960_v54  ;;  %v1601_v59 = vmul.f32 %v960_v54, %v960_v54 }
  0xf7   : > { %v1608_v60 = vadd.f32 %v1606_v51, %v1602_v52  ;;  %v962_v61 = vpop.f32.mrf.mxu0  ;;  %v1005_v62 = vpop.f32.mrf.mxu1  ;;  %v1613_v6 = vmul.f32 %v1003_v55, %v1003_v55 }
  0xf8   : > { %v1616_v63 = vadd.f32 %v1610_v57, %v1001_v47  ;;  %v1603_v1 = vadd.f32 %v1601_v59, %v1597_v56  ;;  %v1605_v2 = vadd.f32 %v1599_v58, %v962_v61  ;;  %v1607_v3 = vmul.f32 %v962_v61, %v962_v61 }
  0xf9   : > { %v1614_v4 = vadd.f32 %v1612_v53, %v1608_v60  ;;  %v1042_v7 = vpop.f32.mrf.mxu0  ;;  %v1085_v8 = vpop.f32.mrf.mxu1  ;;  %v1619_v15 = vmul.f32 %v1005_v62, %v1005_v62 }
  0xfa   : > { %v1609_v10 = vadd.f32 %v1607_v3, %v1603_v1  ;;  %v1611_v11 = vadd.f32 %v1605_v2, %v1003_v55  ;;  %v1622_v12 = vadd.f32 %v1616_v63, %v1042_v7  ;;  %v1624_v13 = vmul.f32 %v1042_v7, %v1042_v7 }
  0xfb   : > { %v1620_v14 = vadd.f32 %v1618_v5, %v1614_v4  ;;  %v1044_v16 = vpop.f32.mrf.mxu0  ;;  %v1087_v17 = vpop.f32.mrf.mxu1  ;;  %v1636_v23 = vmul.f32 %v1085_v8, %v1085_v8 }
  0xfc   : > { %v1615_v18 = vadd.f32 %v1613_v6, %v1609_v10  ;;  %v1617_v19 = vadd.f32 %v1611_v11, %v1005_v62  ;;  %v1628_v20 = vadd.f32 %v1622_v12, %v1044_v16  ;;  %v1630_v21 = vmul.f32 %v1044_v16, %v1044_v16 }
  0xfd   : > { %v1626_v22 = vadd.f32 %v1624_v13, %v1620_v14  ;;  %v1046_v24 = vpop.f32.mrf.mxu0  ;;  %v1089_v25 = vpop.f32.mrf.mxu1  ;;  %v1642_v9 = vmul.f32 %v1087_v17, %v1087_v17 }
  0xfe   : > { %v1621_v26 = vadd.f32 %v1619_v15, %v1615_v18  ;;  %v1634_v27 = vadd.f32 %v1628_v20, %v1085_v8  ;;  %v1623_v0 = vadd.f32 %v1617_v19, %v1046_v24  ;;  %v1625_v28 = vmul.f32 %v1046_v24, %v1046_v24 }
  0xff   : > { %v1632_v29 = vadd.f32 %v1630_v21, %v1626_v22  ;;  %v1048_v30 = vpop.f32.mrf.mxu0  ;;  %v1091_v31 = vpop.f32.mrf.mxu1  ;;  %v1637_v37 = vmul.f32 %v1089_v25, %v1089_v25 }
 0x100   : > { %v1640_v32 = vadd.f32 %v1634_v27, %v1087_v17  ;;  %v1627_v33 = vadd.f32 %v1625_v28, %v1621_v26  ;;  %v1629_v34 = vadd.f32 %v1623_v0, %v1048_v30  ;;  %v1631_v35 = vmul.f32 %v1048_v30, %v1048_v30 }
 0x101   : > { %v1638_v36 = vadd.f32 %v1636_v23, %v1632_v29  ;;  %v1128_v38 = vpop.f32.mrf.mxu0  ;;  %v1171_v39 = vpop.f32.mrf.mxu1  ;;  %v1643_v45 = vmul.f32 %v1091_v31, %v1091_v31 }
 0x102   : > { %v1633_v40 = vadd.f32 %v1631_v35, %v1627_v33  ;;  %v1635_v41 = vadd.f32 %v1629_v34, %v1089_v25  ;;  %v1646_v42 = vadd.f32 %v1640_v32, %v1128_v38  ;;  %v1648_v43 = vmul.f32 %v1128_v38, %v1128_v38 }
 0x103   : > { %v1644_v44 = vadd.f32 %v1642_v9, %v1638_v36  ;;  %v1130_v46 = vpop.f32.mrf.mxu0  ;;  %v1173_v47 = vpop.f32.mrf.mxu1  ;;  %v1660_v53 = vmul.f32 %v1171_v39, %v1171_v39 }
 0x104   : > { %v1639_v48 = vadd.f32 %v1637_v37, %v1633_v40  ;;  %v1641_v49 = vadd.f32 %v1635_v41, %v1091_v31  ;;  %v1652_v50 = vadd.f32 %v1646_v42, %v1130_v46  ;;  %v1654_v51 = vmul.f32 %v1130_v46, %v1130_v46 }
 0x105   : > { %v1650_v52 = vadd.f32 %v1648_v43, %v1644_v44  ;;  %v1132_v54 = vpop.f32.mrf.mxu0  ;;  %v1175_v55 = vpop.f32.mrf.mxu1  ;;  %v1666_v5 = vmul.f32 %v1173_v47, %v1173_v47 }
 0x106   : > { %v1645_v56 = vadd.f32 %v1643_v45, %v1639_v48  ;;  %v1658_v57 = vadd.f32 %v1652_v50, %v1171_v39  ;;  %v1647_v58 = vadd.f32 %v1641_v49, %v1132_v54  ;;  %v1649_v59 = vmul.f32 %v1132_v54, %v1132_v54 }
 0x107   : > { %v1656_v60 = vadd.f32 %v1654_v51, %v1650_v52  ;;  %v1134_v61 = vpop.f32.mrf.mxu0  ;;  %v1177_v62 = vpop.f32.mrf.mxu1  ;;  %v1661_v6 = vmul.f32 %v1175_v55, %v1175_v55 }
 0x108   : > { %v1664_v63 = vadd.f32 %v1658_v57, %v1173_v47  ;;  %v1651_v1 = vadd.f32 %v1649_v59, %v1645_v56  ;;  %v1653_v2 = vadd.f32 %v1647_v58, %v1134_v61  ;;  %v1655_v3 = vmul.f32 %v1134_v61, %v1134_v61 }
 0x109   : > { %v1662_v4 = vadd.f32 %v1660_v53, %v1656_v60  ;;  %v1214_v7 = vpop.f32.mrf.mxu0  ;;  %v1257_v8 = vpop.f32.mrf.mxu1  ;;  %v1667_v15 = vmul.f32 %v1177_v62, %v1177_v62 }
 0x10a   : > { %v1657_v10 = vadd.f32 %v1655_v3, %v1651_v1  ;;  %v1659_v11 = vadd.f32 %v1653_v2, %v1175_v55  ;;  %v1670_v12 = vadd.f32 %v1664_v63, %v1214_v7  ;;  %v1672_v13 = vmul.f32 %v1214_v7, %v1214_v7 }
 0x10b   : > { %v1668_v14 = vadd.f32 %v1666_v5, %v1662_v4  ;;  %v1216_v16 = vpop.f32.mrf.mxu0  ;;  %v1259_v17 = vpop.f32.mrf.mxu1  ;;  %v1684_v23 = vmul.f32 %v1257_v8, %v1257_v8 }
 0x10c   : > { %v1663_v18 = vadd.f32 %v1661_v6, %v1657_v10  ;;  %v1665_v19 = vadd.f32 %v1659_v11, %v1177_v62  ;;  %v1676_v20 = vadd.f32 %v1670_v12, %v1216_v16  ;;  %v1678_v21 = vmul.f32 %v1216_v16, %v1216_v16 }
 0x10d   : > { %v1674_v22 = vadd.f32 %v1672_v13, %v1668_v14  ;;  %v1218_v24 = vpop.f32.mrf.mxu0  ;;  %v1261_v25 = vpop.f32.mrf.mxu1  ;;  %v1690_v9 = vmul.f32 %v1259_v17, %v1259_v17 }
 0x10e   : > { %v1669_v26 = vadd.f32 %v1667_v15, %v1663_v18  ;;  %v1682_v27 = vadd.f32 %v1676_v20, %v1257_v8  ;;  %v1671_v0 = vadd.f32 %v1665_v19, %v1218_v24  ;;  %v1673_v28 = vmul.f32 %v1218_v24, %v1218_v24 }
 0x10f   : > { %v1680_v29 = vadd.f32 %v1678_v21, %v1674_v22  ;;  %v1220_v30 = vpop.f32.mrf.mxu0  ;;  %v1263_v31 = vpop.f32.mrf.mxu1  ;;  %v1685_v37 = vmul.f32 %v1261_v25, %v1261_v25 }
 0x110   : > { %v1688_v32 = vadd.f32 %v1682_v27, %v1259_v17  ;;  %v1675_v33 = vadd.f32 %v1673_v28, %v1669_v26  ;;  %v1677_v34 = vadd.f32 %v1671_v0, %v1220_v30  ;;  %v1679_v35 = vmul.f32 %v1220_v30, %v1220_v30 }
 0x111   : > { %v1686_v36 = vadd.f32 %v1684_v23, %v1680_v29  ;;  %v1300_v38 = vpop.f32.mrf.mxu0  ;;  %v1343_v39 = vpop.f32.mrf.mxu1  ;;  %v1691_v45 = vmul.f32 %v1263_v31, %v1263_v31 }
 0x112   : > { %v1681_v40 = vadd.f32 %v1679_v35, %v1675_v33  ;;  %v1683_v41 = vadd.f32 %v1677_v34, %v1261_v25  ;;  %v1694_v42 = vadd.f32 %v1688_v32, %v1300_v38  ;;  %v1696_v43 = vmul.f32 %v1300_v38, %v1300_v38 }
 0x113   : > { %v1692_v44 = vadd.f32 %v1690_v9, %v1686_v36  ;;  %v1302_v46 = vpop.f32.mrf.mxu0  ;;  %v1345_v47 = vpop.f32.mrf.mxu1  ;;  %v1708_v53 = vmul.f32 %v1343_v39, %v1343_v39 }
 0x114   : > { %v1687_v48 = vadd.f32 %v1685_v37, %v1681_v40  ;;  %v1689_v49 = vadd.f32 %v1683_v41, %v1263_v31  ;;  %v1700_v50 = vadd.f32 %v1694_v42, %v1302_v46  ;;  %v1702_v51 = vmul.f32 %v1302_v46, %v1302_v46 }
 0x115   : > { %v1698_v52 = vadd.f32 %v1696_v43, %v1692_v44  ;;  %v1304_v54 = vpop.f32.mrf.mxu0  ;;  %v1347_v55 = vpop.f32.mrf.mxu1  ;;  %v1714_v5 = vmul.f32 %v1345_v47, %v1345_v47 }
 0x116   : > { %v1693_v56 = vadd.f32 %v1691_v45, %v1687_v48  ;;  %v1706_v57 = vadd.f32 %v1700_v50, %v1343_v39  ;;  %v1695_v58 = vadd.f32 %v1689_v49, %v1304_v54  ;;  %v1697_v59 = vmul.f32 %v1304_v54, %v1304_v54 }
 0x117   : > { %v1704_v60 = vadd.f32 %v1702_v51, %v1698_v52  ;;  %v1306_v61 = vpop.f32.mrf.mxu0  ;;  %v1349_v62 = vpop.f32.mrf.mxu1  ;;  %v1709_v6 = vmul.f32 %v1347_v55, %v1347_v55 }
 0x118   : > { %v1712_v63 = vadd.f32 %v1706_v57, %v1345_v47  ;;  %v1699_v1 = vadd.f32 %v1697_v59, %v1693_v56  ;;  %v1701_v2 = vadd.f32 %v1695_v58, %v1306_v61  ;;  %v1703_v3 = vmul.f32 %v1306_v61, %v1306_v61 }
 0x119   : > { %v1710_v4 = vadd.f32 %v1708_v53, %v1704_v60  ;;  %v1386_v7 = vpop.f32.mrf.mxu0  ;;  %v1429_v8 = vpop.f32.mrf.mxu1  ;;  %v1715_v15 = vmul.f32 %v1349_v62, %v1349_v62 }
 0x11a   : > { %v1705_v10 = vadd.f32 %v1703_v3, %v1699_v1  ;;  %v1707_v11 = vadd.f32 %v1701_v2, %v1347_v55  ;;  %v1718_v12 = vadd.f32 %v1712_v63, %v1386_v7  ;;  %v1720_v13 = vmul.f32 %v1386_v7, %v1386_v7 }
 0x11b   : > { %v1716_v14 = vadd.f32 %v1714_v5, %v1710_v4  ;;  %v1388_v16 = vpop.f32.mrf.mxu0  ;;  %v1431_v17 = vpop.f32.mrf.mxu1  ;;  %v1732_v23 = vmul.f32 %v1429_v8, %v1429_v8 }
 0x11c   : > { %v1711_v18 = vadd.f32 %v1709_v6, %v1705_v10  ;;  %v1713_v19 = vadd.f32 %v1707_v11, %v1349_v62  ;;  %v1724_v20 = vadd.f32 %v1718_v12, %v1388_v16  ;;  %v1726_v21 = vmul.f32 %v1388_v16, %v1388_v16 }
 0x11d   : > { %v1722_v22 = vadd.f32 %v1720_v13, %v1716_v14  ;;  %v1390_v24 = vpop.f32.mrf.mxu0  ;;  %v1433_v25 = vpop.f32.mrf.mxu1  ;;  %v1738_v9 = vmul.f32 %v1431_v17, %v1431_v17 }
 0x11e   : > { %v1717_v26 = vadd.f32 %v1715_v15, %v1711_v18  ;;  %v1730_v27 = vadd.f32 %v1724_v20, %v1429_v8  ;;  %v1719_v0 = vadd.f32 %v1713_v19, %v1390_v24  ;;  %v1721_v28 = vmul.f32 %v1390_v24, %v1390_v24 }
 0x11f   : > { %v1728_v29 = vadd.f32 %v1726_v21, %v1722_v22  ;;  %v1392_v30 = vpop.f32.mrf.mxu0  ;;  %v1435_v31 = vpop.f32.mrf.mxu1  ;;  %v1733_v37 = vmul.f32 %v1433_v25, %v1433_v25 }
 0x120   : > { %v1736_v32 = vadd.f32 %v1730_v27, %v1431_v17  ;;  %v1723_v33 = vadd.f32 %v1721_v28, %v1717_v26  ;;  %v1725_v34 = vadd.f32 %v1719_v0, %v1392_v30  ;;  %v1727_v35 = vmul.f32 %v1392_v30, %v1392_v30 }
 0x121   : > { %v1734_v36 = vadd.f32 %v1732_v23, %v1728_v29  ;;  %v1472_v38 = vpop.f32.mrf.mxu0  ;;  %v1515_v39 = vpop.f32.mrf.mxu1  ;;  %v1739_v45 = vmul.f32 %v1435_v31, %v1435_v31 }
 0x122   : > { %v1729_v40 = vadd.f32 %v1727_v35, %v1723_v33  ;;  %v1731_v41 = vadd.f32 %v1725_v34, %v1433_v25  ;;  %v1742_v42 = vadd.f32 %v1736_v32, %v1472_v38  ;;  %v1744_v43 = vmul.f32 %v1472_v38, %v1472_v38 }
 0x123   : > { %v1740_v44 = vadd.f32 %v1738_v9, %v1734_v36  ;;  %v1474_v46 = vpop.f32.mrf.mxu0  ;;  %v1966_v47 = vpop.f32.mrf.mxu1  ;;  %v1756_v53 = vmul.f32 %v1515_v39, %v1515_v39 }
 0x124   : > { %v1735_v48 = vadd.f32 %v1733_v37, %v1729_v40  ;;  %v1737_v49 = vadd.f32 %v1731_v41, %v1435_v31  ;;  %v1748_v50 = vadd.f32 %v1742_v42, %v1474_v46  ;;  %v1750_v51 = vmul.f32 %v1474_v46, %v1474_v46 }
 0x125   : > { %v1746_v52 = vadd.f32 %v1744_v43, %v1740_v44  ;;  %v1476_v54 = vpop.f32.mrf.mxu0  ;;  %v1518_v55 = vpop.f32.mrf.mxu1 }
 0x126   : > { %v1741_v56 = vadd.f32 %v1739_v45, %v1735_v48  ;;  %v1754_v57 = vadd.f32 %v1748_v50, %v1515_v39  ;;  %v1743_v58 = vadd.f32 %v1737_v49, %v1476_v54  ;;  %v1745_v59 = vmul.f32 %v1476_v54, %v1476_v54 }
 0x127   : > { %v1752_v60 = vadd.f32 %v1750_v51, %v1746_v52  ;;  %v1478_v61 = vpop.f32.mrf.mxu0  ;;  %v1967_v62 = vpop.f32.mrf.mxu1  ;;  %v1757_v4 = vmul.f32 %v1518_v55, %v1518_v55 }
 0x128   : > { %1769 = vst [vmem:[%s171_s22] sm:$0xff] %v1754_v57  ;;  %v1747_v63 = vadd.f32 %v1745_v59, %v1741_v56  ;;  %v1749_v1 = vadd.f32 %v1743_v58, %v1478_v61  ;;  %v1751_v2 = vmul.f32 %v1478_v61, %v1478_v61 }
 0x129   : > { %v1758_v3 = vadd.f32 %v1756_v53, %v1752_v60 }
 0x12a   : > { %v1753_v5 = vadd.f32 %v1751_v2, %v1747_v63  ;;  %v1755_v6 = vadd.f32 %v1749_v1, %v1518_v55 }
 0x12b   : > { %1952 = vst [vmem:[%s171_s22 + $0x10] sm:$0xff] %v1758_v3 }
 0x12c   : > { %v1759_v7 = vadd.f32 %v1757_v4, %v1753_v5  ;;  %1770 = vst [vmem:[%s171_s22 + $0x8] sm:$0xff] %v1755_v6 }
 0x12e   : > { %1953 = vst [vmem:[%s171_s22 + $0x18] sm:$0xff] %v1759_v7 }
 0x12f PF: > { %s12_s11 = sadd.s32 1, %s2135_s11   ;;  %s2339_s9 = smov %s2131_s10 }
 0x130   : > { %p9_p5 = scmp.ge.s32.totalorder %s12_s11, 4   ;;  %s2340_s10 = smov %s2342_s12 }
 0x132   :  { %11 = sbr.rel (!%p9_p5) target bundleno = 2 (0x2), region = 67 }

// kernel: squeeze.14
= control target key start
LH: loop header
LB: loop body
LE: loop exit
PB: predicated region body
PF: predicated region fallthrough
CT: control target
= control target key end

     0   :  { %s67_s8 = smov 122   ;;  %vm8_vm0 = vcmask 15360   ;;  %s68_s11 = smov 124   ;;  %s118_s0 = inlined_call_operand.vmem [shape: f32[16], index: 0, kind: input, shape index: {}]   ;;  %s119_s1 = inlined_call_operand.vmem [shape: f32[8,2], index: 1, kind: output, shape index: {}]  }
   0x1   :  { %v5_v0 = vld [vmem:[%s118_s0] sm:$0x1]  ;;  %s66_s0 = smov 126   ;;  %s69_s12 = smov 120  }
   0x2   :  { %6 = vst [vmem:[#allocation0] sm:$0x1] %v5_v0  ;;  %s70_s13 = smov 118   ;;  %s71_s14 = smov 116  }
   0x3   :  { %s72_s15 = smov 114  }
   0x9   :  { %v10_v1 = vld [vmem:[#allocation0] sm:$0x1]  }
   0xa   :  { %v22_v2 = vld [vmem:[#allocation0] sm:$0x1]   ;;  %11 = vrot.lane.b32.xlu0 %v10_v1, %s66_s0 }
   0xb   :  { %23 = vrot.lane.b32.xlu1 %v22_v2, %s67_s8  ;;  %v16_v3 = vld [vmem:[#allocation0] sm:$0x1]  }
   0xc   :  { %v28_v4 = vld [vmem:[#allocation0] sm:$0x1]  }
   0xd   :  { %v7_v5 = vld [vmem:[#allocation0] sm:$0x1]  }
   0xe   :  { %9 = vst.msk [vmem:[%s119_s1] sm:$0x1] %vm8_vm0, %v7_v5   ;;  %17 = vrot.lane.b32.xlu0 %v16_v3, %s68_s11  ;;  %v34_v6 = vld [vmem:[#allocation0] sm:$0x1]  }
   0xf   :  { %29 = vrot.lane.b32.xlu1 %v28_v4, %s69_s12  ;;  %v40_v7 = vld [vmem:[#allocation0] sm:$0x1]  }
  0x10   :  { %v46_v8 = vld [vmem:[#allocation0] sm:$0x1]  }
  0x12   :  { %35 = vrot.lane.b32.xlu0 %v34_v6, %s70_s13 }
  0x13   :  { %41 = vrot.lane.b32.xlu1 %v40_v7, %s71_s14 }
  0x16   :  { %47 = vrot.lane.b32.xlu0 %v46_v8, %s72_s15 }
  0x7c   :  { %v12_v9 = vpop.permute.xlu0 %11  }
  0x7d   :  { %v24_v10 = vpop.permute.xlu1 %23   ;;  %52 = vst.msk [vmem:[%s119_s1 + $0x1] sm:$0x1] %vm8_vm0, %v12_v9  }
  0x7e   :  { %54 = vst.msk [vmem:[%s119_s1 + $0x3] sm:$0x1] %vm8_vm0, %v24_v10  }
  0x80   :  { %v18_v11 = vpop.permute.xlu0 %17  }
  0x81   :  { %v30_v12 = vpop.permute.xlu1 %29   ;;  %53 = vst.msk [vmem:[%s119_s1 + $0x2] sm:$0x1] %vm8_vm0, %v18_v11  }
  0x82   :  { %55 = vst.msk [vmem:[%s119_s1 + $0x4] sm:$0x1] %vm8_vm0, %v30_v12  }
  0x84   :  { %v36_v13 = vpop.permute.xlu0 %35  }
  0x85   :  { %v42_v14 = vpop.permute.xlu1 %41   ;;  %56 = vst.msk [vmem:[%s119_s1 + $0x5] sm:$0x1] %vm8_vm0, %v36_v13  }
  0x86   :  { %57 = vst.msk [vmem:[%s119_s1 + $0x6] sm:$0x1] %vm8_vm0, %v42_v14  }
  0x88   :  { %v48_v15 = vpop.permute.xlu0 %47  }
  0x89   :  { %58 = vst.msk [vmem:[%s119_s1 + $0x7] sm:$0x1] %vm8_vm0, %v48_v15  }

// kernel: tile.83
= control target key start
LH: loop header
LB: loop body
LE: loop exit
PB: predicated region body
PF: predicated region fallthrough
CT: control target
= control target key end

     0   :  { %s22_s0 = inlined_call_operand.vmem [shape: f32[2], index: 0, kind: input, shape index: {}]   ;;  %s23_s1 = inlined_call_operand.vmem [shape: f32[8,2], index: 1, kind: output, shape index: {}]  }
   0x1   :  { %v4_v0 = vld [vmem:[%s22_s0] ss:$0 sm:$0xff] }
   0x2   :  { %5 = vst [vmem:[%s23_s1] sm:$0xff] %v4_v0 }

// kernel: tile.7
= control target key start
LH: loop header
LB: loop body
LE: loop exit
PB: predicated region body
PF: predicated region fallthrough
CT: control target
= control target key end

     0   :  { %vm3_vm0 = vcmask 7168   ;;  %s13_s9 = smov 127   ;;  %s33_s0 = inlined_call_operand.vmem [shape: f32[8,2], index: 0, kind: input, shape index: {}]   ;;  %s34_s1 = inlined_call_operand.vmem [shape: f32[16,1], index: 1, kind: output, shape index: {}]  }
   0x1   :  { %v2_v0 = vld [vmem:[%s33_s0] sm:$0xff]  }
   0x2   :  { %4 = vst.msk [vmem:[%s34_s1] ss:$2 sm:$0xff] %vm3_vm0, %v2_v0   ;;  %6 = vrot.lane.b32.xlu0 %v2_v0, %s13_s9 }
  0x74   :  { %v7_v1 = vpop.permute.xlu0 %6  }
  0x75   :  { %11 = vst.msk [vmem:[%s34_s1 + $0x1] ss:$2 sm:$0xff] %vm3_vm0, %v7_v1  }

// kernel: generator_forward.16
= control target key start
LH: loop header
LB: loop body
LE: loop exit
PB: predicated region body
PF: predicated region fallthrough
CT: control target
= control target key end

     0   :  { %s2599_s15 = smov 0   ;;  %s2601_s16 = smov 0   ;;  %s3000_s0 = inlined_call_operand.vmem [shape: bf16[16,32], index: 0, kind: input, shape index: {}]   ;;  %s3001_s1 = inlined_call_operand.vmem [shape: bf16[2,32,4992], index: 1, kind: input, shape index: {}]   ;;  %s3002_s2 = inlined_call_operand.vmem [shape: f32[16,1], index: 2, kind: input, shape index: {}]   ;;  %s3003_s3 = inlined_call_operand.vmem [shape: f32[16,1], index: 3, kind: input, shape index: {}]   ;;  %s3004_s4 = inlined_call_operand.vmem [shape: bf16[2,16,4992], index: 4, kind: output, shape index: {}]  }
   0x1   :  { %s2603_s17 = smov 0  }
   0x2 LB: > { %s26_s18 = sadd.s32 1, %s2565_s16  ;;  %p2204_p0 = scmp.ge.s32.totalorder %s2569_s17, 1  ;;  %s2569_s17 = sphi %s2603_s17, %s14_s17   ;;  %s2565_s16 = sphi %s2601_s16, %s3006_s16   ;;  %s2561_s15 = sphi %s2599_s15, %s3005_s15  }
   0x3   : > { %p28_p1 = scmp.ge.s32.totalorder %s26_s18, 2  ;;  %p183_p2 = scmp.lt.s32.totalorder %s2569_s17, 3 }
   0x5   : > { %s3008_s18 = smov (%p28_p1, %s26_s18), 0  ;;  %p184_p3 = pnand %p2204_p0, %p183_p2 }
   0x6   : > { %p218_p4 = scmp.lt.s32.totalorder (!%p184_p3), %s2561_s15, 1 }
   0x7   : > { %187 = sbr.rel (%p184_p3) target bundleno = 305 (0x131), region = 36 }
   0xc   : > { %v2571_v0 = vmov 0   ;;  %v1579_v1 = vld [vmem:[%s3002_s2] sm:$0xff]  ;;  %s3010_s15 = smov (!%p218_p4, %s2561_s15), 1  ;;  %v1580_v3 = vld [vmem:[%s3002_s2 + $0x8] sm:$0xff]  ;;  %vm717_vm0 = vcmask 261120   ;;  %vm2573_vm1 = vmmov 0  }
   0xd   : > { %753 = vmatprep.mubr.bf16.mxu0 %v2571_v0  ;;  %796 = vmatprep.mubr.bf16.mxu1 %v2571_v0  ;;  %v1669_v2 = vld [vmem:[%s3003_s3] sm:$0xff]  ;;  %s2399_s23 = smul.u32 624, %s3010_s15  ;;  %v1670_v4 = vld [vmem:[%s3003_s3 + $0x8] sm:$0xff] }
   0xe   : > { %2428 = vset.pattern.permute.xlu0 %v2571_v0  ;;  %2429 = vset.pattern.permute.xlu1 %v2571_v0  ;;  %v2652_v13 = vld [vmem:[%s3000_s0] sm:$0xff]   ;;  %s2400_s7 = smul.u32 312, %s3010_s15 }
   0xf   : > { %1583 = vperm.xlu0 %2428, %v1579_v1   ;;  %1673 = vperm.xlu1 %2429, %v1669_v2   ;;  %s2639_s30 = scalar_lea.vmem %s3001_s1, %s2399_s23 }
  0x10   : > { %v2430_v5 = vld [vmem:[%s2639_s30 + $0x13c] ss:$156 sps:$4 sm:$0xff]   ;;  %v2432_v6 = vld [vmem:[%s2639_s30 + $0x144] ss:$156 sps:$4 sm:$0xff]   ;;  %v2438_v10 = vld [vmem:[%s2639_s30 + $0xc] ss:$156 sps:$4 sm:$0xff]   ;;  %s2805_s10 = scalar_lea.vmem %s3004_s4, %s2400_s7 }
  0x11   : > { %733 = vmatprep.subr.bf16.mxu0 %v2430_v5  ;;  %v2434_v7 = vld [vmem:[%s2639_s30 + $0x138] ss:$156 sps:$4 sm:$0xff]   ;;  %v2435_v8 = vld [vmem:[%s2639_s30 + $0x140] ss:$156 sps:$4 sm:$0xff]   ;;  %776 = vmatprep.subr.bf16.mxu1 %v2432_v6  ;;  %v2441_v12 = vld [vmem:[%s2639_s30 + $0x8] ss:$156 sps:$4 sm:$0xff]  }
  0x12   : > { %v2436_v9 = vld [vmem:[%s2639_s30 + $0x4] ss:$156 sps:$4 sm:$0xff]   ;;  %734 = vmatpush1.bf16.msra.mxu0 %v2434_v7  ;;  %777 = vmatpush1.bf16.msra.mxu1 %v2435_v8  ;;  %v2445_v14 = vld [vmem:[%s2639_s30 + $0x14c] ss:$156 sps:$4 sm:$0xff]   ;;  %v2448_v16 = vld [vmem:[%s2639_s30 + $0x154] ss:$156 sps:$4 sm:$0xff]  }
  0x13   : > { %1588 = vperm.xlu0 %2428, %v1580_v3   ;;  %1678 = vperm.xlu1 %2429, %v1670_v4   ;;  %v2440_v11 = vld [vmem:[%s2639_s30] ss:$156 sps:$4 sm:$0xff]   ;;  %v2443_v15 = vld [vmem:[%s2639_s30 + $0x148] ss:$156 sps:$4 sm:$0xff]   ;;  %v2446_v17 = vld [vmem:[%s2639_s30 + $0x150] ss:$156 sps:$4 sm:$0xff]  }
  0x14   : > { %735 = vmatprep.subr.bf16.mxu0 %v2436_v9  ;;  %778 = vmatprep.subr.bf16.mxu1 %v2438_v10  ;;  %v2451_v18 = vld [vmem:[%s2639_s30 + $0x14] ss:$156 sps:$4 sm:$0xff]   ;;  %v2454_v19 = vld [vmem:[%s2639_s30 + $0x1c] ss:$156 sps:$4 sm:$0xff]   ;;  %v2460_v23 = vld [vmem:[%s2639_s30 + $0x164] ss:$156 sps:$4 sm:$0xff]  }
  0x15   : > { %v2449_v20 = vld [vmem:[%s2639_s30 + $0x10] ss:$156 sps:$4 sm:$0xff]   ;;  %v2452_v21 = vld [vmem:[%s2639_s30 + $0x18] ss:$156 sps:$4 sm:$0xff]   ;;  %v2458_v25 = vld [vmem:[%s2639_s30 + $0x160] ss:$156 sps:$4 sm:$0xff]  }
  0x16   : > { %736 = vmatpush1.bf16.msra.mxu0 %v2440_v11  ;;  %779 = vmatpush1.bf16.msra.mxu1 %v2441_v12  ;;  %v2457_v22 = vld [vmem:[%s2639_s30 + $0x15c] ss:$156 sps:$4 sm:$0xff]   ;;  %v2463_v26 = vld [vmem:[%s2639_s30 + $0x24] ss:$156 sps:$4 sm:$0xff]   ;;  %v2466_v27 = vld [vmem:[%s2639_s30 + $0x2c] ss:$156 sps:$4 sm:$0xff]  }
  0x17   : > { %819 = vmatprep.subr.bf16.mxu0 %v2445_v14  ;;  %862 = vmatprep.subr.bf16.mxu1 %v2448_v16  ;;  %v2455_v24 = vld [vmem:[%s2639_s30 + $0x158] ss:$156 sps:$4 sm:$0xff]   ;;  %v2461_v28 = vld [vmem:[%s2639_s30 + $0x20] ss:$156 sps:$4 sm:$0xff]   ;;  %v2464_v29 = vld [vmem:[%s2639_s30 + $0x28] ss:$156 sps:$4 sm:$0xff]  }
  0x18   : > { %v2469_v30 = vld [vmem:[%s2639_s30 + $0x16c] ss:$156 sps:$4 sm:$0xff]   ;;  %v2472_v31 = vld [vmem:[%s2639_s30 + $0x174] ss:$156 sps:$4 sm:$0xff]   ;;  %v2478_v35 = vld [vmem:[%s2639_s30 + $0x3c] ss:$156 sps:$4 sm:$0xff]  }
  0x19   : > { %2286 = vmatmul.mubr.msk.bf16.vlgmr.msra.gmra.mxu0 %vm717_vm0, %v2652_v13  ;;  %2287 = vmatmul.mubr.msk.bf16.vlgmr.msra.gmra.mxu1 %vm717_vm0, %v2652_v13  ;;  %v2467_v32 = vld [vmem:[%s2639_s30 + $0x168] ss:$156 sps:$4 sm:$0xff]   ;;  %v2470_v33 = vld [vmem:[%s2639_s30 + $0x170] ss:$156 sps:$4 sm:$0xff]   ;;  %v2476_v37 = vld [vmem:[%s2639_s30 + $0x38] ss:$156 sps:$4 sm:$0xff]  }
  0x1a   : > { %820 = vmatpush1.bf16.msra.mxu0 %v2443_v15  ;;  %863 = vmatpush1.bf16.msra.mxu1 %v2446_v17  ;;  %v2475_v34 = vld [vmem:[%s2639_s30 + $0x34] ss:$156 sps:$4 sm:$0xff]   ;;  %v2481_v38 = vld [vmem:[%s2639_s30 + $0x17c] ss:$156 sps:$4 sm:$0xff]   ;;  %v2484_v39 = vld [vmem:[%s2639_s30 + $0x184] ss:$156 sps:$4 sm:$0xff]  }
  0x1b   : > { %821 = vmatprep.subr.bf16.mxu0 %v2451_v18  ;;  %864 = vmatprep.subr.bf16.mxu1 %v2454_v19  ;;  %v2473_v36 = vld [vmem:[%s2639_s30 + $0x30] ss:$156 sps:$4 sm:$0xff]   ;;  %v2479_v40 = vld [vmem:[%s2639_s30 + $0x178] ss:$156 sps:$4 sm:$0xff]   ;;  %v2482_v41 = vld [vmem:[%s2639_s30 + $0x180] ss:$156 sps:$4 sm:$0xff]  }
  0x1c   : > { %839 = vmatprep.mubr.bf16.mxu0 %v2571_v0  ;;  %882 = vmatprep.mubr.bf16.mxu1 %v2571_v0  ;;  %v2487_v42 = vld [vmem:[%s2639_s30 + $0x44] ss:$156 sps:$4 sm:$0xff]   ;;  %v2490_v43 = vld [vmem:[%s2639_s30 + $0x4c] ss:$156 sps:$4 sm:$0xff]   ;;  %v2496_v47 = vld [vmem:[%s2639_s30 + $0x194] ss:$156 sps:$4 sm:$0xff]  }
  0x1d   : > { %v2485_v44 = vld [vmem:[%s2639_s30 + $0x40] ss:$156 sps:$4 sm:$0xff]   ;;  %v2488_v45 = vld [vmem:[%s2639_s30 + $0x48] ss:$156 sps:$4 sm:$0xff]   ;;  %v2494_v49 = vld [vmem:[%s2639_s30 + $0x190] ss:$156 sps:$4 sm:$0xff]  }
  0x1e   : > { %822 = vmatpush1.bf16.msra.mxu0 %v2449_v20  ;;  %865 = vmatpush1.bf16.msra.mxu1 %v2452_v21  ;;  %v2493_v46 = vld [vmem:[%s2639_s30 + $0x18c] ss:$156 sps:$4 sm:$0xff]   ;;  %v2499_v50 = vld [vmem:[%s2639_s30 + $0x54] ss:$156 sps:$4 sm:$0xff]   ;;  %v2502_v51 = vld [vmem:[%s2639_s30 + $0x5c] ss:$156 sps:$4 sm:$0xff]  }
  0x1f   : > { %905 = vmatprep.subr.bf16.mxu0 %v2457_v22  ;;  %948 = vmatprep.subr.bf16.mxu1 %v2460_v23  ;;  %v2491_v48 = vld [vmem:[%s2639_s30 + $0x188] ss:$156 sps:$4 sm:$0xff]   ;;  %v2497_v52 = vld [vmem:[%s2639_s30 + $0x50] ss:$156 sps:$4 sm:$0xff]   ;;  %v2500_v53 = vld [vmem:[%s2639_s30 + $0x58] ss:$156 sps:$4 sm:$0xff]  }
  0x20   : > { %v2505_v54 = vld [vmem:[%s2639_s30 + $0x19c] ss:$156 sps:$4 sm:$0xff]   ;;  %v2508_v55 = vld [vmem:[%s2639_s30 + $0x1a4] ss:$156 sps:$4 sm:$0xff]   ;;  %v2514_v59 = vld [vmem:[%s2639_s30 + $0x6c] ss:$156 sps:$4 sm:$0xff]  }
  0x21   : > { %2288 = vmatmul.mubr.msk.bf16.vlgmr.msra.gmra.mxu0 %vm717_vm0, %v2652_v13  ;;  %2289 = vmatmul.mubr.msk.bf16.vlgmr.msra.gmra.mxu1 %vm717_vm0, %v2652_v13  ;;  %v2503_v56 = vld [vmem:[%s2639_s30 + $0x198] ss:$156 sps:$4 sm:$0xff]   ;;  %v2506_v57 = vld [vmem:[%s2639_s30 + $0x1a0] ss:$156 sps:$4 sm:$0xff]   ;;  %v2512_v61 = vld [vmem:[%s2639_s30 + $0x68] ss:$156 sps:$4 sm:$0xff]  }
  0x22   : > { %906 = vmatpush1.bf16.msra.mxu0 %v2455_v24  ;;  %949 = vmatpush1.bf16.msra.mxu1 %v2458_v25  ;;  %v2511_v58 = vld [vmem:[%s2639_s30 + $0x64] ss:$156 sps:$4 sm:$0xff]   ;;  %v2517_v62 = vld [vmem:[%s2639_s30 + $0x1ac] ss:$156 sps:$4 sm:$0xff]   ;;  %v2520_v63 = vld [vmem:[%s2639_s30 + $0x1b4] ss:$156 sps:$4 sm:$0xff]  }
  0x23   : > { %907 = vmatprep.subr.bf16.mxu0 %v2463_v26  ;;  %950 = vmatprep.subr.bf16.mxu1 %v2466_v27  ;;  %v2509_v60 = vld [vmem:[%s2639_s30 + $0x60] ss:$156 sps:$4 sm:$0xff]   ;;  %v2515_v1 = vld [vmem:[%s2639_s30 + $0x1a8] ss:$156 sps:$4 sm:$0xff]   ;;  %v2518_v2 = vld [vmem:[%s2639_s30 + $0x1b0] ss:$156 sps:$4 sm:$0xff]  }
  0x24   : > { %925 = vmatprep.mubr.bf16.mxu0 %v2571_v0  ;;  %968 = vmatprep.mubr.bf16.mxu1 %v2571_v0  ;;  %v2523_v3 = vld [vmem:[%s2639_s30 + $0x74] ss:$156 sps:$4 sm:$0xff]   ;;  %v2526_v4 = vld [vmem:[%s2639_s30 + $0x7c] ss:$156 sps:$4 sm:$0xff]   ;;  %v2532_v8 = vld [vmem:[%s2639_s30 + $0x1c4] ss:$156 sps:$4 sm:$0xff]  }
  0x25   : > { %v2521_v5 = vld [vmem:[%s2639_s30 + $0x70] ss:$156 sps:$4 sm:$0xff]   ;;  %v2524_v6 = vld [vmem:[%s2639_s30 + $0x78] ss:$156 sps:$4 sm:$0xff]   ;;  %v2530_v10 = vld [vmem:[%s2639_s30 + $0x1c0] ss:$156 sps:$4 sm:$0xff]  }
  0x26   : > { %908 = vmatpush1.bf16.msra.mxu0 %v2461_v28  ;;  %951 = vmatpush1.bf16.msra.mxu1 %v2464_v29  ;;  %v2529_v7 = vld [vmem:[%s2639_s30 + $0x1bc] ss:$156 sps:$4 sm:$0xff]   ;;  %v2535_v11 = vld [vmem:[%s2639_s30 + $0x84] ss:$156 sps:$4 sm:$0xff]   ;;  %v2538_v12 = vld [vmem:[%s2639_s30 + $0x8c] ss:$156 sps:$4 sm:$0xff]  }
  0x27   : > { %991 = vmatprep.subr.bf16.mxu0 %v2469_v30  ;;  %1034 = vmatprep.subr.bf16.mxu1 %v2472_v31  ;;  %v2527_v9 = vld [vmem:[%s2639_s30 + $0x1b8] ss:$156 sps:$4 sm:$0xff]   ;;  %v2533_v14 = vld [vmem:[%s2639_s30 + $0x80] ss:$156 sps:$4 sm:$0xff]   ;;  %v2536_v15 = vld [vmem:[%s2639_s30 + $0x88] ss:$156 sps:$4 sm:$0xff]  }
  0x28   : > { %v2541_v16 = vld [vmem:[%s2639_s30 + $0x1cc] ss:$156 sps:$4 sm:$0xff]   ;;  %v2572_v19 = vmov 0.0   ;;  %v2545_v20 = vld [vmem:[%s2639_s30 + $0x94] ss:$156 sps:$4 sm:$0xff]  }
  0x29   : > { %2290 = vmatmul.mubr.msk.bf16.vlgmr.msra.gmra.mxu0 %vm717_vm0, %v2652_v13  ;;  %2291 = vmatmul.mubr.msk.bf16.vlgmr.msra.gmra.mxu1 %vm717_vm0, %v2652_v13  ;;  %v2539_v17 = vld [vmem:[%s2639_s30 + $0x1c8] ss:$156 sps:$4 sm:$0xff]   ;;  %v2542_v18 = vld [vmem:[%s2639_s30 + $0x1d0] ss:$156 sps:$4 sm:$0xff]   ;;  %v2546_v22 = vld [vmem:[%s2639_s30 + $0x98] ss:$156 sps:$4 sm:$0xff]  }
  0x2a   : > { %992 = vmatpush1.bf16.msra.mxu0 %v2467_v32  ;;  %1035 = vmatpush1.bf16.msra.mxu1 %v2470_v33  ;;  %v2543_v21 = vld [vmem:[%s2639_s30 + $0x90] ss:$156 sps:$4 sm:$0xff]  }
  0x2b   : > { %993 = vmatprep.subr.bf16.mxu0 %v2475_v34  ;;  %1036 = vmatprep.subr.bf16.mxu1 %v2478_v35 }
  0x2c   : > { %1011 = vmatprep.mubr.bf16.mxu0 %v2571_v0  ;;  %1054 = vmatprep.mubr.bf16.mxu1 %v2571_v0 }
  0x2e   : > { %994 = vmatpush1.bf16.msra.mxu0 %v2473_v36  ;;  %1037 = vmatpush1.bf16.msra.mxu1 %v2476_v37 }
  0x2f   : > { %1077 = vmatprep.subr.bf16.mxu0 %v2481_v38  ;;  %1120 = vmatprep.subr.bf16.mxu1 %v2484_v39 }
  0x31   : > { %2292 = vmatmul.mubr.msk.bf16.vlgmr.msra.gmra.mxu0 %vm717_vm0, %v2652_v13  ;;  %2293 = vmatmul.mubr.msk.bf16.vlgmr.msra.gmra.mxu1 %vm717_vm0, %v2652_v13 }
  0x32   : > { %1078 = vmatpush1.bf16.msra.mxu0 %v2479_v40  ;;  %1121 = vmatpush1.bf16.msra.mxu1 %v2482_v41 }
  0x33   : > { %1079 = vmatprep.subr.bf16.mxu0 %v2487_v42  ;;  %1122 = vmatprep.subr.bf16.mxu1 %v2490_v43 }
  0x34   : > { %1097 = vmatprep.mubr.bf16.mxu0 %v2571_v0  ;;  %1140 = vmatprep.mubr.bf16.mxu1 %v2571_v0 }
  0x36   : > { %1080 = vmatpush1.bf16.msra.mxu0 %v2485_v44  ;;  %1123 = vmatpush1.bf16.msra.mxu1 %v2488_v45 }
  0x37   : > { %1163 = vmatprep.subr.bf16.mxu0 %v2493_v46  ;;  %1206 = vmatprep.subr.bf16.mxu1 %v2496_v47 }
  0x39   : > { %2294 = vmatmul.mubr.msk.bf16.vlgmr.msra.gmra.mxu0 %vm717_vm0, %v2652_v13  ;;  %2295 = vmatmul.mubr.msk.bf16.vlgmr.msra.gmra.mxu1 %vm717_vm0, %v2652_v13 }
  0x3a   : > { %1164 = vmatpush1.bf16.msra.mxu0 %v2491_v48  ;;  %1207 = vmatpush1.bf16.msra.mxu1 %v2494_v49 }
  0x3b   : > { %1165 = vmatprep.subr.bf16.mxu0 %v2499_v50  ;;  %1208 = vmatprep.subr.bf16.mxu1 %v2502_v51 }
  0x3c   : > { %1183 = vmatprep.mubr.bf16.mxu0 %v2571_v0  ;;  %1226 = vmatprep.mubr.bf16.mxu1 %v2571_v0 }
  0x3e   : > { %1166 = vmatpush1.bf16.msra.mxu0 %v2497_v52  ;;  %1209 = vmatpush1.bf16.msra.mxu1 %v2500_v53 }
  0x3f   : > { %1249 = vmatprep.subr.bf16.mxu0 %v2505_v54  ;;  %1292 = vmatprep.subr.bf16.mxu1 %v2508_v55 }
  0x41   : > { %2296 = vmatmul.mubr.msk.bf16.vlgmr.msra.gmra.mxu0 %vm717_vm0, %v2652_v13  ;;  %2297 = vmatmul.mubr.msk.bf16.vlgmr.msra.gmra.mxu1 %vm717_vm0, %v2652_v13 }
  0x42   : > { %1250 = vmatpush1.bf16.msra.mxu0 %v2503_v56  ;;  %1293 = vmatpush1.bf16.msra.mxu1 %v2506_v57 }
  0x43   : > { %1251 = vmatprep.subr.bf16.mxu0 %v2511_v58  ;;  %1294 = vmatprep.subr.bf16.mxu1 %v2514_v59 }
  0x44   : > { %1269 = vmatprep.mubr.bf16.mxu0 %v2571_v0  ;;  %1312 = vmatprep.mubr.bf16.mxu1 %v2571_v0 }
  0x46   : > { %1252 = vmatpush1.bf16.msra.mxu0 %v2509_v60  ;;  %1295 = vmatpush1.bf16.msra.mxu1 %v2512_v61 }
  0x47   : > { %1335 = vmatprep.subr.bf16.mxu0 %v2517_v62  ;;  %1378 = vmatprep.subr.bf16.mxu1 %v2520_v63 }
  0x49   : > { %2298 = vmatmul.mubr.msk.bf16.vlgmr.msra.gmra.mxu0 %vm717_vm0, %v2652_v13  ;;  %2299 = vmatmul.mubr.msk.bf16.vlgmr.msra.gmra.mxu1 %vm717_vm0, %v2652_v13 }
  0x4a   : > { %1336 = vmatpush1.bf16.msra.mxu0 %v2515_v1  ;;  %1379 = vmatpush1.bf16.msra.mxu1 %v2518_v2 }
  0x4b   : > { %1337 = vmatprep.subr.bf16.mxu0 %v2523_v3  ;;  %1380 = vmatprep.subr.bf16.mxu1 %v2526_v4 }
  0x4c   : > { %1355 = vmatprep.mubr.bf16.mxu0 %v2571_v0  ;;  %1398 = vmatprep.mubr.bf16.mxu1 %v2571_v0 }
  0x4e   : > { %1338 = vmatpush1.bf16.msra.mxu0 %v2521_v5  ;;  %1381 = vmatpush1.bf16.msra.mxu1 %v2524_v6 }
  0x4f   : > { %1421 = vmatprep.subr.bf16.mxu0 %v2529_v7  ;;  %1464 = vmatprep.subr.bf16.mxu1 %v2532_v8 }
  0x51   : > { %2300 = vmatmul.mubr.msk.bf16.vlgmr.msra.gmra.mxu0 %vm717_vm0, %v2652_v13  ;;  %2301 = vmatmul.mubr.msk.bf16.vlgmr.msra.gmra.mxu1 %vm717_vm0, %v2652_v13 }
  0x52   : > { %1422 = vmatpush1.bf16.msra.mxu0 %v2527_v9  ;;  %1465 = vmatpush1.bf16.msra.mxu1 %v2530_v10 }
  0x53   : > { %1423 = vmatprep.subr.bf16.mxu0 %v2535_v11  ;;  %1466 = vmatprep.subr.bf16.mxu1 %v2538_v12 }
  0x54   : > { %1441 = vmatprep.mubr.bf16.mxu0 %v2571_v0  ;;  %1484 = vmatprep.mubr.bf16.mxu1 %v2571_v0 }
  0x56   : > { %1424 = vmatpush1.bf16.msra.mxu0 %v2533_v14  ;;  %1467 = vmatpush1.bf16.msra.mxu1 %v2536_v15 }
  0x57   : > { %1507 = vmatprep.subr.bf16.mxu0 %v2541_v16  ;;  %2391 = vmatprep.subr.bf16.mxu1 %v2572_v19 }
  0x59   : > { %2302 = vmatmul.mubr.msk.bf16.vlgmr.msra.gmra.mxu0 %vm717_vm0, %v2652_v13  ;;  %2303 = vmatmul.mubr.msk.bf16.vlgmr.msra.gmra.mxu1 %vm717_vm0, %v2652_v13 }
  0x5a   : > { %1508 = vmatpush1.bf16.msra.mxu0 %v2539_v17  ;;  %2392 = vmatpush3.bf16.msra.mxu1 %v2542_v18 }
  0x5b   : > { %1509 = vmatprep.subr.bf16.mxu0 %v2545_v20  ;;  %2393 = vmatprep.subr.bf16.mxu1 %v2572_v19 }
  0x5c   : > { %1527 = vmatprep.mubr.bf16.mxu0 %v2571_v0  ;;  %2395 = vmatprep.mubr.msk.bf16.mxu1 %vm2573_vm1, %v2572_v19 }
  0x5e   : > { %1510 = vmatpush1.bf16.msra.mxu0 %v2543_v21  ;;  %2394 = vmatpush3.bf16.msra.mxu1 %v2546_v22 }
  0x61   : > { %2304 = vmatmul.mubr.msk.bf16.vlgmr.msra.gmra.mxu0 %vm717_vm0, %v2652_v13  ;;  %2396 = vmatmul.mubr.msk.bf16.vlgmr.msra.gmra.mxu1 %vm717_vm0, %v2652_v13 }
  0x8a   : > { %v2781_v23 = vpop.permute.xlu0 %1583  ;;  %v2783_v24 = vpop.permute.xlu1 %1673 }
  0x8e   : > { %v2791_v33 = vpop.permute.xlu0 %1588  ;;  %v2796_v39 = vpop.permute.xlu1 %1678 }
  0xd9   : > { %v755_v25 = vpop.f32.mrf.mxu0  ;;  %v798_v26 = vpop.f32.mrf.mxu1 }
  0xda   : > { %v1591_v27 = vmul.f32 %v2781_v23, %v755_v25  ;;  %v1593_v0 = vmul.f32 %v2781_v23, %v798_v26 }
  0xdb   : > { %v757_v28 = vpop.f32.mrf.mxu0  ;;  %v800_v29 = vpop.f32.mrf.mxu1 }
  0xdc   : > { %v1592_v30 = vmul.f32 %v2781_v23, %v757_v28  ;;  %v1681_v31 = vadd.f32 %v2783_v24, %v1591_v27  ;;  %v1594_v32 = vmul.f32 %v2781_v23, %v800_v29  ;;  %v1683_v13 = vadd.f32 %v2783_v24, %v1593_v0 }
  0xdd   : > { %v759_v34 = vpop.f32.mrf.mxu0  ;;  %v802_v35 = vpop.f32.mrf.mxu1 }
  0xde   : > { %v1682_v36 = vadd.f32 %v2783_v24, %v1592_v30  ;;  %v1684_v37 = vadd.f32 %v2783_v24, %v1594_v32  ;;  %v1761_v38 = vmax.f32 %v1683_v13, 0.0  ;;  %v1759_v40 = vmax.f32 %v1681_v31, 0.0 }
  0xdf   : > { %v1630_v41 = vmul.f32 %v2791_v33, %v759_v34  ;;  %v1632_v42 = vmul.f32 %v2791_v33, %v802_v35  ;;  %v761_v43 = vpop.f32.mrf.mxu0  ;;  %v804_v44 = vpop.f32.mrf.mxu1 }
  0xe0   : > { %v1760_v45 = vmax.f32 %v1682_v36, 0.0  ;;  %v1762_v46 = vmax.f32 %v1684_v37, 0.0  ;;  %v1631_v47 = vmul.f32 %v2791_v33, %v761_v43  ;;  %v1633_v48 = vmul.f32 %v2791_v33, %v804_v44 }
  0xe1   : > { %v1720_v49 = vadd.f32 %v2796_v39, %v1630_v41  ;;  %v1722_v50 = vadd.f32 %v2796_v39, %v1632_v42  ;;  %v841_v51 = vpop.f32.mrf.mxu0  ;;  %v884_v52 = vpop.f32.mrf.mxu1 }
  0xe2   : > { %v2348_v53 = vpack.c.bf16 %v1760_v45, %v1759_v40  ;;  %v2349_v54 = vpack.c.bf16 %v1762_v46, %v1761_v38  ;;  %v1721_v55 = vadd.f32 %v2796_v39, %v1631_v47  ;;  %v1723_v56 = vadd.f32 %v2796_v39, %v1633_v48 }
  0xe3   : > { %v1798_v57 = vmax.f32 %v1720_v49, 0.0  ;;  %v1800_v58 = vmax.f32 %v1722_v50, 0.0  ;;  %v1595_v59 = vmul.f32 %v2781_v23, %v841_v51  ;;  %v1597_v60 = vmul.f32 %v2781_v23, %v884_v52  ;;  %v843_v61 = vpop.f32.mrf.mxu0  ;;  %v886_v62 = vpop.f32.mrf.mxu1 }
  0xe4   : > { %2073 = vst [vmem:[%s2805_s10] sm:$0xff] %v2348_v53  ;;  %2074 = vst [vmem:[%s2805_s10 + $0x8] sm:$0xff] %v2349_v54  ;;  %v1799_v63 = vmax.f32 %v1721_v55, 0.0  ;;  %v1801_v1 = vmax.f32 %v1723_v56, 0.0  ;;  %v1596_v2 = vmul.f32 %v2781_v23, %v843_v61  ;;  %v1598_v3 = vmul.f32 %v2781_v23, %v886_v62 }
  0xe5   : > { %v1685_v4 = vadd.f32 %v2783_v24, %v1595_v59  ;;  %v1687_v5 = vadd.f32 %v2783_v24, %v1597_v60  ;;  %v845_v6 = vpop.f32.mrf.mxu0  ;;  %v888_v7 = vpop.f32.mrf.mxu1 }
  0xe6   : > { %v2368_v8 = vpack.c.bf16 %v1799_v63, %v1798_v57  ;;  %v2369_v9 = vpack.c.bf16 %v1801_v1, %v1800_v58  ;;  %v1686_v10 = vadd.f32 %v2783_v24, %v1596_v2  ;;  %v1688_v11 = vadd.f32 %v2783_v24, %v1598_v3 }
  0xe7   : > { %v1763_v12 = vmax.f32 %v1685_v4, 0.0  ;;  %v1765_v14 = vmax.f32 %v1687_v5, 0.0  ;;  %v1634_v15 = vmul.f32 %v2791_v33, %v845_v6  ;;  %v1636_v16 = vmul.f32 %v2791_v33, %v888_v7  ;;  %v847_v17 = vpop.f32.mrf.mxu0  ;;  %v890_v18 = vpop.f32.mrf.mxu1 }
  0xe8   : > { %2093 = vst [vmem:[%s2805_s10 + $0x9c] sm:$0xff] %v2368_v8  ;;  %2094 = vst [vmem:[%s2805_s10 + $0xa4] sm:$0xff] %v2369_v9  ;;  %v1764_v19 = vmax.f32 %v1686_v10, 0.0  ;;  %v1766_v20 = vmax.f32 %v1688_v11, 0.0  ;;  %v1635_v21 = vmul.f32 %v2791_v33, %v847_v17  ;;  %v1637_v22 = vmul.f32 %v2791_v33, %v890_v18 }
  0xe9   : > { %v1724_v25 = vadd.f32 %v2796_v39, %v1634_v15  ;;  %v1726_v26 = vadd.f32 %v2796_v39, %v1636_v16  ;;  %v927_v27 = vpop.f32.mrf.mxu0  ;;  %v970_v0 = vpop.f32.mrf.mxu1 }
  0xea   : > { %v2350_v28 = vpack.c.bf16 %v1764_v19, %v1763_v12  ;;  %v2351_v29 = vpack.c.bf16 %v1766_v20, %v1765_v14  ;;  %v1725_v30 = vadd.f32 %v2796_v39, %v1635_v21  ;;  %v1727_v31 = vadd.f32 %v2796_v39, %v1637_v22 }
  0xeb   : > { %v1802_v32 = vmax.f32 %v1724_v25, 0.0  ;;  %v1804_v13 = vmax.f32 %v1726_v26, 0.0  ;;  %v1599_v34 = vmul.f32 %v2781_v23, %v927_v27  ;;  %v1601_v35 = vmul.f32 %v2781_v23, %v970_v0  ;;  %v929_v36 = vpop.f32.mrf.mxu0  ;;  %v972_v37 = vpop.f32.mrf.mxu1 }
  0xec   : > { %2075 = vst [vmem:[%s2805_s10 + $0x10] sm:$0xff] %v2350_v28  ;;  %2076 = vst [vmem:[%s2805_s10 + $0x18] sm:$0xff] %v2351_v29  ;;  %v1803_v38 = vmax.f32 %v1725_v30, 0.0  ;;  %v1805_v40 = vmax.f32 %v1727_v31, 0.0  ;;  %v1600_v41 = vmul.f32 %v2781_v23, %v929_v36  ;;  %v1602_v42 = vmul.f32 %v2781_v23, %v972_v37 }
  0xed   : > { %v1689_v43 = vadd.f32 %v2783_v24, %v1599_v34  ;;  %v1691_v44 = vadd.f32 %v2783_v24, %v1601_v35  ;;  %v931_v45 = vpop.f32.mrf.mxu0  ;;  %v974_v46 = vpop.f32.mrf.mxu1 }
  0xee   : > { %v2370_v47 = vpack.c.bf16 %v1803_v38, %v1802_v32  ;;  %v2371_v48 = vpack.c.bf16 %v1805_v40, %v1804_v13  ;;  %v1690_v49 = vadd.f32 %v2783_v24, %v1600_v41  ;;  %v1692_v50 = vadd.f32 %v2783_v24, %v1602_v42 }
  0xef   : > { %v1767_v51 = vmax.f32 %v1689_v43, 0.0  ;;  %v1769_v52 = vmax.f32 %v1691_v44, 0.0  ;;  %v1638_v53 = vmul.f32 %v2791_v33, %v931_v45  ;;  %v1640_v54 = vmul.f32 %v2791_v33, %v974_v46  ;;  %v933_v55 = vpop.f32.mrf.mxu0  ;;  %v976_v56 = vpop.f32.mrf.mxu1 }
  0xf0   : > { %2095 = vst [vmem:[%s2805_s10 + $0xac] sm:$0xff] %v2370_v47  ;;  %2096 = vst [vmem:[%s2805_s10 + $0xb4] sm:$0xff] %v2371_v48  ;;  %v1768_v57 = vmax.f32 %v1690_v49, 0.0  ;;  %v1770_v58 = vmax.f32 %v1692_v50, 0.0  ;;  %v1639_v59 = vmul.f32 %v2791_v33, %v933_v55  ;;  %v1641_v60 = vmul.f32 %v2791_v33, %v976_v56 }
  0xf1   : > { %v1728_v61 = vadd.f32 %v2796_v39, %v1638_v53  ;;  %v1730_v62 = vadd.f32 %v2796_v39, %v1640_v54  ;;  %v1013_v63 = vpop.f32.mrf.mxu0  ;;  %v1056_v1 = vpop.f32.mrf.mxu1 }
  0xf2   : > { %v2352_v2 = vpack.c.bf16 %v1768_v57, %v1767_v51  ;;  %v2353_v3 = vpack.c.bf16 %v1770_v58, %v1769_v52  ;;  %v1729_v4 = vadd.f32 %v2796_v39, %v1639_v59  ;;  %v1731_v5 = vadd.f32 %v2796_v39, %v1641_v60 }
  0xf3   : > { %v1806_v6 = vmax.f32 %v1728_v61, 0.0  ;;  %v1808_v7 = vmax.f32 %v1730_v62, 0.0  ;;  %v1603_v8 = vmul.f32 %v2781_v23, %v1013_v63  ;;  %v1605_v9 = vmul.f32 %v2781_v23, %v1056_v1  ;;  %v1015_v10 = vpop.f32.mrf.mxu0  ;;  %v1058_v11 = vpop.f32.mrf.mxu1 }
  0xf4   : > { %2077 = vst [vmem:[%s2805_s10 + $0x20] sm:$0xff] %v2352_v2  ;;  %2078 = vst [vmem:[%s2805_s10 + $0x28] sm:$0xff] %v2353_v3  ;;  %v1807_v12 = vmax.f32 %v1729_v4, 0.0  ;;  %v1809_v14 = vmax.f32 %v1731_v5, 0.0  ;;  %v1604_v15 = vmul.f32 %v2781_v23, %v1015_v10  ;;  %v1606_v16 = vmul.f32 %v2781_v23, %v1058_v11 }
  0xf5   : > { %v1693_v17 = vadd.f32 %v2783_v24, %v1603_v8  ;;  %v1695_v18 = vadd.f32 %v2783_v24, %v1605_v9  ;;  %v1017_v19 = vpop.f32.mrf.mxu0  ;;  %v1060_v20 = vpop.f32.mrf.mxu1 }
  0xf6   : > { %v2372_v21 = vpack.c.bf16 %v1807_v12, %v1806_v6  ;;  %v2373_v22 = vpack.c.bf16 %v1809_v14, %v1808_v7  ;;  %v1694_v25 = vadd.f32 %v2783_v24, %v1604_v15  ;;  %v1696_v26 = vadd.f32 %v2783_v24, %v1606_v16 }
  0xf7   : > { %v1771_v27 = vmax.f32 %v1693_v17, 0.0  ;;  %v1773_v0 = vmax.f32 %v1695_v18, 0.0  ;;  %v1642_v28 = vmul.f32 %v2791_v33, %v1017_v19  ;;  %v1644_v29 = vmul.f32 %v2791_v33, %v1060_v20  ;;  %v1019_v30 = vpop.f32.mrf.mxu0  ;;  %v1062_v31 = vpop.f32.mrf.mxu1 }
  0xf8   : > { %2097 = vst [vmem:[%s2805_s10 + $0xbc] sm:$0xff] %v2372_v21  ;;  %2098 = vst [vmem:[%s2805_s10 + $0xc4] sm:$0xff] %v2373_v22  ;;  %v1772_v32 = vmax.f32 %v1694_v25, 0.0  ;;  %v1774_v13 = vmax.f32 %v1696_v26, 0.0  ;;  %v1643_v34 = vmul.f32 %v2791_v33, %v1019_v30  ;;  %v1645_v35 = vmul.f32 %v2791_v33, %v1062_v31 }
  0xf9   : > { %v1732_v36 = vadd.f32 %v2796_v39, %v1642_v28  ;;  %v1734_v37 = vadd.f32 %v2796_v39, %v1644_v29  ;;  %v1099_v38 = vpop.f32.mrf.mxu0  ;;  %v1142_v40 = vpop.f32.mrf.mxu1 }
  0xfa   : > { %v2354_v41 = vpack.c.bf16 %v1772_v32, %v1771_v27  ;;  %v2355_v42 = vpack.c.bf16 %v1774_v13, %v1773_v0  ;;  %v1733_v43 = vadd.f32 %v2796_v39, %v1643_v34  ;;  %v1735_v44 = vadd.f32 %v2796_v39, %v1645_v35 }
  0xfb   : > { %v1810_v45 = vmax.f32 %v1732_v36, 0.0  ;;  %v1812_v46 = vmax.f32 %v1734_v37, 0.0  ;;  %v1607_v47 = vmul.f32 %v2781_v23, %v1099_v38  ;;  %v1609_v48 = vmul.f32 %v2781_v23, %v1142_v40  ;;  %v1101_v49 = vpop.f32.mrf.mxu0  ;;  %v1144_v50 = vpop.f32.mrf.mxu1 }
  0xfc   : > { %2079 = vst [vmem:[%s2805_s10 + $0x30] sm:$0xff] %v2354_v41  ;;  %2080 = vst [vmem:[%s2805_s10 + $0x38] sm:$0xff] %v2355_v42  ;;  %v1811_v51 = vmax.f32 %v1733_v43, 0.0  ;;  %v1813_v52 = vmax.f32 %v1735_v44, 0.0  ;;  %v1608_v53 = vmul.f32 %v2781_v23, %v1101_v49  ;;  %v1610_v54 = vmul.f32 %v2781_v23, %v1144_v50 }
  0xfd   : > { %v1697_v55 = vadd.f32 %v2783_v24, %v1607_v47  ;;  %v1699_v56 = vadd.f32 %v2783_v24, %v1609_v48  ;;  %v1103_v57 = vpop.f32.mrf.mxu0  ;;  %v1146_v58 = vpop.f32.mrf.mxu1 }
  0xfe   : > { %v2374_v59 = vpack.c.bf16 %v1811_v51, %v1810_v45  ;;  %v2375_v60 = vpack.c.bf16 %v1813_v52, %v1812_v46  ;;  %v1698_v61 = vadd.f32 %v2783_v24, %v1608_v53  ;;  %v1700_v62 = vadd.f32 %v2783_v24, %v1610_v54 }
  0xff   : > { %v1775_v63 = vmax.f32 %v1697_v55, 0.0  ;;  %v1777_v1 = vmax.f32 %v1699_v56, 0.0  ;;  %v1646_v2 = vmul.f32 %v2791_v33, %v1103_v57  ;;  %v1648_v3 = vmul.f32 %v2791_v33, %v1146_v58  ;;  %v1105_v4 = vpop.f32.mrf.mxu0  ;;  %v1148_v5 = vpop.f32.mrf.mxu1 }
 0x100   : > { %2099 = vst [vmem:[%s2805_s10 + $0xcc] sm:$0xff] %v2374_v59  ;;  %2100 = vst [vmem:[%s2805_s10 + $0xd4] sm:$0xff] %v2375_v60  ;;  %v1776_v6 = vmax.f32 %v1698_v61, 0.0  ;;  %v1778_v7 = vmax.f32 %v1700_v62, 0.0  ;;  %v1647_v8 = vmul.f32 %v2791_v33, %v1105_v4  ;;  %v1649_v9 = vmul.f32 %v2791_v33, %v1148_v5 }
 0x101   : > { %v1736_v10 = vadd.f32 %v2796_v39, %v1646_v2  ;;  %v1738_v11 = vadd.f32 %v2796_v39, %v1648_v3  ;;  %v1185_v12 = vpop.f32.mrf.mxu0  ;;  %v1228_v14 = vpop.f32.mrf.mxu1 }
 0x102   : > { %v2356_v15 = vpack.c.bf16 %v1776_v6, %v1775_v63  ;;  %v2357_v16 = vpack.c.bf16 %v1778_v7, %v1777_v1  ;;  %v1737_v17 = vadd.f32 %v2796_v39, %v1647_v8  ;;  %v1739_v18 = vadd.f32 %v2796_v39, %v1649_v9 }
 0x103   : > { %v1814_v19 = vmax.f32 %v1736_v10, 0.0  ;;  %v1816_v20 = vmax.f32 %v1738_v11, 0.0  ;;  %v1611_v21 = vmul.f32 %v2781_v23, %v1185_v12  ;;  %v1613_v22 = vmul.f32 %v2781_v23, %v1228_v14  ;;  %v1187_v25 = vpop.f32.mrf.mxu0  ;;  %v1230_v26 = vpop.f32.mrf.mxu1 }
 0x104   : > { %2081 = vst [vmem:[%s2805_s10 + $0x40] sm:$0xff] %v2356_v15  ;;  %2082 = vst [vmem:[%s2805_s10 + $0x48] sm:$0xff] %v2357_v16  ;;  %v1815_v27 = vmax.f32 %v1737_v17, 0.0  ;;  %v1817_v0 = vmax.f32 %v1739_v18, 0.0  ;;  %v1612_v28 = vmul.f32 %v2781_v23, %v1187_v25  ;;  %v1614_v29 = vmul.f32 %v2781_v23, %v1230_v26 }
 0x105   : > { %v1701_v30 = vadd.f32 %v2783_v24, %v1611_v21  ;;  %v1703_v31 = vadd.f32 %v2783_v24, %v1613_v22  ;;  %v1189_v32 = vpop.f32.mrf.mxu0  ;;  %v1232_v13 = vpop.f32.mrf.mxu1 }
 0x106   : > { %v2376_v34 = vpack.c.bf16 %v1815_v27, %v1814_v19  ;;  %v2377_v35 = vpack.c.bf16 %v1817_v0, %v1816_v20  ;;  %v1702_v36 = vadd.f32 %v2783_v24, %v1612_v28  ;;  %v1704_v37 = vadd.f32 %v2783_v24, %v1614_v29 }
 0x107   : > { %v1779_v38 = vmax.f32 %v1701_v30, 0.0  ;;  %v1781_v40 = vmax.f32 %v1703_v31, 0.0  ;;  %v1650_v41 = vmul.f32 %v2791_v33, %v1189_v32  ;;  %v1652_v42 = vmul.f32 %v2791_v33, %v1232_v13  ;;  %v1191_v43 = vpop.f32.mrf.mxu0  ;;  %v1234_v44 = vpop.f32.mrf.mxu1 }
 0x108   : > { %2101 = vst [vmem:[%s2805_s10 + $0xdc] sm:$0xff] %v2376_v34  ;;  %2102 = vst [vmem:[%s2805_s10 + $0xe4] sm:$0xff] %v2377_v35  ;;  %v1780_v45 = vmax.f32 %v1702_v36, 0.0  ;;  %v1782_v46 = vmax.f32 %v1704_v37, 0.0  ;;  %v1651_v47 = vmul.f32 %v2791_v33, %v1191_v43  ;;  %v1653_v48 = vmul.f32 %v2791_v33, %v1234_v44 }
 0x109   : > { %v1740_v49 = vadd.f32 %v2796_v39, %v1650_v41  ;;  %v1742_v50 = vadd.f32 %v2796_v39, %v1652_v42  ;;  %v1271_v51 = vpop.f32.mrf.mxu0  ;;  %v1314_v52 = vpop.f32.mrf.mxu1 }
 0x10a   : > { %v2358_v53 = vpack.c.bf16 %v1780_v45, %v1779_v38  ;;  %v2359_v54 = vpack.c.bf16 %v1782_v46, %v1781_v40  ;;  %v1741_v55 = vadd.f32 %v2796_v39, %v1651_v47  ;;  %v1743_v56 = vadd.f32 %v2796_v39, %v1653_v48 }
 0x10b   : > { %v1818_v57 = vmax.f32 %v1740_v49, 0.0  ;;  %v1820_v58 = vmax.f32 %v1742_v50, 0.0  ;;  %v1615_v59 = vmul.f32 %v2781_v23, %v1271_v51  ;;  %v1617_v60 = vmul.f32 %v2781_v23, %v1314_v52  ;;  %v1273_v61 = vpop.f32.mrf.mxu0  ;;  %v1316_v62 = vpop.f32.mrf.mxu1 }
 0x10c   : > { %2083 = vst [vmem:[%s2805_s10 + $0x50] sm:$0xff] %v2358_v53  ;;  %2084 = vst [vmem:[%s2805_s10 + $0x58] sm:$0xff] %v2359_v54  ;;  %v1819_v63 = vmax.f32 %v1741_v55, 0.0  ;;  %v1821_v1 = vmax.f32 %v1743_v56, 0.0  ;;  %v1616_v2 = vmul.f32 %v2781_v23, %v1273_v61  ;;  %v1618_v3 = vmul.f32 %v2781_v23, %v1316_v62 }
 0x10d   : > { %v1705_v4 = vadd.f32 %v2783_v24, %v1615_v59  ;;  %v1707_v5 = vadd.f32 %v2783_v24, %v1617_v60  ;;  %v1275_v6 = vpop.f32.mrf.mxu0  ;;  %v1318_v7 = vpop.f32.mrf.mxu1 }
 0x10e   : > { %v2378_v8 = vpack.c.bf16 %v1819_v63, %v1818_v57  ;;  %v2379_v9 = vpack.c.bf16 %v1821_v1, %v1820_v58  ;;  %v1706_v10 = vadd.f32 %v2783_v24, %v1616_v2  ;;  %v1708_v11 = vadd.f32 %v2783_v24, %v1618_v3 }
 0x10f   : > { %v1783_v12 = vmax.f32 %v1705_v4, 0.0  ;;  %v1785_v14 = vmax.f32 %v1707_v5, 0.0  ;;  %v1654_v15 = vmul.f32 %v2791_v33, %v1275_v6  ;;  %v1656_v16 = vmul.f32 %v2791_v33, %v1318_v7  ;;  %v1277_v17 = vpop.f32.mrf.mxu0  ;;  %v1320_v18 = vpop.f32.mrf.mxu1 }
 0x110   : > { %2103 = vst [vmem:[%s2805_s10 + $0xec] sm:$0xff] %v2378_v8  ;;  %2104 = vst [vmem:[%s2805_s10 + $0xf4] sm:$0xff] %v2379_v9  ;;  %v1784_v19 = vmax.f32 %v1706_v10, 0.0  ;;  %v1786_v20 = vmax.f32 %v1708_v11, 0.0  ;;  %v1655_v21 = vmul.f32 %v2791_v33, %v1277_v17  ;;  %v1657_v22 = vmul.f32 %v2791_v33, %v1320_v18 }
 0x111   : > { %v1744_v25 = vadd.f32 %v2796_v39, %v1654_v15  ;;  %v1746_v26 = vadd.f32 %v2796_v39, %v1656_v16  ;;  %v1357_v27 = vpop.f32.mrf.mxu0  ;;  %v1400_v0 = vpop.f32.mrf.mxu1 }
 0x112   : > { %v2360_v28 = vpack.c.bf16 %v1784_v19, %v1783_v12  ;;  %v2361_v29 = vpack.c.bf16 %v1786_v20, %v1785_v14  ;;  %v1745_v30 = vadd.f32 %v2796_v39, %v1655_v21  ;;  %v1747_v31 = vadd.f32 %v2796_v39, %v1657_v22 }
 0x113   : > { %v1822_v32 = vmax.f32 %v1744_v25, 0.0  ;;  %v1824_v13 = vmax.f32 %v1746_v26, 0.0  ;;  %v1619_v34 = vmul.f32 %v2781_v23, %v1357_v27  ;;  %v1621_v35 = vmul.f32 %v2781_v23, %v1400_v0  ;;  %v1359_v36 = vpop.f32.mrf.mxu0  ;;  %v1402_v37 = vpop.f32.mrf.mxu1 }
 0x114   : > { %2085 = vst [vmem:[%s2805_s10 + $0x60] sm:$0xff] %v2360_v28  ;;  %2086 = vst [vmem:[%s2805_s10 + $0x68] sm:$0xff] %v2361_v29  ;;  %v1823_v38 = vmax.f32 %v1745_v30, 0.0  ;;  %v1825_v40 = vmax.f32 %v1747_v31, 0.0  ;;  %v1620_v41 = vmul.f32 %v2781_v23, %v1359_v36  ;;  %v1622_v42 = vmul.f32 %v2781_v23, %v1402_v37 }
 0x115   : > { %v1709_v43 = vadd.f32 %v2783_v24, %v1619_v34  ;;  %v1711_v44 = vadd.f32 %v2783_v24, %v1621_v35  ;;  %v1361_v45 = vpop.f32.mrf.mxu0  ;;  %v1404_v46 = vpop.f32.mrf.mxu1 }
 0x116   : > { %v2380_v47 = vpack.c.bf16 %v1823_v38, %v1822_v32  ;;  %v2381_v48 = vpack.c.bf16 %v1825_v40, %v1824_v13  ;;  %v1710_v49 = vadd.f32 %v2783_v24, %v1620_v41  ;;  %v1712_v50 = vadd.f32 %v2783_v24, %v1622_v42 }
 0x117   : > { %v1787_v51 = vmax.f32 %v1709_v43, 0.0  ;;  %v1789_v52 = vmax.f32 %v1711_v44, 0.0  ;;  %v1658_v53 = vmul.f32 %v2791_v33, %v1361_v45  ;;  %v1660_v54 = vmul.f32 %v2791_v33, %v1404_v46  ;;  %v1363_v55 = vpop.f32.mrf.mxu0  ;;  %v1406_v56 = vpop.f32.mrf.mxu1 }
 0x118   : > { %2105 = vst [vmem:[%s2805_s10 + $0xfc] sm:$0xff] %v2380_v47  ;;  %2106 = vst [vmem:[%s2805_s10 + $0x104] sm:$0xff] %v2381_v48  ;;  %v1788_v57 = vmax.f32 %v1710_v49, 0.0  ;;  %v1790_v58 = vmax.f32 %v1712_v50, 0.0  ;;  %v1659_v59 = vmul.f32 %v2791_v33, %v1363_v55  ;;  %v1661_v60 = vmul.f32 %v2791_v33, %v1406_v56 }
 0x119   : > { %v1748_v61 = vadd.f32 %v2796_v39, %v1658_v53  ;;  %v1750_v62 = vadd.f32 %v2796_v39, %v1660_v54  ;;  %v1443_v63 = vpop.f32.mrf.mxu0  ;;  %v1486_v1 = vpop.f32.mrf.mxu1 }
 0x11a   : > { %v2362_v2 = vpack.c.bf16 %v1788_v57, %v1787_v51  ;;  %v2363_v3 = vpack.c.bf16 %v1790_v58, %v1789_v52  ;;  %v1749_v4 = vadd.f32 %v2796_v39, %v1659_v59  ;;  %v1751_v5 = vadd.f32 %v2796_v39, %v1661_v60 }
 0x11b   : > { %v1826_v6 = vmax.f32 %v1748_v61, 0.0  ;;  %v1828_v7 = vmax.f32 %v1750_v62, 0.0  ;;  %v1623_v8 = vmul.f32 %v2781_v23, %v1443_v63  ;;  %v1625_v9 = vmul.f32 %v2781_v23, %v1486_v1  ;;  %v1445_v10 = vpop.f32.mrf.mxu0  ;;  %v1488_v11 = vpop.f32.mrf.mxu1 }
 0x11c   : > { %2087 = vst [vmem:[%s2805_s10 + $0x70] sm:$0xff] %v2362_v2  ;;  %2088 = vst [vmem:[%s2805_s10 + $0x78] sm:$0xff] %v2363_v3  ;;  %v1827_v12 = vmax.f32 %v1749_v4, 0.0  ;;  %v1829_v14 = vmax.f32 %v1751_v5, 0.0  ;;  %v1624_v15 = vmul.f32 %v2781_v23, %v1445_v10  ;;  %v1626_v16 = vmul.f32 %v2781_v23, %v1488_v11 }
 0x11d   : > { %v1713_v17 = vadd.f32 %v2783_v24, %v1623_v8  ;;  %v1715_v18 = vadd.f32 %v2783_v24, %v1625_v9  ;;  %v1447_v19 = vpop.f32.mrf.mxu0  ;;  %v1490_v20 = vpop.f32.mrf.mxu1 }
 0x11e   : > { %v2382_v21 = vpack.c.bf16 %v1827_v12, %v1826_v6  ;;  %v2383_v22 = vpack.c.bf16 %v1829_v14, %v1828_v7  ;;  %v1714_v25 = vadd.f32 %v2783_v24, %v1624_v15  ;;  %v1716_v26 = vadd.f32 %v2783_v24, %v1626_v16 }
 0x11f   : > { %v1791_v27 = vmax.f32 %v1713_v17, 0.0  ;;  %v1793_v0 = vmax.f32 %v1715_v18, 0.0  ;;  %v1662_v28 = vmul.f32 %v2791_v33, %v1447_v19  ;;  %v1664_v29 = vmul.f32 %v2791_v33, %v1490_v20  ;;  %v1449_v30 = vpop.f32.mrf.mxu0  ;;  %v1492_v31 = vpop.f32.mrf.mxu1 }
 0x120   : > { %2107 = vst [vmem:[%s2805_s10 + $0x10c] sm:$0xff] %v2382_v21  ;;  %2108 = vst [vmem:[%s2805_s10 + $0x114] sm:$0xff] %v2383_v22  ;;  %v1792_v32 = vmax.f32 %v1714_v25, 0.0  ;;  %v1794_v13 = vmax.f32 %v1716_v26, 0.0  ;;  %v1663_v34 = vmul.f32 %v2791_v33, %v1449_v30  ;;  %v1665_v35 = vmul.f32 %v2791_v33, %v1492_v31 }
 0x121   : > { %v1752_v36 = vadd.f32 %v2796_v39, %v1662_v28  ;;  %v1754_v37 = vadd.f32 %v2796_v39, %v1664_v29  ;;  %v1529_v38 = vpop.f32.mrf.mxu0  ;;  %v1572_v40 = vpop.f32.mrf.mxu1 }
 0x122   : > { %v2364_v41 = vpack.c.bf16 %v1792_v32, %v1791_v27  ;;  %v2365_v42 = vpack.c.bf16 %v1794_v13, %v1793_v0  ;;  %v1753_v43 = vadd.f32 %v2796_v39, %v1663_v34  ;;  %v1755_v44 = vadd.f32 %v2796_v39, %v1665_v35 }
 0x123   : > { %v1830_v45 = vmax.f32 %v1752_v36, 0.0  ;;  %v1627_v46 = vmul.f32 %v2781_v23, %v1529_v38  ;;  %v1629_v47 = vmul.f32 %v2781_v23, %v1572_v40  ;;  %v1531_v48 = vpop.f32.mrf.mxu0  ;;  %v2397_v49 = vpop.f32.mrf.mxu1  ;;  %v1832_v50 = vmax.f32 %v1754_v37, 0.0 }
 0x124   : > { %2089 = vst [vmem:[%s2805_s10 + $0x80] sm:$0xff] %v2364_v41  ;;  %2090 = vst [vmem:[%s2805_s10 + $0x88] sm:$0xff] %v2365_v42  ;;  %v1831_v51 = vmax.f32 %v1753_v43, 0.0  ;;  %v1833_v52 = vmax.f32 %v1755_v44, 0.0  ;;  %v1628_v53 = vmul.f32 %v2781_v23, %v1531_v48 }
 0x125   : > { %v1717_v54 = vadd.f32 %v2783_v24, %v1627_v46  ;;  %v1719_v55 = vadd.f32 %v2783_v24, %v1629_v47  ;;  %v1533_v56 = vpop.f32.mrf.mxu0  ;;  %v1575_v57 = vpop.f32.mrf.mxu1 }
 0x126   : > { %v2384_v58 = vpack.c.bf16 %v1831_v51, %v1830_v45  ;;  %v2385_v59 = vpack.c.bf16 %v1833_v52, %v1832_v50  ;;  %v1718_v60 = vadd.f32 %v2783_v24, %v1628_v53  ;;  %v1666_v61 = vmul.f32 %v2791_v33, %v1533_v56 }
 0x127   : > { %v1797_v62 = vmax.f32 %v1719_v55, 0.0  ;;  %v1668_v63 = vmul.f32 %v2791_v33, %v1575_v57  ;;  %v1535_v1 = vpop.f32.mrf.mxu0  ;;  %v2398_v2 = vpop.f32.mrf.mxu1  ;;  %v1795_v23 = vmax.f32 %v1717_v54, 0.0 }
 0x128   : > { %2109 = vst [vmem:[%s2805_s10 + $0x11c] sm:$0xff] %v2384_v58  ;;  %2110 = vst [vmem:[%s2805_s10 + $0x124] sm:$0xff] %v2385_v59  ;;  %v1796_v3 = vmax.f32 %v1718_v60, 0.0  ;;  %v1756_v4 = vadd.f32 %v2796_v39, %v1666_v61  ;;  %v1667_v5 = vmul.f32 %v2791_v33, %v1535_v1 }
 0x129   : > { %v2367_v24 = vpack.c.bf16 %v1797_v62, %v1797_v62  ;;  %v1758_v6 = vadd.f32 %v2796_v39, %v1668_v63 }
 0x12a   : > { %v2366_v7 = vpack.c.bf16 %v1796_v3, %v1795_v23  ;;  %v1757_v8 = vadd.f32 %v2796_v39, %v1667_v5  ;;  %v1834_v10 = vmax.f32 %v1756_v4, 0.0 }
 0x12b   : > { %2092 = vst [vmem:[%s2805_s10 + $0x98] sm:$0xf] %v2367_v24  ;;  %v1836_v9 = vmax.f32 %v1758_v6, 0.0 }
 0x12c   : > { %2091 = vst [vmem:[%s2805_s10 + $0x90] sm:$0xff] %v2366_v7  ;;  %v1835_v11 = vmax.f32 %v1757_v8, 0.0 }
 0x12d   : > { %v2387_v12 = vpack.c.bf16 %v1836_v9, %v1836_v9 }
 0x12e   : > { %v2386_v14 = vpack.c.bf16 %v1835_v11, %v1834_v10 }
 0x12f   : > { %2112 = vst [vmem:[%s2805_s10 + $0x134] sm:$0xf] %v2387_v12 }
 0x130   : > { %2111 = vst [vmem:[%s2805_s10 + $0x12c] sm:$0xff] %v2386_v14 }
 0x131 PF: > { %s14_s17 = sadd.s32 1, %s2569_s17   ;;  %s3005_s15 = smov %s2565_s16 }
 0x132   : > { %p11_p5 = scmp.ge.s32.totalorder %s14_s17, 4   ;;  %s3006_s16 = smov %s3008_s18 }
 0x134   :  { %13 = sbr.rel (!%p11_p5) target bundleno = 2 (0x2), region = 66 }

// kernel: generator_forward.17
= control target key start
LH: loop header
LB: loop body
LE: loop exit
PB: predicated region body
PF: predicated region fallthrough
CT: control target
= control target key end

     0   :  { %s8025_s18 = smov 0   ;;  %s8027_s19 = smov 0   ;;  %s10820_s0 = inlined_call_operand.vmem [shape: bf16[24,16], index: 0, kind: input, shape index: {}]   ;;  %s10821_s1 = inlined_call_operand.vmem [shape: bf16[2,16,36096], index: 1, kind: input, shape index: {}]   ;;  %s10822_s2 = inlined_call_operand.vmem [shape: f32[24,1], index: 2, kind: input, shape index: {}]   ;;  %s10823_s3 = inlined_call_operand.vmem [shape: f32[8,24], index: 3, kind: input, shape index: {}]   ;;  %s10824_s4 = inlined_call_operand.vmem [shape: f32[24,8], index: 4, kind: input, shape index: {}]   ;;  %s10825_s5 = inlined_call_operand.vmem [shape: f32[2,24,36096], index: 5, kind: output, shape index: {}]  }
   0x1   :  { %s8029_s20 = smov 0   ;;  %s8031_s21 = smov 0  }
   0x2   :  { %s8033_s22 = smov 0   ;;  %s8035_s23 = smov 0  }
   0x3   :  { %s8037_s24 = smov 0  }
   0x4 LB: > { %s24_s25 = sadd.s32 1, %s7982_s22  ;;  %s27_s26 = sadd.s32 1, %s7986_s23  ;;  %s7990_s24 = sphi %s8037_s24, %s15_s24   ;;  %s7986_s23 = sphi %s8035_s23, %s11167_s23   ;;  %s7982_s22 = sphi %s8033_s22, %s11166_s22   ;;  %s7978_s21 = sphi %s8031_s21, %s11165_s21   ;;  %s7974_s20 = sphi %s8029_s20, %s11164_s20   ;;  %s7970_s19 = sphi %s8027_s19, %s11163_s19   ;;  %s7966_s18 = sphi %s8025_s18, %s11162_s18  }
   0x5   : > { %p25_p0 = scmp.ge.s32.totalorder %s24_s25, 6  ;;  %s7177_s27 = sadd.s32 4294967295, %s7990_s24  }
   0x6   : > { %p64_p1 = scmp.ne.s32.totalorder %s7970_s19, %s7966_s18  ;;  %p65_p2 = scmp.eq.s32.totalorder %s7990_s24, 0 }
   0x7   : > { %s11169_s25 = smov (%p25_p0, %s24_s25), 0  ;;  %s11171_s26 = smov (!%p25_p0, %s27_s26), %s7986_s23 }
   0x8   : > { %p29_p3 = scmp.ge.s32.totalorder %s11171_s26, 2  ;;  %p159_p4 = scmp.eq.s32.totalorder %s7177_s27, 11 }
   0x9   : > { %s53_s28 = ssub.s32 %s7982_s22, %s11169_s25  ;;  %p66_p5 = por %p65_p2, %p64_p1 }
   0xa   : > { %s11173_s26 = smov (%p29_p3, %s11171_s26), 0  ;;  %p8073_p6 = por %p159_p4, %p64_p1 }
   0xb   : > { %s52_s30 = ssub.s32 %s7986_s23, %s11173_s26  ;;  %s57_s7 = sadd.s32 1, %s7970_s19 }
   0xc   : > { %s54_s6 = sor.u32 %s53_s28, %s52_s30  ;;  %p7180_p8 = scmp.ge.s32.totalorder %s7990_s24, 12 }
   0xd   : > { %p55_p7 = scmp.eq.s32.totalorder %s54_s6, 0 }
   0xe   : > { %193 = sbr.rel (%p7180_p8) target bundleno = 52 (0x34), region = 32 }
   0xf   : > { %s8081_s8 = scalar_select %p55_p7, %s7970_s19, %s57_s7  }
  0x13   : > { %196 = sbr.rel (!%p66_p5) target bundleno = 52 (0x34), region = 36  ;;  %s198_s9 = sand.u32 (%p66_p5), 1, %s7970_s19  }
  0x14   : > { %s201_s10 = smul.u32 (%p66_p5), 47, %s7982_s22 }
  0x15   : > { %s7420_s11 = smul.u32 (%p66_p5), 376, %s198_s9 }
  0x16   : > { %s7421_s12 = smul.u32 (%p66_p5), 564, %s7986_s23 }
  0x17   : > { %s8095_s27 = scalar_lea.vmem (%p66_p5), [#allocation2], %s7420_s11 }
  0x18   : > { %s203_s13 = sadd.s32 %s7421_s12, %s201_s10 }
  0x19   : > { %s7181_s14 = sshll.u32 %s203_s13, 2 }
  0x1a   : > { %s8090_s17 = scalar_lea.vmem %s10821_s1, %s7181_s14 }
  0x1b   : > { %v220_v0 = vld [vmem:[%s8090_s17] sm:$0xff]  ;;  %v222_v1 = vld [vmem:[%s8090_s17 + $0x8] sm:$0xff]  ;;  %v224_v2 = vld [vmem:[%s8090_s17 + $0x10] sm:$0xff] }
  0x1c   : > { %221 = vst [vmem:[%s8095_s27] sm:$0xff] %v220_v0  ;;  %223 = vst [vmem:[%s8095_s27 + $0x8] sm:$0xff] %v222_v1  ;;  %v226_v3 = vld [vmem:[%s8090_s17 + $0x18] sm:$0xff]  ;;  %v228_v4 = vld [vmem:[%s8090_s17 + $0x20] sm:$0xff] }
  0x1d   : > { %225 = vst [vmem:[%s8095_s27 + $0x10] sm:$0xff] %v224_v2  ;;  %v230_v5 = vld [vmem:[%s8090_s17 + $0x28] sm:$0xff]  ;;  %227 = vst [vmem:[%s8095_s27 + $0x18] sm:$0xff] %v226_v3  ;;  %v232_v6 = vld [vmem:[%s8090_s17 + $0x30] sm:$0xff] }
  0x1e   : > { %229 = vst [vmem:[%s8095_s27 + $0x20] sm:$0xff] %v228_v4  ;;  %231 = vst [vmem:[%s8095_s27 + $0x28] sm:$0xff] %v230_v5  ;;  %v234_v7 = vld [vmem:[%s8090_s17 + $0x38] sm:$0xff]  ;;  %v236_v8 = vld [vmem:[%s8090_s17 + $0x40] sm:$0xff] }
  0x1f   : > { %233 = vst [vmem:[%s8095_s27 + $0x30] sm:$0xff] %v232_v6  ;;  %235 = vst [vmem:[%s8095_s27 + $0x38] sm:$0xff] %v234_v7  ;;  %v238_v9 = vld [vmem:[%s8090_s17 + $0x48] sm:$0xff]  ;;  %v240_v10 = vld [vmem:[%s8090_s17 + $0x50] sm:$0xff] }
  0x20   : > { %237 = vst [vmem:[%s8095_s27 + $0x40] sm:$0xff] %v236_v8  ;;  %v242_v11 = vld [vmem:[%s8090_s17 + $0x58] sm:$0xff]  ;;  %239 = vst [vmem:[%s8095_s27 + $0x48] sm:$0xff] %v238_v9  ;;  %v244_v12 = vld [vmem:[%s8090_s17 + $0x60] sm:$0xff] }
  0x21   : > { %241 = vst [vmem:[%s8095_s27 + $0x50] sm:$0xff] %v240_v10  ;;  %243 = vst [vmem:[%s8095_s27 + $0x58] sm:$0xff] %v242_v11  ;;  %v246_v13 = vld [vmem:[%s8090_s17 + $0x68] sm:$0xff]  ;;  %v248_v14 = vld [vmem:[%s8090_s17 + $0x70] sm:$0xff] }
  0x22   : > { %245 = vst [vmem:[%s8095_s27 + $0x60] sm:$0xff] %v244_v12  ;;  %247 = vst [vmem:[%s8095_s27 + $0x68] sm:$0xff] %v246_v13  ;;  %v250_v15 = vld [vmem:[%s8090_s17 + $0x78] sm:$0xff]  ;;  %v252_v16 = vld [vmem:[%s8090_s17 + $0x80] sm:$0xff] }
  0x23   : > { %249 = vst [vmem:[%s8095_s27 + $0x70] sm:$0xff] %v248_v14  ;;  %v254_v17 = vld [vmem:[%s8090_s17 + $0x88] sm:$0xff]  ;;  %251 = vst [vmem:[%s8095_s27 + $0x78] sm:$0xff] %v250_v15  ;;  %v256_v18 = vld [vmem:[%s8090_s17 + $0x90] sm:$0xff] }
  0x24   : > { %253 = vst [vmem:[%s8095_s27 + $0x80] sm:$0xff] %v252_v16  ;;  %255 = vst [vmem:[%s8095_s27 + $0x88] sm:$0xff] %v254_v17  ;;  %v258_v19 = vld [vmem:[%s8090_s17 + $0x98] sm:$0xff]  ;;  %v260_v20 = vld [vmem:[%s8090_s17 + $0xa0] sm:$0xff] }
  0x25   : > { %257 = vst [vmem:[%s8095_s27 + $0x90] sm:$0xff] %v256_v18  ;;  %259 = vst [vmem:[%s8095_s27 + $0x98] sm:$0xff] %v258_v19  ;;  %v262_v21 = vld [vmem:[%s8090_s17 + $0xa8] sm:$0xff]  ;;  %v264_v22 = vld [vmem:[%s8090_s17 + $0xb0] sm:$0xff] }
  0x26   : > { %261 = vst [vmem:[%s8095_s27 + $0xa0] sm:$0xff] %v260_v20  ;;  %v266_v23 = vld [vmem:[%s8090_s17 + $0x468] sm:$0xff]  ;;  %263 = vst [vmem:[%s8095_s27 + $0xa8] sm:$0xff] %v262_v21  ;;  %v268_v24 = vld [vmem:[%s8090_s17 + $0x470] sm:$0xff] }
  0x27   : > { %265 = vst [vmem:[%s8095_s27 + $0xb0] sm:$0xff] %v264_v22  ;;  %267 = vst [vmem:[%s8095_s27 + $0xbc] sm:$0xff] %v266_v23  ;;  %v270_v25 = vld [vmem:[%s8090_s17 + $0x478] sm:$0xff]  ;;  %v272_v26 = vld [vmem:[%s8090_s17 + $0x480] sm:$0xff] }
  0x28   : > { %269 = vst [vmem:[%s8095_s27 + $0xc4] sm:$0xff] %v268_v24  ;;  %271 = vst [vmem:[%s8095_s27 + $0xcc] sm:$0xff] %v270_v25  ;;  %v274_v27 = vld [vmem:[%s8090_s17 + $0x488] sm:$0xff]  ;;  %v276_v28 = vld [vmem:[%s8090_s17 + $0x490] sm:$0xff] }
  0x29   : > { %273 = vst [vmem:[%s8095_s27 + $0xd4] sm:$0xff] %v272_v26  ;;  %v278_v29 = vld [vmem:[%s8090_s17 + $0x498] sm:$0xff]  ;;  %275 = vst [vmem:[%s8095_s27 + $0xdc] sm:$0xff] %v274_v27  ;;  %v280_v30 = vld [vmem:[%s8090_s17 + $0x4a0] sm:$0xff] }
  0x2a   : > { %277 = vst [vmem:[%s8095_s27 + $0xe4] sm:$0xff] %v276_v28  ;;  %279 = vst [vmem:[%s8095_s27 + $0xec] sm:$0xff] %v278_v29  ;;  %v282_v31 = vld [vmem:[%s8090_s17 + $0x4a8] sm:$0xff]  ;;  %v284_v32 = vld [vmem:[%s8090_s17 + $0x4b0] sm:$0xff] }
  0x2b   : > { %281 = vst [vmem:[%s8095_s27 + $0xf4] sm:$0xff] %v280_v30  ;;  %283 = vst [vmem:[%s8095_s27 + $0xfc] sm:$0xff] %v282_v31  ;;  %v286_v33 = vld [vmem:[%s8090_s17 + $0x4b8] sm:$0xff]  ;;  %v288_v34 = vld [vmem:[%s8090_s17 + $0x4c0] sm:$0xff] }
  0x2c   : > { %285 = vst [vmem:[%s8095_s27 + $0x104] sm:$0xff] %v284_v32  ;;  %v290_v35 = vld [vmem:[%s8090_s17 + $0x4c8] sm:$0xff]  ;;  %287 = vst [vmem:[%s8095_s27 + $0x10c] sm:$0xff] %v286_v33  ;;  %v292_v36 = vld [vmem:[%s8090_s17 + $0x4d0] sm:$0xff] }
  0x2d   : > { %289 = vst [vmem:[%s8095_s27 + $0x114] sm:$0xff] %v288_v34  ;;  %291 = vst [vmem:[%s8095_s27 + $0x11c] sm:$0xff] %v290_v35  ;;  %v294_v37 = vld [vmem:[%s8090_s17 + $0x4d8] sm:$0xff]  ;;  %v296_v38 = vld [vmem:[%s8090_s17 + $0x4e0] sm:$0xff] }
  0x2e   : > { %293 = vst [vmem:[%s8095_s27 + $0x124] sm:$0xff] %v292_v36  ;;  %295 = vst [vmem:[%s8095_s27 + $0x12c] sm:$0xff] %v294_v37  ;;  %v298_v39 = vld [vmem:[%s8090_s17 + $0x4e8] sm:$0xff]  ;;  %v300_v40 = vld [vmem:[%s8090_s17 + $0x4f0] sm:$0xff] }
  0x2f   : > { %297 = vst [vmem:[%s8095_s27 + $0x134] sm:$0xff] %v296_v38  ;;  %v302_v41 = vld [vmem:[%s8090_s17 + $0x4f8] sm:$0xff]  ;;  %299 = vst [vmem:[%s8095_s27 + $0x13c] sm:$0xff] %v298_v39  ;;  %v304_v42 = vld [vmem:[%s8090_s17 + $0x500] sm:$0xff] }
  0x30   : > { %301 = vst [vmem:[%s8095_s27 + $0x144] sm:$0xff] %v300_v40  ;;  %303 = vst [vmem:[%s8095_s27 + $0x14c] sm:$0xff] %v302_v41  ;;  %v306_v43 = vld [vmem:[%s8090_s17 + $0x508] sm:$0xff]  ;;  %v308_v44 = vld [vmem:[%s8090_s17 + $0x510] sm:$0xff] }
  0x31   : > { %305 = vst [vmem:[%s8095_s27 + $0x154] sm:$0xff] %v304_v42  ;;  %307 = vst [vmem:[%s8095_s27 + $0x15c] sm:$0xff] %v306_v43  ;;  %v310_v45 = vld [vmem:[%s8090_s17 + $0x518] sm:$0xff]  ;;  %v7184_v47 = vld [vmem:[%s8090_s17 + $0x520] sm:$0xf] }
  0x32   : > { %309 = vst [vmem:[%s8095_s27 + $0x164] sm:$0xff] %v308_v44  ;;  %v7182_v46 = vld [vmem:[%s8090_s17 + $0xb8] sm:$0xf]  ;;  %311 = vst [vmem:[%s8095_s27 + $0x16c] sm:$0xff] %v310_v45 }
  0x33   : > { %7183 = vst [vmem:[%s8095_s27 + $0xb8] sm:$0xf] %v7182_v46  ;;  %7185 = vst [vmem:[%s8095_s27 + $0x174] sm:$0xf] %v7184_v47 }
  0x34 PF: > { %p7186_p9 = scmp.ge.s32.totalorder %s7990_s24, 1  ;;  %p328_p10 = scmp.lt.s32.totalorder %s7990_s24, 13 }
  0x36   : > { %p329_p11 = pnand %p7186_p9, %p328_p10 }
  0x38   : > { %332 = sbr.rel (%p329_p11) target bundleno = 999 (0x3e7), region = 62 }
  0x3d   : > { %s335_s28 = sand.u32 1, %s7966_s18   ;;  %v7992_v48 = vmov 0   ;;  %v415_v49 = vld [vmem:[%s10822_s2] sm:$0xff]  ;;  %v417_v50 = vld [vmem:[%s10822_s2 + $0x10] sm:$0xff]  ;;  %v416_v51 = vld [vmem:[%s10822_s2 + $0x8] sm:$0xff]  ;;  %vm677_vm0 = vcmask 130048  }
  0x3e   : > { %s7422_s30 = smul.u32 376, %s335_s28  ;;  %716 = vmatprep.mubr.bf16.mxu0 %v7992_v48  ;;  %767 = vmatprep.mubr.bf16.mxu1 %v7992_v48  ;;  %v8217_v56 = vld [vmem:[%s10820_s0] sm:$0xff]   ;;  %v8234_v63 = vld [vmem:[%s10820_s0 + $0x8] ss:$0 sps:$4 sm:$0xff]   ;;  %v10826_v37 = vmov 0.0   ;;  %vm2705_vm1 = vcmask 195584  }
  0x3f   : > { %7484 = vset.pattern.permute.xlu0 %v7992_v48  ;;  %7485 = vset.pattern.permute.xlu1 %v7992_v48  ;;  %vm7994_vm2 = vmmov 0   ;;  %vm4509_vm3 = vcmask 64512   ;;  %s7423_s17 = smul.u32 1128, %s335_s28 }
  0x40   : > { %420 = vperm.xlu0 %7484, %v415_v49   ;;  %430 = vperm.xlu1 %7485, %v417_v50   ;;  %s8208_s13 = scalar_lea.vmem [#allocation2], %s7422_s30  ;;  %s6797_s28 = smul.u32 (%p8073_p6), 47, %s7974_s20 }
  0x41   : > { %v7486_v52 = vld [vmem:[%s8208_s13 + $0x4] ss:$188 sps:$4 sm:$0xff]   ;;  %v7488_v53 = vld [vmem:[%s8208_s13 + $0xc] ss:$188 sps:$4 sm:$0xff]   ;;  %v7496_v57 = vld [vmem:[%s8208_s13 + $0x14] ss:$188 sps:$4 sm:$0xff]  }
  0x42   : > { %698 = vmatprep.subr.bf16.mxu0 %v7486_v52  ;;  %v7490_v54 = vld [vmem:[%s8208_s13] ss:$188 sps:$4 sm:$0xff]   ;;  %v7491_v55 = vld [vmem:[%s8208_s13 + $0x8] ss:$188 sps:$4 sm:$0xff]   ;;  %749 = vmatprep.subr.bf16.mxu1 %v7488_v53  ;;  %v7494_v58 = vld [vmem:[%s8208_s13 + $0x10] ss:$188 sps:$4 sm:$0xff]  }
  0x43   : > { %699 = vmatpush1.bf16.msra.mxu0 %v7490_v54  ;;  %750 = vmatpush1.bf16.msra.mxu1 %v7491_v55  ;;  %v7499_v59 = vld [vmem:[%s8208_s13 + $0x1c] ss:$188 sps:$4 sm:$0xff]   ;;  %v7502_v61 = vld [vmem:[%s8208_s13 + $0x24] ss:$188 sps:$4 sm:$0xff]   ;;  %v7505_v62 = vld [vmem:[%s8208_s13 + $0x2c] ss:$188 sps:$4 sm:$0xff]  }
  0x44   : > { %425 = vperm.xlu0 %7484, %v416_v51   ;;  %800 = vmatprep.subr.bf16.mxu0 %v7496_v57  ;;  %v7497_v60 = vld [vmem:[%s8208_s13 + $0x18] ss:$188 sps:$4 sm:$0xff]   ;;  %v7500_v0 = vld [vmem:[%s8208_s13 + $0x20] ss:$188 sps:$4 sm:$0xff]   ;;  %v7503_v1 = vld [vmem:[%s8208_s13 + $0x28] ss:$188 sps:$4 sm:$0xff]  }
  0x45   : > { %851 = vmatprep.subr.bf16.mxu1 %v7499_v59  ;;  %v7508_v2 = vld [vmem:[%s8208_s13 + $0x34] ss:$188 sps:$4 sm:$0xff]   ;;  %v7511_v3 = vld [vmem:[%s8208_s13 + $0x3c] ss:$188 sps:$4 sm:$0xff]   ;;  %v7514_v6 = vld [vmem:[%s8208_s13 + $0x44] ss:$188 sps:$4 sm:$0xff]  }
  0x46   : > { %7236 = vmatmul.mubr.msk.bf16.vlgmr.msra.gmra.mxu0 %vm677_vm0, %v8217_v56  ;;  %7238 = vmatmul.mubr.msk.bf16.vlgmr.msra.gmra.mxu1 %vm677_vm0, %v8217_v56  ;;  %v7506_v4 = vld [vmem:[%s8208_s13 + $0x30] ss:$188 sps:$4 sm:$0xff]   ;;  %v7509_v5 = vld [vmem:[%s8208_s13 + $0x38] ss:$188 sps:$4 sm:$0xff]   ;;  %v7512_v8 = vld [vmem:[%s8208_s13 + $0x40] ss:$188 sps:$4 sm:$0xff]  }
  0x47   : > { %726 = vmatprep.mubr.bf16.mxu0 %v7992_v48  ;;  %777 = vmatprep.mubr.bf16.mxu1 %v7992_v48  ;;  %v7517_v7 = vld [vmem:[%s8208_s13 + $0x4c] ss:$188 sps:$4 sm:$0xff]   ;;  %v7520_v10 = vld [vmem:[%s8208_s13 + $0x54] ss:$188 sps:$4 sm:$0xff]   ;;  %v7523_v11 = vld [vmem:[%s8208_s13 + $0x5c] ss:$188 sps:$4 sm:$0xff]  }
  0x48   : > { %801 = vmatpush1.bf16.msra.mxu0 %v7494_v58  ;;  %852 = vmatpush1.bf16.msra.mxu1 %v7497_v60  ;;  %v7515_v9 = vld [vmem:[%s8208_s13 + $0x48] ss:$188 sps:$4 sm:$0xff]   ;;  %v7518_v12 = vld [vmem:[%s8208_s13 + $0x50] ss:$188 sps:$4 sm:$0xff]   ;;  %v7521_v13 = vld [vmem:[%s8208_s13 + $0x58] ss:$188 sps:$4 sm:$0xff]  }
  0x49   : > { %902 = vmatprep.subr.bf16.mxu0 %v7502_v61  ;;  %953 = vmatprep.subr.bf16.mxu1 %v7505_v62  ;;  %v7526_v14 = vld [vmem:[%s8208_s13 + $0x64] ss:$188 sps:$4 sm:$0xff]   ;;  %v7529_v15 = vld [vmem:[%s8208_s13 + $0x6c] ss:$188 sps:$4 sm:$0xff]   ;;  %v7532_v18 = vld [vmem:[%s8208_s13 + $0x74] ss:$188 sps:$4 sm:$0xff]  }
  0x4a   : > { %v7524_v16 = vld [vmem:[%s8208_s13 + $0x60] ss:$188 sps:$4 sm:$0xff]   ;;  %v7527_v17 = vld [vmem:[%s8208_s13 + $0x68] ss:$188 sps:$4 sm:$0xff]   ;;  %v7530_v20 = vld [vmem:[%s8208_s13 + $0x70] ss:$188 sps:$4 sm:$0xff]  }
  0x4b   : > { %v7535_v19 = vld [vmem:[%s8208_s13 + $0x7c] ss:$188 sps:$4 sm:$0xff]   ;;  %v7538_v22 = vld [vmem:[%s8208_s13 + $0x84] ss:$188 sps:$4 sm:$0xff]   ;;  %v7541_v23 = vld [vmem:[%s8208_s13 + $0x8c] ss:$188 sps:$4 sm:$0xff]  }
  0x4c   : > { %v7533_v21 = vld [vmem:[%s8208_s13 + $0x78] ss:$188 sps:$4 sm:$0xff]   ;;  %v7536_v24 = vld [vmem:[%s8208_s13 + $0x80] ss:$188 sps:$4 sm:$0xff]   ;;  %v7539_v25 = vld [vmem:[%s8208_s13 + $0x88] ss:$188 sps:$4 sm:$0xff]  }
  0x4d   : > { %v7544_v26 = vld [vmem:[%s8208_s13 + $0x94] ss:$188 sps:$4 sm:$0xff]   ;;  %v7547_v27 = vld [vmem:[%s8208_s13 + $0x9c] ss:$188 sps:$4 sm:$0xff]   ;;  %v7550_v30 = vld [vmem:[%s8208_s13 + $0xa4] ss:$188 sps:$4 sm:$0xff]  }
  0x4e   : > { %7237 = vmatmul.mubr.msk.bf16.gmra.mxu0 %vm677_vm0, %v8234_v63  ;;  %7239 = vmatmul.mubr.msk.bf16.gmra.mxu1 %vm677_vm0, %v8234_v63  ;;  %v7542_v28 = vld [vmem:[%s8208_s13 + $0x90] ss:$188 sps:$4 sm:$0xff]   ;;  %v7545_v29 = vld [vmem:[%s8208_s13 + $0x98] ss:$188 sps:$4 sm:$0xff]   ;;  %v7548_v32 = vld [vmem:[%s8208_s13 + $0xa0] ss:$188 sps:$4 sm:$0xff]  }
  0x4f   : > { %818 = vmatprep.mubr.bf16.mxu0 %v7992_v48  ;;  %869 = vmatprep.mubr.bf16.mxu1 %v7992_v48  ;;  %v7553_v31 = vld [vmem:[%s8208_s13 + $0xac] ss:$188 sps:$4 sm:$0xff]   ;;  %v7556_v34 = vld [vmem:[%s8208_s13 + $0xb4] ss:$188 sps:$4 sm:$0xff]   ;;  %s10203_s18 = scalar_lea.vmem [#allocation3], %s7423_s17  ;;  %s7424_s27 = smul.u32 (%p8073_p6), 846, %s7978_s21 }
  0x50   : > { %v7551_v33 = vld [vmem:[%s8208_s13 + $0xa8] ss:$188 sps:$4 sm:$0xff]   ;;  %v7557_v35 = vld [vmem:[%s8208_s13 + $0xb8] ss:$188 sps:$4 sm:$0xff]   ;;  %v7554_v36 = vld [vmem:[%s8208_s13 + $0xb0] ss:$188 sps:$4 sm:$0xff]  }
  0x51   : > { %s6799_s29 = sadd.s32 (%p8073_p6), %s7424_s27, %s6797_s28 }
  0x52   : > { %s7380_s20 = sshll.u32 (%p8073_p6), %s6799_s29, 3 }
  0x53   : > { %s10530_s6 = scalar_lea.vmem (%p8073_p6), %s10825_s5, %s7380_s20 }
  0x56   : > { %7240 = vmatmul.mubr.msk.bf16.vlgmr.msra.gmra.mxu0 %vm677_vm0, %v8217_v56  ;;  %7242 = vmatmul.mubr.msk.bf16.vlgmr.msra.gmra.mxu1 %vm677_vm0, %v8217_v56 }
  0x57   : > { %828 = vmatprep.mubr.bf16.mxu0 %v7992_v48  ;;  %879 = vmatprep.mubr.bf16.mxu1 %v7992_v48 }
  0x58   : > { %903 = vmatpush1.bf16.msra.mxu0 %v7500_v0  ;;  %954 = vmatpush1.bf16.msra.mxu1 %v7503_v1 }
  0x59   : > { %1004 = vmatprep.subr.bf16.mxu0 %v7508_v2  ;;  %1055 = vmatprep.subr.bf16.mxu1 %v7511_v3 }
  0x5e   : > { %7241 = vmatmul.mubr.msk.bf16.gmra.mxu0 %vm677_vm0, %v8234_v63  ;;  %7243 = vmatmul.mubr.msk.bf16.gmra.mxu1 %vm677_vm0, %v8234_v63 }
  0x5f   : > { %920 = vmatprep.mubr.bf16.mxu0 %v7992_v48  ;;  %971 = vmatprep.mubr.bf16.mxu1 %v7992_v48 }
  0x66   : > { %7244 = vmatmul.mubr.msk.bf16.vlgmr.msra.gmra.mxu0 %vm677_vm0, %v8217_v56  ;;  %7246 = vmatmul.mubr.msk.bf16.vlgmr.msra.gmra.mxu1 %vm677_vm0, %v8217_v56 }
  0x67   : > { %930 = vmatprep.mubr.bf16.mxu0 %v7992_v48  ;;  %981 = vmatprep.mubr.bf16.mxu1 %v7992_v48 }
  0x68   : > { %1005 = vmatpush1.bf16.msra.mxu0 %v7506_v4  ;;  %1056 = vmatpush1.bf16.msra.mxu1 %v7509_v5 }
  0x69   : > { %1106 = vmatprep.subr.bf16.mxu0 %v7514_v6  ;;  %1157 = vmatprep.subr.bf16.mxu1 %v7517_v7 }
  0x6e   : > { %7245 = vmatmul.mubr.msk.bf16.gmra.mxu0 %vm677_vm0, %v8234_v63  ;;  %7247 = vmatmul.mubr.msk.bf16.gmra.mxu1 %vm677_vm0, %v8234_v63 }
  0x6f   : > { %1022 = vmatprep.mubr.bf16.mxu0 %v7992_v48  ;;  %1073 = vmatprep.mubr.bf16.mxu1 %v7992_v48 }
  0x76   : > { %7248 = vmatmul.mubr.msk.bf16.vlgmr.msra.gmra.mxu0 %vm677_vm0, %v8217_v56  ;;  %7250 = vmatmul.mubr.msk.bf16.vlgmr.msra.gmra.mxu1 %vm677_vm0, %v8217_v56 }
  0x77   : > { %1032 = vmatprep.mubr.bf16.mxu0 %v7992_v48  ;;  %1083 = vmatprep.mubr.bf16.mxu1 %v7992_v48 }
  0x78   : > { %1107 = vmatpush1.bf16.msra.mxu0 %v7512_v8  ;;  %1158 = vmatpush1.bf16.msra.mxu1 %v7515_v9 }
  0x79   : > { %1208 = vmatprep.subr.bf16.mxu0 %v7520_v10  ;;  %1259 = vmatprep.subr.bf16.mxu1 %v7523_v11 }
  0x7e   : > { %7249 = vmatmul.mubr.msk.bf16.gmra.mxu0 %vm677_vm0, %v8234_v63  ;;  %7251 = vmatmul.mubr.msk.bf16.gmra.mxu1 %vm677_vm0, %v8234_v63 }
  0x7f   : > { %1124 = vmatprep.mubr.bf16.mxu0 %v7992_v48  ;;  %1175 = vmatprep.mubr.bf16.mxu1 %v7992_v48 }
  0x86   : > { %7252 = vmatmul.mubr.msk.bf16.vlgmr.msra.gmra.mxu0 %vm677_vm0, %v8217_v56  ;;  %7254 = vmatmul.mubr.msk.bf16.vlgmr.msra.gmra.mxu1 %vm677_vm0, %v8217_v56 }
  0x87   : > { %1134 = vmatprep.mubr.bf16.mxu0 %v7992_v48  ;;  %1185 = vmatprep.mubr.bf16.mxu1 %v7992_v48 }
  0x88   : > { %1209 = vmatpush1.bf16.msra.mxu0 %v7518_v12  ;;  %1260 = vmatpush1.bf16.msra.mxu1 %v7521_v13 }
  0x89   : > { %1310 = vmatprep.subr.bf16.mxu0 %v7526_v14  ;;  %1361 = vmatprep.subr.bf16.mxu1 %v7529_v15 }
  0x8e   : > { %7253 = vmatmul.mubr.msk.bf16.gmra.mxu0 %vm677_vm0, %v8234_v63  ;;  %7255 = vmatmul.mubr.msk.bf16.gmra.mxu1 %vm677_vm0, %v8234_v63 }
  0x8f   : > { %1226 = vmatprep.mubr.bf16.mxu0 %v7992_v48  ;;  %1277 = vmatprep.mubr.bf16.mxu1 %v7992_v48 }
  0x96   : > { %7256 = vmatmul.mubr.msk.bf16.vlgmr.msra.gmra.mxu0 %vm677_vm0, %v8217_v56  ;;  %7258 = vmatmul.mubr.msk.bf16.vlgmr.msra.gmra.mxu1 %vm677_vm0, %v8217_v56 }
  0x97   : > { %1236 = vmatprep.mubr.bf16.mxu0 %v7992_v48  ;;  %1287 = vmatprep.mubr.bf16.mxu1 %v7992_v48 }
  0x98   : > { %1311 = vmatpush1.bf16.msra.mxu0 %v7524_v16  ;;  %1362 = vmatpush1.bf16.msra.mxu1 %v7527_v17 }
  0x99   : > { %1412 = vmatprep.subr.bf16.mxu0 %v7532_v18  ;;  %1463 = vmatprep.subr.bf16.mxu1 %v7535_v19 }
  0x9e   : > { %7257 = vmatmul.mubr.msk.bf16.gmra.mxu0 %vm677_vm0, %v8234_v63  ;;  %7259 = vmatmul.mubr.msk.bf16.gmra.mxu1 %vm677_vm0, %v8234_v63 }
  0x9f   : > { %1328 = vmatprep.mubr.bf16.mxu0 %v7992_v48  ;;  %1379 = vmatprep.mubr.bf16.mxu1 %v7992_v48 }
  0xa6   : > { %7260 = vmatmul.mubr.msk.bf16.vlgmr.msra.gmra.mxu0 %vm677_vm0, %v8217_v56  ;;  %7262 = vmatmul.mubr.msk.bf16.vlgmr.msra.gmra.mxu1 %vm677_vm0, %v8217_v56 }
  0xa7   : > { %1338 = vmatprep.mubr.bf16.mxu0 %v7992_v48  ;;  %1389 = vmatprep.mubr.bf16.mxu1 %v7992_v48 }
  0xa8   : > { %1413 = vmatpush1.bf16.msra.mxu0 %v7530_v20  ;;  %1464 = vmatpush1.bf16.msra.mxu1 %v7533_v21 }
  0xa9   : > { %1514 = vmatprep.subr.bf16.mxu0 %v7538_v22  ;;  %1565 = vmatprep.subr.bf16.mxu1 %v7541_v23 }
  0xae   : > { %7261 = vmatmul.mubr.msk.bf16.gmra.mxu0 %vm677_vm0, %v8234_v63  ;;  %7263 = vmatmul.mubr.msk.bf16.gmra.mxu1 %vm677_vm0, %v8234_v63 }
  0xaf   : > { %1430 = vmatprep.mubr.bf16.mxu0 %v7992_v48  ;;  %1481 = vmatprep.mubr.bf16.mxu1 %v7992_v48 }
  0xb6   : > { %7264 = vmatmul.mubr.msk.bf16.vlgmr.msra.gmra.mxu0 %vm677_vm0, %v8217_v56  ;;  %7266 = vmatmul.mubr.msk.bf16.vlgmr.msra.gmra.mxu1 %vm677_vm0, %v8217_v56 }
  0xb7   : > { %1440 = vmatprep.mubr.bf16.mxu0 %v7992_v48  ;;  %1491 = vmatprep.mubr.bf16.mxu1 %v7992_v48 }
  0xb8   : > { %1515 = vmatpush1.bf16.msra.mxu0 %v7536_v24  ;;  %1566 = vmatpush1.bf16.msra.mxu1 %v7539_v25 }
  0xb9   : > { %1616 = vmatprep.subr.bf16.mxu0 %v7544_v26  ;;  %1667 = vmatprep.subr.bf16.mxu1 %v7547_v27 }
  0xbb   : > { %v8409_v38 = vpop.permute.xlu0 %420  ;;  %v8422_v49 = vpop.permute.xlu1 %430 }
  0xbe   : > { %7265 = vmatmul.mubr.msk.bf16.gmra.mxu0 %vm677_vm0, %v8234_v63  ;;  %7267 = vmatmul.mubr.msk.bf16.gmra.mxu1 %vm677_vm0, %v8234_v63 }
  0xbf   : > { %1532 = vmatprep.mubr.bf16.mxu0 %v7992_v48  ;;  %1583 = vmatprep.mubr.bf16.mxu1 %v7992_v48  ;;  %v8411_v41 = vpop.permute.xlu0 %425 }
  0xc6   : > { %7268 = vmatmul.mubr.msk.bf16.vlgmr.msra.gmra.mxu0 %vm677_vm0, %v8217_v56  ;;  %7270 = vmatmul.mubr.msk.bf16.vlgmr.msra.gmra.mxu1 %vm677_vm0, %v8217_v56 }
  0xc7   : > { %1542 = vmatprep.mubr.bf16.mxu0 %v7992_v48  ;;  %1593 = vmatprep.mubr.bf16.mxu1 %v7992_v48 }
  0xc8   : > { %1617 = vmatpush1.bf16.msra.mxu0 %v7542_v28  ;;  %1668 = vmatpush1.bf16.msra.mxu1 %v7545_v29 }
  0xc9   : > { %1718 = vmatprep.subr.bf16.mxu0 %v7550_v30  ;;  %1769 = vmatprep.subr.bf16.mxu1 %v7553_v31 }
  0xce   : > { %7269 = vmatmul.mubr.msk.bf16.gmra.mxu0 %vm677_vm0, %v8234_v63  ;;  %7271 = vmatmul.mubr.msk.bf16.gmra.mxu1 %vm677_vm0, %v8234_v63 }
  0xcf   : > { %1634 = vmatprep.mubr.bf16.mxu0 %v7992_v48  ;;  %1685 = vmatprep.mubr.bf16.mxu1 %v7992_v48 }
  0xd6   : > { %7272 = vmatmul.mubr.msk.bf16.vlgmr.msra.gmra.mxu0 %vm677_vm0, %v8217_v56  ;;  %7274 = vmatmul.mubr.msk.bf16.vlgmr.msra.gmra.mxu1 %vm677_vm0, %v8217_v56 }
  0xd7   : > { %1644 = vmatprep.mubr.bf16.mxu0 %v7992_v48  ;;  %1695 = vmatprep.mubr.bf16.mxu1 %v7992_v48 }
  0xd8   : > { %1719 = vmatpush1.bf16.msra.mxu0 %v7548_v32  ;;  %1770 = vmatpush1.bf16.msra.mxu1 %v7551_v33 }
  0xd9   : > { %1820 = vmatprep.subr.bf16.mxu0 %v7556_v34  ;;  %7394 = vmatprep.subr.bf16.mxu1 %v7557_v35 }
  0xde   : > { %7273 = vmatmul.mubr.msk.bf16.gmra.mxu0 %vm677_vm0, %v8234_v63  ;;  %7275 = vmatmul.mubr.msk.bf16.gmra.mxu1 %vm677_vm0, %v8234_v63 }
  0xdf   : > { %1736 = vmatprep.mubr.bf16.mxu0 %v7992_v48  ;;  %1787 = vmatprep.mubr.bf16.mxu1 %v7992_v48 }
  0xe6   : > { %7276 = vmatmul.mubr.msk.bf16.vlgmr.msra.gmra.mxu0 %vm677_vm0, %v8217_v56  ;;  %7278 = vmatmul.mubr.msk.bf16.vlgmr.msra.gmra.mxu1 %vm677_vm0, %v8217_v56 }
  0xe7   : > { %1746 = vmatprep.mubr.bf16.mxu0 %v7992_v48  ;;  %1797 = vmatprep.mubr.bf16.mxu1 %v7992_v48 }
  0xe8   : > { %1821 = vmatpush1.bf16.msra.mxu0 %v7554_v36  ;;  %7395 = vmatpush3.bf16.msra.mxu1 %v7557_v35 }
  0xee   : > { %7277 = vmatmul.mubr.msk.bf16.gmra.mxu0 %vm677_vm0, %v8234_v63  ;;  %7279 = vmatmul.mubr.msk.bf16.gmra.mxu1 %vm677_vm0, %v8234_v63 }
  0xef   : > { %1838 = vmatprep.mubr.bf16.mxu0 %v7992_v48  ;;  %7396 = vmatprep.mubr.msk.bf16.mxu1 %vm677_vm0, %v8217_v56 }
  0xf6   : > { %7280 = vmatmul.mubr.msk.bf16.vlgmr.msra.gmra.mxu0 %vm677_vm0, %v8217_v56  ;;  %7397 = vmatmul.mubr.msk.bf16.vlgmr.msra.gmra.mxu1 %vm677_vm0, %v8234_v63 }
  0xf7   : > { %1848 = vmatprep.mubr.bf16.mxu0 %v7992_v48  ;;  %2773 = vmatprep.mubr.f32.mxu1 %v10826_v37 }
  0xfe   : > { %7281 = vmatmul.mubr.msk.bf16.gmra.mxu0 %vm677_vm0, %v8234_v63 }
  0xff   : > { %2915 = vmatprep.mubr.f32.mxu0 %v10826_v37 }
 0x106   : > { %v718_v39 = vpop.f32.mrf.mxu0  ;;  %v769_v40 = vpop.f32.mrf.mxu1 }
 0x107   : > { %v8414_v44 = vadd.f32 %v769_v40, %v8409_v38  ;;  %v8428_v53 = vadd.f32 %v718_v39, %v8409_v38 }
 0x108   : > { %v720_v42 = vpop.f32.mrf.mxu0  ;;  %v771_v43 = vpop.f32.mrf.mxu1 }
 0x109   : > { %v8425_v50 = vadd.f32 %v771_v43, %v8409_v38  ;;  %v8439_v57 = vadd.f32 %v720_v42, %v8409_v38 }
 0x10a   : > { %v722_v45 = vpop.f32.mrf.mxu0  ;;  %v773_v46 = vpop.f32.mrf.mxu1 }
 0x10b   : > { %v8417_v47 = vadd.f32 %v722_v45, %v8411_v41  ;;  %v8420_v48 = vadd.f32 %v773_v46, %v8411_v41 }
 0x10c   : > { %v724_v51 = vpop.f32.mrf.mxu0  ;;  %v775_v52 = vpop.f32.mrf.mxu1 }
 0x10d   : > { %v1921_v54 = vmax.f32 %v8414_v44, %v8420_v48  ;;  %v8433_v55 = vadd.f32 %v724_v51, %v8411_v41  ;;  %v8436_v56 = vadd.f32 %v775_v52, %v8411_v41  ;;  %v1905_v60 = vmax.f32 %v8428_v53, %v8417_v47 }
 0x10e   : > { %v728_v58 = vpop.f32.mrf.mxu0  ;;  %v779_v59 = vpop.f32.mrf.mxu1 }
 0x10f   : > { %v8444_v61 = vadd.f32 %v728_v58, %v8422_v49  ;;  %v8447_v62 = vadd.f32 %v779_v59, %v8422_v49  ;;  %v1913_v63 = vmax.f32 %v8439_v57, %v8433_v55  ;;  %v1929_v0 = vmax.f32 %v8425_v50, %v8436_v56 }
 0x110   : > { %v730_v1 = vpop.f32.mrf.mxu0  ;;  %v781_v2 = vpop.f32.mrf.mxu1 }
 0x111   : > { %v1906_v3 = vmax.f32 %v1905_v60, %v8444_v61  ;;  %v1922_v4 = vmax.f32 %v1921_v54, %v8447_v62  ;;  %v8456_v5 = vadd.f32 %v730_v1, %v8422_v49  ;;  %v8459_v6 = vadd.f32 %v781_v2, %v8422_v49 }
 0x112   : > { %v732_v7 = vpop.f32.mrf.mxu0  ;;  %v783_v8 = vpop.f32.mrf.mxu1 }
 0x113   : > { %v1907_v9 = vrot.slane %v1906_v3, 4  ;;  %v1923_v10 = vrot.slane %v1922_v4, 4  ;;  %v1914_v11 = vmax.f32 %v1913_v63, %v8456_v5  ;;  %v1930_v12 = vmax.f32 %v1929_v0, %v8459_v6 }
 0x114   : > { %v733_v13 = vpop.f32.mrf.mxu0  ;;  %v784_v14 = vpop.f32.mrf.mxu1 }
 0x115   : > { %v1908_v15 = vmax.f32 %v1906_v3, %v1907_v9  ;;  %v1924_v16 = vmax.f32 %v1922_v4, %v1923_v10  ;;  %v1915_v17 = vrot.slane %v1914_v11, 4  ;;  %v1931_v18 = vrot.slane %v1930_v12, 4 }
 0x116   : > { %v820_v19 = vpop.f32.mrf.mxu0  ;;  %v871_v20 = vpop.f32.mrf.mxu1 }
 0x117   : > { %v1909_v21 = vrot.slane %v1908_v15, 2  ;;  %v1925_v22 = vrot.slane %v1924_v16, 2  ;;  %v1916_v23 = vmax.f32 %v1914_v11, %v1915_v17  ;;  %v1932_v24 = vmax.f32 %v1930_v12, %v1931_v18 }
 0x118   : > { %v822_v25 = vpop.f32.mrf.mxu0  ;;  %v873_v26 = vpop.f32.mrf.mxu1  ;;  %v8464_v31 = vadd.f32 %v871_v20, %v8409_v38  ;;  %v8467_v40 = vadd.f32 %v820_v19, %v8409_v38 }
 0x119   : > { %v1910_v27 = vmax.f32 %v1908_v15, %v1909_v21  ;;  %v1926_v28 = vmax.f32 %v1924_v16, %v1925_v22  ;;  %v1917_v29 = vrot.slane %v1916_v23, 2  ;;  %v1933_v30 = vrot.slane %v1932_v24, 2 }
 0x11a   : > { %v824_v32 = vpop.f32.mrf.mxu0  ;;  %v875_v33 = vpop.f32.mrf.mxu1  ;;  %v8476_v59 = vadd.f32 %v822_v25, %v8409_v38  ;;  %v8479_v60 = vadd.f32 %v873_v26, %v8409_v38 }
 0x11b   : > { %v1911_v34 = vrot.slane %v1910_v27, 1  ;;  %v1927_v35 = vrot.slane %v1926_v28, 1  ;;  %v1918_v36 = vmax.f32 %v1916_v23, %v1917_v29  ;;  %v1934_v39 = vmax.f32 %v1932_v24, %v1933_v30 }
 0x11c   : > { %v8470_v42 = vadd.f32 %v824_v32, %v8411_v41  ;;  %v8473_v43 = vadd.f32 %v875_v33, %v8411_v41  ;;  %v826_v45 = vpop.f32.mrf.mxu0  ;;  %v877_v46 = vpop.f32.mrf.mxu1 }
 0x11d   : > { %v1912_v51 = vmax.f32 %v1910_v27, %v1911_v34  ;;  %v1928_v52 = vmax.f32 %v1926_v28, %v1927_v35  ;;  %v1919_v54 = vrot.slane %v1918_v36, 1  ;;  %v1935_v58 = vrot.slane %v1934_v39, 1 }
 0x11e   : > { %v1937_v63 = vmax.f32 %v8467_v40, %v8470_v42  ;;  %v1953_v0 = vmax.f32 %v8464_v31, %v8473_v43  ;;  %v830_v1 = vpop.f32.mrf.mxu0  ;;  %v881_v2 = vpop.f32.mrf.mxu1  ;;  %v8492_v18 = vadd.f32 %v826_v45, %v8411_v41 }
 0x11f   : > { %v2281_v3 = vsub.f32 %v8428_v53, %v1912_v51  ;;  %v2328_v4 = vsub.f32 %v8417_v47, %v1912_v51  ;;  %v2375_v7 = vsub.f32 %v8444_v61, %v1912_v51  ;;  %v2283_v8 = vsub.f32 %v8414_v44, %v1928_v52 }
 0x120   : > { %v2330_v9 = vsub.f32 %v8420_v48, %v1928_v52  ;;  %v2377_v10 = vsub.f32 %v8447_v62, %v1928_v52  ;;  %v1920_v11 = vmax.f32 %v1918_v36, %v1919_v54  ;;  %v1936_v12 = vmax.f32 %v1934_v39, %v1935_v58  ;;  %v832_v13 = vpop.f32.mrf.mxu0  ;;  %v883_v14 = vpop.f32.mrf.mxu1 }
 0x121   : > { %v2422_v15 = vmul.f32 1.442695, %v2281_v3  ;;  %v2516_v16 = vmul.f32 1.442695, %v2328_v4  ;;  %v2610_v17 = vmul.f32 1.442695, %v2375_v7  ;;  %v8496_v44 = vadd.f32 %v877_v46, %v8411_v41 }
 0x122   : > { %v2426_v53 = vmul.f32 1.442695, %v2283_v8  ;;  %v2520_v47 = vmul.f32 1.442695, %v2330_v9  ;;  %v2282_v61 = vsub.f32 %v8439_v57, %v1920_v11  ;;  %v834_v48 = vpop.f32.mrf.mxu0  ;;  %v885_v19 = vpop.f32.mrf.mxu1  ;;  %v2329_v62 = vsub.f32 %v8433_v55, %v1920_v11 }
 0x123   : > { %7558 = vpow2.f32 %v2422_v15  ;;  %v2376_v20 = vsub.f32 %v8456_v5, %v1920_v11  ;;  %v2284_v21 = vsub.f32 %v8425_v50, %v1936_v12  ;;  %v2614_v22 = vmul.f32 1.442695, %v2377_v10 }
 0x124   : > { %7560 = vpow2.f32 %v2516_v16  ;;  %v2331_v23 = vsub.f32 %v8436_v56, %v1936_v12  ;;  %v2378_v24 = vsub.f32 %v8459_v6, %v1936_v12  ;;  %v835_v25 = vpop.f32.mrf.mxu0  ;;  %v886_v57 = vpop.f32.mrf.mxu1  ;;  %v2424_v26 = vmul.f32 1.442695, %v2282_v61 }
 0x125   : > { %7562 = vpow2.f32 %v2610_v17  ;;  %v2518_v27 = vmul.f32 1.442695, %v2329_v62  ;;  %v1945_v28 = vmax.f32 %v8476_v59, %v8492_v18  ;;  %v2612_v55 = vmul.f32 1.442695, %v2376_v20 }
 0x126   : > { %7564 = vpow2.f32 %v2426_v53  ;;  %v2428_v29 = vmul.f32 1.442695, %v2284_v21  ;;  %v2522_v5 = vmul.f32 1.442695, %v2331_v23  ;;  %v922_v30 = vpop.f32.mrf.mxu0  ;;  %v973_v50 = vpop.f32.mrf.mxu1  ;;  %v8506_v32 = vadd.f32 %v830_v1, %v8422_v49 }
 0x127   : > { %7566 = vpow2.f32 %v2520_v47  ;;  %v8509_v56 = vadd.f32 %v881_v2, %v8422_v49  ;;  %v8512_v6 = vadd.f32 %v832_v13, %v8422_v49  ;;  %v2616_v33 = vmul.f32 1.442695, %v2378_v24 }
 0x128   : > { %7568 = vpow2.f32 %v2614_v22  ;;  %v1961_v34 = vmax.f32 %v8479_v60, %v8496_v44  ;;  %v8517_v35 = vadd.f32 %v883_v14, %v8422_v49  ;;  %v924_v36 = vpop.f32.mrf.mxu0  ;;  %v975_v39 = vpop.f32.mrf.mxu1  ;;  %v1938_v45 = vmax.f32 %v1937_v63, %v8506_v32 }
 0x129   : > { %7570 = vpow2.f32 %v2424_v26  ;;  %v1954_v46 = vmax.f32 %v1953_v0, %v8509_v56  ;;  %v1946_v51 = vmax.f32 %v1945_v28, %v8512_v6  ;;  %v8524_v54 = vadd.f32 %v922_v30, %v8409_v38 }
 0x12a   : > { %7572 = vpow2.f32 %v2518_v27  ;;  %v1962_v52 = vmax.f32 %v1961_v34, %v8517_v35  ;;  %v8527_v58 = vadd.f32 %v973_v50, %v8409_v38  ;;  %v926_v1 = vpop.f32.mrf.mxu0  ;;  %v977_v2 = vpop.f32.mrf.mxu1  ;;  %v1939_v3 = vrot.slane %v1938_v45, 4 }
 0x12b   : > { %7574 = vpow2.f32 %v2612_v55  ;;  %v1955_v4 = vrot.slane %v1954_v46, 4  ;;  %v1947_v7 = vrot.slane %v1946_v51, 4  ;;  %v8530_v0 = vadd.f32 %v924_v36, %v8409_v38 }
 0x12c   : > { %v1963_v63 = vrot.slane %v1962_v52, 4  ;;  %v8533_v8 = vadd.f32 %v926_v1, %v8411_v41  ;;  %v8536_v9 = vadd.f32 %v977_v2, %v8411_v41  ;;  %v928_v10 = vpop.f32.mrf.mxu0  ;;  %v979_v11 = vpop.f32.mrf.mxu1  ;;  %v1940_v12 = vmax.f32 %v1938_v45, %v1939_v3 }
 0x12d   : > { %v1956_v13 = vmax.f32 %v1954_v46, %v1955_v4  ;;  %v1948_v14 = vmax.f32 %v1946_v51, %v1947_v7  ;;  %v8539_v15 = vadd.f32 %v975_v39, %v8409_v38  ;;  %7576 = vpow2.f32 %v2428_v29 }
 0x12e   : > { %v1964_v16 = vmax.f32 %v1962_v52, %v1963_v63  ;;  %v1969_v17 = vmax.f32 %v8524_v54, %v8533_v8  ;;  %v1985_v53 = vmax.f32 %v8527_v58, %v8536_v9  ;;  %v932_v47 = vpop.f32.mrf.mxu0  ;;  %v983_v61 = vpop.f32.mrf.mxu1  ;;  %v1941_v48 = vrot.slane %v1940_v12, 2 }
 0x12f   : > { %v1957_v19 = vrot.slane %v1956_v13, 2  ;;  %v1949_v62 = vrot.slane %v1948_v14, 2  ;;  %v8546_v20 = vadd.f32 %v928_v10, %v8411_v41  ;;  %v8551_v23 = vadd.f32 %v979_v11, %v8411_v41 }
 0x130   : > { %v8548_v21 = vpop.eup %7558  ;;  %v1965_v22 = vrot.slane %v1964_v16, 2  ;;  %v8554_v24 = vadd.f32 %v932_v47, %v8422_v49  ;;  %v8557_v25 = vadd.f32 %v983_v61, %v8422_v49  ;;  %v934_v57 = vpop.f32.mrf.mxu0  ;;  %7578 = vpow2.f32 %v2616_v33 }
 0x131   : > { %10929 = vst [vmem:[#allocation4_spill] sm:$0xff] %v8548_v21  ;;  %v985_v26 = vpop.f32.mrf.mxu1  ;;  %v8559_v27 = vpop.eup %7560  ;;  %v1942_v28 = vmax.f32 %v1940_v12, %v1941_v48  ;;  %v1958_v55 = vmax.f32 %v1956_v13, %v1957_v19  ;;  %v1950_v29 = vmax.f32 %v1948_v14, %v1949_v62  ;;  %7580 = vpow2.f32 %v2522_v5 }
 0x132   : > { %10930 = vst [vmem:[#allocation5_spill] sm:$0xff] %v8559_v27  ;;  %v8561_v30 = vpop.eup %7562  ;;  %v1966_v50 = vmax.f32 %v1964_v16, %v1965_v22  ;;  %v1970_v34 = vmax.f32 %v1969_v17, %v8554_v24  ;;  %v1986_v36 = vmax.f32 %v1985_v53, %v8557_v25  ;;  %v936_v39 = vpop.f32.mrf.mxu0  ;;  %v8568_v33 = vadd.f32 %v934_v57, %v8422_v49 }
 0x133   : > { %10931 = vst [vmem:[#allocation6_spill] sm:$0xff] %v8561_v30  ;;  %v987_v45 = vpop.f32.mrf.mxu1  ;;  %v8565_v46 = vpop.eup %7564  ;;  %v1943_v51 = vrot.slane %v1942_v28, 1  ;;  %v1959_v52 = vrot.slane %v1958_v55, 1  ;;  %v1951_v1 = vrot.slane %v1950_v29, 1  ;;  %v1977_v5 = vmax.f32 %v8530_v0, %v8546_v20 }
 0x134   : > { %10932 = vst [vmem:[#allocation7_spill] sm:$0xff] %v8565_v46  ;;  %v8570_v2 = vpop.eup %7566  ;;  %v1967_v3 = vrot.slane %v1966_v50, 1  ;;  %v1993_v4 = vmax.f32 %v8539_v15, %v8551_v23  ;;  %v1971_v7 = vrot.slane %v1970_v34, 4  ;;  %v937_v63 = vpop.f32.mrf.mxu0  ;;  %v1987_v16 = vrot.slane %v1986_v36, 4 }
 0x135   : > { %10933 = vst [vmem:[#allocation8_spill] sm:$0xff] %v8570_v2  ;;  %v988_v10 = vpop.f32.mrf.mxu1  ;;  %v8576_v11 = vpop.eup %7568  ;;  %v1944_v12 = vmax.f32 %v1942_v28, %v1943_v51  ;;  %v1960_v13 = vmax.f32 %v1958_v55, %v1959_v52  ;;  %v1952_v14 = vmax.f32 %v1950_v29, %v1951_v1  ;;  %v1978_v61 = vmax.f32 %v1977_v5, %v8568_v33 }
 0x136   : > { %10934 = vst [vmem:[#allocation9_spill] sm:$0xff] %v8576_v11  ;;  %v8578_v17 = vpop.eup %7570  ;;  %v8580_v53 = vmax.f32 %v1966_v50, %v1967_v3  ;;  %v1972_v47 = vmax.f32 %v1970_v34, %v1971_v7  ;;  %v8584_v48 = vadd.f32 %v985_v26, %v8422_v49  ;;  %v8586_v19 = vpop.f32.mrf.mxu0  ;;  %v8627_v10 = vld [vmem:[%s10823_s3] sm:$0xff] }
 0x137   : > { %10935 = vst [vmem:[#allocation10_spill] sm:$0xff] %v8578_v17  ;;  %v8588_v62 = vpop.f32.mrf.mxu1  ;;  %v8590_v22 = vpop.eup %7572  ;;  %v2285_v57 = vsub.f32 %v8467_v40, %v1944_v12  ;;  %v2332_v28 = vsub.f32 %v8470_v42, %v1944_v12  ;;  %v2379_v55 = vsub.f32 %v8506_v32, %v1944_v12  ;;  %v2287_v29 = vsub.f32 %v8464_v31, %v1960_v13 }
 0x138   : > { %10936 = vst [vmem:[#allocation11_spill] sm:$0xff] %v8590_v22  ;;  %v8596_v50 = vpop.eup %7574  ;;  %v2334_v34 = vsub.f32 %v8473_v43, %v1960_v13  ;;  %v2381_v26 = vsub.f32 %v8509_v56, %v1960_v13  ;;  %v2286_v39 = vsub.f32 %v8476_v59, %v1952_v14  ;;  %v2333_v45 = vsub.f32 %v8492_v18, %v1952_v14  ;;  %v8602_v51 = vpop.f32.mrf.mxu0 }
 0x139   : > { %10937 = vst [vmem:[#allocation12_spill] sm:$0xff] %v8596_v50  ;;  %v8604_v52 = vpop.f32.mrf.mxu1  ;;  %v2430_v40 = vmul.f32 1.442695, %v2285_v57  ;;  %v2524_v42 = vmul.f32 1.442695, %v2332_v28  ;;  %v1988_v32 = vmax.f32 %v1986_v36, %v1987_v16  ;;  %2735 = vmatprep.subr.mxu1 %v8596_v50  ;;  %v2380_v3 = vsub.f32 %v8512_v6, %v1952_v14 }
 0x13a   : > { %v2618_v1 = vmul.f32 1.442695, %v2379_v55  ;;  %v2434_v31 = vmul.f32 1.442695, %v2287_v29  ;;  %v2288_v43 = vsub.f32 %v8479_v60, %v8580_v53  ;;  %v1994_v59 = vmax.f32 %v1993_v4, %v8584_v48  ;;  %2736 = vmatpush1.msra.mxu1 %v8561_v30  ;;  %v8612_v18 = vpop.f32.mrf.mxu0  ;;  %v8616_v5 = vpop.eup %7576 }
 0x13b   : > { %v8614_v56 = vpop.f32.mrf.mxu1  ;;  %10938 = vst [vmem:[#allocation13_spill] sm:$0xff] %v8616_v5  ;;  %7582 = vpow2.f32 %v2430_v40  ;;  %v2528_v36 = vmul.f32 1.442695, %v2334_v34  ;;  %v2622_v7 = vmul.f32 1.442695, %v2381_v26  ;;  %2737 = vmatprep.subr.mxu1 %v8590_v22  ;;  %v2335_v60 = vsub.f32 %v8496_v44, %v8580_v53 }
 0x13c   : > { %v2432_v63 = vmul.f32 1.442695, %v2286_v39  ;;  %7584 = vpow2.f32 %v2524_v42  ;;  %v2526_v6 = vmul.f32 1.442695, %v2333_v45  ;;  %v2382_v4 = vsub.f32 %v8517_v35, %v8580_v53  ;;  %2738 = vmatpush1.msra.mxu1 %v8559_v27  ;;  %v8629_v12 = vpop.f32.mrf.mxu0 }
 0x13d   : > { %v8631_v13 = vpop.f32.mrf.mxu1  ;;  %7586 = vpow2.f32 %v2618_v1  ;;  %v1973_v14 = vrot.slane %v1972_v47, 2  ;;  %v1989_v16 = vrot.slane %v1988_v32, 2  ;;  %v1979_v57 = vrot.slane %v1978_v61, 4  ;;  %2739 = vmatprep.subr.mxu1 %v8578_v17  ;;  %v8634_v44 = vpop.eup %7578 }
 0x13e   : > { %10939 = vst [vmem:[#allocation14_spill] sm:$0xff] %v8634_v44  ;;  %7588 = vpow2.f32 %v2434_v31  ;;  %v2620_v35 = vmul.f32 1.442695, %v2380_v3  ;;  %v2436_v53 = vmul.f32 1.442695, %v2288_v43  ;;  %v1995_v28 = vrot.slane %v1994_v59, 4  ;;  %2740 = vmatpush1.msra.mxu1 %v8548_v21  ;;  %v8637_v55 = vpop.f32.mrf.mxu0  ;;  %v8641_v34 = vpop.eup %7580 }
 0x13f   : > { %v8639_v29 = vpop.f32.mrf.mxu1  ;;  %10940 = vst [vmem:[#allocation15_spill] sm:$0xff] %v8641_v34  ;;  %7590 = vpow2.f32 %v2528_v36  ;;  %v1974_v26 = vmax.f32 %v1972_v47, %v1973_v14  ;;  %v1990_v39 = vmax.f32 %v1988_v32, %v1989_v16  ;;  %v1980_v45 = vmax.f32 %v1978_v61, %v1979_v57  ;;  %7284 = vmatmul.mubr.msk.f32.vlgmr.msra.gmra.mxu1 %vm2705_vm1, %v8627_v10 }
 0x140   : > { %2806 = vmatprep.subr.mxu1 %v8634_v44  ;;  %7592 = vpow2.f32 %v2622_v7  ;;  %v2530_v40 = vmul.f32 1.442695, %v2335_v60  ;;  %v2624_v42 = vmul.f32 1.442695, %v2382_v4  ;;  %v1996_v1 = vmax.f32 %v1994_v59, %v1995_v28  ;;  %2844 = vmatprep.mubr.f32.mxu1 %v10826_v37  ;;  %v8648_v31 = vpop.f32.mrf.mxu0 }
 0x141   : > { %2807 = vmatpush1.msra.mxu1 %v8576_v11  ;;  %v8650_v3 = vpop.f32.mrf.mxu1  ;;  %7594 = vpow2.f32 %v2432_v63  ;;  %v1975_v47 = vrot.slane %v1974_v26, 1  ;;  %v1991_v61 = vrot.slane %v1990_v39, 1  ;;  %v1981_v32 = vrot.slane %v1980_v45, 2 }
 0x142   : > { %2808 = vmatprep.subr.mxu1 %v8641_v34  ;;  %7596 = vpow2.f32 %v2526_v6  ;;  %v1997_v43 = vrot.slane %v1996_v1, 2  ;;  %v8655_v36 = vadd.f32 %v8586_v19, %v8409_v38  ;;  %v8659_v59 = vadd.f32 %v8588_v62, %v8409_v38  ;;  %v1038_v7 = vpop.f32.mrf.mxu0 }
 0x143   : > { %2809 = vmatpush1.msra.mxu1 %v8570_v2  ;;  %v1089_v60 = vpop.f32.mrf.mxu1  ;;  %7598 = vpow2.f32 %v2620_v35  ;;  %v1976_v63 = vmax.f32 %v1974_v26, %v1975_v47  ;;  %v1992_v4 = vmax.f32 %v1990_v39, %v1991_v61  ;;  %v8664_v14 = vadd.f32 %v8602_v51, %v8409_v38 }
 0x144   : > { %2810 = vmatprep.subr.mxu1 %v8616_v5  ;;  %7600 = vpow2.f32 %v2436_v53  ;;  %v1982_v19 = vmax.f32 %v1980_v45, %v1981_v32  ;;  %v8669_v6 = vadd.f32 %v8604_v52, %v8409_v38  ;;  %v8673_v62 = vadd.f32 %v8612_v18, %v8411_v41  ;;  %v1039_v16 = vpop.f32.mrf.mxu0 }
 0x145   : > { %2811 = vmatpush1.msra.mxu1 %v8565_v46  ;;  %v1090_v57 = vpop.f32.mrf.mxu1  ;;  %v2289_v35 = vsub.f32 %v8524_v54, %v1976_v63  ;;  %v2336_v51 = vsub.f32 %v8533_v8, %v1976_v63  ;;  %v2383_v28 = vsub.f32 %v8554_v24, %v1976_v63  ;;  %v1998_v53 = vmax.f32 %v1996_v1, %v1997_v43 }
 0x146   : > { %7285 = vmatmul.mubr.msk.f32.vlgmr.msra.gmra.mxu1 %vm2705_vm1, %v8627_v10  ;;  %7602 = vpow2.f32 %v2624_v42  ;;  %v2291_v52 = vsub.f32 %v8527_v58, %v1992_v4  ;;  %v2338_v18 = vsub.f32 %v8536_v9, %v1992_v4  ;;  %v2385_v26 = vsub.f32 %v8557_v25, %v1992_v4  ;;  %v8684_v39 = vpop.f32.mrf.mxu0 }
 0x147   : > { %v8686_v45 = vpop.f32.mrf.mxu1  ;;  %2986 = vmatprep.mubr.f32.mxu1 %v10826_v37  ;;  %v2438_v54 = vmul.f32 1.442695, %v2289_v35  ;;  %v2532_v8 = vmul.f32 1.442695, %v2336_v51  ;;  %v2626_v24 = vmul.f32 1.442695, %v2383_v28  ;;  %v8691_v1 = vadd.f32 %v8614_v56, %v8411_v41 }
 0x148   : > { %v8693_v42 = vpop.eup %7582  ;;  %7604 = vpow2.f32 %v2530_v40  ;;  %v2442_v58 = vmul.f32 1.442695, %v2291_v52  ;;  %v2536_v9 = vmul.f32 1.442695, %v2338_v18  ;;  %v2001_v25 = vmax.f32 %v8655_v36, %v8673_v62  ;;  %v8697_v47 = vpop.f32.mrf.mxu0 }
 0x149   : > { %10941 = vst [vmem:[#allocation16_spill] sm:$0xff] %v8693_v42  ;;  %v8699_v61 = vpop.f32.mrf.mxu1  ;;  %v8701_v32 = vpop.eup %7584  ;;  %7606 = vpow2.f32 %v2438_v54  ;;  %v1983_v43 = vrot.slane %v1982_v19, 1  ;;  %v1999_v7 = vrot.slane %v1998_v53, 1  ;;  %v8705_v56 = vadd.f32 %v8629_v12, %v8411_v41 }
 0x14a   : > { %10942 = vst [vmem:[#allocation17_spill] sm:$0xff] %v8701_v32  ;;  %v8707_v60 = vpop.eup %7586  ;;  %7608 = vpow2.f32 %v2532_v8  ;;  %v2630_v40 = vmul.f32 1.442695, %v2385_v26  ;;  %v8711_v63 = vadd.f32 %v8637_v55, %v8422_v49  ;;  %v8715_v4 = vadd.f32 %v8639_v29, %v8422_v49  ;;  %v8717_v16 = vpop.f32.mrf.mxu0 }
 0x14b   : > { %10943 = vst [vmem:[#allocation18_spill] sm:$0xff] %v8707_v60  ;;  %v8719_v57 = vpop.f32.mrf.mxu1  ;;  %v8721_v35 = vpop.eup %7588  ;;  %7610 = vpow2.f32 %v2626_v24  ;;  %v1984_v12 = vmax.f32 %v1982_v19, %v1983_v43  ;;  %v2000_v51 = vmax.f32 %v1998_v53, %v1999_v7  ;;  %v2017_v28 = vmax.f32 %v8659_v59, %v8691_v1 }
 0x14c   : > { %10944 = vst [vmem:[#allocation19_spill] sm:$0xff] %v8721_v35  ;;  %v8725_v52 = vpop.eup %7590  ;;  %7612 = vpow2.f32 %v2442_v58  ;;  %v2009_v55 = vmax.f32 %v8664_v14, %v8705_v56  ;;  %v8731_v29 = vadd.f32 %v8631_v13, %v8411_v41  ;;  %v2002_v18 = vmax.f32 %v2001_v25, %v8711_v63  ;;  %v8734_v26 = vpop.f32.mrf.mxu0 }
 0x14d   : > { %10945 = vst [vmem:[#allocation20_spill] sm:$0xff] %v8725_v52  ;;  %v8736_v54 = vpop.f32.mrf.mxu1  ;;  %v8738_v19 = vpop.eup %7592  ;;  %v2290_v53 = vsub.f32 %v8530_v0, %v1984_v12  ;;  %v2337_v8 = vsub.f32 %v8546_v20, %v1984_v12  ;;  %v2384_v24 = vsub.f32 %v8568_v33, %v1984_v12  ;;  %v2018_v58 = vmax.f32 %v2017_v28, %v8715_v4 }
 0x14e   : > { %10946 = vst [vmem:[#allocation21_spill] sm:$0xff] %v8738_v19  ;;  %v8744_v43 = vpop.eup %7594  ;;  %7614 = vpow2.f32 %v2536_v9  ;;  %v2292_v13 = vsub.f32 %v8539_v15, %v2000_v51  ;;  %v2339_v25 = vsub.f32 %v8551_v23, %v2000_v51  ;;  %v2386_v7 = vsub.f32 %v8584_v48, %v2000_v51  ;;  %v8749_v37 = vpop.f32.mrf.mxu0 }
 0x14f   : > { %10947 = vst [vmem:[#allocation22_spill] sm:$0xff] %v8744_v43  ;;  %v8751_v50 = vpop.f32.mrf.mxu1  ;;  %v8753_v0 = vpop.eup %7596  ;;  %v2440_v20 = vmul.f32 1.442695, %v2290_v53  ;;  %v2534_v30 = vmul.f32 1.442695, %v2337_v8  ;;  %v8757_v12 = vadd.f32 %v8648_v31, %v8422_v49  ;;  %7616 = vpow2.f32 %v2630_v40 }
 0x150   : > { %10948 = vst [vmem:[#allocation23_spill] sm:$0xff] %v8753_v0  ;;  %v2628_v33 = vmul.f32 1.442695, %v2384_v24  ;;  %v8759_v9 = vpop.eup %7598  ;;  %v2444_v15 = vmul.f32 1.442695, %v2292_v13  ;;  %v2025_v23 = vmax.f32 %v8669_v6, %v8731_v29  ;;  %v8765_v48 = vadd.f32 %v8650_v3, %v8422_v49  ;;  %v8767_v51 = vpop.f32.mrf.mxu0 }
 0x151   : > { %10949 = vst [vmem:[#allocation24_spill] sm:$0xff] %v8759_v9  ;;  %v8769_v28 = vpop.f32.mrf.mxu1  ;;  %v8771_v53 = vpop.eup %7600  ;;  %7618 = vpow2.f32 %v2440_v20  ;;  %v2003_v31 = vrot.slane %v2002_v18, 4  ;;  %v2019_v8 = vrot.slane %v2018_v58, 4  ;;  %v2010_v24 = vmax.f32 %v2009_v55, %v8757_v12  ;;  %2877 = vmatprep.subr.mxu0 %v8759_v9 }
 0x152   : > { %10950 = vst [vmem:[#allocation25_spill] sm:$0xff] %v8771_v53  ;;  %7620 = vpow2.f32 %v2534_v30  ;;  %v2538_v40 = vmul.f32 1.442695, %v2339_v25  ;;  %v2632_v13 = vmul.f32 1.442695, %v2386_v7  ;;  %v2026_v22 = vmax.f32 %v2025_v23, %v8765_v48  ;;  %2878 = vmatpush1.msra.mxu0 %v8707_v60  ;;  %v1140_v3 = vpop.f32.mrf.mxu0 }
 0x153   : > { %v1191_v44 = vpop.f32.mrf.mxu1  ;;  %v8777_v27 = vpop.eup %7602  ;;  %7622 = vpow2.f32 %v2628_v33  ;;  %v2004_v11 = vmax.f32 %v2002_v18, %v2003_v31  ;;  %v2020_v20 = vmax.f32 %v2018_v58, %v2019_v8  ;;  %v2011_v17 = vrot.slane %v2010_v24, 4  ;;  %2879 = vmatprep.subr.mxu0 %v8753_v0 }
 0x154   : > { %10951 = vst [vmem:[#allocation26_spill] sm:$0xff] %v8777_v27  ;;  %7624 = vpow2.f32 %v2444_v15  ;;  %v2027_v55 = vrot.slane %v2026_v22, 4  ;;  %2948 = vmatprep.subr.mxu1 %v8777_v27  ;;  %v8783_v30 = vadd.f32 %v8684_v39, %v8409_v38  ;;  %v8787_v25 = vadd.f32 %v8686_v45, %v8409_v38  ;;  %2880 = vmatpush1.msra.mxu0 %v8701_v32  ;;  %v1141_v44 = vpop.f32.mrf.mxu0 }
 0x155   : > { %v1192_v18 = vpop.f32.mrf.mxu1  ;;  %v8790_v58 = vpop.eup %7604  ;;  %v2005_v7 = vrot.slane %v2004_v11, 2  ;;  %v2021_v33 = vrot.slane %v2020_v20, 2  ;;  %v2012_v15 = vmax.f32 %v2010_v24, %v2011_v17  ;;  %2949 = vmatpush1.msra.mxu1 %v8738_v19  ;;  %2881 = vmatprep.subr.mxu0 %v8744_v43  ;;  %v8796_v39 = vadd.f32 %v8697_v47, %v8409_v38 }
 0x156   : > { %10952 = vst [vmem:[#allocation27_spill] sm:$0xff] %v8790_v58  ;;  %v8798_v23 = vpop.eup %7606  ;;  %7626 = vpow2.f32 %v2632_v13  ;;  %v2028_v45 = vmax.f32 %v2026_v22, %v2027_v55  ;;  %2950 = vmatprep.subr.mxu1 %v8790_v58  ;;  %2882 = vmatpush1.msra.mxu0 %v8693_v42  ;;  %v8804_v31 = vadd.f32 %v8717_v16, %v8411_v41  ;;  %v8810_v8 = vpop.f32.mrf.mxu0 }
 0x157   : > { %10953 = vst [vmem:[#allocation28_spill] sm:$0xff] %v8798_v23  ;;  %v8808_v17 = vadd.f32 %v8719_v57, %v8411_v41  ;;  %v8812_v47 = vpop.f32.mrf.mxu1  ;;  %v8814_v24 = vpop.eup %7608  ;;  %v2006_v13 = vmax.f32 %v2004_v11, %v2005_v7  ;;  %v2022_v22 = vmax.f32 %v2020_v20, %v2021_v33  ;;  %v2013_v3 = vrot.slane %v2012_v15, 2  ;;  %2951 = vmatpush1.msra.mxu1 %v8725_v52 }
 0x158   : > { %10954 = vst [vmem:[#allocation29_spill] sm:$0xff] %v8814_v24  ;;  %7286 = vmatmul.mubr.msk.f32.vlgmr.msra.gmra.mxu0 %vm2705_vm1, %v8627_v10  ;;  %v8821_v16 = vadd.f32 %v8734_v26, %v8411_v41  ;;  %v8823_v57 = vpop.eup %7610  ;;  %7628 = vpow2.f32 %v2538_v40  ;;  %v2029_v55 = vrot.slane %v2028_v45, 2  ;;  %2952 = vmatprep.subr.mxu1 %v8771_v53  ;;  %v8828_v11 = vadd.f32 %v8699_v61, %v8409_v38  ;;  %v8832_v44 = vpop.f32.mrf.mxu0 }
 0x159   : > { %10956 = vst [vmem:[#allocation31_spill] sm:$0xff] %v8823_v57  ;;  %v2033_v20 = vmax.f32 %v8783_v30, %v8804_v31  ;;  %v8834_v18 = vpop.f32.mrf.mxu1  ;;  %v10957_v7 = vmov 0.0   ;;  %v8837_v26 = vpop.eup %7612  ;;  %v2007_v33 = vrot.slane %v2006_v13, 1  ;;  %v2023_v40 = vrot.slane %v2022_v22, 1  ;;  %2953 = vmatpush1.msra.mxu1 %v8721_v35 }
 0x15a   : > { %10955 = vst [vmem:[#allocation30_spill] sm:$0xff] %v8821_v16  ;;  %3057 = vmatprep.mubr.f32.mxu0 %v10957_v7  ;;  %10958 = vst [vmem:[#allocation32_spill] sm:$0xff] %v8837_v26  ;;  %v2014_v9 = vmax.f32 %v2012_v15, %v2013_v3  ;;  %v2049_v61 = vmax.f32 %v8787_v25, %v8808_v17  ;;  %v2030_v27 = vmax.f32 %v2028_v45, %v2029_v55  ;;  %v8856_v3 = vpop.f32.mrf.mxu0 }
 0x15b   : > { %7287 = vmatmul.mubr.msk.f32.vlgmr.msra.gmra.mxu1 %vm2705_vm1, %v8627_v10  ;;  %v8846_v60 = vadd.f32 %v8736_v54, %v8411_v41  ;;  %v8850_v19 = vadd.f32 %v8749_v37, %v8422_v49  ;;  %v8854_v15 = vadd.f32 %v8751_v50, %v8422_v49  ;;  %v8858_v0 = vpop.f32.mrf.mxu1  ;;  %v8860_v45 = vpop.eup %7614  ;;  %v2008_v55 = vmax.f32 %v2006_v13, %v2007_v33 }
 0x15c   : > { %10959 = vst [vmem:[#allocation33_spill] sm:$0xff] %v8860_v45  ;;  %v2024_v58 = vmax.f32 %v2022_v22, %v2023_v40  ;;  %v2015_v32 = vrot.slane %v2014_v9, 1  ;;  %v2041_v54 = vmax.f32 %v8796_v39, %v8821_v16  ;;  %3128 = vmatprep.mubr.f32.mxu1 %v10957_v7  ;;  %v2031_v37 = vrot.slane %v2030_v27, 1  ;;  %v8875_v53 = vpop.f32.mrf.mxu0  ;;  %v8879_v22 = vpop.eup %7616 }
 0x15d   : > { %v8866_v52 = vmax.f32 %v2033_v20, %v8850_v19  ;;  %v8869_v50 = vmax.f32 %v2049_v61, %v8854_v15  ;;  %v8873_v43 = vadd.f32 %v8767_v51, %v8422_v49  ;;  %v8877_v13 = vpop.f32.mrf.mxu1  ;;  %10960 = vst [vmem:[#allocation34_spill] sm:$0xff] %v8879_v22  ;;  %v2293_v33 = vsub.f32 %v8655_v36, %v2008_v55 }
 0x15e   : > { %v2340_v40 = vsub.f32 %v8673_v62, %v2008_v55  ;;  %v2387_v20 = vsub.f32 %v8711_v63, %v2008_v55  ;;  %v2295_v42 = vsub.f32 %v8659_v59, %v2024_v58  ;;  %v8885_v61 = vpop.eup %7618  ;;  %v2342_v35 = vsub.f32 %v8691_v1, %v2024_v58  ;;  %v8889_v2 = vpop.f32.mrf.mxu0 }
 0x15f   : > { %10961 = vst [vmem:[#allocation35_spill] sm:$0xff] %v8885_v61  ;;  %v2389_v51 = vsub.f32 %v8715_v4, %v2024_v58  ;;  %v2016_v34 = vmax.f32 %v2014_v9, %v2015_v32  ;;  %v2032_v21 = vmax.f32 %v2030_v27, %v2031_v37  ;;  %v8891_v5 = vpop.f32.mrf.mxu1  ;;  %v8893_v46 = vpop.eup %7620  ;;  %v2446_v36 = vmul.f32 1.442695, %v2293_v33 }
 0x160   : > { %10962 = vst [vmem:[#allocation36_spill] sm:$0xff] %v8893_v46  ;;  %v2540_v62 = vmul.f32 1.442695, %v2340_v40  ;;  %v2634_v16 = vmul.f32 1.442695, %v2387_v20  ;;  %v8897_v59 = vadd.f32 %v8769_v28, %v8422_v49  ;;  %v8899_v63 = vpop.eup %7622  ;;  %v2042_v27 = vmax.f32 %v2041_v54, %v8873_v43  ;;  %v8903_v4 = vpop.f32.mrf.mxu0 }
 0x161   : > { %10963 = vst [vmem:[#allocation37_spill] sm:$0xff] %v8899_v63  ;;  %v2450_v1 = vmul.f32 1.442695, %v2295_v42  ;;  %v2544_v55 = vmul.f32 1.442695, %v2342_v35  ;;  %v2294_v32 = vsub.f32 %v8664_v14, %v2016_v34  ;;  %v8905_v9 = vpop.f32.mrf.mxu1  ;;  %v8907_v58 = vpop.eup %7624  ;;  %7630 = vpow2.f32 %v2446_v36  ;;  %3019 = vmatprep.subr.mxu0 %v8899_v63 }
 0x162   : > { %10964 = vst [vmem:[#allocation38_spill] sm:$0xff] %v8907_v58  ;;  %v2341_v37 = vsub.f32 %v8705_v56, %v2016_v34  ;;  %v2388_v28 = vsub.f32 %v8757_v12, %v2016_v34  ;;  %v2296_v33 = vsub.f32 %v8669_v6, %v2032_v21  ;;  %7632 = vpow2.f32 %v2540_v62  ;;  %3020 = vmatpush1.msra.mxu0 %v8823_v57  ;;  %v1242_v54 = vpop.f32.mrf.mxu0 }
 0x163   : > { %v2638_v42 = vmul.f32 1.442695, %v2389_v51  ;;  %v2343_v14 = vsub.f32 %v8731_v29, %v2032_v21  ;;  %v2390_v35 = vsub.f32 %v8765_v48, %v2032_v21  ;;  %v1293_v40 = vpop.f32.mrf.mxu1  ;;  %v8916_v20 = vpop.eup %7626  ;;  %7634 = vpow2.f32 %v2634_v16  ;;  %3021 = vmatprep.subr.mxu0 %v8893_v46 }
 0x164   : > { %10965 = vst [vmem:[#allocation39_spill] sm:$0xff] %v8916_v20  ;;  %v2448_v56 = vmul.f32 1.442695, %v2294_v32  ;;  %v2542_v36 = vmul.f32 1.442695, %v2341_v37  ;;  %v2057_v34 = vmax.f32 %v8828_v11, %v8846_v60  ;;  %7636 = vpow2.f32 %v2450_v1  ;;  %3090 = vmatprep.subr.mxu1 %v8916_v20  ;;  %3022 = vmatpush1.msra.mxu0 %v8814_v24  ;;  %v1243_v21 = vpop.f32.mrf.mxu0 }
 0x165   : > { %v2636_v6 = vmul.f32 1.442695, %v2388_v28  ;;  %v2452_v12 = vmul.f32 1.442695, %v2296_v33  ;;  %v2035_v29 = vrot.slane %v8866_v52, 4  ;;  %v1294_v48 = vpop.f32.mrf.mxu1  ;;  %v8924_v51 = vpop.eup %7628  ;;  %7638 = vpow2.f32 %v2544_v55  ;;  %3091 = vmatpush1.msra.mxu1 %v8879_v22  ;;  %3023 = vmatprep.subr.mxu0 %v8885_v61 }
 0x166   : > { %10966 = vst [vmem:[#allocation40_spill] sm:$0xff] %v8924_v51  ;;  %v2051_v16 = vrot.slane %v8869_v50, 4  ;;  %v2043_v62 = vrot.slane %v2042_v27, 4  ;;  %v2058_v32 = vmax.f32 %v2057_v34, %v8897_v59  ;;  %7640 = vpow2.f32 %v2638_v42  ;;  %3092 = vmatprep.subr.mxu1 %v8924_v51  ;;  %3024 = vmatpush1.msra.mxu0 %v8798_v23  ;;  %v8933_v33 = vpop.f32.mrf.mxu0  ;;  %v10975_v23 = vld [vmem:[#allocation30_spill] sm:$0xff] }
 0x167   : > { %v2546_v1 = vmul.f32 1.442695, %v2343_v14  ;;  %v2640_v37 = vmul.f32 1.442695, %v2390_v35  ;;  %v2036_v28 = vmax.f32 %v8866_v52, %v2035_v29  ;;  %v8935_v55 = vpop.f32.mrf.mxu1  ;;  %7642 = vpow2.f32 %v2448_v56  ;;  %3093 = vmatpush1.msra.mxu1 %v8860_v45  ;;  %7288 = vmatmul.mubr.msk.f32.vlgmr.msra.gmra.mxu0 %vm2705_vm1, %v8627_v10 }
 0x168   : > { %v2052_v54 = vmax.f32 %v8869_v50, %v2051_v16  ;;  %v2044_v40 = vmax.f32 %v2042_v27, %v2043_v62  ;;  %v2059_v34 = vrot.slane %v2058_v32, 4  ;;  %7644 = vpow2.f32 %v2542_v36  ;;  %3094 = vmatprep.subr.mxu1 %v8907_v58  ;;  %v8950_v50 = vpop.f32.mrf.mxu0  ;;  %3199 = vmatprep.mubr.f32.mxu0 %v10957_v7 }
 0x169   : > { %v2037_v52 = vrot.slane %v2036_v28, 2  ;;  %v8943_v42 = vadd.f32 %v8810_v8, %v8409_v38  ;;  %v8947_v14 = vadd.f32 %v8812_v47, %v8409_v38  ;;  %v8952_v27 = vpop.f32.mrf.mxu1  ;;  %7646 = vpow2.f32 %v2636_v6  ;;  %3095 = vmatpush1.msra.mxu1 %v8837_v26 }
 0x16a   : > { %10967 = vst [vmem:[#allocation41_spill] sm:$0xff] %v8952_v27  ;;  %v2053_v35 = vrot.slane %v2052_v54, 2  ;;  %v2045_v56 = vrot.slane %v2044_v40, 2  ;;  %v2060_v36 = vmax.f32 %v2058_v32, %v2059_v34  ;;  %7648 = vpow2.f32 %v2452_v12  ;;  %7289 = vmatmul.mubr.msk.f32.vlgmr.msra.gmra.mxu1 %vm2705_vm1, %v8627_v10  ;;  %v8966_v21 = vpop.f32.mrf.mxu0 }
 0x16b   : > { %v2038_v8 = vmax.f32 %v2036_v28, %v2037_v52  ;;  %v8960_v47 = vadd.f32 %v8856_v3, %v8411_v41  ;;  %v8964_v29 = vadd.f32 %v8858_v0, %v8411_v41  ;;  %v8968_v6 = vpop.f32.mrf.mxu1  ;;  %7650 = vpow2.f32 %v2546_v1  ;;  %3270 = vmatprep.mubr.f32.mxu1 %v10957_v7 }
 0x16c   : > { %v2054_v48 = vmax.f32 %v2052_v54, %v2053_v35  ;;  %v2046_v16 = vmax.f32 %v2044_v40, %v2045_v56  ;;  %v2061_v12 = vrot.slane %v2060_v36, 2  ;;  %7652 = vpow2.f32 %v2640_v37  ;;  %v8979_v32 = vpop.f32.mrf.mxu0 }
 0x16d   : > { %v2039_v62 = vrot.slane %v2038_v8, 1  ;;  %v8973_v3 = vadd.f32 %v8832_v44, %v8409_v38  ;;  %v8977_v0 = vadd.f32 %v8834_v18, %v8409_v38  ;;  %v8981_v28 = vpop.f32.mrf.mxu1  ;;  %v2065_v34 = vmax.f32 %v8943_v42, %v8960_v47 }
 0x16e   : > { %v2055_v1 = vrot.slane %v2054_v48, 1  ;;  %v2047_v54 = vrot.slane %v2046_v16, 1  ;;  %v2062_v40 = vmax.f32 %v2060_v36, %v2061_v12  ;;  %v8985_v37 = vpop.eup %7630  ;;  %v2081_v44 = vmax.f32 %v8947_v14, %v8964_v29  ;;  %v8997_v56 = vpop.f32.mrf.mxu0 }
 0x16f   : > { %10968 = vst [vmem:[#allocation42_spill] sm:$0xff] %v8985_v37  ;;  %v2040_v52 = vmax.f32 %v2038_v8, %v2039_v62  ;;  %v8991_v18 = vadd.f32 %v8875_v53, %v8411_v41  ;;  %v8995_v35 = vadd.f32 %v8877_v13, %v8411_v41  ;;  %v8999_v36 = vpop.f32.mrf.mxu1  ;;  %v9001_v12 = vpop.eup %7632  ;;  %v9005_v8 = vadd.f32 %v8889_v2, %v8422_v49 }
 0x170   : > { %10969 = vst [vmem:[#allocation43_spill] sm:$0xff] %v9001_v12  ;;  %v2056_v20 = vmax.f32 %v2054_v48, %v2055_v1  ;;  %v2048_v63 = vmax.f32 %v2046_v16, %v2047_v54  ;;  %v9009_v53 = vadd.f32 %v8891_v5, %v8422_v49  ;;  %v9011_v62 = vpop.eup %7634  ;;  %v2063_v51 = vrot.slane %v2062_v40, 1  ;;  %v9016_v46 = vpop.f32.mrf.mxu0 }
 0x171   : > { %10970 = vst [vmem:[#allocation44_spill] sm:$0xff] %v9011_v62  ;;  %v2297_v13 = vsub.f32 %v8783_v30, %v2040_v52  ;;  %v2344_v22 = vsub.f32 %v8804_v31, %v2040_v52  ;;  %v2391_v57 = vsub.f32 %v8850_v19, %v2040_v52  ;;  %v9018_v48 = vpop.f32.mrf.mxu1  ;;  %v9020_v16 = vpop.eup %7636  ;;  %v2073_v52 = vmax.f32 %v8973_v3, %v8991_v18 }
 0x172   : > { %10971 = vst [vmem:[#allocation45_spill] sm:$0xff] %v9018_v48  ;;  %10972 = vst [vmem:[#allocation46_spill] sm:$0xff] %v9020_v16  ;;  %v2299_v2 = vsub.f32 %v8787_v25, %v2056_v20  ;;  %v2346_v5 = vsub.f32 %v8808_v17, %v2056_v20  ;;  %v2393_v1 = vsub.f32 %v8854_v15, %v2056_v20  ;;  %v9026_v30 = vpop.eup %7638  ;;  %v1344_v24 = vpop.f32.mrf.mxu0 }
 0x173   : > { %v2298_v54 = vsub.f32 %v8796_v39, %v2048_v63  ;;  %10973 = vst [vmem:[#allocation47_spill] sm:$0xff] %v9026_v30  ;;  %v2454_v31 = vmul.f32 1.442695, %v2297_v13  ;;  %v2548_v45 = vmul.f32 1.442695, %v2344_v22  ;;  %v1395_v58 = vpop.f32.mrf.mxu1  ;;  %v9030_v61 = vpop.eup %7640  ;;  %v2345_v17 = vsub.f32 %v10975_v23, %v2048_v63 }
 0x174   : > { %v2642_v19 = vmul.f32 1.442695, %v2391_v57  ;;  %10974 = vst [vmem:[#allocation48_spill] sm:$0xff] %v9030_v61  ;;  %v2458_v26 = vmul.f32 1.442695, %v2299_v2  ;;  %v2089_v15 = vmax.f32 %v8977_v0, %v8995_v35  ;;  %v9035_v39 = vpop.eup %7642  ;;  %v2392_v57 = vsub.f32 %v8873_v43, %v2048_v63  ;;  %v1345_v13 = vpop.f32.mrf.mxu0 }
 0x175   : > { %v2552_v25 = vmul.f32 1.442695, %v2346_v5  ;;  %10976 = vst [vmem:[#allocation30_spill] sm:$0xff] %v9035_v39  ;;  %7654 = vpow2.f32 %v2454_v31  ;;  %v2646_v20 = vmul.f32 1.442695, %v2393_v1  ;;  %v2064_v22 = vmax.f32 %v2062_v40, %v2063_v51  ;;  %v1396_v48 = vpop.f32.mrf.mxu1  ;;  %v9038_v24 = vpop.eup %7644 }
 0x176   : > { %10977 = vst [vmem:[#allocation49_spill] sm:$0xff] %v9038_v24  ;;  %7656 = vpow2.f32 %v2548_v45  ;;  %v2456_v58 = vmul.f32 1.442695, %v2298_v54  ;;  %v2066_v2 = vmax.f32 %v2065_v34, %v9005_v8  ;;  %v2082_v23 = vmax.f32 %v2081_v44, %v9009_v53  ;;  %v9042_v5 = vpop.eup %7646  ;;  %v9047_v63 = vpop.f32.mrf.mxu0 }
 0x177   : > { %10978 = vst [vmem:[#allocation50_spill] sm:$0xff] %v9042_v5  ;;  %7658 = vpow2.f32 %v2642_v19  ;;  %v2300_v27 = vsub.f32 %v8828_v11, %v2064_v22  ;;  %v2347_v1 = vsub.f32 %v8846_v60, %v2064_v22  ;;  %v2394_v43 = vsub.f32 %v8897_v59, %v2064_v22  ;;  %v9049_v51 = vpop.f32.mrf.mxu1  ;;  %v9051_v40 = vpop.eup %7648  ;;  %3161 = vmatprep.subr.mxu0 %v9042_v5 }
 0x178   : > { %10979 = vst [vmem:[#allocation51_spill] sm:$0xff] %v9051_v40  ;;  %7660 = vpow2.f32 %v2458_v26  ;;  %v2067_v45 = vrot.slane %v2066_v2, 4  ;;  %v2083_v34 = vrot.slane %v2082_v23, 4  ;;  %v9055_v44 = vadd.f32 %v8903_v4, %v8422_v49  ;;  %v9058_v11 = vpop.eup %7650  ;;  %3162 = vmatpush1.msra.mxu0 %v9011_v62  ;;  %v9061_v54 = vpop.f32.mrf.mxu0 }
 0x179   : > { %10980 = vst [vmem:[#allocation52_spill] sm:$0xff] %v9058_v11  ;;  %7662 = vpow2.f32 %v2552_v25  ;;  %v2550_v60 = vmul.f32 1.442695, %v2345_v17  ;;  %v2644_v59 = vmul.f32 1.442695, %v2392_v57  ;;  %v9063_v31 = vpop.f32.mrf.mxu1  ;;  %v9065_v26 = vpop.eup %7652  ;;  %3163 = vmatprep.subr.mxu0 %v9038_v24 }
 0x17a   : > { %v2460_v48 = vmul.f32 1.442695, %v2300_v27  ;;  %10981 = vst [vmem:[#allocation53_spill] sm:$0xff] %v9065_v26  ;;  %7664 = vpow2.f32 %v2646_v20  ;;  %v2068_v19 = vmax.f32 %v2066_v2, %v2067_v45  ;;  %v2084_v4 = vmax.f32 %v2082_v23, %v2083_v34  ;;  %3232 = vmatprep.subr.mxu1 %v9065_v26  ;;  %3164 = vmatpush1.msra.mxu0 %v9001_v12  ;;  %v9075_v57 = vpop.f32.mrf.mxu0 }
 0x17b   : > { %v2074_v22 = vmax.f32 %v2073_v52, %v9055_v44  ;;  %7666 = vpow2.f32 %v2456_v58  ;;  %v2554_v25 = vmul.f32 1.442695, %v2347_v1  ;;  %v2648_v17 = vmul.f32 1.442695, %v2394_v43  ;;  %v9077_v20 = vpop.f32.mrf.mxu1  ;;  %3233 = vmatpush1.msra.mxu1 %v9030_v61  ;;  %3165 = vmatprep.subr.mxu0 %v9035_v39 }
 0x17c   : > { %v9071_v27 = vadd.f32 %v8905_v9, %v8422_v49  ;;  %v2069_v13 = vrot.slane %v2068_v19, 2  ;;  %v2085_v2 = vrot.slane %v2084_v4, 2  ;;  %v9082_v58 = vadd.f32 %v8933_v33, %v8409_v38  ;;  %3234 = vmatprep.subr.mxu1 %v9058_v11  ;;  %3166 = vmatpush1.msra.mxu0 %v8985_v37  ;;  %v9096_v43 = vpop.f32.mrf.mxu0 }
 0x17d   : > { %v2075_v52 = vrot.slane %v2074_v22, 4  ;;  %7668 = vpow2.f32 %v2644_v59  ;;  %v9089_v23 = vadd.f32 %v8935_v55, %v8409_v38  ;;  %v9093_v1 = vadd.f32 %v8950_v50, %v8409_v38  ;;  %v9098_v33 = vpop.f32.mrf.mxu1  ;;  %3235 = vmatpush1.msra.mxu1 %v9026_v30  ;;  %7290 = vmatmul.mubr.msk.f32.vlgmr.msra.gmra.mxu0 %vm2705_vm1, %v8627_v10 }
 0x17e   : > { %v2090_v9 = vmax.f32 %v2089_v15, %v9071_v27  ;;  %7670 = vpow2.f32 %v2550_v60  ;;  %v2070_v45 = vmax.f32 %v2068_v19, %v2069_v13  ;;  %v2086_v34 = vmax.f32 %v2084_v4, %v2085_v2  ;;  %3236 = vmatprep.subr.mxu1 %v9051_v40  ;;  %3341 = vmatprep.mubr.f32.mxu0 %v10957_v7  ;;  %v9113_v60 = vpop.f32.mrf.mxu0 }
 0x17f   : > { %v2076_v15 = vmax.f32 %v2074_v22, %v2075_v52  ;;  %7672 = vpow2.f32 %v2460_v48  ;;  %v9106_v50 = vadd.f32 %v8966_v21, %v8411_v41  ;;  %v9110_v59 = vadd.f32 %v8968_v6, %v8411_v41  ;;  %v9115_v19 = vpop.f32.mrf.mxu1  ;;  %3237 = vmatpush1.msra.mxu1 %v9020_v16 }
 0x180   : > { %v2091_v55 = vrot.slane %v2090_v9, 4  ;;  %7674 = vpow2.f32 %v2648_v17  ;;  %v2071_v4 = vrot.slane %v2070_v45, 1  ;;  %v2087_v48 = vrot.slane %v2086_v34, 1  ;;  %7291 = vmatmul.mubr.msk.f32.vlgmr.msra.gmra.mxu1 %vm2705_vm1, %v8627_v10  ;;  %v9124_v2 = vpop.f32.mrf.mxu0 }
 0x181   : > { %v2077_v22 = vrot.slane %v2076_v15, 2  ;;  %7676 = vpow2.f32 %v2554_v25  ;;  %v2097_v21 = vmax.f32 %v9082_v58, %v9106_v50  ;;  %v2113_v6 = vmax.f32 %v9089_v23, %v9110_v59  ;;  %v9126_v52 = vpop.f32.mrf.mxu1  ;;  %3412 = vmatprep.mubr.f32.mxu1 %v10957_v7 }
 0x182   : > { %v2092_v13 = vmax.f32 %v2090_v9, %v2091_v55  ;;  %v9128_v17 = vpop.eup %7654  ;;  %v2072_v26 = vmax.f32 %v2070_v45, %v2071_v4  ;;  %v2088_v61 = vmax.f32 %v2086_v34, %v2087_v48  ;;  %v9132_v25 = vadd.f32 %v8979_v32, %v8411_v41  ;;  %v1446_v34 = vpop.f32.mrf.mxu0 }
 0x183   : > { %10982 = vst [vmem:[#allocation54_spill] sm:$0xff] %v9128_v17  ;;  %v2078_v5 = vmax.f32 %v2076_v15, %v2077_v22  ;;  %v9135_v10 = vpop.eup %7656  ;;  %v9139_v55 = vadd.f32 %v8981_v28, %v8411_v41  ;;  %v9143_v11 = vadd.f32 %v8997_v56, %v8422_v49  ;;  %v9147_v45 = vadd.f32 %v8999_v36, %v8422_v49  ;;  %v1497_v32 = vpop.f32.mrf.mxu1 }
 0x184   : > { %10983 = vst [vmem:[#allocation55_spill] sm:$0xff] %v9135_v10  ;;  %v2093_v9 = vrot.slane %v2092_v13, 2  ;;  %v9149_v15 = vpop.eup %7658  ;;  %v2301_v4 = vsub.f32 %v8943_v42, %v2072_v26  ;;  %v2348_v48 = vsub.f32 %v8960_v47, %v2072_v26  ;;  %v2395_v22 = vsub.f32 %v9005_v8, %v2072_v26  ;;  %v1447_v34 = vpop.f32.mrf.mxu0 }
 0x185   : > { %10984 = vst [vmem:[#allocation56_spill] sm:$0xff] %v9149_v15  ;;  %v2303_v28 = vsub.f32 %v8947_v14, %v2088_v61  ;;  %v9155_v62 = vpop.eup %7660  ;;  %v2350_v56 = vsub.f32 %v8964_v29, %v2088_v61  ;;  %v2397_v30 = vsub.f32 %v9009_v53, %v2088_v61  ;;  %v2079_v36 = vrot.slane %v2078_v5, 1  ;;  %v1498_v32 = vpop.f32.mrf.mxu1 }
 0x186   : > { %10985 = vst [vmem:[#allocation57_spill] sm:$0xff] %v9155_v62  ;;  %v2094_v24 = vmax.f32 %v2092_v13, %v2093_v9  ;;  %v9159_v40 = vpop.eup %7662  ;;  %v2462_v12 = vmul.f32 1.442695, %v2301_v4  ;;  %v2556_v42 = vmul.f32 1.442695, %v2348_v48  ;;  %v2105_v47 = vmax.f32 %v9093_v1, %v9132_v25  ;;  %v9165_v37 = vpop.f32.mrf.mxu0 }
 0x187   : > { %10986 = vst [vmem:[#allocation58_spill] sm:$0xff] %v9159_v40  ;;  %v2650_v16 = vmul.f32 1.442695, %v2395_v22  ;;  %v9163_v8 = vpop.eup %7664  ;;  %v2466_v14 = vmul.f32 1.442695, %v2303_v28  ;;  %v2080_v29 = vmax.f32 %v2078_v5, %v2079_v36  ;;  %v9167_v61 = vpop.f32.mrf.mxu1  ;;  %v2098_v9 = vmax.f32 %v2097_v21, %v9143_v11 }
 0x188   : > { %10987 = vst [vmem:[#allocation59_spill] sm:$0xff] %v9163_v8  ;;  %v2560_v26 = vmul.f32 1.442695, %v2350_v56  ;;  %v2654_v39 = vmul.f32 1.442695, %v2397_v30  ;;  %v9169_v53 = vpop.eup %7666  ;;  %7678 = vpow2.f32 %v2462_v12  ;;  %v2095_v13 = vrot.slane %v2094_v24, 1  ;;  %v9176_v5 = vpop.f32.mrf.mxu0 }
 0x189   : > { %10988 = vst [vmem:[#allocation60_spill] sm:$0xff] %v9169_v53  ;;  %v2114_v4 = vmax.f32 %v2113_v6, %v9147_v45  ;;  %7680 = vpow2.f32 %v2556_v42  ;;  %v2302_v48 = vsub.f32 %v8973_v3, %v2080_v29  ;;  %v2349_v22 = vsub.f32 %v8991_v18, %v2080_v29  ;;  %v9178_v28 = vpop.f32.mrf.mxu1 }
 0x18a   : > { %v2396_v30 = vsub.f32 %v9055_v44, %v2080_v29  ;;  %v9180_v56 = vpop.eup %7668  ;;  %7682 = vpow2.f32 %v2650_v16  ;;  %v2096_v12 = vmax.f32 %v2094_v24, %v2095_v13  ;;  %v2099_v36 = vrot.slane %v2098_v9, 4  ;;  %v9185_v18 = vpop.f32.mrf.mxu0 }
 0x18b   : > { %10989 = vst [vmem:[#allocation61_spill] sm:$0xff] %v9180_v56  ;;  %v2115_v34 = vrot.slane %v2114_v4, 4  ;;  %v9182_v21 = vpop.eup %7670  ;;  %7684 = vpow2.f32 %v2466_v14  ;;  %v2464_v6 = vmul.f32 1.442695, %v2302_v48  ;;  %v2558_v32 = vmul.f32 1.442695, %v2349_v22  ;;  %3303 = vmatprep.subr.mxu0 %v9180_v56  ;;  %v9187_v44 = vpop.f32.mrf.mxu1 }
 0x18c   : > { %10990 = vst [vmem:[#allocation62_spill] sm:$0xff] %v9182_v21  ;;  %v2652_v3 = vmul.f32 1.442695, %v2396_v30  ;;  %v9189_v42 = vpop.eup %7672  ;;  %7686 = vpow2.f32 %v2560_v26  ;;  %v2304_v16 = vsub.f32 %v8977_v0, %v2096_v12  ;;  %v2351_v24 = vsub.f32 %v8995_v35, %v2096_v12  ;;  %3304 = vmatpush1.msra.mxu0 %v9149_v15  ;;  %v9202_v26 = vpop.f32.mrf.mxu0  ;;  %v10994_v30 = vld [vmem:[#allocation41_spill] sm:$0xff] }
 0x18d   : > { %10991 = vst [vmem:[#allocation63_spill] sm:$0xff] %v9189_v42  ;;  %v2398_v29 = vsub.f32 %v9071_v27, %v2096_v12  ;;  %v9195_v14 = vpop.eup %7674  ;;  %7688 = vpow2.f32 %v2654_v39  ;;  %v2100_v13 = vmax.f32 %v2098_v9, %v2099_v36  ;;  %v2116_v48 = vmax.f32 %v2114_v4, %v2115_v34  ;;  %3305 = vmatprep.subr.mxu0 %v9182_v21  ;;  %v9204_v0 = vpop.f32.mrf.mxu1 }
 0x18e   : > { %10992 = vst [vmem:[#allocation64_spill] sm:$0xff] %v9195_v14  ;;  %v9199_v22 = vadd.f32 %v9016_v46, %v8422_v49  ;;  %v9206_v35 = vpop.eup %7676  ;;  %7690 = vpow2.f32 %v2464_v6  ;;  %v2468_v27 = vmul.f32 1.442695, %v2304_v16  ;;  %v9210_v12 = vadd.f32 %v10994_v30, %v8409_v38  ;;  %3374 = vmatprep.subr.mxu1 %v9195_v14  ;;  %3306 = vmatpush1.msra.mxu0 %v9135_v10  ;;  %v9217_v36 = vpop.f32.mrf.mxu0  ;;  %v10995_v30 = vld [vmem:[#allocation45_spill] sm:$0xff] }
 0x18f   : > { %10993 = vst [vmem:[#allocation65_spill] sm:$0xff] %v9206_v35  ;;  %v2656_v46 = vmul.f32 1.442695, %v2398_v29  ;;  %v2101_v39 = vrot.slane %v2100_v13, 2  ;;  %v2117_v9 = vrot.slane %v2116_v48, 2  ;;  %3375 = vmatpush1.msra.mxu1 %v9163_v8  ;;  %3307 = vmatprep.subr.mxu0 %v9169_v53  ;;  %v9219_v34 = vpop.f32.mrf.mxu1  ;;  %7692 = vpow2.f32 %v2652_v3  ;;  %v9233_v3 = vld [vmem:[%s10823_s3] sm:$0xff] }
 0x190   : > { %v2106_v4 = vmax.f32 %v2105_v47, %v9199_v22  ;;  %v2562_v6 = vmul.f32 1.442695, %v2351_v24  ;;  %v2121_v16 = vmax.f32 %v9210_v12, %v9139_v55  ;;  %v9225_v29 = vadd.f32 %v10995_v30, %v8422_v49  ;;  %3376 = vmatprep.subr.mxu1 %v9206_v35  ;;  %3308 = vmatpush1.msra.mxu0 %v9128_v17  ;;  %v9237_v24 = vpop.f32.mrf.mxu0 }
 0x191   : > { %7694 = vpow2.f32 %v2558_v32  ;;  %v2102_v47 = vmax.f32 %v2100_v13, %v2101_v39  ;;  %v2118_v14 = vmax.f32 %v2116_v48, %v2117_v9  ;;  %3377 = vmatpush1.msra.mxu1 %v9159_v40  ;;  %7292 = vmatmul.mubr.msk.f32.vlgmr.msra.gmra.mxu0 %vm2705_vm1, %v9233_v3  ;;  %v9239_v30 = vpop.f32.mrf.mxu1  ;;  %v9244_v13 = vadd.f32 %v9047_v63, %v8409_v38 }
 0x192   : > { %v2107_v8 = vrot.slane %v2106_v4, 4  ;;  %7696 = vpow2.f32 %v2468_v27  ;;  %v2122_v32 = vmax.f32 %v2121_v16, %v9225_v29  ;;  %v9248_v48 = vadd.f32 %v9049_v51, %v8409_v38  ;;  %3378 = vmatprep.subr.mxu1 %v9189_v42  ;;  %3483 = vmatprep.mubr.f32.mxu0 %v10957_v7  ;;  %v1548_v27 = vpop.f32.mrf.mxu0 }
 0x193   : > { %7698 = vpow2.f32 %v2656_v46  ;;  %v2103_v39 = vrot.slane %v2102_v47, 1  ;;  %v2119_v9 = vrot.slane %v2118_v14, 1  ;;  %3379 = vmatpush1.msra.mxu1 %v9155_v62  ;;  %v1599_v16 = vpop.f32.mrf.mxu1  ;;  %v9257_v63 = vadd.f32 %v9075_v57, %v8411_v41 }
 0x194   : > { %v2108_v56 = vmax.f32 %v2106_v4, %v2107_v8  ;;  %7700 = vpow2.f32 %v2562_v6  ;;  %v2123_v35 = vrot.slane %v2122_v32, 4  ;;  %7293 = vmatmul.mubr.msk.f32.vlgmr.msra.gmra.mxu1 %vm2705_vm1, %v9233_v3  ;;  %v9261_v51 = vadd.f32 %v9077_v20, %v8411_v41  ;;  %v1549_v27 = vpop.f32.mrf.mxu0 }
 0x195   : > { %v9263_v46 = vpop.eup %7678  ;;  %v2104_v8 = vmax.f32 %v2102_v47, %v2103_v39  ;;  %v2120_v4 = vmax.f32 %v2118_v14, %v2119_v9  ;;  %v9267_v6 = vadd.f32 %v9061_v54, %v8409_v38  ;;  %3554 = vmatprep.mubr.f32.mxu1 %v10957_v7  ;;  %v1600_v16 = vpop.f32.mrf.mxu1  ;;  %v9274_v20 = vadd.f32 %v9063_v31, %v8409_v38 }
 0x196   : > { %10996 = vst [vmem:[#allocation41_spill] sm:$0xff] %v9263_v46  ;;  %v2109_v15 = vrot.slane %v2108_v56, 2  ;;  %v9270_v40 = vpop.eup %7680  ;;  %v2124_v57 = vmax.f32 %v2122_v32, %v2123_v35  ;;  %v9278_v47 = vadd.f32 %v9096_v43, %v8411_v41  ;;  %v9282_v14 = vadd.f32 %v9098_v33, %v8411_v41  ;;  %v9290_v31 = vpop.f32.mrf.mxu0 }
 0x197   : > { %10997 = vst [vmem:[#allocation45_spill] sm:$0xff] %v9270_v40  ;;  %10998 = vst [vmem:[#allocation66_spill] sm:$0xff] %v9274_v20  ;;  %v9284_v54 = vpop.eup %7682  ;;  %v2305_v39 = vsub.f32 %v9082_v58, %v2104_v8  ;;  %v2352_v9 = vsub.f32 %v9106_v50, %v2104_v8  ;;  %v2399_v35 = vsub.f32 %v9143_v11, %v2104_v8  ;;  %v9292_v27 = vpop.f32.mrf.mxu1 }
 0x198   : > { %10999 = vst [vmem:[#allocation67_spill] sm:$0xff] %v9282_v14  ;;  %11000 = vst [vmem:[#allocation68_spill] sm:$0xff] %v9284_v54  ;;  %v2307_v32 = vsub.f32 %v9089_v23, %v2120_v4  ;;  %v9294_v43 = vpop.eup %7684  ;;  %v2110_v16 = vmax.f32 %v2108_v56, %v2109_v15  ;;  %v2125_v21 = vrot.slane %v2124_v57, 2  ;;  %v2129_v33 = vmax.f32 %v9244_v13, %v9257_v63  ;;  %v9304_v10 = vpop.f32.mrf.mxu0 }
 0x199   : > { %11001 = vst [vmem:[#allocation69_spill] sm:$0xff] %v9290_v31  ;;  %11002 = vst [vmem:[#allocation70_spill] sm:$0xff] %v9292_v27  ;;  %v2145_v58 = vmax.f32 %v9248_v48, %v9261_v51  ;;  %v9300_v42 = vpop.eup %7686  ;;  %v2470_v50 = vmul.f32 1.442695, %v2305_v39  ;;  %v2564_v11 = vmul.f32 1.442695, %v2352_v9  ;;  %v2354_v23 = vsub.f32 %v9110_v59, %v2120_v4  ;;  %v9306_v62 = vpop.f32.mrf.mxu1 }
 0x19a   : > { %11003 = vst [vmem:[#allocation71_spill] sm:$0xff] %v9294_v43  ;;  %11004 = vst [vmem:[#allocation72_spill] sm:$0xff] %v9300_v42  ;;  %v2401_v8 = vsub.f32 %v9147_v45, %v2120_v4  ;;  %v9308_v15 = vpop.eup %7688  ;;  %v2658_v56 = vmul.f32 1.442695, %v2399_v35  ;;  %v2126_v53 = vmax.f32 %v2124_v57, %v2125_v21  ;;  %v2137_v17 = vmax.f32 %v9267_v6, %v9278_v47  ;;  %v9324_v35 = vpop.f32.mrf.mxu0 }
 0x19b   : > { %11005 = vst [vmem:[#allocation73_spill] sm:$0xff] %v9304_v10  ;;  %11006 = vst [vmem:[#allocation74_spill] sm:$0xff] %v9306_v62  ;;  %v2153_v27 = vmax.f32 %v9274_v20, %v9282_v14  ;;  %v9314_v39 = vpop.eup %7690  ;;  %v2474_v9 = vmul.f32 1.442695, %v2307_v32  ;;  %v2111_v59 = vrot.slane %v2110_v16, 1  ;;  %v9318_v45 = vadd.f32 %v9113_v60, %v8422_v49  ;;  %v9326_v21 = vpop.f32.mrf.mxu1 }
 0x19c   : > { %11007 = vst [vmem:[#allocation75_spill] sm:$0xff] %v9308_v15  ;;  %11008 = vst [vmem:[#allocation76_spill] sm:$0xff] %v9314_v39  ;;  %v9322_v4 = vadd.f32 %v9115_v19, %v8422_v49  ;;  %7702 = vpow2.f32 %v2470_v50  ;;  %v2127_v57 = vrot.slane %v2126_v53, 1  ;;  %v9330_v62 = vadd.f32 %v9124_v2, %v8422_v49  ;;  %v9336_v60 = vpop.eup %7692  ;;  %v9338_v14 = vpop.f32.mrf.mxu0 }
 0x19d   : > { %11009 = vst [vmem:[#allocation77_spill] sm:$0xff] %v9324_v35  ;;  %11010 = vst [vmem:[#allocation78_spill] sm:$0xff] %v9326_v21  ;;  %v9334_v32 = vadd.f32 %v9126_v52, %v8422_v49  ;;  %7704 = vpow2.f32 %v2564_v11  ;;  %v2568_v10 = vmul.f32 1.442695, %v2354_v23  ;;  %v2662_v19 = vmul.f32 1.442695, %v2401_v8  ;;  %v9340_v35 = vpop.f32.mrf.mxu1  ;;  %3445 = vmatprep.subr.mxu0 %v9336_v60 }
 0x19e   : > { %11011 = vst [vmem:[#allocation79_spill] sm:$0xff] %v9336_v60  ;;  %v2112_v31 = vmax.f32 %v2110_v16, %v2111_v59  ;;  %v9342_v50 = vpop.eup %7694  ;;  %7706 = vpow2.f32 %v2658_v56  ;;  %v9344_v21 = vmax.f32 %v2126_v53, %v2127_v57  ;;  %v2130_v2 = vmax.f32 %v2129_v33, %v9318_v45  ;;  %3446 = vmatpush1.msra.mxu0 %v9284_v54  ;;  %v9356_v53 = vpop.f32.mrf.mxu0 }
 0x19f   : > { %11012 = vst [vmem:[#allocation80_spill] sm:$0xff] %v9342_v50  ;;  %v2146_v52 = vmax.f32 %v2145_v58, %v9322_v4  ;;  %v9349_v20 = vpop.eup %7696  ;;  %v2138_v8 = vmax.f32 %v2137_v17, %v9330_v62  ;;  %v9358_v56 = vpop.f32.mrf.mxu1  ;;  %7708 = vpow2.f32 %v2474_v9  ;;  %3447 = vmatprep.subr.mxu0 %v9342_v50 }
 0x1a0   : > { %11013 = vst [vmem:[#allocation81_spill] sm:$0xff] %v9349_v20  ;;  %v2306_v11 = vsub.f32 %v9093_v1, %v2112_v31  ;;  %v2353_v16 = vsub.f32 %v9132_v25, %v2112_v31  ;;  %v2400_v23 = vsub.f32 %v9199_v22, %v2112_v31  ;;  %v9360_v33 = vpop.eup %7698  ;;  %v2355_v58 = vsub.f32 %v9139_v55, %v9344_v21  ;;  %v9372_v9 = vpop.f32.mrf.mxu0 }
 0x1a1   : > { %11014 = vst [vmem:[#allocation82_spill] sm:$0xff] %v9360_v33  ;;  %v2402_v1 = vsub.f32 %v9225_v29, %v9344_v21  ;;  %v2154_v25 = vmax.f32 %v2153_v27, %v9334_v32  ;;  %v9368_v17 = vpop.eup %7700  ;;  %7710 = vpow2.f32 %v2568_v10  ;;  %3516 = vmatprep.subr.mxu1 %v9360_v33  ;;  %3448 = vmatpush1.msra.mxu0 %v9270_v40  ;;  %v9374_v59 = vpop.f32.mrf.mxu1  ;;  %v2131_v10 = vrot.slane %v2130_v2, 4 }
 0x1a2   : > { %11015 = vst [vmem:[#allocation83_spill] sm:$0xff] %v9368_v17  ;;  %v2472_v22 = vmul.f32 1.442695, %v2306_v11  ;;  %v2660_v31 = vmul.f32 1.442695, %v2400_v23  ;;  %7712 = vpow2.f32 %v2662_v19  ;;  %3517 = vmatpush1.msra.mxu1 %v9308_v15  ;;  %3449 = vmatprep.subr.mxu0 %v9314_v39  ;;  %v2308_v29 = vsub.f32 %v9210_v12, %v9344_v21  ;;  %v1650_v11 = vpop.f32.mrf.mxu0 }
 0x1a3   : > { %v2566_v55 = vmul.f32 1.442695, %v2353_v16  ;;  %v2147_v27 = vrot.slane %v2146_v52, 4  ;;  %v2139_v57 = vrot.slane %v2138_v8, 4  ;;  %3518 = vmatprep.subr.mxu1 %v9368_v17  ;;  %3450 = vmatpush1.msra.mxu0 %v9263_v46  ;;  %v1701_v23 = vpop.f32.mrf.mxu1  ;;  %v2570_v33 = vmul.f32 1.442695, %v2355_v58 }
 0x1a4   : > { %7714 = vpow2.f32 %v2472_v22  ;;  %v2664_v19 = vmul.f32 1.442695, %v2402_v1  ;;  %v2155_v16 = vrot.slane %v2154_v25, 4  ;;  %3519 = vmatpush1.msra.mxu1 %v9300_v42  ;;  %7294 = vmatmul.mubr.msk.f32.vlgmr.msra.gmra.mxu0 %vm2705_vm1, %v9233_v3  ;;  %v2132_v12 = vmax.f32 %v2130_v2, %v2131_v10  ;;  %v1651_v60 = vpop.f32.mrf.mxu0 }
 0x1a5   : > { %7716 = vpow2.f32 %v2660_v31  ;;  %v2148_v21 = vmax.f32 %v2146_v52, %v2147_v27  ;;  %v2140_v15 = vmax.f32 %v2138_v8, %v2139_v57  ;;  %3520 = vmatprep.subr.mxu1 %v9349_v20  ;;  %3625 = vmatprep.mubr.f32.mxu0 %v10957_v7  ;;  %v1702_v11 = vpop.f32.mrf.mxu1  ;;  %v9389_v58 = vadd.f32 %v9165_v37, %v8409_v38 }
 0x1a6   : > { %7718 = vpow2.f32 %v2566_v55  ;;  %v2156_v22 = vmax.f32 %v2154_v25, %v2155_v16  ;;  %3521 = vmatpush1.msra.mxu1 %v9294_v43  ;;  %v9394_v1 = vadd.f32 %v9185_v18, %v8411_v41  ;;  %v2133_v2 = vrot.slane %v2132_v12, 2  ;;  %v9402_v25 = vpop.f32.mrf.mxu0 }
 0x1a7   : > { %v2149_v52 = vrot.slane %v2148_v21, 2  ;;  %v2141_v8 = vrot.slane %v2140_v15, 2  ;;  %7295 = vmatmul.mubr.msk.f32.vlgmr.msra.gmra.mxu1 %vm2705_vm1, %v9233_v3  ;;  %v9400_v60 = vadd.f32 %v9187_v44, %v8411_v41  ;;  %v9404_v37 = vpop.f32.mrf.mxu1  ;;  %v2476_v31 = vmul.f32 1.442695, %v2308_v29 }
 0x1a8   : > { %7720 = vpow2.f32 %v2664_v19  ;;  %v2157_v55 = vrot.slane %v2156_v22, 2  ;;  %v9408_v18 = vadd.f32 %v9167_v61, %v8409_v38  ;;  %3696 = vmatprep.mubr.f32.mxu1 %v10957_v7  ;;  %v2134_v27 = vmax.f32 %v2132_v12, %v2133_v2  ;;  %v9413_v23 = vpop.f32.mrf.mxu0 }
 0x1a9   : > { %v9411_v10 = vpop.eup %7702  ;;  %7722 = vpow2.f32 %v2570_v33  ;;  %v2150_v57 = vmax.f32 %v2148_v21, %v2149_v52  ;;  %v2142_v44 = vmax.f32 %v2140_v15, %v2141_v8  ;;  %11016 = vst [vmem:[#allocation84_spill] sm:$0xff] %v9413_v23  ;;  %v9415_v16 = vpop.f32.mrf.mxu1  ;;  %v2161_v19 = vmax.f32 %v9389_v58, %v9394_v1 }
 0x1aa   : > { %11017 = vst [vmem:[#allocation85_spill] sm:$0xff] %v9415_v16  ;;  %v9417_v11 = vpop.eup %7704  ;;  %v2158_v29 = vmax.f32 %v2156_v22, %v2157_v55  ;;  %v9423_v61 = vadd.f32 %v9217_v36, %v8422_v49  ;;  %v9427_v33 = vadd.f32 %v9219_v34, %v8422_v49  ;;  %v2135_v15 = vrot.slane %v2134_v27, 1  ;;  %v9433_v22 = vpop.f32.mrf.mxu0 }
 0x1ab   : > { %11018 = vst [vmem:[#allocation86_spill] sm:$0xff] %v9417_v11  ;;  %v9429_v12 = vpop.eup %7706  ;;  %v2151_v21 = vrot.slane %v2150_v57, 1  ;;  %v2143_v2 = vrot.slane %v2142_v44, 1  ;;  %v2177_v52 = vmax.f32 %v9408_v18, %v9400_v60  ;;  %v9435_v8 = vpop.f32.mrf.mxu1  ;;  %7724 = vpow2.f32 %v2476_v31 }
 0x1ac   : > { %11019 = vst [vmem:[#allocation87_spill] sm:$0xff] %v9429_v12  ;;  %v2159_v55 = vrot.slane %v2158_v29, 1  ;;  %v2162_v36 = vmax.f32 %v2161_v19, %v9423_v61  ;;  %v9438_v17 = vpop.eup %7708  ;;  %v2136_v34 = vmax.f32 %v2134_v27, %v2135_v15  ;;  %v9443_v20 = vpop.f32.mrf.mxu0  ;;  %v9451_v31 = vadd.f32 %v9176_v5, %v8409_v38 }
 0x1ad   : > { %v2152_v54 = vmax.f32 %v2150_v57, %v2151_v21  ;;  %v9440_v42 = vmax.f32 %v2142_v44, %v2143_v2  ;;  %v2178_v50 = vmax.f32 %v2177_v52, %v9427_v33  ;;  %11020 = vst [vmem:[#allocation88_spill] sm:$0xff] %v9443_v20  ;;  %v9445_v40 = vpop.f32.mrf.mxu1  ;;  %v9455_v19 = vadd.f32 %v9178_v28, %v8409_v38 }
 0x1ae   : > { %11021 = vst [vmem:[#allocation89_spill] sm:$0xff] %v9445_v40  ;;  %v9447_v43 = vpop.eup %7710  ;;  %v9459_v27 = vadd.f32 %v9202_v26, %v8411_v41  ;;  %v9463_v57 = vadd.f32 %v9204_v0, %v8411_v41  ;;  %v2309_v15 = vsub.f32 %v9244_v13, %v2136_v34  ;;  %v2356_v21 = vsub.f32 %v9257_v63, %v2136_v34  ;;  %v9471_v28 = vpop.f32.mrf.mxu0 }
 0x1af   : > { %11022 = vst [vmem:[#allocation90_spill] sm:$0xff] %v9447_v43  ;;  %v9465_v44 = vpop.eup %7712  ;;  %v2403_v5 = vsub.f32 %v9318_v45, %v2136_v34  ;;  %v2311_v2 = vsub.f32 %v9248_v48, %v2152_v54  ;;  %11024 = vst [vmem:[#allocation92_spill] sm:$0xff] %v9471_v28  ;;  %v9473_v52 = vpop.f32.mrf.mxu1  ;;  %v2358_v26 = vsub.f32 %v9261_v51, %v2152_v54  ;;  %v2163_v45 = vrot.slane %v2162_v36, 4 }
 0x1b0   : > { %11023 = vst [vmem:[#allocation91_spill] sm:$0xff] %v9465_v44  ;;  %11025 = vst [vmem:[#allocation93_spill] sm:$0xff] %v9473_v52  ;;  %v2405_v39 = vsub.f32 %v9322_v4, %v2152_v54  ;;  %v9477_v0 = vmax.f32 %v2158_v29, %v2159_v55  ;;  %v9481_v46 = vadd.f32 %v9237_v24, %v8422_v49  ;;  %v2478_v63 = vmul.f32 1.442695, %v2309_v15  ;;  %v9487_v16 = vpop.f32.mrf.mxu0 }
 0x1b1   : > { %v9483_v13 = vpop.eup %7714  ;;  %v2310_v48 = vsub.f32 %v9267_v6, %v9440_v42  ;;  %v2179_v34 = vrot.slane %v2178_v50, 4  ;;  %11026 = vst [vmem:[#allocation94_spill] sm:$0xff] %v9487_v16  ;;  %v9489_v40 = vpop.f32.mrf.mxu1  ;;  %v2572_v54 = vmul.f32 1.442695, %v2356_v21  ;;  %v2404_v4 = vsub.f32 %v9330_v62, %v9440_v42 }
 0x1b2   : > { %11027 = vst [vmem:[#allocation95_spill] sm:$0xff] %v9489_v40  ;;  %v9491_v51 = vpop.eup %7716  ;;  %v2169_v24 = vmax.f32 %v9451_v31, %v9459_v27  ;;  %v9499_v29 = vadd.f32 %v9239_v30, %v8422_v49  ;;  %v2666_v55 = vmul.f32 1.442695, %v2403_v5  ;;  %v2482_v15 = vmul.f32 1.442695, %v2311_v2  ;;  %v1752_v62 = vpop.f32.mrf.mxu0  ;;  %v11030_v30 = vld [vmem:[#allocation66_spill] sm:$0xff] }
 0x1b3   : > { %11028 = vst [vmem:[#allocation96_spill] sm:$0xff] %v9491_v51  ;;  %v9501_v6 = vpop.eup %7718  ;;  %v2357_v40 = vsub.f32 %v9278_v47, %v9440_v42  ;;  %v2185_v21 = vmax.f32 %v9455_v19, %v9463_v57  ;;  %3587 = vmatprep.subr.mxu0 %v9491_v51  ;;  %v1803_v16 = vpop.f32.mrf.mxu1  ;;  %7726 = vpow2.f32 %v2478_v63  ;;  %v2576_v20 = vmul.f32 1.442695, %v2358_v26 }
 0x1b4   : > { %11029 = vst [vmem:[#allocation97_spill] sm:$0xff] %v9501_v6  ;;  %v2670_v23 = vmul.f32 1.442695, %v2405_v39  ;;  %v2312_v52 = vsub.f32 %v11030_v30, %v9477_v0  ;;  %3588 = vmatpush1.msra.mxu0 %v9429_v12  ;;  %v2480_v2 = vmul.f32 1.442695, %v2310_v48  ;;  %v2164_v28 = vmax.f32 %v2162_v36, %v2163_v45  ;;  %v1753_v51 = vpop.f32.mrf.mxu0 }
 0x1b5   : > { %v9511_v5 = vpop.eup %7720  ;;  %v2180_v42 = vmax.f32 %v2178_v50, %v2179_v34  ;;  %v2170_v47 = vmax.f32 %v2169_v24, %v9481_v46  ;;  %3589 = vmatprep.subr.mxu0 %v9501_v6  ;;  %v1804_v62 = vpop.f32.mrf.mxu1  ;;  %7728 = vpow2.f32 %v2572_v54  ;;  %v2668_v39 = vmul.f32 1.442695, %v2404_v4  ;;  %v11033_v51 = vld [vmem:[#allocation67_spill] sm:$0xff] }
 0x1b6   : > { %11031 = vst [vmem:[#allocation66_spill] sm:$0xff] %v9511_v5  ;;  %v9515_v16 = vpop.eup %7722  ;;  %v2406_v26 = vsub.f32 %v9334_v32, %v9477_v0  ;;  %v2186_v63 = vmax.f32 %v2185_v21, %v9499_v29  ;;  %3658 = vmatprep.subr.mxu1 %v9511_v5  ;;  %3590 = vmatpush1.msra.mxu0 %v9417_v11  ;;  %7730 = vpow2.f32 %v2666_v55  ;;  %v2165_v50 = vrot.slane %v2164_v28, 2  ;;  %v9524_v45 = vpop.f32.mrf.mxu0 }
 0x1b7   : > { %11032 = vst [vmem:[#allocation98_spill] sm:$0xff] %v9515_v16  ;;  %v2181_v36 = vrot.slane %v2180_v42, 2  ;;  %v2171_v48 = vrot.slane %v2170_v47, 4  ;;  %3659 = vmatpush1.msra.mxu1 %v9465_v44  ;;  %3591 = vmatprep.subr.mxu0 %v9483_v13  ;;  %v9526_v34 = vpop.f32.mrf.mxu1  ;;  %7732 = vpow2.f32 %v2482_v15  ;;  %v2574_v32 = vmul.f32 1.442695, %v2357_v40 }
 0x1b8   : > { %v2359_v54 = vsub.f32 %v11033_v51, %v9477_v0  ;;  %v2187_v4 = vrot.slane %v2186_v63, 4  ;;  %3660 = vmatprep.subr.mxu1 %v9515_v16  ;;  %3592 = vmatpush1.msra.mxu0 %v9411_v10  ;;  %v9532_v24 = vpop.eup %7724  ;;  %7734 = vpow2.f32 %v2576_v20  ;;  %v2166_v55 = vmax.f32 %v2164_v28, %v2165_v50  ;;  %v9537_v40 = vpop.f32.mrf.mxu0 }
 0x1b9   : > { %11034 = vst [vmem:[#allocation67_spill] sm:$0xff] %v9532_v24  ;;  %v2182_v21 = vmax.f32 %v2180_v42, %v2181_v36  ;;  %v2172_v30 = vmax.f32 %v2170_v47, %v2171_v48  ;;  %3661 = vmatpush1.msra.mxu1 %v9447_v43  ;;  %7296 = vmatmul.mubr.msk.f32.vlgmr.msra.gmra.mxu0 %vm2705_vm1, %v9233_v3  ;;  %v9539_v15 = vpop.f32.mrf.mxu1  ;;  %7736 = vpow2.f32 %v2670_v23  ;;  %v2484_v0 = vmul.f32 1.442695, %v2312_v52  ;;  %v11035_v23 = vld [vmem:[#allocation69_spill] sm:$0xff] }
 0x1ba   : > { %v2672_v62 = vmul.f32 1.442695, %v2406_v26  ;;  %v2188_v51 = vmax.f32 %v2186_v63, %v2187_v4  ;;  %3662 = vmatprep.subr.mxu1 %v9532_v24  ;;  %3767 = vmatprep.mubr.f32.mxu0 %v10957_v7  ;;  %7738 = vpow2.f32 %v2668_v39  ;;  %v2167_v20 = vrot.slane %v2166_v55, 1  ;;  %v9544_v47 = vpop.f32.mrf.mxu0 }
 0x1bb   : > { %v2183_v28 = vrot.slane %v2182_v21, 1  ;;  %v2173_v42 = vrot.slane %v2172_v30, 2  ;;  %3663 = vmatpush1.msra.mxu1 %v9438_v17  ;;  %v7399_v50 = vpop.f32.mrf.mxu1  ;;  %7740 = vpow2.f32 %v2480_v2  ;;  %v2578_v36 = vmul.f32 1.442695, %v2359_v54  ;;  %v11036_v2 = vld [vmem:[#allocation70_spill] sm:$0xff] }
 0x1bc   : > { %v2189_v48 = vrot.slane %v2188_v51, 2  ;;  %v9548_v52 = vadd.f32 %v11035_v23, %v8409_v38  ;;  %7297 = vmatmul.mubr.msk.f32.vlgmr.msra.gmra.mxu1 %vm2705_vm1, %v9233_v3  ;;  %7742 = vpow2.f32 %v2574_v32  ;;  %v2168_v39 = vmax.f32 %v2166_v55, %v2167_v20  ;;  %v9553_v4 = vpop.f32.mrf.mxu0  ;;  %v11037_v23 = vld [vmem:[#allocation77_spill] sm:$0xff] }
 0x1bd   : > { %v2184_v26 = vmax.f32 %v2182_v21, %v2183_v28  ;;  %v2174_v63 = vmax.f32 %v2172_v30, %v2173_v42  ;;  %3838 = vmatprep.mubr.f32.mxu1 %v10957_v7  ;;  %7744 = vpow2.f32 %v2672_v62  ;;  %v9557_v54 = vadd.f32 %v11036_v2, %v8409_v38  ;;  %v11038_v21 = vld [vmem:[#allocation78_spill] sm:$0xff] }
 0x1be   : > { %v2190_v50 = vmax.f32 %v2188_v51, %v2189_v48  ;;  %v9561_v5 = vadd.f32 %v11037_v23, %v8411_v41  ;;  %v2313_v44 = vsub.f32 %v9389_v58, %v2168_v39  ;;  %v2360_v32 = vsub.f32 %v9394_v1, %v2168_v39  ;;  %v9570_v62 = vpop.f32.mrf.mxu0  ;;  %v11040_v1 = vld [vmem:[#allocation73_spill] sm:$0xff] }
 0x1bf   : > { %v2407_v55 = vsub.f32 %v9423_v61, %v2168_v39  ;;  %v9568_v30 = vadd.f32 %v11038_v21, %v8411_v41  ;;  %7746 = vpow2.f32 %v2578_v36  ;;  %v2315_v51 = vsub.f32 %v9408_v18, %v2184_v26 }
 0x1c0   : > { %v2175_v20 = vrot.slane %v2174_v63, 1  ;;  %v2191_v28 = vrot.slane %v2190_v50, 1  ;;  %v9573_v42 = vpop.eup %7726  ;;  %7748 = vpow2.f32 %v2484_v0  ;;  %v2486_v48 = vmul.f32 1.442695, %v2313_v44  ;;  %v9580_v39 = vpop.f32.mrf.mxu0 }
 0x1c1   : > { %11039 = vst [vmem:[#allocation69_spill] sm:$0xff] %v9573_v42  ;;  %v2362_v58 = vsub.f32 %v9400_v60, %v2184_v26  ;;  %v9578_v61 = vadd.f32 %v11040_v1, %v8409_v38  ;;  %v2580_v2 = vmul.f32 1.442695, %v2360_v32  ;;  %v2409_v23 = vsub.f32 %v9427_v33, %v2184_v26  ;;  %v11042_v60 = vld [vmem:[#allocation74_spill] sm:$0xff] }
 0x1c2   : > { %v2176_v36 = vmax.f32 %v2174_v63, %v2175_v20  ;;  %v9585_v18 = vadd.f32 %v9338_v14, %v8411_v41  ;;  %v9587_v21 = vpop.eup %7728  ;;  %v2674_v0 = vmul.f32 1.442695, %v2407_v55  ;;  %v2192_v44 = vmax.f32 %v2190_v50, %v2191_v28  ;;  %v1854_v12 = vpop.f32.mrf.mxu0 }
 0x1c3   : > { %11041 = vst [vmem:[#allocation70_spill] sm:$0xff] %v9587_v21  ;;  %v9591_v16 = vadd.f32 %v11042_v60, %v8409_v38  ;;  %v2193_v1 = vmax.f32 %v9548_v52, %v9561_v5  ;;  %v9595_v32 = vpop.eup %7730  ;;  %v2490_v33 = vmul.f32 1.442695, %v2315_v51  ;;  %v2209_v63 = vmax.f32 %v9557_v54, %v9568_v30 }
 0x1c4   : > { %11043 = vst [vmem:[#allocation77_spill] sm:$0xff] %v9595_v32  ;;  %v2314_v26 = vsub.f32 %v9451_v31, %v2176_v36  ;;  %v2408_v14 = vsub.f32 %v9481_v46, %v2176_v36  ;;  %v9601_v55 = vpop.eup %7732  ;;  %7750 = vpow2.f32 %v2486_v48  ;;  %v2584_v50 = vmul.f32 1.442695, %v2362_v58  ;;  %v1855_v12 = vpop.f32.mrf.mxu0 }
 0x1c5   : > { %11044 = vst [vmem:[#allocation78_spill] sm:$0xff] %v9601_v55  ;;  %v2361_v20 = vsub.f32 %v9459_v27, %v2176_v36  ;;  %v9606_v28 = vadd.f32 %v9340_v35, %v8411_v41  ;;  %v9608_v60 = vpop.eup %7734  ;;  %7752 = vpow2.f32 %v2580_v2  ;;  %v2678_v31 = vmul.f32 1.442695, %v2409_v23 }
 0x1c6   : > { %11045 = vst [vmem:[#allocation73_spill] sm:$0xff] %v9608_v60  ;;  %v2410_v46 = vsub.f32 %v9499_v29, %v2192_v44  ;;  %v2201_v51 = vmax.f32 %v9578_v61, %v9585_v18  ;;  %v9613_v43 = vpop.eup %7736  ;;  %7754 = vpow2.f32 %v2674_v0  ;;  %v2676_v48 = vmul.f32 1.442695, %v2408_v14 }
 0x1c7   : > { %11046 = vst [vmem:[#allocation74_spill] sm:$0xff] %v9613_v43  ;;  %v2316_v27 = vsub.f32 %v9455_v19, %v2192_v44  ;;  %v2363_v58 = vsub.f32 %v9463_v57, %v2192_v44  ;;  %v9617_v35 = vpop.eup %7738  ;;  %7756 = vpow2.f32 %v2490_v33  ;;  %v2488_v36 = vmul.f32 1.442695, %v2314_v26 }
 0x1c8   : > { %11047 = vst [vmem:[#allocation99_spill] sm:$0xff] %v9617_v35  ;;  %v9621_v2 = vadd.f32 %v9356_v53, %v8422_v49  ;;  %v9625_v29 = vadd.f32 %v9358_v56, %v8422_v49  ;;  %v9627_v23 = vpop.eup %7740  ;;  %v2582_v0 = vmul.f32 1.442695, %v2361_v20  ;;  %v2217_v19 = vmax.f32 %v9591_v16, %v9606_v28  ;;  %3729 = vmatprep.subr.mxu0 %v9617_v35 }
 0x1c9   : > { %11048 = vst [vmem:[#allocation100_spill] sm:$0xff] %v9627_v23  ;;  %v9633_v57 = vadd.f32 %v9372_v9, %v8422_v49  ;;  %v9637_v44 = vadd.f32 %v9374_v59, %v8422_v49  ;;  %v9640_v53 = vpop.eup %7742  ;;  %7758 = vpow2.f32 %v2584_v50  ;;  %v2680_v56 = vmul.f32 1.442695, %v2410_v46  ;;  %3730 = vmatpush1.msra.mxu0 %v9595_v32 }
 0x1ca   : > { %11049 = vst [vmem:[#allocation101_spill] sm:$0xff] %v9640_v53  ;;  %v2194_v33 = vmax.f32 %v2193_v1, %v9621_v2  ;;  %v2210_v26 = vmax.f32 %v2209_v63, %v9625_v29  ;;  %v9645_v14 = vpop.eup %7744  ;;  %7760 = vpow2.f32 %v2676_v48  ;;  %v2492_v9 = vmul.f32 1.442695, %v2316_v27  ;;  %3731 = vmatprep.subr.mxu0 %v9640_v53 }
 0x1cb   : > { %11050 = vst [vmem:[#allocation102_spill] sm:$0xff] %v9645_v14  ;;  %v2202_v20 = vmax.f32 %v2201_v51, %v9633_v57  ;;  %v2218_v59 = vmax.f32 %v2217_v19, %v9637_v44  ;;  %7762 = vpow2.f32 %v2678_v31  ;;  %v2586_v12 = vmul.f32 1.442695, %v2363_v58  ;;  %3800 = vmatprep.subr.mxu1 %v9645_v14  ;;  %3732 = vmatpush1.msra.mxu0 %v9587_v21 }
 0x1cc   : > { %v2195_v50 = vrot.slane %v2194_v33, 4  ;;  %v2211_v46 = vrot.slane %v2210_v26, 4  ;;  %v9652_v1 = vpop.eup %7746  ;;  %7764 = vpow2.f32 %v2582_v0  ;;  %3801 = vmatpush1.msra.mxu1 %v9613_v43  ;;  %3733 = vmatprep.subr.mxu0 %v9627_v23  ;;  %v9658_v51 = vadd.f32 %v9433_v22, %v8411_v41 }
 0x1cd   : > { %11051 = vst [vmem:[#allocation103_spill] sm:$0xff] %v9652_v1  ;;  %v2203_v63 = vrot.slane %v2202_v20, 4  ;;  %v2219_v48 = vrot.slane %v2218_v59, 4  ;;  %v9660_v31 = vpop.eup %7748  ;;  %7766 = vpow2.f32 %v2680_v56  ;;  %3802 = vmatprep.subr.mxu1 %v9652_v1  ;;  %v9665_v0 = vadd.f32 %v9402_v25, %v8409_v38  ;;  %3734 = vmatpush1.msra.mxu0 %v9573_v42  ;;  %v11059_v42 = vld [vmem:[#allocation85_spill] sm:$0xff] }
 0x1ce   : > { %11052 = vst [vmem:[#allocation104_spill] sm:$0xff] %v9660_v31  ;;  %v2196_v27 = vmax.f32 %v2194_v33, %v2195_v50  ;;  %v2212_v58 = vmax.f32 %v2210_v26, %v2211_v46  ;;  %7768 = vpow2.f32 %v2488_v36  ;;  %3803 = vmatpush1.msra.mxu1 %v9608_v60  ;;  %7298 = vmatmul.mubr.msk.f32.vlgmr.msra.gmra.mxu0 %vm2705_vm1, %v9233_v3  ;;  %v11054_v46 = vld [vmem:[#allocation93_spill] sm:$0xff]  ;;  %v11058_v60 = vld [vmem:[#allocation94_spill] sm:$0xff] }
 0x1cf   : > { %v2204_v19 = vmax.f32 %v2202_v20, %v2203_v63  ;;  %v2220_v14 = vmax.f32 %v2218_v59, %v2219_v48  ;;  %v9673_v22 = vadd.f32 %v9435_v8, %v8411_v41  ;;  %7770 = vpow2.f32 %v2586_v12  ;;  %3804 = vmatprep.subr.mxu1 %v9660_v31  ;;  %3909 = vmatprep.mubr.f32.mxu0 %v10957_v7  ;;  %v11053_v8 = vld [vmem:[#allocation92_spill] sm:$0xff] }
 0x1d0   : > { %v2197_v56 = vrot.slane %v2196_v27, 2  ;;  %v2213_v33 = vrot.slane %v2212_v58, 2  ;;  %v9677_v25 = vadd.f32 %v9404_v37, %v8409_v38  ;;  %3805 = vmatpush1.msra.mxu1 %v9601_v55  ;;  %v2225_v20 = vmax.f32 %v9665_v0, %v9658_v51 }
 0x1d1   : > { %v2205_v36 = vrot.slane %v2204_v19, 2  ;;  %v2221_v26 = vrot.slane %v2220_v14, 2  ;;  %v9686_v59 = vadd.f32 %v11053_v8, %v8422_v49  ;;  %v9688_v12 = vpop.eup %7750  ;;  %7772 = vpow2.f32 %v2492_v9  ;;  %7299 = vmatmul.mubr.msk.f32.vlgmr.msra.gmra.mxu1 %vm2705_vm1, %v9233_v3 }
 0x1d2   : > { %v2198_v37 = vmax.f32 %v2196_v27, %v2197_v56  ;;  %v2214_v50 = vmax.f32 %v2212_v58, %v2213_v33  ;;  %v9694_v63 = vadd.f32 %v11054_v46, %v8422_v49  ;;  %v9696_v48 = vpop.eup %7752  ;;  %v2241_v8 = vmax.f32 %v9677_v25, %v9673_v22  ;;  %3980 = vmatprep.mubr.f32.mxu1 %v10957_v7  ;;  %v11055_v56 = vld [vmem:[#allocation84_spill] sm:$0xff] }
 0x1d3   : > { %v2206_v43 = vmax.f32 %v2204_v19, %v2205_v36  ;;  %v2222_v35 = vmax.f32 %v2220_v14, %v2221_v26  ;;  %v2226_v1 = vmax.f32 %v2225_v20, %v9686_v59  ;;  %v9702_v9 = vpop.eup %7754  ;;  %v9706_v33 = vadd.f32 %v11055_v56, %v8409_v38  ;;  %v11056_v46 = vld [vmem:[#allocation88_spill] sm:$0xff]  ;;  %v11057_v36 = vld [vmem:[#allocation89_spill] sm:$0xff] }
 0x1d4   : > { %v2199_v27 = vrot.slane %v2198_v37, 1  ;;  %v2215_v58 = vrot.slane %v2214_v50, 1  ;;  %v9710_v32 = vadd.f32 %v11056_v46, %v8411_v41  ;;  %v9712_v14 = vpop.eup %7756  ;;  %v9716_v26 = vadd.f32 %v11057_v36, %v8411_v41  ;;  %v11060_v36 = vld [vmem:[#allocation95_spill] sm:$0xff] }
 0x1d5   : > { %v2207_v19 = vrot.slane %v2206_v43, 1  ;;  %v2242_v20 = vmax.f32 %v2241_v8, %v9694_v63  ;;  %v9721_v53 = vadd.f32 %v11058_v60, %v8422_v49  ;;  %v2223_v21 = vrot.slane %v2222_v35, 1 }
 0x1d6   : > { %v2200_v31 = vmax.f32 %v2198_v37, %v2199_v27  ;;  %v2216_v56 = vmax.f32 %v2214_v50, %v2215_v58  ;;  %v2227_v55 = vrot.slane %v2226_v1, 4  ;;  %v9723_v23 = vpop.eup %7758  ;;  %v9729_v6 = vadd.f32 %v11059_v42, %v8409_v38 }
 0x1d7   : > { %v9725_v46 = vmax.f32 %v2206_v43, %v2207_v19  ;;  %v9733_v24 = vadd.f32 %v11060_v36, %v8422_v49  ;;  %v9735_v8 = vpop.eup %7760  ;;  %v2233_v43 = vmax.f32 %v9706_v33, %v9710_v32 }
 0x1d8   : > { %11061 = vst [vmem:[#allocation92_spill] sm:$0xff] %v9735_v8  ;;  %v2317_v60 = vsub.f32 %v9548_v52, %v2200_v31  ;;  %v2364_v37 = vsub.f32 %v9561_v5, %v2200_v31  ;;  %v2411_v50 = vsub.f32 %v9621_v2, %v2200_v31  ;;  %v9742_v27 = vpop.eup %7762  ;;  %v2319_v42 = vsub.f32 %v9557_v54, %v2216_v56 }
 0x1d9   : > { %11062 = vst [vmem:[#allocation93_spill] sm:$0xff] %v9742_v27  ;;  %v2366_v58 = vsub.f32 %v9568_v30, %v2216_v56  ;;  %v2413_v19 = vsub.f32 %v9625_v29, %v2216_v56  ;;  %v2249_v36 = vmax.f32 %v9729_v6, %v9716_v26  ;;  %3871 = vmatprep.subr.mxu0 %v9735_v8  ;;  %v9750_v52 = vpop.eup %7764  ;;  %v2243_v31 = vrot.slane %v2242_v20, 4 }
 0x1da   : > { %v9752_v5 = vmax.f32 %v2222_v35, %v2223_v21  ;;  %v2228_v2 = vmax.f32 %v2226_v1, %v2227_v55  ;;  %v2234_v11 = vmax.f32 %v2233_v43, %v9721_v53  ;;  %3872 = vmatpush1.msra.mxu0 %v9702_v9  ;;  %v9756_v54 = vpop.eup %7766  ;;  %v2494_v30 = vmul.f32 1.442695, %v2317_v60 }
 0x1db   : > { %11063 = vst [vmem:[#allocation84_spill] sm:$0xff] %v9756_v54  ;;  %v2412_v29 = vsub.f32 %v9633_v57, %v9725_v46  ;;  %v2250_v56 = vmax.f32 %v2249_v36, %v9733_v24  ;;  %3873 = vmatprep.subr.mxu0 %v9750_v52  ;;  %v9762_v8 = vpop.eup %7768  ;;  %v2588_v21 = vmul.f32 1.442695, %v2364_v37  ;;  %v2682_v35 = vmul.f32 1.442695, %v2411_v50  ;;  %3942 = vmatprep.subr.mxu1 %v9756_v54 }
 0x1dc   : > { %v2318_v55 = vsub.f32 %v9578_v61, %v9725_v46  ;;  %3874 = vmatpush1.msra.mxu0 %v9696_v48  ;;  %v9768_v1 = vpop.eup %7770  ;;  %v2498_v60 = vmul.f32 1.442695, %v2319_v42  ;;  %v2592_v43 = vmul.f32 1.442695, %v2366_v58  ;;  %v2686_v57 = vmul.f32 1.442695, %v2413_v19  ;;  %3943 = vmatpush1.msra.mxu1 %v9742_v27 }
 0x1dd   : > { %11064 = vst [vmem:[#allocation88_spill] sm:$0xff] %v9768_v1  ;;  %v2365_v36 = vsub.f32 %v9585_v18, %v9725_v46  ;;  %3875 = vmatprep.subr.mxu0 %v9762_v8  ;;  %v2320_v37 = vsub.f32 %v9591_v16, %v9752_v5  ;;  %v2229_v61 = vrot.slane %v2228_v2, 2  ;;  %v2244_v50 = vmax.f32 %v2242_v20, %v2243_v31 }
 0x1de   : > { %v2235_v54 = vrot.slane %v2234_v11, 4  ;;  %3944 = vmatprep.subr.mxu1 %v9768_v1  ;;  %3876 = vmatpush1.msra.mxu0 %v9688_v12  ;;  %v9778_v42 = vpop.eup %7772  ;;  %7774 = vpow2.f32 %v2494_v30  ;;  %v2684_v58 = vmul.f32 1.442695, %v2412_v29  ;;  %v2414_v18 = vsub.f32 %v9637_v44, %v9752_v5 }
 0x1df   : > { %v2251_v46 = vrot.slane %v2250_v56, 4  ;;  %3945 = vmatpush1.msra.mxu1 %v9723_v23  ;;  %7300 = vmatmul.mubr.msk.f32.vlgmr.msra.gmra.mxu0 %vm2705_vm1, %v9233_v3  ;;  %7776 = vpow2.f32 %v2588_v21  ;;  %v2230_v16 = vmax.f32 %v2228_v2, %v2229_v61  ;;  %v2245_v20 = vrot.slane %v2244_v50, 2 }
 0x1e0   : > { %v2236_v19 = vmax.f32 %v2234_v11, %v2235_v54  ;;  %3946 = vmatprep.subr.mxu1 %v9778_v42  ;;  %4051 = vmatprep.mubr.f32.mxu0 %v10957_v7  ;;  %7778 = vpow2.f32 %v2682_v35  ;;  %v2590_v31 = vmul.f32 1.442695, %v2365_v36  ;;  %v2367_v30 = vsub.f32 %v9606_v28, %v9752_v5 }
 0x1e1   : > { %v2252_v44 = vmax.f32 %v2250_v56, %v2251_v46  ;;  %3947 = vmatpush1.msra.mxu1 %v9712_v14  ;;  %7780 = vpow2.f32 %v2498_v60  ;;  %v2231_v29 = vrot.slane %v2230_v16, 1  ;;  %v2246_v27 = vmax.f32 %v2244_v50, %v2245_v20 }
 0x1e2   : > { %v2237_v1 = vrot.slane %v2236_v19, 2  ;;  %7301 = vmatmul.mubr.msk.f32.vlgmr.msra.gmra.mxu1 %vm2705_vm1, %v9233_v3  ;;  %7782 = vpow2.f32 %v2592_v43  ;;  %v2496_v11 = vmul.f32 1.442695, %v2318_v55  ;;  %v2688_v2 = vmul.f32 1.442695, %v2414_v18 }
 0x1e3   : > { %v2253_v54 = vrot.slane %v2252_v44, 2  ;;  %4122 = vmatprep.mubr.f32.mxu1 %v10957_v7  ;;  %7784 = vpow2.f32 %v2684_v58  ;;  %v2232_v21 = vmax.f32 %v2230_v16, %v2231_v29  ;;  %v2247_v35 = vrot.slane %v2246_v27, 1 }
 0x1e4   : > { %v2238_v28 = vmax.f32 %v2236_v19, %v2237_v1  ;;  %7786 = vpow2.f32 %v2686_v57  ;;  %v2594_v5 = vmul.f32 1.442695, %v2367_v30  ;;  %v2500_v60 = vmul.f32 1.442695, %v2320_v37 }
 0x1e5   : > { %v2254_v56 = vmax.f32 %v2252_v44, %v2253_v54  ;;  %7788 = vpow2.f32 %v2590_v31  ;;  %v2321_v36 = vsub.f32 %v9665_v0, %v2232_v21  ;;  %v2368_v61 = vsub.f32 %v9658_v51, %v2232_v21  ;;  %v1894_v0 = vpop.f32.mrf.mxu1 }
 0x1e6   : > { %7790 = vpow2.f32 %v2688_v2  ;;  %v9795_v3 = vmax.f32 %v2246_v27, %v2247_v35  ;;  %v2239_v55 = vrot.slane %v2238_v28, 1  ;;  %v9799_v50 = vadd.f32 %v9524_v45, %v8409_v38 }
 0x1e7   : > { %v2255_v43 = vrot.slane %v2254_v56, 1  ;;  %7792 = vpow2.f32 %v2496_v11  ;;  %v2415_v1 = vsub.f32 %v9686_v59, %v2232_v21  ;;  %v9804_v37 = vadd.f32 %v9544_v47, %v8411_v41 }
 0x1e8   : > { %7794 = vpow2.f32 %v2594_v5  ;;  %v2240_v57 = vmax.f32 %v2238_v28, %v2239_v55  ;;  %v2502_v51 = vmul.f32 1.442695, %v2321_v36  ;;  %v9808_v27 = vadd.f32 %v9526_v34, %v8422_v49 }
 0x1e9   : > { %v2256_v58 = vmax.f32 %v2254_v56, %v2255_v43  ;;  %v9812_v18 = vadd.f32 %v9537_v40, %v8409_v38  ;;  %7796 = vpow2.f32 %v2500_v60  ;;  %v2596_v45 = vmul.f32 1.442695, %v2368_v61 }
 0x1ea   : > { %v2417_v59 = vsub.f32 %v9694_v63, %v9795_v3  ;;  %v9818_v47 = vadd.f32 %v9553_v4, %v8411_v41  ;;  %v2369_v16 = vsub.f32 %v9710_v32, %v2240_v57  ;;  %v2416_v34 = vsub.f32 %v9721_v53, %v2240_v57 }
 0x1eb   : > { %v9820_v46 = vpop.eup %7774  ;;  %v9826_v20 = vadd.f32 %v9539_v15, %v8409_v38  ;;  %v9829_v40 = vadd.f32 %v1894_v0, %v8411_v41  ;;  %v2690_v63 = vmul.f32 1.442695, %v2415_v1  ;;  %v2322_v31 = vsub.f32 %v9706_v33, %v2240_v57 }
 0x1ec   : > { %v9831_v19 = vpop.eup %7776  ;;  %v2418_v4 = vsub.f32 %v9733_v24, %v2256_v58  ;;  %v2257_v30 = vmax.f32 %v9799_v50, %v9804_v37  ;;  %7798 = vpow2.f32 %v2502_v51  ;;  %v2323_v38 = vsub.f32 %v9677_v25, %v9795_v3 }
 0x1ed   : > { %v9837_v32 = vpop.eup %7778  ;;  %v2370_v41 = vsub.f32 %v9673_v22, %v9795_v3  ;;  %v2692_v15 = vmul.f32 1.442695, %v2416_v34  ;;  %7800 = vpow2.f32 %v2596_v45  ;;  %v2694_v44 = vmul.f32 1.442695, %v2417_v59 }
 0x1ee   : > { %v9843_v53 = vpop.eup %7780  ;;  %v2371_v33 = vsub.f32 %v9716_v26, %v2256_v58  ;;  %v2265_v24 = vmax.f32 %v9812_v18, %v9818_v47  ;;  %v2598_v11 = vmul.f32 1.442695, %v2369_v16  ;;  %v2273_v2 = vmax.f32 %v9826_v20, %v9829_v40 }
 0x1ef   : > { %v9848_v29 = vpop.eup %7782  ;;  %v9854_v25 = vadd.f32 %v9570_v62, %v8422_v49  ;;  %v9858_v22 = vadd.f32 %v9580_v39, %v8422_v49  ;;  %7802 = vpow2.f32 %v2690_v63  ;;  %v2504_v26 = vmul.f32 1.442695, %v2322_v31  ;;  %v9891_v63 = vld [vmem:[%s10823_s3] sm:$0xff] }
 0x1f0   : > { %v9860_v54 = vpop.eup %7784  ;;  %v2324_v21 = vsub.f32 %v9729_v6, %v2256_v58  ;;  %v2696_v35 = vmul.f32 1.442695, %v2418_v4  ;;  %7804 = vpow2.f32 %v2692_v15  ;;  %v2274_v5 = vmax.f32 %v2273_v2, %v9808_v27 }
 0x1f1   : > { %v9863_v28 = vpop.eup %7786  ;;  %v2258_v56 = vmax.f32 %v2257_v30, %v9854_v25  ;;  %v2266_v62 = vmax.f32 %v2265_v24, %v9858_v22  ;;  %4013 = vmatprep.subr.mxu0 %v9860_v54  ;;  %v2600_v39 = vmul.f32 1.442695, %v2370_v41  ;;  %7806 = vpow2.f32 %v2694_v44 }
 0x1f2   : > { %v9869_v49 = vpop.eup %7788  ;;  %v2602_v60 = vmul.f32 1.442695, %v2371_v33  ;;  %4014 = vmatpush1.msra.mxu0 %v9837_v32  ;;  %7808 = vpow2.f32 %v2598_v11  ;;  %v2275_v36 = vrot.slane %v2274_v5, 4  ;;  %v2506_v43 = vmul.f32 1.442695, %v2323_v38 }
 0x1f3   : > { %v9872_v6 = vpop.eup %7790  ;;  %v2259_v61 = vrot.slane %v2258_v56, 4  ;;  %v2267_v3 = vrot.slane %v2266_v62, 4  ;;  %4015 = vmatprep.subr.mxu0 %v9869_v49  ;;  %v2508_v1 = vmul.f32 1.442695, %v2324_v21  ;;  %7810 = vpow2.f32 %v2696_v35 }
 0x1f4   : > { %v9875_v55 = vpop.eup %7792  ;;  %4084 = vmatprep.subr.mxu1 %v9872_v6  ;;  %4016 = vmatpush1.msra.mxu0 %v9831_v19  ;;  %7812 = vpow2.f32 %v2504_v26  ;;  %v2276_v0 = vmax.f32 %v2274_v5, %v2275_v36 }
 0x1f5   : > { %v9879_v57 = vpop.eup %7794  ;;  %v2260_v51 = vmax.f32 %v2258_v56, %v2259_v61  ;;  %v2268_v58 = vmax.f32 %v2266_v62, %v2267_v3  ;;  %4085 = vmatpush1.msra.mxu1 %v9863_v28  ;;  %4017 = vmatprep.subr.mxu0 %v9875_v55  ;;  %7814 = vpow2.f32 %v2602_v60 }
 0x1f6   : > { %4086 = vmatprep.subr.mxu1 %v9879_v57  ;;  %4018 = vmatpush1.msra.mxu0 %v9820_v46  ;;  %v9885_v45 = vpop.eup %7796  ;;  %7816 = vpow2.f32 %v2600_v39  ;;  %v2277_v59 = vrot.slane %v2276_v0, 2 }
 0x1f7   : > { %v2261_v16 = vrot.slane %v2260_v51, 2  ;;  %v2269_v34 = vrot.slane %v2268_v58, 2  ;;  %4087 = vmatpush1.msra.mxu1 %v9848_v29  ;;  %7302 = vmatmul.mubr.msk.f32.vlgmr.msra.gmra.mxu0 %vm2705_vm1, %v9891_v63  ;;  %7818 = vpow2.f32 %v2508_v1 }
 0x1f8   : > { %4088 = vmatprep.subr.mxu1 %v9885_v45  ;;  %4193 = vmatprep.mubr.f32.mxu0 %v10957_v7  ;;  %7820 = vpow2.f32 %v2506_v43  ;;  %v2278_v31 = vmax.f32 %v2276_v0, %v2277_v59 }
 0x1f9   : > { %v2262_v4 = vmax.f32 %v2260_v51, %v2261_v16  ;;  %v2270_v30 = vmax.f32 %v2268_v58, %v2269_v34  ;;  %4089 = vmatpush1.msra.mxu1 %v9843_v53  ;;  %v9898_v38 = vpop.eup %7798 }
 0x1fa   : > { %7303 = vmatmul.mubr.msk.f32.vlgmr.msra.gmra.mxu1 %vm2705_vm1, %v9891_v63  ;;  %v9902_v41 = vpop.eup %7800  ;;  %v2279_v15 = vrot.slane %v2278_v31, 1 }
 0x1fb   : > { %v2263_v44 = vrot.slane %v2262_v4, 1  ;;  %v2271_v33 = vrot.slane %v2270_v30, 1  ;;  %4264 = vmatprep.mubr.f32.mxu1 %v10957_v7 }
 0x1fc   : > { %v9905_v24 = vpop.eup %7802  ;;  %v2280_v11 = vmax.f32 %v2278_v31, %v2279_v15 }
 0x1fd   : > { %v2264_v2 = vmax.f32 %v2262_v4, %v2263_v44  ;;  %v9907_v26 = vpop.eup %7804  ;;  %v2272_v21 = vmax.f32 %v2270_v30, %v2271_v33 }
 0x1fe   : > { %v9909_v35 = vpop.eup %7806  ;;  %v2327_v5 = vsub.f32 %v9826_v20, %v2280_v11  ;;  %v2374_v56 = vsub.f32 %v9829_v40, %v2280_v11  ;;  %v2421_v62 = vsub.f32 %v9808_v27, %v2280_v11  ;;  %4155 = vmatprep.subr.mxu0 %v9907_v26 }
 0x1ff   : > { %v9915_v39 = vpop.eup %7808  ;;  %v2372_v60 = vsub.f32 %v9804_v37, %v2264_v2  ;;  %4156 = vmatpush1.msra.mxu0 %v9905_v24  ;;  %v2419_v3 = vsub.f32 %v9854_v25, %v2264_v2  ;;  %v2775_v20 = vpop.f32.mrf.mxu1  ;;  %v2326_v27 = vsub.f32 %v9812_v18, %v2272_v21  ;;  %v2420_v0 = vsub.f32 %v9858_v22, %v2272_v21 }
 0x200   : > { %v9919_v36 = vpop.eup %7810  ;;  %v2702_v61 = vmul.f32 1.442695, %v2421_v62  ;;  %4157 = vmatprep.subr.mxu0 %v9915_v39  ;;  %v2514_v40 = vmul.f32 1.442695, %v2327_v5  ;;  %v2608_v1 = vmul.f32 1.442695, %v2374_v56  ;;  %v2373_v58 = vsub.f32 %v9818_v47, %v2272_v21 }
 0x201   : > { %v9923_v43 = vpop.eup %7812  ;;  %4226 = vmatprep.subr.mxu1 %v9919_v36  ;;  %4158 = vmatpush1.msra.mxu0 %v9902_v41  ;;  %v2604_v51 = vmul.f32 1.442695, %v2372_v60  ;;  %7822 = vrcp.f32 %v2775_v20  ;;  %v2698_v59 = vmul.f32 1.442695, %v2419_v3  ;;  %v2777_v22 = vpop.f32.mrf.mxu1  ;;  %v2512_v34 = vmul.f32 1.442695, %v2326_v27 }
 0x202   : > { %v9928_v37 = vpop.eup %7814  ;;  %4227 = vmatpush1.msra.mxu1 %v9909_v35  ;;  %4159 = vmatprep.subr.mxu0 %v9923_v43  ;;  %7824 = vpow2.f32 %v2702_v61  ;;  %v2700_v47 = vmul.f32 1.442695, %v2420_v0  ;;  %v2325_v4 = vsub.f32 %v9799_v50, %v2264_v2  ;;  %v2606_v30 = vmul.f32 1.442695, %v2373_v58  ;;  %v9988_v58 = vld [vmem:[%s10824_s4] sm:$0xff] }
 0x203   : > { %v9933_v25 = vpop.eup %7816  ;;  %4228 = vmatprep.subr.mxu1 %v9928_v37  ;;  %4160 = vmatpush1.msra.mxu0 %v9898_v38  ;;  %7826 = vpow2.f32 %v2514_v40 }
 0x204   : > { %v9938_v18 = vpop.eup %7818  ;;  %4229 = vmatpush1.msra.mxu1 %v9933_v25  ;;  %7304 = vmatmul.mubr.msk.f32.vlgmr.msra.gmra.mxu0 %vm2705_vm1, %v9891_v63  ;;  %7828 = vpow2.f32 %v2608_v1  ;;  %v2510_v44 = vmul.f32 1.442695, %v2325_v4 }
 0x205   : > { %v9943_v16 = vpop.eup %7820  ;;  %4230 = vmatprep.subr.mxu1 %v9938_v18  ;;  %4335 = vmatprep.mubr.f32.mxu0 %v10957_v7  ;;  %7830 = vpow2.f32 %v2604_v51 }
 0x206   : > { %4231 = vmatpush1.msra.mxu1 %v9943_v16  ;;  %v2846_v31 = vpop.f32.mrf.mxu1  ;;  %7832 = vpow2.f32 %v2698_v59  ;;  %v9999_v59 = vld [vmem:[%s10824_s4 + $0x8] sm:$0xff] }
 0x207   : > { %7305 = vmatmul.mubr.msk.f32.vlgmr.msra.gmra.mxu1 %vm2705_vm1, %v9891_v63  ;;  %7400 = vmatprep.subr.mxu1 %v10957_v7  ;;  %7834 = vpow2.f32 %v2512_v34 }
 0x208   : > { %7406 = vmatprep.mubr.msk.f32.mxu1 %vm7994_vm2, %v10957_v7  ;;  %7836 = vpow2.f32 %v2700_v47  ;;  %v2848_v15 = vpop.f32.mrf.mxu1 }
 0x209   : > { %7838 = vpow2.f32 %v2606_v30 }
 0x20a   : > { %7840 = vrcp.f32 %v2846_v31 }
 0x20b   : > { %7842 = vrcp.f32 %v2848_v15 }
 0x20c   : > { %7844 = vrcp.f32 %v2777_v22 }
 0x20d   : > { %7846 = vpow2.f32 %v2510_v44 }
 0x20e   : > { %v7823_v50 = vpop.eup %7822 }
 0x20f   : > { %v9954_v33 = vpop.eup %7824 }
 0x210   : > { %v9956_v11 = vpop.eup %7826  ;;  %7401 = vmatpush3.msra.mxu1 %v9954_v33 }
 0x211   : > { %v9959_v2 = vpop.eup %7828  ;;  %7402 = vmatprep.subr.mxu1 %v10957_v7 }
 0x212   : > { %v9962_v21 = vpop.eup %7830  ;;  %7403 = vmatpush3.msra.mxu1 %v9959_v2 }
 0x213   : > { %v9965_v5 = vpop.eup %7832  ;;  %7404 = vmatprep.subr.mxu1 %v10957_v7 }
 0x214   : > { %v9968_v56 = vpop.eup %7834  ;;  %7405 = vmatpush3.msra.mxu1 %v9956_v11 }
 0x215   : > { %v9971_v60 = vpop.eup %7836  ;;  %7407 = vmatmul.mubr.msk.f32.vlgmr.msra.gmra.mxu1 %vm2705_vm1, %v9891_v63 }
 0x216   : > { %v9975_v61 = vpop.eup %7838  ;;  %4297 = vmatprep.subr.mxu0 %v9971_v60  ;;  %4666 = vmatprep.mubr.f32.mxu1 %v10957_v7 }
 0x217   : > { %v7841_v20 = vpop.eup %7840  ;;  %4298 = vmatpush1.msra.mxu0 %v9965_v5 }
 0x218   : > { %v2917_v62 = vpop.f32.mrf.mxu0  ;;  %v7843_v27 = vpop.eup %7842  ;;  %4299 = vmatprep.subr.mxu0 %v9975_v61 }
 0x219   : > { %7848 = vrcp.f32 %v2917_v62  ;;  %v7845_v1 = vpop.eup %7844  ;;  %4300 = vmatpush1.msra.mxu0 %v9962_v21  ;;  %4632 = vmatprep.subr.mxu1 %v7843_v27 }
 0x21a   : > { %v2919_v3 = vpop.f32.mrf.mxu0  ;;  %v9982_v51 = vpop.eup %7846  ;;  %4301 = vmatprep.subr.mxu0 %v9968_v56  ;;  %4633 = vmatpush1.msra.mxu1 %v7841_v20 }
 0x21b   : > { %7850 = vrcp.f32 %v2919_v3  ;;  %v2988_v40 = vpop.f32.mrf.mxu1  ;;  %4302 = vmatpush1.msra.mxu0 %v9982_v51  ;;  %7311 = vmatmul.mubr.msk.f32.vlgmr.msra.gmra.mxu1 %vm4509_vm3, %v9988_v58 }
 0x21c   : > { %7852 = vrcp.f32 %v2988_v40  ;;  %7306 = vmatmul.mubr.msk.f32.vlgmr.msra.gmra.mxu0 %vm2705_vm1, %v9891_v63  ;;  %4549 = vmatprep.subr.mxu0 %v7845_v1  ;;  %v10011_v63 = vld [vmem:[%s10824_s4 + $0x10] sm:$0xff] }
 0x21d   : > { %v2990_v0 = vpop.f32.mrf.mxu1  ;;  %4550 = vmatpush1.msra.mxu0 %v7823_v50  ;;  %4583 = vmatprep.mubr.f32.mxu0 %v10957_v7 }
 0x21e   : > { %7854 = vrcp.f32 %v2990_v0  ;;  %4672 = vmatprep.mubr.f32.mxu1 %v10957_v7 }
 0x21f   : > { %7312 = vmatmul.mubr.msk.f32.gmra.mxu1 %vm4509_vm3, %v9999_v59 }
 0x220   : > { %7308 = vmatmul.mubr.msk.f32.vlgmr.msra.gmra.mxu0 %vm4509_vm3, %v9988_v58  ;;  %4678 = vmatprep.mubr.f32.mxu1 %v10957_v7 }
 0x221   : > { %4589 = vmatprep.mubr.f32.mxu0 %v10957_v7 }
 0x223   : > { %7313 = vmatmul.mubr.msk.f32.gmra.mxu1 %vm4509_vm3, %v10011_v63 }
 0x224   : > { %7309 = vmatmul.mubr.msk.f32.gmra.mxu0 %vm4509_vm3, %v9999_v59  ;;  %4832 = vmatprep.mubr.f32.mxu1 %v10957_v7 }
 0x225   : > { %4595 = vmatprep.mubr.f32.mxu0 %v10957_v7 }
 0x226   : > { %v7849_v22 = vpop.eup %7848 }
 0x227   : > { %v3059_v47 = vpop.f32.mrf.mxu0 }
 0x228   : > { %v7851_v34 = vpop.eup %7850  ;;  %7856 = vrcp.f32 %v3059_v47  ;;  %7310 = vmatmul.mubr.msk.f32.gmra.mxu0 %vm4509_vm3, %v10011_v63 }
 0x229   : > { %4715 = vmatprep.subr.mxu0 %v7851_v34  ;;  %v7853_v31 = vpop.eup %7852  ;;  %v3061_v4 = vpop.f32.mrf.mxu0  ;;  %4749 = vmatprep.mubr.f32.mxu0 %v10957_v7 }
 0x22a   : > { %4716 = vmatpush1.msra.mxu0 %v7849_v22  ;;  %v3130_v15 = vpop.f32.mrf.mxu1  ;;  %7858 = vrcp.f32 %v3061_v4 }
 0x22b   : > { %v7855_v30 = vpop.eup %7854  ;;  %7860 = vrcp.f32 %v3130_v15 }
 0x22c   : > { %4798 = vmatprep.subr.mxu1 %v7855_v30  ;;  %v3132_v44 = vpop.f32.mrf.mxu1  ;;  %7314 = vmatmul.mubr.msk.f32.vlgmr.msra.gmra.mxu0 %vm4509_vm3, %v9988_v58 }
 0x22d   : > { %4799 = vmatpush1.msra.mxu1 %v7853_v31  ;;  %7862 = vrcp.f32 %v3132_v44  ;;  %4755 = vmatprep.mubr.f32.mxu0 %v10957_v7 }
 0x22e   : > { %7317 = vmatmul.mubr.msk.f32.vlgmr.msra.gmra.mxu1 %vm4509_vm3, %v9988_v58 }
 0x22f   : > { %4838 = vmatprep.mubr.f32.mxu1 %v10957_v7 }
 0x230   : > { %7315 = vmatmul.mubr.msk.f32.gmra.mxu0 %vm4509_vm3, %v9999_v59 }
 0x231   : > { %4761 = vmatprep.mubr.f32.mxu0 %v10957_v7 }
 0x232   : > { %7318 = vmatmul.mubr.msk.f32.gmra.mxu1 %vm4509_vm3, %v9999_v59 }
 0x233   : > { %4844 = vmatprep.mubr.f32.mxu1 %v10957_v7 }
 0x234   : > { %7316 = vmatmul.mubr.msk.f32.gmra.mxu0 %vm4509_vm3, %v10011_v63 }
 0x235   : > { %v7857_v50 = vpop.eup %7856  ;;  %4915 = vmatprep.mubr.f32.mxu0 %v10957_v7 }
 0x236   : > { %7319 = vmatmul.mubr.msk.f32.gmra.mxu1 %vm4509_vm3, %v10011_v63 }
 0x237   : > { %4998 = vmatprep.mubr.f32.mxu1 %v10957_v7  ;;  %v7859_v62 = vpop.eup %7858 }
 0x238   : > { %4881 = vmatprep.subr.mxu0 %v7859_v62  ;;  %v7861_v3 = vpop.eup %7860 }
 0x239   : > { %4882 = vmatpush1.msra.mxu0 %v7857_v50 }
 0x23a   : > { %v7863_v20 = vpop.eup %7862  ;;  %7320 = vmatmul.mubr.msk.f32.vlgmr.msra.gmra.mxu0 %vm4509_vm3, %v9988_v58 }
 0x23b   : > { %4964 = vmatprep.subr.mxu1 %v7863_v20  ;;  %4921 = vmatprep.mubr.f32.mxu0 %v10957_v7 }
 0x23c   : > { %4965 = vmatpush1.msra.mxu1 %v7861_v3 }
 0x23d   : > { %v3201_v40 = vpop.f32.mrf.mxu0  ;;  %7323 = vmatmul.mubr.msk.f32.vlgmr.msra.gmra.mxu1 %vm4509_vm3, %v9988_v58 }
 0x23e   : > { %5004 = vmatprep.mubr.f32.mxu1 %v10957_v7  ;;  %7864 = vrcp.f32 %v3201_v40  ;;  %7321 = vmatmul.mubr.msk.f32.gmra.mxu0 %vm4509_vm3, %v9999_v59 }
 0x23f   : > { %v3203_v27 = vpop.f32.mrf.mxu0  ;;  %4927 = vmatprep.mubr.f32.mxu0 %v10957_v7 }
 0x240   : > { %v3272_v1 = vpop.f32.mrf.mxu1  ;;  %7866 = vrcp.f32 %v3203_v27 }
 0x241   : > { %7324 = vmatmul.mubr.msk.f32.gmra.mxu1 %vm4509_vm3, %v9999_v59  ;;  %7868 = vrcp.f32 %v3272_v1 }
 0x242   : > { %v3274_v0 = vpop.f32.mrf.mxu1  ;;  %5010 = vmatprep.mubr.f32.mxu1 %v10957_v7  ;;  %7322 = vmatmul.mubr.msk.f32.gmra.mxu0 %vm4509_vm3, %v10011_v63 }
 0x243   : > { %7870 = vrcp.f32 %v3274_v0  ;;  %5081 = vmatprep.mubr.f32.mxu0 %v10957_v7 }
 0x245   : > { %7325 = vmatmul.mubr.msk.f32.gmra.mxu1 %vm4509_vm3, %v10011_v63 }
 0x246   : > { %5164 = vmatprep.mubr.f32.mxu1 %v10957_v7 }
 0x24b   : > { %v7865_v22 = vpop.eup %7864 }
 0x24d   : > { %v7867_v34 = vpop.eup %7866 }
 0x24e   : > { %5047 = vmatprep.subr.mxu0 %v7867_v34  ;;  %v7869_v47 = vpop.eup %7868 }
 0x24f   : > { %5048 = vmatpush1.msra.mxu0 %v7865_v22 }
 0x250   : > { %v7871_v31 = vpop.eup %7870  ;;  %7326 = vmatmul.mubr.msk.f32.vlgmr.msra.gmra.mxu0 %vm4509_vm3, %v9988_v58 }
 0x251   : > { %v3343_v4 = vpop.f32.mrf.mxu0  ;;  %5130 = vmatprep.subr.mxu1 %v7871_v31  ;;  %5087 = vmatprep.mubr.f32.mxu0 %v10957_v7 }
 0x252   : > { %7872 = vrcp.f32 %v3343_v4  ;;  %5131 = vmatpush1.msra.mxu1 %v7869_v47 }
 0x253   : > { %v3345_v30 = vpop.f32.mrf.mxu0  ;;  %7329 = vmatmul.mubr.msk.f32.vlgmr.msra.gmra.mxu1 %vm4509_vm3, %v9988_v58 }
 0x254   : > { %v3414_v15 = vpop.f32.mrf.mxu1  ;;  %7874 = vrcp.f32 %v3345_v30  ;;  %5170 = vmatprep.mubr.f32.mxu1 %v10957_v7  ;;  %7327 = vmatmul.mubr.msk.f32.gmra.mxu0 %vm4509_vm3, %v9999_v59 }
 0x255   : > { %7876 = vrcp.f32 %v3414_v15  ;;  %5093 = vmatprep.mubr.f32.mxu0 %v10957_v7 }
 0x256   : > { %v3416_v44 = vpop.f32.mrf.mxu1 }
 0x257   : > { %7878 = vrcp.f32 %v3416_v44  ;;  %7330 = vmatmul.mubr.msk.f32.gmra.mxu1 %vm4509_vm3, %v9999_v59 }
 0x258   : > { %5176 = vmatprep.mubr.f32.mxu1 %v10957_v7  ;;  %7328 = vmatmul.mubr.msk.f32.gmra.mxu0 %vm4509_vm3, %v10011_v63 }
 0x259   : > { %5247 = vmatprep.mubr.f32.mxu0 %v10957_v7 }
 0x25b   : > { %7331 = vmatmul.mubr.msk.f32.gmra.mxu1 %vm4509_vm3, %v10011_v63 }
 0x25c   : > { %5330 = vmatprep.mubr.f32.mxu1 %v10957_v7 }
 0x25f   : > { %v7873_v50 = vpop.eup %7872 }
 0x261   : > { %v7875_v62 = vpop.eup %7874 }
 0x262   : > { %5213 = vmatprep.subr.mxu0 %v7875_v62  ;;  %v7877_v3 = vpop.eup %7876 }
 0x263   : > { %5214 = vmatpush1.msra.mxu0 %v7873_v50 }
 0x264   : > { %v7879_v20 = vpop.eup %7878  ;;  %v3485_v40 = vpop.f32.mrf.mxu0  ;;  %7332 = vmatmul.mubr.msk.f32.vlgmr.msra.gmra.mxu0 %vm4509_vm3, %v9988_v58 }
 0x265   : > { %5296 = vmatprep.subr.mxu1 %v7879_v20  ;;  %5253 = vmatprep.mubr.f32.mxu0 %v10957_v7  ;;  %7880 = vrcp.f32 %v3485_v40 }
 0x266   : > { %v3487_v27 = vpop.f32.mrf.mxu0  ;;  %5297 = vmatpush1.msra.mxu1 %v7877_v3 }
 0x267   : > { %v3556_v1 = vpop.f32.mrf.mxu1  ;;  %7882 = vrcp.f32 %v3487_v27  ;;  %7335 = vmatmul.mubr.msk.f32.vlgmr.msra.gmra.mxu1 %vm4509_vm3, %v9988_v58 }
 0x268   : > { %5336 = vmatprep.mubr.f32.mxu1 %v10957_v7  ;;  %7333 = vmatmul.mubr.msk.f32.gmra.mxu0 %vm4509_vm3, %v9999_v59  ;;  %7884 = vrcp.f32 %v3556_v1 }
 0x269   : > { %v3558_v0 = vpop.f32.mrf.mxu1  ;;  %5259 = vmatprep.mubr.f32.mxu0 %v10957_v7 }
 0x26a   : > { %7886 = vrcp.f32 %v3558_v0 }
 0x26b   : > { %7336 = vmatmul.mubr.msk.f32.gmra.mxu1 %vm4509_vm3, %v9999_v59 }
 0x26c   : > { %5342 = vmatprep.mubr.f32.mxu1 %v10957_v7  ;;  %7334 = vmatmul.mubr.msk.f32.gmra.mxu0 %vm4509_vm3, %v10011_v63 }
 0x26d   : > { %5413 = vmatprep.mubr.f32.mxu0 %v10957_v7 }
 0x26f   : > { %7337 = vmatmul.mubr.msk.f32.gmra.mxu1 %vm4509_vm3, %v10011_v63 }
 0x270   : > { %5496 = vmatprep.mubr.f32.mxu1 %v10957_v7 }
 0x272   : > { %v7881_v22 = vpop.eup %7880 }
 0x274   : > { %v7883_v34 = vpop.eup %7882 }
 0x275   : > { %5379 = vmatprep.subr.mxu0 %v7883_v34  ;;  %v7885_v47 = vpop.eup %7884 }
 0x276   : > { %5380 = vmatpush1.msra.mxu0 %v7881_v22 }
 0x277   : > { %v7887_v31 = vpop.eup %7886  ;;  %7338 = vmatmul.mubr.msk.f32.vlgmr.msra.gmra.mxu0 %vm4509_vm3, %v9988_v58 }
 0x278   : > { %5462 = vmatprep.subr.mxu1 %v7887_v31  ;;  %5419 = vmatprep.mubr.f32.mxu0 %v10957_v7 }
 0x279   : > { %v3627_v4 = vpop.f32.mrf.mxu0  ;;  %5463 = vmatpush1.msra.mxu1 %v7885_v47 }
 0x27a   : > { %7341 = vmatmul.mubr.msk.f32.vlgmr.msra.gmra.mxu1 %vm4509_vm3, %v9988_v58  ;;  %7888 = vrcp.f32 %v3627_v4 }
 0x27b   : > { %v3629_v30 = vpop.f32.mrf.mxu0  ;;  %5502 = vmatprep.mubr.f32.mxu1 %v10957_v7  ;;  %7339 = vmatmul.mubr.msk.f32.gmra.mxu0 %vm4509_vm3, %v9999_v59 }
 0x27c   : > { %v3698_v15 = vpop.f32.mrf.mxu1  ;;  %7890 = vrcp.f32 %v3629_v30  ;;  %5425 = vmatprep.mubr.f32.mxu0 %v10957_v7 }
 0x27d   : > { %7892 = vrcp.f32 %v3698_v15 }
 0x27e   : > { %v3700_v44 = vpop.f32.mrf.mxu1  ;;  %7342 = vmatmul.mubr.msk.f32.gmra.mxu1 %vm4509_vm3, %v9999_v59 }
 0x27f   : > { %7894 = vrcp.f32 %v3700_v44  ;;  %5508 = vmatprep.mubr.f32.mxu1 %v10957_v7  ;;  %7340 = vmatmul.mubr.msk.f32.gmra.mxu0 %vm4509_vm3, %v10011_v63 }
 0x280   : > { %5579 = vmatprep.mubr.f32.mxu0 %v10957_v7 }
 0x282   : > { %7343 = vmatmul.mubr.msk.f32.gmra.mxu1 %vm4509_vm3, %v10011_v63 }
 0x283   : > { %5662 = vmatprep.mubr.f32.mxu1 %v10957_v7 }
 0x287   : > { %v7889_v50 = vpop.eup %7888 }
 0x289   : > { %v7891_v62 = vpop.eup %7890 }
 0x28a   : > { %5545 = vmatprep.subr.mxu0 %v7891_v62  ;;  %v7893_v3 = vpop.eup %7892 }
 0x28b   : > { %5546 = vmatpush1.msra.mxu0 %v7889_v50 }
 0x28c   : > { %v7895_v20 = vpop.eup %7894  ;;  %7344 = vmatmul.mubr.msk.f32.vlgmr.msra.gmra.mxu0 %vm4509_vm3, %v9988_v58 }
 0x28d   : > { %5628 = vmatprep.subr.mxu1 %v7895_v20  ;;  %5585 = vmatprep.mubr.f32.mxu0 %v10957_v7 }
 0x28e   : > { %5629 = vmatpush1.msra.mxu1 %v7893_v3  ;;  %v3769_v40 = vpop.f32.mrf.mxu0 }
 0x28f   : > { %7347 = vmatmul.mubr.msk.f32.vlgmr.msra.gmra.mxu1 %vm4509_vm3, %v9988_v58  ;;  %7896 = vrcp.f32 %v3769_v40 }
 0x290   : > { %5668 = vmatprep.mubr.f32.mxu1 %v10957_v7  ;;  %7345 = vmatmul.mubr.msk.f32.gmra.mxu0 %vm4509_vm3, %v9999_v59  ;;  %v3771_v27 = vpop.f32.mrf.mxu0 }
 0x291   : > { %5591 = vmatprep.mubr.f32.mxu0 %v10957_v7  ;;  %v3840_v1 = vpop.f32.mrf.mxu1  ;;  %7898 = vrcp.f32 %v3771_v27 }
 0x292   : > { %7900 = vrcp.f32 %v3840_v1 }
 0x293   : > { %7348 = vmatmul.mubr.msk.f32.gmra.mxu1 %vm4509_vm3, %v9999_v59  ;;  %v3842_v0 = vpop.f32.mrf.mxu1 }
 0x294   : > { %5674 = vmatprep.mubr.f32.mxu1 %v10957_v7  ;;  %7346 = vmatmul.mubr.msk.f32.gmra.mxu0 %vm4509_vm3, %v10011_v63  ;;  %7902 = vrcp.f32 %v3842_v0 }
 0x295   : > { %5745 = vmatprep.mubr.f32.mxu0 %v10957_v7 }
 0x297   : > { %7349 = vmatmul.mubr.msk.f32.gmra.mxu1 %vm4509_vm3, %v10011_v63 }
 0x298   : > { %5828 = vmatprep.mubr.f32.mxu1 %v10957_v7 }
 0x29c   : > { %v7897_v22 = vpop.eup %7896 }
 0x29e   : > { %v7899_v34 = vpop.eup %7898 }
 0x29f   : > { %v3911_v47 = vpop.f32.mrf.mxu0  ;;  %5711 = vmatprep.subr.mxu0 %v7899_v34  ;;  %v7901_v31 = vpop.eup %7900 }
 0x2a0   : > { %7904 = vrcp.f32 %v3911_v47  ;;  %5712 = vmatpush1.msra.mxu0 %v7897_v22 }
 0x2a1   : > { %v3913_v4 = vpop.f32.mrf.mxu0  ;;  %v7903_v30 = vpop.eup %7902  ;;  %7350 = vmatmul.mubr.msk.f32.vlgmr.msra.gmra.mxu0 %vm4509_vm3, %v9988_v58 }
 0x2a2   : > { %v3982_v15 = vpop.f32.mrf.mxu1  ;;  %7906 = vrcp.f32 %v3913_v4  ;;  %5794 = vmatprep.subr.mxu1 %v7903_v30  ;;  %5751 = vmatprep.mubr.f32.mxu0 %v10957_v7 }
 0x2a3   : > { %7908 = vrcp.f32 %v3982_v15  ;;  %5795 = vmatpush1.msra.mxu1 %v7901_v31 }
 0x2a4   : > { %v3984_v44 = vpop.f32.mrf.mxu1  ;;  %7353 = vmatmul.mubr.msk.f32.vlgmr.msra.gmra.mxu1 %vm4509_vm3, %v9988_v58 }
 0x2a5   : > { %7910 = vrcp.f32 %v3984_v44  ;;  %5834 = vmatprep.mubr.f32.mxu1 %v10957_v7  ;;  %7351 = vmatmul.mubr.msk.f32.gmra.mxu0 %vm4509_vm3, %v9999_v59 }
 0x2a6   : > { %5757 = vmatprep.mubr.f32.mxu0 %v10957_v7 }
 0x2a8   : > { %7354 = vmatmul.mubr.msk.f32.gmra.mxu1 %vm4509_vm3, %v9999_v59 }
 0x2a9   : > { %5840 = vmatprep.mubr.f32.mxu1 %v10957_v7  ;;  %7352 = vmatmul.mubr.msk.f32.gmra.mxu0 %vm4509_vm3, %v10011_v63 }
 0x2aa   : > { %5911 = vmatprep.mubr.f32.mxu0 %v10957_v7 }
 0x2ac   : > { %7355 = vmatmul.mubr.msk.f32.gmra.mxu1 %vm4509_vm3, %v10011_v63 }
 0x2ad   : > { %v7905_v50 = vpop.eup %7904  ;;  %5994 = vmatprep.mubr.f32.mxu1 %v10957_v7 }
 0x2af   : > { %v7907_v62 = vpop.eup %7906 }
 0x2b0   : > { %5877 = vmatprep.subr.mxu0 %v7907_v62  ;;  %v7909_v3 = vpop.eup %7908 }
 0x2b1   : > { %5878 = vmatpush1.msra.mxu0 %v7905_v50 }
 0x2b2   : > { %v7911_v20 = vpop.eup %7910  ;;  %7356 = vmatmul.mubr.msk.f32.vlgmr.msra.gmra.mxu0 %vm4509_vm3, %v9988_v58 }
 0x2b3   : > { %5960 = vmatprep.subr.mxu1 %v7911_v20  ;;  %5917 = vmatprep.mubr.f32.mxu0 %v10957_v7 }
 0x2b4   : > { %5961 = vmatpush1.msra.mxu1 %v7909_v3 }
 0x2b5   : > { %7359 = vmatmul.mubr.msk.f32.vlgmr.msra.gmra.mxu1 %vm4509_vm3, %v9988_v58 }
 0x2b6   : > { %6000 = vmatprep.mubr.f32.mxu1 %v10957_v7  ;;  %7357 = vmatmul.mubr.msk.f32.gmra.mxu0 %vm4509_vm3, %v9999_v59 }
 0x2b7   : > { %5923 = vmatprep.mubr.f32.mxu0 %v10957_v7  ;;  %v4053_v40 = vpop.f32.mrf.mxu0 }
 0x2b8   : > { %7912 = vrcp.f32 %v4053_v40 }
 0x2b9   : > { %7360 = vmatmul.mubr.msk.f32.gmra.mxu1 %vm4509_vm3, %v9999_v59  ;;  %v4055_v27 = vpop.f32.mrf.mxu0 }
 0x2ba   : > { %6006 = vmatprep.mubr.f32.mxu1 %v10957_v7  ;;  %7358 = vmatmul.mubr.msk.f32.gmra.mxu0 %vm4509_vm3, %v10011_v63  ;;  %v4124_v1 = vpop.f32.mrf.mxu1  ;;  %7914 = vrcp.f32 %v4055_v27 }
 0x2bb   : > { %6077 = vmatprep.mubr.f32.mxu0 %v10957_v7  ;;  %7916 = vrcp.f32 %v4124_v1 }
 0x2bc   : > { %v4126_v0 = vpop.f32.mrf.mxu1 }
 0x2bd   : > { %7361 = vmatmul.mubr.msk.f32.gmra.mxu1 %vm4509_vm3, %v10011_v63  ;;  %7918 = vrcp.f32 %v4126_v0 }
 0x2be   : > { %6160 = vmatprep.mubr.f32.mxu1 %v10957_v7 }
 0x2c4   : > { %v4195_v22 = vpop.f32.mrf.mxu0 }
 0x2c5   : > { %v7913_v34 = vpop.eup %7912  ;;  %7920 = vrcp.f32 %v4195_v22  ;;  %v11065_v22 = vld [vmem:[#allocation7_spill] sm:$0xff] }
 0x2c6   : > { %v4197_v31 = vpop.f32.mrf.mxu0 }
 0x2c7   : > { %v7915_v47 = vpop.eup %7914  ;;  %v4266_v4 = vpop.f32.mrf.mxu1  ;;  %7922 = vrcp.f32 %v4197_v31 }
 0x2c8   : > { %6043 = vmatprep.subr.mxu0 %v7915_v47  ;;  %v7917_v30 = vpop.eup %7916  ;;  %7924 = vrcp.f32 %v4266_v4  ;;  %v11066_v4 = vld [vmem:[#allocation13_spill] sm:$0xff] }
 0x2c9   : > { %6044 = vmatpush1.msra.mxu0 %v7913_v34  ;;  %v4268_v44 = vpop.f32.mrf.mxu1 }
 0x2ca   : > { %v7919_v15 = vpop.eup %7918  ;;  %7362 = vmatmul.mubr.msk.f32.vlgmr.msra.gmra.mxu0 %vm4509_vm3, %v9988_v58  ;;  %7926 = vrcp.f32 %v4268_v44 }
 0x2cb   : > { %6126 = vmatprep.subr.mxu1 %v7919_v15  ;;  %6083 = vmatprep.mubr.f32.mxu0 %v10957_v7 }
 0x2cc   : > { %6127 = vmatpush1.msra.mxu1 %v7917_v30 }
 0x2cd   : > { %7365 = vmatmul.mubr.msk.f32.vlgmr.msra.gmra.mxu1 %vm4509_vm3, %v9988_v58 }
 0x2ce   : > { %6166 = vmatprep.mubr.f32.mxu1 %v10957_v7  ;;  %7363 = vmatmul.mubr.msk.f32.gmra.mxu0 %vm4509_vm3, %v9999_v59 }
 0x2cf   : > { %6089 = vmatprep.mubr.f32.mxu0 %v10957_v7 }
 0x2d1   : > { %7366 = vmatmul.mubr.msk.f32.gmra.mxu1 %vm4509_vm3, %v9999_v59 }
 0x2d2   : > { %6172 = vmatprep.mubr.f32.mxu1 %v10957_v7  ;;  %7364 = vmatmul.mubr.msk.f32.gmra.mxu0 %vm4509_vm3, %v10011_v63  ;;  %v7921_v50 = vpop.eup %7920 }
 0x2d3   : > { %6243 = vmatprep.mubr.f32.mxu0 %v10957_v7 }
 0x2d4   : > { %v7923_v62 = vpop.eup %7922 }
 0x2d5   : > { %7367 = vmatmul.mubr.msk.f32.gmra.mxu1 %vm4509_vm3, %v10011_v63  ;;  %6209 = vmatprep.subr.mxu0 %v7923_v62  ;;  %v7925_v3 = vpop.eup %7924  ;;  %v4408_v40 = vpop.f32.mrf.mxu1 }
 0x2d6   : > { %6326 = vmatprep.mubr.f32.mxu1 %v10957_v7  ;;  %6210 = vmatpush1.msra.mxu0 %v7921_v50  ;;  %7928 = vrcp.f32 %v4408_v40  ;;  %v11067_v50 = vld [vmem:[#allocation8_spill] sm:$0xff] }
 0x2d7   : > { %v7927_v20 = vpop.eup %7926  ;;  %7368 = vmatmul.mubr.msk.f32.vlgmr.msra.gmra.mxu0 %vm4509_vm3, %v9988_v58  ;;  %v7408_v27 = vpop.f32.mrf.mxu1 }
 0x2d8   : > { %6292 = vmatprep.subr.mxu1 %v7927_v20  ;;  %6249 = vmatprep.mubr.f32.mxu0 %v10957_v7 }
 0x2d9   : > { %6293 = vmatpush1.msra.mxu1 %v7925_v3  ;;  %v11068_v3 = vld [vmem:[#allocation4_spill] sm:$0xff] }
 0x2da   : > { %7371 = vmatmul.mubr.msk.f32.vlgmr.msra.gmra.mxu1 %vm4509_vm3, %v9988_v58  ;;  %7409 = vmatprep.subr.mxu1 %v10957_v7 }
 0x2db   : > { %6332 = vmatprep.mubr.f32.mxu1 %v10957_v7  ;;  %7369 = vmatmul.mubr.msk.f32.gmra.mxu0 %vm4509_vm3, %v9999_v59  ;;  %v4668_v1 = vpop.f32.mrf.mxu1 }
 0x2dc   : > { %6255 = vmatprep.mubr.f32.mxu0 %v10957_v7  ;;  %v4337_v0 = vpop.f32.mrf.mxu0  ;;  %v6510_v34 = vmul.f32 %v11065_v22, %v4668_v1  ;;  %v11069_v1 = vld [vmem:[#allocation15_spill] sm:$0xff] }
 0x2dd   : > { %v4670_v47 = vpop.f32.mrf.mxu1 }
 0x2de   : > { %7372 = vmatmul.mubr.msk.f32.gmra.mxu1 %vm4509_vm3, %v9999_v59  ;;  %v4339_v31 = vpop.f32.mrf.mxu0  ;;  %6651 = vst [vmem:[%s10203_s18 + $0x10] sm:$0xff] %v6510_v34  ;;  %v6511_v30 = vmul.f32 %v11066_v4, %v4670_v47  ;;  %v11070_v34 = vld [vmem:[#allocation10_spill] sm:$0xff] }
 0x2df   : > { %6338 = vmatprep.mubr.f32.mxu1 %v10957_v7  ;;  %7370 = vmatmul.mubr.msk.f32.gmra.mxu0 %vm4509_vm3, %v10011_v63  ;;  %7930 = vrcp.f32 %v4339_v31  ;;  %v4674_v15 = vpop.f32.mrf.mxu1 }
 0x2e0   : > { %6409 = vmatprep.mubr.f32.mxu0 %v10957_v7  ;;  %7932 = vrcp.f32 %v4337_v0  ;;  %v4585_v44 = vpop.f32.mrf.mxu0  ;;  %6652 = vst [vmem:[%s10203_s18 + $0x18] sm:$0xff] %v6511_v30  ;;  %v6557_v62 = vmul.f32 %v11067_v50, %v4674_v15  ;;  %v11071_v30 = vld [vmem:[#allocation9_spill] sm:$0xff] }
 0x2e1   : > { %v6508_v20 = vmul.f32 %v11068_v3, %v4585_v44  ;;  %v4676_v40 = vpop.f32.mrf.mxu1  ;;  %v11072_v44 = vld [vmem:[#allocation5_spill] sm:$0xff] }
 0x2e2   : > { %7373 = vmatmul.mubr.msk.f32.gmra.mxu1 %vm4509_vm3, %v10011_v63  ;;  %v4587_v27 = vpop.f32.mrf.mxu0  ;;  %6698 = vst [vmem:[%s10203_s18 + $0x188] sm:$0xff] %v6557_v62  ;;  %v6558_v0 = vmul.f32 %v11069_v1, %v4676_v40 }
 0x2e3   : > { %7411 = vmatprep.mubr.msk.f32.mxu1 %vm7994_vm2, %v10957_v7  ;;  %v7929_v22 = vpop.eup %7928  ;;  %6649 = vst [vmem:[%s10203_s18] sm:$0xff] %v6508_v20  ;;  %v6509_v47 = vmul.f32 %v11070_v34, %v4587_v27  ;;  %v4680_v31 = vpop.f32.mrf.mxu1  ;;  %v11073_v20 = vld [vmem:[#allocation14_spill] sm:$0xff]  ;;  %v11074_v27 = vld [vmem:[#allocation11_spill] sm:$0xff] }
 0x2e4   : > { %7410 = vmatpush3.msra.mxu1 %v7929_v22  ;;  %v4591_v4 = vpop.f32.mrf.mxu0  ;;  %6699 = vst [vmem:[%s10203_s18 + $0x190] sm:$0xff] %v6558_v0  ;;  %v6604_v15 = vmul.f32 %v11071_v30, %v4680_v31  ;;  %v11075_v22 = vld [vmem:[#allocation6_spill] sm:$0xff] }
 0x2e5   : > { %6650 = vst [vmem:[%s10203_s18 + $0x8] sm:$0xff] %v6509_v47  ;;  %v6555_v50 = vmul.f32 %v11072_v44, %v4591_v4  ;;  %v4682_v62 = vpop.f32.mrf.mxu1  ;;  %v11076_v4 = vld [vmem:[#allocation12_spill] sm:$0xff] }
 0x2e6   : > { %7412 = vmatmul.mubr.msk.f32.vlgmr.msra.gmra.mxu1 %vm4509_vm3, %v9988_v58  ;;  %v4593_v3 = vpop.f32.mrf.mxu0  ;;  %6745 = vst [vmem:[%s10203_s18 + $0x300] sm:$0xff] %v6604_v15  ;;  %v6605_v40 = vmul.f32 %v11073_v20, %v4682_v62  ;;  %v11077_v15 = vld [vmem:[#allocation19_spill] sm:$0xff] }
 0x2e7   : > { %7414 = vmatprep.mubr.msk.f32.mxu1 %vm7994_vm2, %v10957_v7  ;;  %6696 = vst [vmem:[%s10203_s18 + $0x178] sm:$0xff] %v6555_v50  ;;  %v6556_v1 = vmul.f32 %v11074_v27, %v4593_v3 }
 0x2e8   : > { %v4597_v0 = vpop.f32.mrf.mxu0  ;;  %6746 = vst [vmem:[%s10203_s18 + $0x308] sm:$0xff] %v6605_v40  ;;  %v11078_v40 = vld [vmem:[#allocation16_spill] sm:$0xff] }
 0x2e9   : > { %6697 = vst [vmem:[%s10203_s18 + $0x180] sm:$0xff] %v6556_v1  ;;  %v6602_v34 = vmul.f32 %v11075_v22, %v4597_v0  ;;  %v11079_v1 = vld [vmem:[#allocation25_spill] sm:$0xff] }
 0x2ea   : > { %7415 = vmatmul.mubr.msk.f32.gmra.mxu1 %vm4509_vm3, %v9999_v59  ;;  %v4599_v47 = vpop.f32.mrf.mxu0 }
 0x2eb   : > { %7417 = vmatprep.mubr.msk.f32.mxu1 %vm7994_vm2, %v10957_v7  ;;  %6743 = vst [vmem:[%s10203_s18 + $0x2f0] sm:$0xff] %v6602_v34  ;;  %v6603_v30 = vmul.f32 %v11076_v4, %v4599_v47  ;;  %v11080_v47 = vld [vmem:[#allocation22_spill] sm:$0xff]  ;;  %v11081_v4 = vld [vmem:[#allocation20_spill] sm:$0xff] }
 0x2ec   : > { %v7931_v50 = vpop.eup %7930  ;;  %v4751_v62 = vpop.f32.mrf.mxu0 }
 0x2ed   : > { %v7933_v20 = vpop.eup %7932  ;;  %6375 = vmatprep.subr.mxu0 %v7931_v50  ;;  %6744 = vst [vmem:[%s10203_s18 + $0x2f8] sm:$0xff] %v6603_v30  ;;  %v6512_v27 = vmul.f32 %v11078_v40, %v4751_v62  ;;  %v11082_v50 = vld [vmem:[#allocation17_spill] sm:$0xff] }
 0x2ee   : > { %v4834_v31 = vpop.f32.mrf.mxu1  ;;  %7418 = vmatmul.mubr.msk.f32.gmra.mxu1 %vm4509_vm3, %v10011_v63  ;;  %6376 = vmatpush1.msra.mxu0 %v7933_v20  ;;  %v4753_v22 = vpop.f32.mrf.mxu0 }
 0x2ef   : > { %v6514_v44 = vmul.f32 %v11077_v15, %v4834_v31  ;;  %7374 = vmatmul.mubr.msk.f32.vlgmr.msra.gmra.mxu0 %vm4509_vm3, %v9988_v58  ;;  %6653 = vst [vmem:[%s10203_s18 + $0x20] sm:$0xff] %v6512_v27  ;;  %v6513_v31 = vmul.f32 %v11080_v47, %v4753_v22  ;;  %v11084_v27 = vld [vmem:[#allocation23_spill] sm:$0xff] }
 0x2f0   : > { %v4836_v3 = vpop.f32.mrf.mxu1  ;;  %6415 = vmatprep.mubr.f32.mxu0 %v10957_v7  ;;  %v4757_v15 = vpop.f32.mrf.mxu0 }
 0x2f1   : > { %6655 = vst [vmem:[%s10203_s18 + $0x30] sm:$0xff] %v6514_v44  ;;  %v6515_v0 = vmul.f32 %v11079_v1, %v4836_v3  ;;  %6654 = vst [vmem:[%s10203_s18 + $0x28] sm:$0xff] %v6513_v31  ;;  %v6559_v62 = vmul.f32 %v11082_v50, %v4757_v15  ;;  %v11083_v3 = vld [vmem:[#allocation27_spill] sm:$0xff]  ;;  %v11086_v31 = vld [vmem:[#allocation18_spill] sm:$0xff] }
 0x2f2   : > { %v4840_v34 = vpop.f32.mrf.mxu1  ;;  %v4759_v58 = vpop.f32.mrf.mxu0 }
 0x2f3   : > { %6656 = vst [vmem:[%s10203_s18 + $0x38] sm:$0xff] %v6515_v0  ;;  %v6561_v30 = vmul.f32 %v11081_v4, %v4840_v34  ;;  %7375 = vmatmul.mubr.msk.f32.gmra.mxu0 %vm4509_vm3, %v9999_v59  ;;  %6700 = vst [vmem:[%s10203_s18 + $0x198] sm:$0xff] %v6559_v62  ;;  %v6560_v1 = vmul.f32 %v11084_v27, %v4759_v58  ;;  %v11085_v0 = vld [vmem:[#allocation21_spill] sm:$0xff]  ;;  %v11089_v62 = vld [vmem:[#allocation28_spill] sm:$0xff] }
 0x2f4   : > { %v4842_v44 = vpop.f32.mrf.mxu1  ;;  %6421 = vmatprep.mubr.f32.mxu0 %v10957_v7  ;;  %v4763_v34 = vpop.f32.mrf.mxu0 }
 0x2f5   : > { %6702 = vst [vmem:[%s10203_s18 + $0x1a8] sm:$0xff] %v6561_v30  ;;  %v6562_v20 = vmul.f32 %v11083_v3, %v4842_v44  ;;  %6701 = vst [vmem:[%s10203_s18 + $0x1a0] sm:$0xff] %v6560_v1  ;;  %v6606_v4 = vmul.f32 %v11086_v31, %v4763_v34  ;;  %v11087_v30 = vld [vmem:[#allocation26_spill] sm:$0xff]  ;;  %v11088_v44 = vld [vmem:[#allocation24_spill] sm:$0xff] }
 0x2f6   : > { %v4846_v40 = vpop.f32.mrf.mxu1  ;;  %v4765_v59 = vpop.f32.mrf.mxu0  ;;  %v11091_v1 = vld [vmem:[#allocation35_spill] sm:$0xff]  ;;  %v11092_v34 = vld [vmem:[#allocation38_spill] sm:$0xff]  ;;  %v11093_v31 = vld [vmem:[#allocation29_spill] sm:$0xff] }
 0x2f7   : > { %6703 = vst [vmem:[%s10203_s18 + $0x1b0] sm:$0xff] %v6562_v20  ;;  %v6608_v22 = vmul.f32 %v11085_v0, %v4846_v40  ;;  %7376 = vmatmul.mubr.msk.f32.gmra.mxu0 %vm4509_vm3, %v10011_v63  ;;  %6747 = vst [vmem:[%s10203_s18 + $0x310] sm:$0xff] %v6606_v4  ;;  %v6607_v50 = vmul.f32 %v11088_v44, %v4765_v59  ;;  %v11090_v40 = vld [vmem:[#allocation32_spill] sm:$0xff]  ;;  %v11094_v59 = vld [vmem:[#allocation33_spill] sm:$0xff] }
 0x2f8   : > { %v4848_v47 = vpop.f32.mrf.mxu1 }
 0x2f9   : > { %6749 = vst [vmem:[%s10203_s18 + $0x320] sm:$0xff] %v6608_v22  ;;  %v6609_v15 = vmul.f32 %v11087_v30, %v4848_v47  ;;  %6748 = vst [vmem:[%s10203_s18 + $0x318] sm:$0xff] %v6607_v50  ;;  %v11095_v50 = vld [vmem:[#allocation36_spill] sm:$0xff] }
 0x2fa   : > { %v4917_v7 = vpop.f32.mrf.mxu0 }
 0x2fb   : > { %6750 = vst [vmem:[%s10203_s18 + $0x328] sm:$0xff] %v6609_v15  ;;  %v6516_v3 = vmul.f32 %v11089_v62, %v4917_v7 }
 0x2fc   : > { %v4919_v58 = vpop.f32.mrf.mxu0 }
 0x2fd   : > { %v5000_v20 = vpop.f32.mrf.mxu1  ;;  %6657 = vst [vmem:[%s10203_s18 + $0x40] sm:$0xff] %v6516_v3  ;;  %v6517_v0 = vmul.f32 %v11091_v1, %v4919_v58 }
 0x2fe   : > { %v6518_v27 = vmul.f32 %v11090_v40, %v5000_v20  ;;  %v4923_v22 = vpop.f32.mrf.mxu0  ;;  %v11096_v20 = vld [vmem:[#allocation40_spill] sm:$0xff]  ;;  %v11097_v40 = vld [vmem:[#allocation31_spill] sm:$0xff] }
 0x2ff   : > { %v5002_v63 = vpop.f32.mrf.mxu1  ;;  %6658 = vst [vmem:[%s10203_s18 + $0x48] sm:$0xff] %v6517_v0  ;;  %v6563_v4 = vmul.f32 %v11093_v31, %v4923_v22 }
 0x300   : > { %6659 = vst [vmem:[%s10203_s18 + $0x50] sm:$0xff] %v6518_v27  ;;  %v6519_v47 = vmul.f32 %v11092_v34, %v5002_v63  ;;  %v4925_v15 = vpop.f32.mrf.mxu0  ;;  %v11098_v63 = vld [vmem:[#allocation34_spill] sm:$0xff]  ;;  %v11099_v34 = vld [vmem:[#allocation37_spill] sm:$0xff] }
 0x301   : > { %v5006_v30 = vpop.f32.mrf.mxu1  ;;  %6704 = vst [vmem:[%s10203_s18 + $0x1b8] sm:$0xff] %v6563_v4  ;;  %v6564_v7 = vmul.f32 %v11095_v50, %v4925_v15  ;;  %v11100_v4 = vld [vmem:[#allocation39_spill] sm:$0xff] }
 0x302   : > { %6660 = vst [vmem:[%s10203_s18 + $0x58] sm:$0xff] %v6519_v47  ;;  %v6565_v44 = vmul.f32 %v11094_v59, %v5006_v30  ;;  %v4929_v3 = vpop.f32.mrf.mxu0  ;;  %v11101_v59 = vld [vmem:[#allocation42_spill] sm:$0xff] }
 0x303   : > { %v5008_v62 = vpop.f32.mrf.mxu1  ;;  %6705 = vst [vmem:[%s10203_s18 + $0x1c0] sm:$0xff] %v6564_v7  ;;  %v6610_v27 = vmul.f32 %v11097_v40, %v4929_v3 }
 0x304   : > { %6706 = vst [vmem:[%s10203_s18 + $0x1c8] sm:$0xff] %v6565_v44  ;;  %v6566_v58 = vmul.f32 %v11096_v20, %v5008_v62  ;;  %v4931_v0 = vpop.f32.mrf.mxu0  ;;  %v11102_v62 = vld [vmem:[#allocation30_spill] sm:$0xff] }
 0x305   : > { %v5012_v1 = vpop.f32.mrf.mxu1  ;;  %6751 = vst [vmem:[%s10203_s18 + $0x330] sm:$0xff] %v6610_v27  ;;  %v6611_v47 = vmul.f32 %v11099_v34, %v4931_v0  ;;  %v11103_v20 = vld [vmem:[#allocation46_spill] sm:$0xff] }
 0x306   : > { %6707 = vst [vmem:[%s10203_s18 + $0x1d0] sm:$0xff] %v6566_v58  ;;  %v6612_v22 = vmul.f32 %v11098_v63, %v5012_v1  ;;  %v11104_v1 = vld [vmem:[#allocation43_spill] sm:$0xff] }
 0x307   : > { %v5014_v31 = vpop.f32.mrf.mxu1  ;;  %6752 = vst [vmem:[%s10203_s18 + $0x338] sm:$0xff] %v6611_v47  ;;  %v11105_v63 = vld [vmem:[#allocation51_spill] sm:$0xff] }
 0x308   : > { %6753 = vst [vmem:[%s10203_s18 + $0x340] sm:$0xff] %v6612_v22  ;;  %v6613_v30 = vmul.f32 %v11100_v4, %v5014_v31  ;;  %v11106_v31 = vld [vmem:[#allocation49_spill] sm:$0xff] }
 0x30a   : > { %6754 = vst [vmem:[%s10203_s18 + $0x348] sm:$0xff] %v6613_v30  ;;  %v11107_v30 = vld [vmem:[#allocation47_spill] sm:$0xff] }
 0x310   : > { %v5083_v15 = vpop.f32.mrf.mxu0 }
 0x311   : > { %v6520_v44 = vmul.f32 %v11101_v59, %v5083_v15 }
 0x312   : > { %v5085_v50 = vpop.f32.mrf.mxu0 }
 0x313   : > { %6661 = vst [vmem:[%s10203_s18 + $0x60] sm:$0xff] %v6520_v44  ;;  %v5166_v7 = vpop.f32.mrf.mxu1  ;;  %v6521_v3 = vmul.f32 %v11102_v62, %v5085_v50  ;;  %v11108_v50 = vld [vmem:[#allocation44_spill] sm:$0xff] }
 0x314   : > { %v6522_v58 = vmul.f32 %v11103_v20, %v5166_v7  ;;  %v5089_v40 = vpop.f32.mrf.mxu0  ;;  %v11109_v62 = vld [vmem:[#allocation52_spill] sm:$0xff] }
 0x315   : > { %6662 = vst [vmem:[%s10203_s18 + $0x68] sm:$0xff] %v6521_v3  ;;  %v5168_v27 = vpop.f32.mrf.mxu1  ;;  %v6567_v0 = vmul.f32 %v11104_v1, %v5089_v40  ;;  %v11110_v40 = vld [vmem:[#allocation50_spill] sm:$0xff]  ;;  %v11111_v1 = vld [vmem:[#allocation48_spill] sm:$0xff] }
 0x316   : > { %6663 = vst [vmem:[%s10203_s18 + $0x70] sm:$0xff] %v6522_v58  ;;  %v6523_v22 = vmul.f32 %v11105_v63, %v5168_v27  ;;  %v5091_v34 = vpop.f32.mrf.mxu0 }
 0x317   : > { %6708 = vst [vmem:[%s10203_s18 + $0x1d8] sm:$0xff] %v6567_v0  ;;  %v5172_v47 = vpop.f32.mrf.mxu1  ;;  %v6568_v4 = vmul.f32 %v11106_v31, %v5091_v34  ;;  %v11113_v31 = vld [vmem:[#allocation54_spill] sm:$0xff] }
 0x318   : > { %6664 = vst [vmem:[%s10203_s18 + $0x78] sm:$0xff] %v6523_v22  ;;  %v6569_v15 = vmul.f32 %v11107_v30, %v5172_v47  ;;  %v5095_v59 = vpop.f32.mrf.mxu0  ;;  %v11112_v22 = vld [vmem:[#allocation53_spill] sm:$0xff] }
 0x319   : > { %6709 = vst [vmem:[%s10203_s18 + $0x1e0] sm:$0xff] %v6568_v4  ;;  %v5174_v44 = vpop.f32.mrf.mxu1  ;;  %v6614_v7 = vmul.f32 %v11108_v50, %v5095_v59  ;;  %v11114_v59 = vld [vmem:[#allocation60_spill] sm:$0xff]  ;;  %v11115_v50 = vld [vmem:[#allocation57_spill] sm:$0xff] }
 0x31a   : > { %6710 = vst [vmem:[%s10203_s18 + $0x1e8] sm:$0xff] %v6569_v15  ;;  %v6570_v3 = vmul.f32 %v11109_v62, %v5174_v44  ;;  %v5097_v20 = vpop.f32.mrf.mxu0 }
 0x31b   : > { %6755 = vst [vmem:[%s10203_s18 + $0x350] sm:$0xff] %v6614_v7  ;;  %v5178_v58 = vpop.f32.mrf.mxu1  ;;  %v6615_v27 = vmul.f32 %v11110_v40, %v5097_v20  ;;  %v11116_v20 = vld [vmem:[#allocation55_spill] sm:$0xff] }
 0x31c   : > { %6711 = vst [vmem:[%s10203_s18 + $0x1f0] sm:$0xff] %v6570_v3  ;;  %v6616_v0 = vmul.f32 %v11111_v1, %v5178_v58  ;;  %v11117_v40 = vld [vmem:[#allocation63_spill] sm:$0xff] }
 0x31d   : > { %6756 = vst [vmem:[%s10203_s18 + $0x358] sm:$0xff] %v6615_v27  ;;  %v5180_v63 = vpop.f32.mrf.mxu1 }
 0x31e   : > { %6757 = vst [vmem:[%s10203_s18 + $0x360] sm:$0xff] %v6616_v0  ;;  %v6617_v34 = vmul.f32 %v11112_v22, %v5180_v63  ;;  %v11118_v63 = vld [vmem:[#allocation62_spill] sm:$0xff] }
 0x320   : > { %6758 = vst [vmem:[%s10203_s18 + $0x368] sm:$0xff] %v6617_v34  ;;  %v11119_v34 = vld [vmem:[#allocation58_spill] sm:$0xff] }
 0x324   : > { %v5249_v47 = vpop.f32.mrf.mxu0 }
 0x325   : > { %v6524_v4 = vmul.f32 %v11113_v31, %v5249_v47 }
 0x326   : > { %v5251_v30 = vpop.f32.mrf.mxu0 }
 0x327   : > { %6665 = vst [vmem:[%s10203_s18 + $0x80] sm:$0xff] %v6524_v4  ;;  %v5332_v15 = vpop.f32.mrf.mxu1  ;;  %v6525_v44 = vmul.f32 %v11114_v59, %v5251_v30  ;;  %v11120_v30 = vld [vmem:[#allocation56_spill] sm:$0xff]  ;;  %v11121_v59 = vld [vmem:[#allocation65_spill] sm:$0xff] }
 0x328   : > { %v6526_v7 = vmul.f32 %v11115_v50, %v5332_v15  ;;  %v5255_v62 = vpop.f32.mrf.mxu0 }
 0x329   : > { %6666 = vst [vmem:[%s10203_s18 + $0x88] sm:$0xff] %v6525_v44  ;;  %v5334_v3 = vpop.f32.mrf.mxu1  ;;  %v6571_v58 = vmul.f32 %v11116_v20, %v5255_v62  ;;  %v11122_v62 = vld [vmem:[#allocation61_spill] sm:$0xff]  ;;  %v11123_v20 = vld [vmem:[#allocation59_spill] sm:$0xff] }
 0x32a   : > { %6667 = vst [vmem:[%s10203_s18 + $0x90] sm:$0xff] %v6526_v7  ;;  %v6527_v27 = vmul.f32 %v11117_v40, %v5334_v3  ;;  %v5257_v1 = vpop.f32.mrf.mxu0 }
 0x32b   : > { %6712 = vst [vmem:[%s10203_s18 + $0x1f8] sm:$0xff] %v6571_v58  ;;  %v5338_v0 = vpop.f32.mrf.mxu1  ;;  %v6572_v22 = vmul.f32 %v11118_v63, %v5257_v1  ;;  %v11125_v63 = vld [vmem:[#allocation41_spill] sm:$0xff] }
 0x32c   : > { %6668 = vst [vmem:[%s10203_s18 + $0x98] sm:$0xff] %v6527_v27  ;;  %v6573_v47 = vmul.f32 %v11119_v34, %v5338_v0  ;;  %v5261_v31 = vpop.f32.mrf.mxu0  ;;  %v11124_v27 = vld [vmem:[#allocation64_spill] sm:$0xff] }
 0x32d   : > { %6713 = vst [vmem:[%s10203_s18 + $0x200] sm:$0xff] %v6572_v22  ;;  %v5340_v4 = vpop.f32.mrf.mxu1  ;;  %v6618_v15 = vmul.f32 %v11120_v30, %v5261_v31  ;;  %v11126_v31 = vld [vmem:[#allocation76_spill] sm:$0xff]  ;;  %v11127_v30 = vld [vmem:[#allocation71_spill] sm:$0xff] }
 0x32e   : > { %6714 = vst [vmem:[%s10203_s18 + $0x208] sm:$0xff] %v6573_v47  ;;  %v6574_v44 = vmul.f32 %v11121_v59, %v5340_v4  ;;  %v5263_v50 = vpop.f32.mrf.mxu0 }
 0x32f   : > { %6759 = vst [vmem:[%s10203_s18 + $0x370] sm:$0xff] %v6618_v15  ;;  %v5344_v7 = vpop.f32.mrf.mxu1  ;;  %v6619_v3 = vmul.f32 %v11122_v62, %v5263_v50  ;;  %v11128_v50 = vld [vmem:[#allocation45_spill] sm:$0xff] }
 0x330   : > { %6715 = vst [vmem:[%s10203_s18 + $0x210] sm:$0xff] %v6574_v44  ;;  %v6620_v58 = vmul.f32 %v11123_v20, %v5344_v7  ;;  %v11129_v62 = vld [vmem:[#allocation81_spill] sm:$0xff] }
 0x331   : > { %6760 = vst [vmem:[%s10203_s18 + $0x378] sm:$0xff] %v6619_v3  ;;  %v5346_v40 = vpop.f32.mrf.mxu1 }
 0x332   : > { %6761 = vst [vmem:[%s10203_s18 + $0x380] sm:$0xff] %v6620_v58  ;;  %v6621_v1 = vmul.f32 %v11124_v27, %v5346_v40  ;;  %v11130_v40 = vld [vmem:[#allocation80_spill] sm:$0xff] }
 0x334   : > { %6762 = vst [vmem:[%s10203_s18 + $0x388] sm:$0xff] %v6621_v1  ;;  %v11131_v1 = vld [vmem:[#allocation72_spill] sm:$0xff] }
 0x337   : > { %v5415_v0 = vpop.f32.mrf.mxu0 }
 0x338   : > { %v6528_v22 = vmul.f32 %v11125_v63, %v5415_v0 }
 0x339   : > { %v5417_v34 = vpop.f32.mrf.mxu0 }
 0x33a   : > { %6669 = vst [vmem:[%s10203_s18 + $0xa0] sm:$0xff] %v6528_v22  ;;  %v5498_v47 = vpop.f32.mrf.mxu1  ;;  %v6529_v4 = vmul.f32 %v11126_v31, %v5417_v34  ;;  %v11132_v34 = vld [vmem:[#allocation68_spill] sm:$0xff]  ;;  %v11133_v31 = vld [vmem:[#allocation83_spill] sm:$0xff] }
 0x33b   : > { %v6530_v15 = vmul.f32 %v11127_v30, %v5498_v47  ;;  %v5421_v59 = vpop.f32.mrf.mxu0 }
 0x33c   : > { %6670 = vst [vmem:[%s10203_s18 + $0xa8] sm:$0xff] %v6529_v4  ;;  %v5500_v44 = vpop.f32.mrf.mxu1  ;;  %v6575_v7 = vmul.f32 %v11128_v50, %v5421_v59  ;;  %v11134_v59 = vld [vmem:[#allocation79_spill] sm:$0xff] }
 0x33d   : > { %6671 = vst [vmem:[%s10203_s18 + $0xb0] sm:$0xff] %v6530_v15  ;;  %v6531_v3 = vmul.f32 %v11129_v62, %v5500_v44  ;;  %v5423_v20 = vpop.f32.mrf.mxu0  ;;  %v11135_v50 = vld [vmem:[#allocation75_spill] sm:$0xff] }
 0x33e   : > { %6716 = vst [vmem:[%s10203_s18 + $0x218] sm:$0xff] %v6575_v7  ;;  %v5504_v58 = vpop.f32.mrf.mxu1  ;;  %v6576_v27 = vmul.f32 %v11130_v40, %v5423_v20 }
 0x33f   : > { %6672 = vst [vmem:[%s10203_s18 + $0xb8] sm:$0xff] %v6531_v3  ;;  %v6577_v0 = vmul.f32 %v11131_v1, %v5504_v58  ;;  %v5427_v63 = vpop.f32.mrf.mxu0  ;;  %v11136_v3 = vld [vmem:[#allocation82_spill] sm:$0xff] }
 0x340   : > { %6717 = vst [vmem:[%s10203_s18 + $0x220] sm:$0xff] %v6576_v27  ;;  %v5506_v22 = vpop.f32.mrf.mxu1  ;;  %v6622_v47 = vmul.f32 %v11132_v34, %v5427_v63 }
 0x341   : > { %6718 = vst [vmem:[%s10203_s18 + $0x228] sm:$0xff] %v6577_v0  ;;  %v6578_v4 = vmul.f32 %v11133_v31, %v5506_v22  ;;  %v5429_v30 = vpop.f32.mrf.mxu0 }
 0x342   : > { %6763 = vst [vmem:[%s10203_s18 + $0x390] sm:$0xff] %v6622_v47  ;;  %v5510_v15 = vpop.f32.mrf.mxu1  ;;  %v6623_v44 = vmul.f32 %v11134_v59, %v5429_v30  ;;  %v11137_v47 = vld [vmem:[#allocation86_spill] sm:$0xff]  ;;  %v11139_v59 = vld [vmem:[#allocation97_spill] sm:$0xff] }
 0x343   : > { %6719 = vst [vmem:[%s10203_s18 + $0x230] sm:$0xff] %v6578_v4  ;;  %v6624_v7 = vmul.f32 %v11135_v50, %v5510_v15  ;;  %v11138_v4 = vld [vmem:[#allocation67_spill] sm:$0xff] }
 0x344   : > { %6764 = vst [vmem:[%s10203_s18 + $0x398] sm:$0xff] %v6623_v44  ;;  %v5512_v62 = vpop.f32.mrf.mxu1 }
 0x345   : > { %6765 = vst [vmem:[%s10203_s18 + $0x3a0] sm:$0xff] %v6624_v7  ;;  %v6625_v20 = vmul.f32 %v11136_v3, %v5512_v62  ;;  %v11141_v62 = vld [vmem:[#allocation87_spill] sm:$0xff] }
 0x347   : > { %6766 = vst [vmem:[%s10203_s18 + $0x3a8] sm:$0xff] %v6625_v20  ;;  %v11142_v20 = vld [vmem:[#allocation98_spill] sm:$0xff] }
 0x34c   : > { %v5581_v58 = vpop.f32.mrf.mxu0 }
 0x34d   : > { %v6532_v40 = vmul.f32 %v9411_v10, %v5581_v58 }
 0x34e   : > { %v5583_v27 = vpop.f32.mrf.mxu0 }
 0x34f   : > { %6673 = vst [vmem:[%s10203_s18 + $0xc0] sm:$0xff] %v6532_v40  ;;  %v5664_v1 = vpop.f32.mrf.mxu1  ;;  %v6533_v0 = vmul.f32 %v9483_v13, %v5583_v27  ;;  %v11140_v13 = vld [vmem:[#allocation90_spill] sm:$0xff] }
 0x350   : > { %v6534_v63 = vmul.f32 %v9438_v17, %v5664_v1  ;;  %v5587_v22 = vpop.f32.mrf.mxu0  ;;  %v11143_v1 = vld [vmem:[#allocation96_spill] sm:$0xff] }
 0x351   : > { %6674 = vst [vmem:[%s10203_s18 + $0xc8] sm:$0xff] %v6533_v0  ;;  %v5666_v34 = vpop.f32.mrf.mxu1  ;;  %v6579_v31 = vmul.f32 %v11137_v47, %v5587_v22  ;;  %v11145_v47 = vld [vmem:[#allocation66_spill] sm:$0xff] }
 0x352   : > { %6675 = vst [vmem:[%s10203_s18 + $0xd0] sm:$0xff] %v6534_v63  ;;  %v6535_v30 = vmul.f32 %v11138_v4, %v5666_v34  ;;  %v5589_v10 = vpop.f32.mrf.mxu0  ;;  %v11144_v63 = vld [vmem:[#allocation91_spill] sm:$0xff] }
 0x353   : > { %6720 = vst [vmem:[%s10203_s18 + $0x238] sm:$0xff] %v6579_v31  ;;  %v5670_v15 = vpop.f32.mrf.mxu1  ;;  %v6580_v44 = vmul.f32 %v11139_v59, %v5589_v10 }
 0x354   : > { %6676 = vst [vmem:[%s10203_s18 + $0xd8] sm:$0xff] %v6535_v30  ;;  %v6581_v17 = vmul.f32 %v11140_v13, %v5670_v15  ;;  %v5593_v50 = vpop.f32.mrf.mxu0  ;;  %v11146_v30 = vld [vmem:[#allocation69_spill] sm:$0xff] }
 0x355   : > { %6721 = vst [vmem:[%s10203_s18 + $0x240] sm:$0xff] %v6580_v44  ;;  %v5672_v7 = vpop.f32.mrf.mxu1  ;;  %v6626_v3 = vmul.f32 %v11141_v62, %v5593_v50  ;;  %v11147_v44 = vld [vmem:[#allocation100_spill] sm:$0xff] }
 0x356   : > { %6722 = vst [vmem:[%s10203_s18 + $0x248] sm:$0xff] %v6581_v17  ;;  %v6582_v58 = vmul.f32 %v11142_v20, %v5672_v7  ;;  %v5595_v40 = vpop.f32.mrf.mxu0  ;;  %v11148_v17 = vld [vmem:[#allocation78_spill] sm:$0xff] }
 0x357   : > { %6767 = vst [vmem:[%s10203_s18 + $0x3b0] sm:$0xff] %v6626_v3  ;;  %v5676_v27 = vpop.f32.mrf.mxu1  ;;  %v6627_v0 = vmul.f32 %v11143_v1, %v5595_v40  ;;  %v11149_v3 = vld [vmem:[#allocation70_spill] sm:$0xff] }
 0x358   : > { %6723 = vst [vmem:[%s10203_s18 + $0x250] sm:$0xff] %v6582_v58  ;;  %v6628_v22 = vmul.f32 %v11144_v63, %v5676_v27  ;;  %v11150_v58 = vld [vmem:[#allocation104_spill] sm:$0xff] }
 0x359   : > { %6768 = vst [vmem:[%s10203_s18 + $0x3b8] sm:$0xff] %v6627_v0  ;;  %v5678_v34 = vpop.f32.mrf.mxu1  ;;  %v11151_v0 = vld [vmem:[#allocation101_spill] sm:$0xff] }
 0x35a   : > { %6769 = vst [vmem:[%s10203_s18 + $0x3c0] sm:$0xff] %v6628_v22  ;;  %v6629_v31 = vmul.f32 %v11145_v47, %v5678_v34  ;;  %v11152_v22 = vld [vmem:[#allocation73_spill] sm:$0xff] }
 0x35c   : > { %6770 = vst [vmem:[%s10203_s18 + $0x3c8] sm:$0xff] %v6629_v31 }
 0x361   : > { %v5747_v4 = vpop.f32.mrf.mxu0 }
 0x362   : > { %v6536_v10 = vmul.f32 %v11146_v30, %v5747_v4  ;;  %v11153_v4 = vld [vmem:[#allocation77_spill] sm:$0xff] }
 0x363   : > { %v5749_v15 = vpop.f32.mrf.mxu0 }
 0x364   : > { %6677 = vst [vmem:[%s10203_s18 + $0xe0] sm:$0xff] %v6536_v10  ;;  %v5830_v59 = vpop.f32.mrf.mxu1  ;;  %v6537_v13 = vmul.f32 %v11147_v44, %v5749_v15  ;;  %v11154_v10 = vld [vmem:[#allocation103_spill] sm:$0xff] }
 0x365   : > { %v6538_v50 = vmul.f32 %v11148_v17, %v5830_v59  ;;  %v5753_v7 = vpop.f32.mrf.mxu0 }
 0x366   : > { %6678 = vst [vmem:[%s10203_s18 + $0xe8] sm:$0xff] %v6537_v13  ;;  %v5832_v62 = vpop.f32.mrf.mxu1  ;;  %v6583_v20 = vmul.f32 %v11149_v3, %v5753_v7  ;;  %v11155_v13 = vld [vmem:[#allocation99_spill] sm:$0xff]  ;;  %v11157_v3 = vld [vmem:[#allocation102_spill] sm:$0xff] }
 0x367   : > { %6679 = vst [vmem:[%s10203_s18 + $0xf0] sm:$0xff] %v6538_v50  ;;  %v6539_v40 = vmul.f32 %v11150_v58, %v5832_v62  ;;  %v5755_v27 = vpop.f32.mrf.mxu0  ;;  %v11156_v50 = vld [vmem:[#allocation74_spill] sm:$0xff] }
 0x368   : > { %6724 = vst [vmem:[%s10203_s18 + $0x258] sm:$0xff] %v6583_v20  ;;  %v5836_v1 = vpop.f32.mrf.mxu1  ;;  %v6584_v63 = vmul.f32 %v11151_v0, %v5755_v27 }
 0x369   : > { %6680 = vst [vmem:[%s10203_s18 + $0xf8] sm:$0xff] %v6539_v40  ;;  %v6585_v34 = vmul.f32 %v11152_v22, %v5836_v1  ;;  %v5759_v47 = vpop.f32.mrf.mxu0 }
 0x36a   : > { %6725 = vst [vmem:[%s10203_s18 + $0x260] sm:$0xff] %v6584_v63  ;;  %v5838_v31 = vpop.f32.mrf.mxu1  ;;  %v6630_v30 = vmul.f32 %v11153_v4, %v5759_v47 }
 0x36b   : > { %6726 = vst [vmem:[%s10203_s18 + $0x268] sm:$0xff] %v6585_v34  ;;  %v6586_v15 = vmul.f32 %v11154_v10, %v5838_v31  ;;  %v5761_v59 = vpop.f32.mrf.mxu0 }
 0x36c   : > { %6771 = vst [vmem:[%s10203_s18 + $0x3d0] sm:$0xff] %v6630_v30  ;;  %v5842_v44 = vpop.f32.mrf.mxu1  ;;  %v6631_v17 = vmul.f32 %v11155_v13, %v5761_v59  ;;  %v11159_v13 = vld [vmem:[#allocation92_spill] sm:$0xff] }
 0x36d   : > { %6727 = vst [vmem:[%s10203_s18 + $0x270] sm:$0xff] %v6586_v15  ;;  %v6632_v7 = vmul.f32 %v11156_v50, %v5842_v44  ;;  %v11158_v15 = vld [vmem:[#allocation88_spill] sm:$0xff] }
 0x36e   : > { %6772 = vst [vmem:[%s10203_s18 + $0x3d8] sm:$0xff] %v6631_v17  ;;  %v5844_v62 = vpop.f32.mrf.mxu1 }
 0x36f   : > { %6773 = vst [vmem:[%s10203_s18 + $0x3e0] sm:$0xff] %v6632_v7  ;;  %v6633_v20 = vmul.f32 %v11157_v3, %v5844_v62  ;;  %v11161_v7 = vld [vmem:[#allocation84_spill] sm:$0xff] }
 0x371   : > { %6774 = vst [vmem:[%s10203_s18 + $0x3e8] sm:$0xff] %v6633_v20 }
 0x372   : > { %v5913_v58 = vpop.f32.mrf.mxu0 }
 0x373   : > { %v6540_v40 = vmul.f32 %v9688_v12, %v5913_v58 }
 0x374   : > { %v5915_v27 = vpop.f32.mrf.mxu0 }
 0x375   : > { %6681 = vst [vmem:[%s10203_s18 + $0x100] sm:$0xff] %v6540_v40  ;;  %v5996_v1 = vpop.f32.mrf.mxu1  ;;  %v6541_v0 = vmul.f32 %v9762_v8, %v5915_v27 }
 0x376   : > { %v6542_v63 = vmul.f32 %v9712_v14, %v5996_v1  ;;  %v5919_v22 = vpop.f32.mrf.mxu0 }
 0x377   : > { %6682 = vst [vmem:[%s10203_s18 + $0x108] sm:$0xff] %v6541_v0  ;;  %v5998_v34 = vpop.f32.mrf.mxu1  ;;  %v6587_v47 = vmul.f32 %v9696_v48, %v5919_v22 }
 0x378   : > { %6683 = vst [vmem:[%s10203_s18 + $0x110] sm:$0xff] %v6542_v63  ;;  %v6543_v31 = vmul.f32 %v9778_v42, %v5998_v34  ;;  %v5921_v12 = vpop.f32.mrf.mxu0 }
 0x379   : > { %6728 = vst [vmem:[%s10203_s18 + $0x278] sm:$0xff] %v6587_v47  ;;  %v6002_v4 = vpop.f32.mrf.mxu1  ;;  %v6588_v30 = vmul.f32 %v9750_v52, %v5921_v12  ;;  %v11160_v52 = vld [vmem:[#allocation93_spill] sm:$0xff] }
 0x37a   : > { %6684 = vst [vmem:[%s10203_s18 + $0x118] sm:$0xff] %v6543_v31  ;;  %v6589_v14 = vmul.f32 %v9723_v23, %v6002_v4  ;;  %v5925_v8 = vpop.f32.mrf.mxu0 }
 0x37b   : > { %6729 = vst [vmem:[%s10203_s18 + $0x280] sm:$0xff] %v6588_v30  ;;  %v6004_v10 = vpop.f32.mrf.mxu1  ;;  %v6634_v48 = vmul.f32 %v9702_v9, %v5925_v8 }
 0x37c   : > { %6730 = vst [vmem:[%s10203_s18 + $0x288] sm:$0xff] %v6589_v14  ;;  %v6590_v42 = vmul.f32 %v11158_v15, %v6004_v10  ;;  %v5927_v59 = vpop.f32.mrf.mxu0 }
 0x37d   : > { %6775 = vst [vmem:[%s10203_s18 + $0x3f0] sm:$0xff] %v6634_v48  ;;  %v6008_v44 = vpop.f32.mrf.mxu1  ;;  %v6635_v17 = vmul.f32 %v11159_v13, %v5927_v59 }
 0x37e   : > { %6731 = vst [vmem:[%s10203_s18 + $0x290] sm:$0xff] %v6590_v42  ;;  %v6636_v50 = vmul.f32 %v11160_v52, %v6008_v44 }
 0x37f   : > { %6776 = vst [vmem:[%s10203_s18 + $0x3f8] sm:$0xff] %v6635_v17  ;;  %v6010_v23 = vpop.f32.mrf.mxu1 }
 0x380   : > { %6777 = vst [vmem:[%s10203_s18 + $0x400] sm:$0xff] %v6636_v50  ;;  %v6637_v62 = vmul.f32 %v11161_v7, %v6010_v23 }
 0x382   : > { %6778 = vst [vmem:[%s10203_s18 + $0x408] sm:$0xff] %v6637_v62 }
 0x38a   : > { %v6079_v9 = vpop.f32.mrf.mxu0 }
 0x38b   : > { %v6544_v3 = vmul.f32 %v9820_v46, %v6079_v9 }
 0x38c   : > { %v6081_v20 = vpop.f32.mrf.mxu0 }
 0x38d   : > { %6685 = vst [vmem:[%s10203_s18 + $0x120] sm:$0xff] %v6544_v3  ;;  %v6162_v58 = vpop.f32.mrf.mxu1  ;;  %v6545_v40 = vmul.f32 %v9875_v55, %v6081_v20 }
 0x38e   : > { %v6546_v27 = vmul.f32 %v9843_v53, %v6162_v58  ;;  %v6085_v1 = vpop.f32.mrf.mxu0 }
 0x38f   : > { %6686 = vst [vmem:[%s10203_s18 + $0x128] sm:$0xff] %v6545_v40  ;;  %v6164_v0 = vpop.f32.mrf.mxu1  ;;  %v6591_v63 = vmul.f32 %v9831_v19, %v6085_v1 }
 0x390   : > { %6687 = vst [vmem:[%s10203_s18 + $0x130] sm:$0xff] %v6546_v27  ;;  %v6547_v22 = vmul.f32 %v9885_v45, %v6164_v0  ;;  %v6087_v46 = vpop.f32.mrf.mxu0 }
 0x391   : > { %6732 = vst [vmem:[%s10203_s18 + $0x298] sm:$0xff] %v6591_v63  ;;  %v6168_v34 = vpop.f32.mrf.mxu1  ;;  %v6592_v47 = vmul.f32 %v9869_v49, %v6087_v46  ;;  %v6824_v46 = vld [vmem:[%s10203_s18 + $0x28] sm:$0xff] (%p8073_p6) }
 0x392   : > { %6688 = vst [vmem:[%s10203_s18 + $0x138] sm:$0xff] %v6547_v22  ;;  %v6593_v53 = vmul.f32 %v9848_v29, %v6168_v34  ;;  %v6091_v55 = vpop.f32.mrf.mxu0  ;;  %v6826_v34 = vld [vmem:[%s10203_s18 + $0x30] sm:$0xff] (%p8073_p6)  ;;  %6825 = vst [vmem:[%s10530_s6 + $0x28] sm:$0xff] (%p8073_p6), %v6824_v46  ;;  %v6952_v46 = vld [vmem:[%s10203_s18 + $0x228] sm:$0xff] (%p8073_p6) }
 0x393   : > { %6733 = vst [vmem:[%s10203_s18 + $0x2a0] sm:$0xff] %v6592_v47  ;;  %v6170_v31 = vpop.f32.mrf.mxu1  ;;  %v6638_v19 = vmul.f32 %v9837_v32, %v6091_v55  ;;  %v6828_v47 = vld [vmem:[%s10203_s18 + $0x38] sm:$0xff] (%p8073_p6)  ;;  %v6832_v55 = vld [vmem:[%s10203_s18 + $0x48] sm:$0xff] (%p8073_p6)  ;;  %6827 = vst [vmem:[%s10530_s6 + $0x30] sm:$0xff] (%p8073_p6), %v6826_v34 }
 0x394   : > { %6734 = vst [vmem:[%s10203_s18 + $0x2a8] sm:$0xff] %v6593_v53  ;;  %v6594_v45 = vmul.f32 %v9879_v57, %v6170_v31  ;;  %v6093_v12 = vpop.f32.mrf.mxu0  ;;  %v6830_v53 = vld [vmem:[%s10203_s18 + $0x40] sm:$0xff] (%p8073_p6)  ;;  %v6834_v31 = vld [vmem:[%s10203_s18 + $0x50] sm:$0xff] (%p8073_p6)  ;;  %6829 = vst [vmem:[%s10530_s6 + $0x38] sm:$0xff] (%p8073_p6), %v6828_v47 }
 0x395   : > { %6779 = vst [vmem:[%s10203_s18 + $0x410] sm:$0xff] %v6638_v19  ;;  %v6174_v4 = vpop.f32.mrf.mxu1  ;;  %v6639_v30 = vmul.f32 %v9860_v54, %v6093_v12  ;;  %v6836_v19 = vld [vmem:[%s10203_s18 + $0x58] sm:$0xff] (%p8073_p6)  ;;  %v6840_v12 = vld [vmem:[%s10203_s18 + $0x68] sm:$0xff] (%p8073_p6)  ;;  %6831 = vst [vmem:[%s10530_s6 + $0x40] sm:$0xff] (%p8073_p6), %v6830_v53 }
 0x396   : > { %6735 = vst [vmem:[%s10203_s18 + $0x2b0] sm:$0xff] %v6594_v45  ;;  %v6640_v49 = vmul.f32 %v9863_v28, %v6174_v4  ;;  %v6838_v45 = vld [vmem:[%s10203_s18 + $0x60] sm:$0xff] (%p8073_p6)  ;;  %v6842_v4 = vld [vmem:[%s10203_s18 + $0x70] sm:$0xff] (%p8073_p6)  ;;  %6833 = vst [vmem:[%s10530_s6 + $0x48] sm:$0xff] (%p8073_p6), %v6832_v55 }
 0x397   : > { %6780 = vst [vmem:[%s10203_s18 + $0x418] sm:$0xff] %v6639_v30  ;;  %v6176_v29 = vpop.f32.mrf.mxu1  ;;  %v6245_v32 = vpop.f32.mrf.mxu0  ;;  %v6844_v30 = vld [vmem:[%s10203_s18 + $0x78] sm:$0xff] (%p8073_p6)  ;;  %6835 = vst [vmem:[%s10530_s6 + $0x50] sm:$0xff] (%p8073_p6), %v6834_v31  ;;  %v6954_v34 = vld [vmem:[%s10203_s18 + $0x230] sm:$0xff] (%p8073_p6) }
 0x398   : > { %6781 = vst [vmem:[%s10203_s18 + $0x420] sm:$0xff] %v6640_v49  ;;  %v6641_v14 = vmul.f32 %v9872_v6, %v6176_v29  ;;  %v6548_v8 = vmul.f32 %v9898_v38, %v6245_v32  ;;  %v6846_v49 = vld [vmem:[%s10203_s18 + $0x80] sm:$0xff] (%p8073_p6)  ;;  %v6848_v29 = vld [vmem:[%s10203_s18 + $0x88] sm:$0xff] (%p8073_p6)  ;;  %6837 = vst [vmem:[%s10530_s6 + $0x58] sm:$0xff] (%p8073_p6), %v6836_v19 }
 0x399   : > { %v6247_v57 = vpop.f32.mrf.mxu0  ;;  %6839 = vst [vmem:[%s10530_s6 + $0x60] sm:$0xff] (%p8073_p6), %v6838_v45  ;;  %6841 = vst [vmem:[%s10530_s6 + $0x68] sm:$0xff] (%p8073_p6), %v6840_v12  ;;  %v6852_v32 = vld [vmem:[%s10203_s18 + $0x98] sm:$0xff] (%p8073_p6)  ;;  %v6958_v53 = vld [vmem:[%s10203_s18 + $0x240] sm:$0xff] (%p8073_p6) }
 0x39a   : > { %6782 = vst [vmem:[%s10203_s18 + $0x428] sm:$0xff] %v6641_v14  ;;  %6689 = vst [vmem:[%s10203_s18 + $0x140] sm:$0xff] %v6548_v8  ;;  %v6328_v10 = vpop.f32.mrf.mxu1  ;;  %v6549_v54 = vmul.f32 %v9923_v43, %v6247_v57  ;;  %v6850_v14 = vld [vmem:[%s10203_s18 + $0x90] sm:$0xff] (%p8073_p6)  ;;  %v6854_v8 = vld [vmem:[%s10203_s18 + $0xa0] sm:$0xff] (%p8073_p6) }
 0x39b   : > { %v6550_v28 = vmul.f32 %v9943_v16, %v6328_v10  ;;  %v6251_v48 = vpop.f32.mrf.mxu0  ;;  %6843 = vst [vmem:[%s10530_s6 + $0x70] sm:$0xff] (%p8073_p6), %v6842_v4  ;;  %6845 = vst [vmem:[%s10530_s6 + $0x78] sm:$0xff] (%p8073_p6), %v6844_v30  ;;  %v6856_v57 = vld [vmem:[%s10203_s18 + $0xa8] sm:$0xff] (%p8073_p6)  ;;  %v6858_v10 = vld [vmem:[%s10203_s18 + $0xb0] sm:$0xff] (%p8073_p6) }
 0x39c   : > { %6690 = vst [vmem:[%s10203_s18 + $0x148] sm:$0xff] %v6549_v54  ;;  %v6330_v15 = vpop.f32.mrf.mxu1  ;;  %v6595_v6 = vmul.f32 %v9902_v41, %v6251_v48  ;;  %6847 = vst [vmem:[%s10530_s6 + $0x80] sm:$0xff] (%p8073_p6), %v6846_v49  ;;  %v6860_v54 = vld [vmem:[%s10203_s18 + $0xb8] sm:$0xff] (%p8073_p6)  ;;  %v6864_v48 = vld [vmem:[%s10203_s18 + $0xc8] sm:$0xff] (%p8073_p6) }
 0x39d   : > { %6691 = vst [vmem:[%s10203_s18 + $0x150] sm:$0xff] %v6550_v28  ;;  %v6551_v38 = vmul.f32 %v9938_v18, %v6330_v15  ;;  %v6253_v42 = vpop.f32.mrf.mxu0  ;;  %6849 = vst [vmem:[%s10530_s6 + $0x88] sm:$0xff] (%p8073_p6), %v6848_v29  ;;  %v6862_v28 = vld [vmem:[%s10203_s18 + $0xc0] sm:$0xff] (%p8073_p6)  ;;  %v6866_v15 = vld [vmem:[%s10203_s18 + $0xd0] sm:$0xff] (%p8073_p6) }
 0x39e   : > { %6736 = vst [vmem:[%s10203_s18 + $0x2b8] sm:$0xff] %v6595_v6  ;;  %v6334_v59 = vpop.f32.mrf.mxu1  ;;  %v6596_v44 = vmul.f32 %v9915_v39, %v6253_v42  ;;  %6851 = vst [vmem:[%s10530_s6 + $0x90] sm:$0xff] (%p8073_p6), %v6850_v14  ;;  %v6868_v6 = vld [vmem:[%s10203_s18 + $0xd8] sm:$0xff] (%p8073_p6)  ;;  %v6872_v42 = vld [vmem:[%s10203_s18 + $0xe8] sm:$0xff] (%p8073_p6) }
 0x39f   : > { %6692 = vst [vmem:[%s10203_s18 + $0x158] sm:$0xff] %v6551_v38  ;;  %v6597_v43 = vmul.f32 %v9933_v25, %v6334_v59  ;;  %v6257_v16 = vpop.f32.mrf.mxu0  ;;  %6853 = vst [vmem:[%s10530_s6 + $0x98] sm:$0xff] (%p8073_p6), %v6852_v32  ;;  %v6870_v38 = vld [vmem:[%s10203_s18 + $0xe0] sm:$0xff] (%p8073_p6)  ;;  %v6874_v59 = vld [vmem:[%s10203_s18 + $0xf0] sm:$0xff] (%p8073_p6) }
 0x3a0   : > { %6737 = vst [vmem:[%s10203_s18 + $0x2c0] sm:$0xff] %v6596_v44  ;;  %v6336_v13 = vpop.f32.mrf.mxu1  ;;  %v6642_v41 = vmul.f32 %v9905_v24, %v6257_v16  ;;  %6855 = vst [vmem:[%s10530_s6 + $0xa0] sm:$0xff] (%p8073_p6), %v6854_v8  ;;  %v6876_v44 = vld [vmem:[%s10203_s18 + $0xf8] sm:$0xff] (%p8073_p6)  ;;  %v6880_v16 = vld [vmem:[%s10203_s18 + $0x108] sm:$0xff] (%p8073_p6) }
 0x3a1   : > { %6738 = vst [vmem:[%s10203_s18 + $0x2c8] sm:$0xff] %v6597_v43  ;;  %v6598_v18 = vmul.f32 %v9928_v37, %v6336_v13  ;;  %v6259_v17 = vpop.f32.mrf.mxu0  ;;  %6857 = vst [vmem:[%s10530_s6 + $0xa8] sm:$0xff] (%p8073_p6), %v6856_v57  ;;  %v6878_v43 = vld [vmem:[%s10203_s18 + $0x100] sm:$0xff] (%p8073_p6)  ;;  %v6882_v13 = vld [vmem:[%s10203_s18 + $0x110] sm:$0xff] (%p8073_p6) }
 0x3a2   : > { %6783 = vst [vmem:[%s10203_s18 + $0x430] sm:$0xff] %v6642_v41  ;;  %v6340_v52 = vpop.f32.mrf.mxu1  ;;  %v6643_v39 = vmul.f32 %v9907_v26, %v6259_v17  ;;  %6859 = vst [vmem:[%s10530_s6 + $0xb0] sm:$0xff] (%p8073_p6), %v6858_v10  ;;  %v6884_v41 = vld [vmem:[%s10203_s18 + $0x118] sm:$0xff] (%p8073_p6)  ;;  %v6888_v17 = vld [vmem:[%s10203_s18 + $0x128] sm:$0xff] (%p8073_p6) }
 0x3a3   : > { %6739 = vst [vmem:[%s10203_s18 + $0x2d0] sm:$0xff] %v6598_v18  ;;  %v6644_v50 = vmul.f32 %v9909_v35, %v6340_v52  ;;  %6861 = vst [vmem:[%s10530_s6 + $0xb8] sm:$0xff] (%p8073_p6), %v6860_v54  ;;  %v6886_v18 = vld [vmem:[%s10203_s18 + $0x120] sm:$0xff] (%p8073_p6)  ;;  %v6890_v52 = vld [vmem:[%s10203_s18 + $0x130] sm:$0xff] (%p8073_p6) }
 0x3a4   : > { %6784 = vst [vmem:[%s10203_s18 + $0x438] sm:$0xff] %v6643_v39  ;;  %v6342_v25 = vpop.f32.mrf.mxu1  ;;  %6863 = vst [vmem:[%s10530_s6 + $0xc0] sm:$0xff] (%p8073_p6), %v6862_v28  ;;  %v6892_v39 = vld [vmem:[%s10203_s18 + $0x138] sm:$0xff] (%p8073_p6)  ;;  %v6960_v55 = vld [vmem:[%s10203_s18 + $0x248] sm:$0xff] (%p8073_p6) }
 0x3a5   : > { %6785 = vst [vmem:[%s10203_s18 + $0x440] sm:$0xff] %v6644_v50  ;;  %v6645_v23 = vmul.f32 %v9919_v36, %v6342_v25  ;;  %6865 = vst [vmem:[%s10530_s6 + $0xc8] sm:$0xff] (%p8073_p6), %v6864_v48  ;;  %v6894_v50 = vld [vmem:[%s10203_s18 + $0x140] sm:$0xff] (%p8073_p6)  ;;  %v6896_v25 = vld [vmem:[%s10203_s18 + $0x148] sm:$0xff] (%p8073_p6) }
 0x3a6   : > { %v6494_v24 = vpop.f32.mrf.mxu1  ;;  %6867 = vst [vmem:[%s10530_s6 + $0xd0] sm:$0xff] (%p8073_p6), %v6866_v15  ;;  %6869 = vst [vmem:[%s10530_s6 + $0xd8] sm:$0xff] (%p8073_p6), %v6868_v6  ;;  %v6956_v47 = vld [vmem:[%s10203_s18 + $0x238] sm:$0xff] (%p8073_p6)  ;;  %v6962_v31 = vld [vmem:[%s10203_s18 + $0x250] sm:$0xff] (%p8073_p6) }
 0x3a7   : > { %6786 = vst [vmem:[%s10203_s18 + $0x448] sm:$0xff] %v6645_v23  ;;  %v6554_v37 = vmul.f32 %v9956_v11, %v6494_v24  ;;  %6871 = vst [vmem:[%s10530_s6 + $0xe0] sm:$0xff] (%p8073_p6), %v6870_v38  ;;  %v6898_v23 = vld [vmem:[%s10203_s18 + $0x150] sm:$0xff] (%p8073_p6)  ;;  %v6900_v24 = vld [vmem:[%s10203_s18 + $0x158] sm:$0xff] (%p8073_p6) }
 0x3a8   : > { %v7413_v7 = vpop.f32.mrf.mxu1  ;;  %6873 = vst [vmem:[%s10530_s6 + $0xe8] sm:$0xff] (%p8073_p6), %v6872_v42  ;;  %6875 = vst [vmem:[%s10530_s6 + $0xf0] sm:$0xff] (%p8073_p6), %v6874_v59  ;;  %v6964_v19 = vld [vmem:[%s10203_s18 + $0x258] sm:$0xff] (%p8073_p6)  ;;  %v6966_v45 = vld [vmem:[%s10203_s18 + $0x260] sm:$0xff] (%p8073_p6) }
 0x3a9   : > { %6695 = vst [vmem:[%s10203_s18 + $0x170] sm:$0xff] %v6554_v37  ;;  %6877 = vst [vmem:[%s10530_s6 + $0xf8] sm:$0xff] (%p8073_p6), %v6876_v44  ;;  %v6968_v12 = vld [vmem:[%s10203_s18 + $0x268] sm:$0xff] (%p8073_p6)  ;;  %v6970_v4 = vld [vmem:[%s10203_s18 + $0x270] sm:$0xff] (%p8073_p6) }
 0x3aa   : > { %v6499_v62 = vpop.f32.mrf.mxu1  ;;  %6879 = vst [vmem:[%s10530_s6 + $0x100] sm:$0xff] (%p8073_p6), %v6878_v43  ;;  %6881 = vst [vmem:[%s10530_s6 + $0x108] sm:$0xff] (%p8073_p6), %v6880_v16  ;;  %v6972_v30 = vld [vmem:[%s10203_s18 + $0x278] sm:$0xff] (%p8073_p6)  ;;  %v6974_v49 = vld [vmem:[%s10203_s18 + $0x280] sm:$0xff] (%p8073_p6) }
 0x3ab   : > { %v6601_v26 = vmul.f32 %v9959_v2, %v6499_v62  ;;  %6883 = vst [vmem:[%s10530_s6 + $0x110] sm:$0xff] (%p8073_p6), %v6882_v13  ;;  %6885 = vst [vmem:[%s10530_s6 + $0x118] sm:$0xff] (%p8073_p6), %v6884_v41  ;;  %v6976_v29 = vld [vmem:[%s10203_s18 + $0x288] sm:$0xff] (%p8073_p6)  ;;  %v6978_v14 = vld [vmem:[%s10203_s18 + $0x290] sm:$0xff] (%p8073_p6) }
 0x3ac   : > { %v7416_v9 = vpop.f32.mrf.mxu1  ;;  %6887 = vst [vmem:[%s10530_s6 + $0x120] sm:$0xff] (%p8073_p6), %v6886_v18  ;;  %6889 = vst [vmem:[%s10530_s6 + $0x128] sm:$0xff] (%p8073_p6), %v6888_v17  ;;  %v6980_v32 = vld [vmem:[%s10203_s18 + $0x298] sm:$0xff] (%p8073_p6)  ;;  %v6982_v8 = vld [vmem:[%s10203_s18 + $0x2a0] sm:$0xff] (%p8073_p6) }
 0x3ad   : > { %6742 = vst [vmem:[%s10203_s18 + $0x2e8] sm:$0xff] %v6601_v26  ;;  %6891 = vst [vmem:[%s10530_s6 + $0x130] sm:$0xff] (%p8073_p6), %v6890_v52  ;;  %v6908_v26 = vld [vmem:[%s10203_s18 + $0x178] sm:$0xff] (%p8073_p6)  ;;  %v6910_v9 = vld [vmem:[%s10203_s18 + $0x180] sm:$0xff] (%p8073_p6) }
 0x3ae   : > { %v6504_v35 = vpop.f32.mrf.mxu1  ;;  %6893 = vst [vmem:[%s10530_s6 + $0x138] sm:$0xff] (%p8073_p6), %v6892_v39  ;;  %6895 = vst [vmem:[%s10530_s6 + $0x140] sm:$0xff] (%p8073_p6), %v6894_v50  ;;  %v6984_v57 = vld [vmem:[%s10203_s18 + $0x2a8] sm:$0xff] (%p8073_p6)  ;;  %v6986_v10 = vld [vmem:[%s10203_s18 + $0x2b0] sm:$0xff] (%p8073_p6) }
 0x3af   : > { %v6648_v3 = vmul.f32 %v9954_v33, %v6504_v35  ;;  %v6411_v20 = vpop.f32.mrf.mxu0  ;;  %6897 = vst [vmem:[%s10530_s6 + $0x148] sm:$0xff] (%p8073_p6), %v6896_v25  ;;  %6899 = vst [vmem:[%s10530_s6 + $0x150] sm:$0xff] (%p8073_p6), %v6898_v23  ;;  %v6912_v35 = vld [vmem:[%s10203_s18 + $0x188] sm:$0xff] (%p8073_p6)  ;;  %v6988_v54 = vld [vmem:[%s10203_s18 + $0x2b8] sm:$0xff] (%p8073_p6) }
 0x3b0   : > { %v7419_v36 = vpop.f32.mrf.mxu1  ;;  %v6552_v58 = vmul.f32 %v9982_v51, %v6411_v20  ;;  %6901 = vst [vmem:[%s10530_s6 + $0x158] sm:$0xff] (%p8073_p6), %v6900_v24  ;;  %v6906_v62 = vld [vmem:[%s10203_s18 + $0x170] sm:$0xff] (%p8073_p6)  ;;  %6909 = vst [vmem:[%s10530_s6 + $0x8d0] sm:$0xff] (%p8073_p6), %v6908_v26  ;;  %v6916_v20 = vld [vmem:[%s10203_s18 + $0x198] sm:$0xff] (%p8073_p6) }
 0x3b1   : > { %6789 = vst [vmem:[%s10203_s18 + $0x460] sm:$0xff] %v6648_v3  ;;  %v6413_v11 = vpop.f32.mrf.mxu0  ;;  %6907 = vst [vmem:[%s10530_s6 + $0x170] sm:$0xff] (%p8073_p6), %v6906_v62  ;;  %v6914_v3 = vld [vmem:[%s10203_s18 + $0x190] sm:$0xff] (%p8073_p6)  ;;  %v6918_v36 = vld [vmem:[%s10203_s18 + $0x1a0] sm:$0xff] (%p8073_p6) }
 0x3b2   : > { %6693 = vst [vmem:[%s10203_s18 + $0x160] sm:$0xff] %v6552_v58  ;;  %v6553_v40 = vmul.f32 %v9968_v56, %v6413_v11  ;;  %v6818_v56 = vld [vmem:[%s10203_s18 + $0x10] sm:$0xff] (%p8073_p6)  ;;  %6911 = vst [vmem:[%s10530_s6 + $0x8d8] sm:$0xff] (%p8073_p6), %v6910_v9  ;;  %v6920_v58 = vld [vmem:[%s10203_s18 + $0x1a8] sm:$0xff] (%p8073_p6) }
 0x3b3   : > { %v6417_v27 = vpop.f32.mrf.mxu0  ;;  %6819 = vst [vmem:[%s10530_s6 + $0x10] sm:$0xff] (%p8073_p6), %v6818_v56  ;;  %6913 = vst [vmem:[%s10530_s6 + $0x8e0] sm:$0xff] (%p8073_p6), %v6912_v35  ;;  %v6922_v11 = vld [vmem:[%s10203_s18 + $0x1b0] sm:$0xff] (%p8073_p6)  ;;  %v6990_v28 = vld [vmem:[%s10203_s18 + $0x2c0] sm:$0xff] (%p8073_p6) }
 0x3b4   : > { %6694 = vst [vmem:[%s10203_s18 + $0x168] sm:$0xff] %v6553_v40  ;;  %v6599_v2 = vmul.f32 %v9962_v21, %v6417_v27  ;;  %v6814_v21 = vld [vmem:[%s10203_s18] sm:$0xff] (%p8073_p6)  ;;  %6915 = vst [vmem:[%s10530_s6 + $0x8e8] sm:$0xff] (%p8073_p6), %v6914_v3  ;;  %v6924_v40 = vld [vmem:[%s10203_s18 + $0x1b8] sm:$0xff] (%p8073_p6) }
 0x3b5   : > { %v6419_v1 = vpop.f32.mrf.mxu0  ;;  %6815 = vst [vmem:[%s10530_s6] sm:$0xff] (%p8073_p6), %v6814_v21  ;;  %6917 = vst [vmem:[%s10530_s6 + $0x8f0] sm:$0xff] (%p8073_p6), %v6916_v20  ;;  %v6926_v27 = vld [vmem:[%s10203_s18 + $0x1c0] sm:$0xff] (%p8073_p6)  ;;  %v6946_v56 = vld [vmem:[%s10203_s18 + $0x210] sm:$0xff] (%p8073_p6) }
 0x3b6   : > { %6740 = vst [vmem:[%s10203_s18 + $0x2d8] sm:$0xff] %v6599_v2  ;;  %v6600_v0 = vmul.f32 %v9975_v61, %v6419_v1  ;;  %v6822_v61 = vld [vmem:[%s10203_s18 + $0x20] sm:$0xff] (%p8073_p6)  ;;  %6919 = vst [vmem:[%s10530_s6 + $0x8f8] sm:$0xff] (%p8073_p6), %v6918_v36  ;;  %v6928_v2 = vld [vmem:[%s10203_s18 + $0x1c8] sm:$0xff] (%p8073_p6) }
 0x3b7   : > { %v6423_v33 = vpop.f32.mrf.mxu0  ;;  %6823 = vst [vmem:[%s10530_s6 + $0x20] sm:$0xff] (%p8073_p6), %v6822_v61  ;;  %6921 = vst [vmem:[%s10530_s6 + $0x900] sm:$0xff] (%p8073_p6), %v6920_v58  ;;  %v6930_v1 = vld [vmem:[%s10203_s18 + $0x1d0] sm:$0xff] (%p8073_p6)  ;;  %v6942_v21 = vld [vmem:[%s10203_s18 + $0x200] sm:$0xff] (%p8073_p6) }
 0x3b8   : > { %6741 = vst [vmem:[%s10203_s18 + $0x2e0] sm:$0xff] %v6600_v0  ;;  %v6646_v63 = vmul.f32 %v9965_v5, %v6423_v33  ;;  %6796 = sbr.rel (!%p8073_p6) target bundleno = 999 (0x3e7), region = 70  ;;  %v6816_v5 = vld [vmem:[%s10203_s18 + $0x8] sm:$0xff] (%p8073_p6)  ;;  %6923 = vst [vmem:[%s10530_s6 + $0x908] sm:$0xff] (%p8073_p6), %v6922_v11  ;;  %v6932_v0 = vld [vmem:[%s10203_s18 + $0x1d8] sm:$0xff] (%p8073_p6) }
 0x3b9   : > { %v6425_v22 = vpop.f32.mrf.mxu0  ;;  %6817 = vst [vmem:[%s10530_s6 + $0x8] sm:$0xff] (%p8073_p6), %v6816_v5  ;;  %v6902_v37 = vld [vmem:[%s10203_s18 + $0x160] sm:$0xff] (%p8073_p6)  ;;  %6925 = vst [vmem:[%s10530_s6 + $0x910] sm:$0xff] (%p8073_p6), %v6924_v40  ;;  %v6944_v5 = vld [vmem:[%s10203_s18 + $0x208] sm:$0xff] (%p8073_p6) }
 0x3ba   : > { %6787 = vst [vmem:[%s10203_s18 + $0x450] sm:$0xff] %v6646_v63  ;;  %v6647_v51 = vmul.f32 %v9971_v60, %v6425_v22  ;;  %v6820_v60 = vld [vmem:[%s10203_s18 + $0x18] sm:$0xff] (%p8073_p6)  ;;  %6903 = vst [vmem:[%s10530_s6 + $0x160] sm:$0xff] (%p8073_p6), %v6902_v37  ;;  %v6934_v33 = vld [vmem:[%s10203_s18 + $0x1e0] sm:$0xff] (%p8073_p6) }
 0x3bb   : > { %6821 = vst [vmem:[%s10530_s6 + $0x18] sm:$0xff] (%p8073_p6), %v6820_v60  ;;  %v6904_v7 = vld [vmem:[%s10203_s18 + $0x168] sm:$0xff] (%p8073_p6)  ;;  %6927 = vst [vmem:[%s10530_s6 + $0x918] sm:$0xff] (%p8073_p6), %v6926_v27  ;;  %v6938_v22 = vld [vmem:[%s10203_s18 + $0x1f0] sm:$0xff] (%p8073_p6) }
 0x3bc   : > { %6788 = vst [vmem:[%s10203_s18 + $0x458] sm:$0xff] %v6647_v51  ;;  %6905 = vst [vmem:[%s10530_s6 + $0x168] sm:$0xff] (%p8073_p6), %v6904_v7  ;;  %v6936_v63 = vld [vmem:[%s10203_s18 + $0x1e8] sm:$0xff] (%p8073_p6)  ;;  %v6940_v51 = vld [vmem:[%s10203_s18 + $0x1f8] sm:$0xff] (%p8073_p6) }
 0x3bd   : > { %6929 = vst [vmem:[%s10530_s6 + $0x920] sm:$0xff] %v6928_v2  ;;  %6931 = vst [vmem:[%s10530_s6 + $0x928] sm:$0xff] %v6930_v1  ;;  %v6948_v60 = vld [vmem:[%s10203_s18 + $0x218] sm:$0xff]  ;;  %v6950_v61 = vld [vmem:[%s10203_s18 + $0x220] sm:$0xff] }
 0x3be   : > { %6933 = vst [vmem:[%s10530_s6 + $0x930] sm:$0xff] %v6932_v0  ;;  %6935 = vst [vmem:[%s10530_s6 + $0x938] sm:$0xff] %v6934_v33  ;;  %v6992_v48 = vld [vmem:[%s10203_s18 + $0x2c8] sm:$0xff]  ;;  %v6994_v15 = vld [vmem:[%s10203_s18 + $0x2d0] sm:$0xff] }
 0x3bf   : > { %6937 = vst [vmem:[%s10530_s6 + $0x940] sm:$0xff] %v6936_v63  ;;  %6939 = vst [vmem:[%s10530_s6 + $0x948] sm:$0xff] %v6938_v22  ;;  %v6996_v6 = vld [vmem:[%s10203_s18 + $0x2d8] sm:$0xff]  ;;  %v6998_v38 = vld [vmem:[%s10203_s18 + $0x2e0] sm:$0xff] }
 0x3c0   : > { %6941 = vst [vmem:[%s10530_s6 + $0x950] sm:$0xff] %v6940_v51  ;;  %6943 = vst [vmem:[%s10530_s6 + $0x958] sm:$0xff] %v6942_v21  ;;  %v7000_v42 = vld [vmem:[%s10203_s18 + $0x2e8] sm:$0xff]  ;;  %v7002_v59 = vld [vmem:[%s10203_s18 + $0x2f0] sm:$0xff] }
 0x3c1   : > { %6945 = vst [vmem:[%s10530_s6 + $0x960] sm:$0xff] %v6944_v5  ;;  %6947 = vst [vmem:[%s10530_s6 + $0x968] sm:$0xff] %v6946_v56  ;;  %v7004_v44 = vld [vmem:[%s10203_s18 + $0x2f8] sm:$0xff]  ;;  %v7006_v43 = vld [vmem:[%s10203_s18 + $0x300] sm:$0xff] }
 0x3c2   : > { %6949 = vst [vmem:[%s10530_s6 + $0x970] sm:$0xff] %v6948_v60  ;;  %6951 = vst [vmem:[%s10530_s6 + $0x978] sm:$0xff] %v6950_v61  ;;  %v7008_v16 = vld [vmem:[%s10203_s18 + $0x308] sm:$0xff]  ;;  %v7010_v13 = vld [vmem:[%s10203_s18 + $0x310] sm:$0xff] }
 0x3c3   : > { %6953 = vst [vmem:[%s10530_s6 + $0x980] sm:$0xff] %v6952_v46  ;;  %6955 = vst [vmem:[%s10530_s6 + $0x988] sm:$0xff] %v6954_v34  ;;  %v7012_v41 = vld [vmem:[%s10203_s18 + $0x318] sm:$0xff]  ;;  %v7014_v18 = vld [vmem:[%s10203_s18 + $0x320] sm:$0xff] }
 0x3c4   : > { %6957 = vst [vmem:[%s10530_s6 + $0x990] sm:$0xff] %v6956_v47  ;;  %6959 = vst [vmem:[%s10530_s6 + $0x998] sm:$0xff] %v6958_v53  ;;  %v7016_v17 = vld [vmem:[%s10203_s18 + $0x328] sm:$0xff]  ;;  %v7018_v52 = vld [vmem:[%s10203_s18 + $0x330] sm:$0xff] }
 0x3c5   : > { %6961 = vst [vmem:[%s10530_s6 + $0x9a0] sm:$0xff] %v6960_v55  ;;  %6963 = vst [vmem:[%s10530_s6 + $0x9a8] sm:$0xff] %v6962_v31  ;;  %v7020_v39 = vld [vmem:[%s10203_s18 + $0x338] sm:$0xff]  ;;  %v7022_v50 = vld [vmem:[%s10203_s18 + $0x340] sm:$0xff] }
 0x3c6   : > { %6965 = vst [vmem:[%s10530_s6 + $0x9b0] sm:$0xff] %v6964_v19  ;;  %6967 = vst [vmem:[%s10530_s6 + $0x9b8] sm:$0xff] %v6966_v45  ;;  %v7024_v25 = vld [vmem:[%s10203_s18 + $0x348] sm:$0xff]  ;;  %v7026_v23 = vld [vmem:[%s10203_s18 + $0x350] sm:$0xff] }
 0x3c7   : > { %6969 = vst [vmem:[%s10530_s6 + $0x9c0] sm:$0xff] %v6968_v12  ;;  %6971 = vst [vmem:[%s10530_s6 + $0x9c8] sm:$0xff] %v6970_v4  ;;  %v7028_v24 = vld [vmem:[%s10203_s18 + $0x358] sm:$0xff]  ;;  %v7030_v37 = vld [vmem:[%s10203_s18 + $0x360] sm:$0xff] }
 0x3c8   : > { %6973 = vst [vmem:[%s10530_s6 + $0x9d0] sm:$0xff] %v6972_v30  ;;  %6975 = vst [vmem:[%s10530_s6 + $0x9d8] sm:$0xff] %v6974_v49  ;;  %v7032_v7 = vld [vmem:[%s10203_s18 + $0x368] sm:$0xff]  ;;  %v7034_v62 = vld [vmem:[%s10203_s18 + $0x370] sm:$0xff] }
 0x3c9   : > { %6977 = vst [vmem:[%s10530_s6 + $0x9e0] sm:$0xff] %v6976_v29  ;;  %6979 = vst [vmem:[%s10530_s6 + $0x9e8] sm:$0xff] %v6978_v14  ;;  %v7036_v26 = vld [vmem:[%s10203_s18 + $0x378] sm:$0xff]  ;;  %v7038_v9 = vld [vmem:[%s10203_s18 + $0x380] sm:$0xff] }
 0x3ca   : > { %6981 = vst [vmem:[%s10530_s6 + $0x9f0] sm:$0xff] %v6980_v32  ;;  %6983 = vst [vmem:[%s10530_s6 + $0x9f8] sm:$0xff] %v6982_v8  ;;  %v7040_v35 = vld [vmem:[%s10203_s18 + $0x388] sm:$0xff]  ;;  %v7042_v3 = vld [vmem:[%s10203_s18 + $0x390] sm:$0xff] }
 0x3cb   : > { %6985 = vst [vmem:[%s10530_s6 + $0xa00] sm:$0xff] %v6984_v57  ;;  %6987 = vst [vmem:[%s10530_s6 + $0xa08] sm:$0xff] %v6986_v10  ;;  %v7044_v20 = vld [vmem:[%s10203_s18 + $0x398] sm:$0xff]  ;;  %v7046_v36 = vld [vmem:[%s10203_s18 + $0x3a0] sm:$0xff] }
 0x3cc   : > { %6989 = vst [vmem:[%s10530_s6 + $0xa10] sm:$0xff] %v6988_v54  ;;  %6991 = vst [vmem:[%s10530_s6 + $0xa18] sm:$0xff] %v6990_v28  ;;  %v7048_v58 = vld [vmem:[%s10203_s18 + $0x3a8] sm:$0xff]  ;;  %v7050_v11 = vld [vmem:[%s10203_s18 + $0x3b0] sm:$0xff] }
 0x3cd   : > { %6993 = vst [vmem:[%s10530_s6 + $0xa20] sm:$0xff] %v6992_v48  ;;  %6995 = vst [vmem:[%s10530_s6 + $0xa28] sm:$0xff] %v6994_v15  ;;  %v7052_v40 = vld [vmem:[%s10203_s18 + $0x3b8] sm:$0xff]  ;;  %v7054_v27 = vld [vmem:[%s10203_s18 + $0x3c0] sm:$0xff] }
 0x3ce   : > { %6997 = vst [vmem:[%s10530_s6 + $0xa30] sm:$0xff] %v6996_v6  ;;  %6999 = vst [vmem:[%s10530_s6 + $0xa38] sm:$0xff] %v6998_v38  ;;  %v7056_v2 = vld [vmem:[%s10203_s18 + $0x3c8] sm:$0xff]  ;;  %v7058_v1 = vld [vmem:[%s10203_s18 + $0x3d0] sm:$0xff] }
 0x3cf   : > { %7001 = vst [vmem:[%s10530_s6 + $0xa40] sm:$0xff] %v7000_v42  ;;  %7003 = vst [vmem:[%s10530_s6 + $0x11a0] sm:$0xff] %v7002_v59  ;;  %v7060_v0 = vld [vmem:[%s10203_s18 + $0x3d8] sm:$0xff]  ;;  %v7062_v33 = vld [vmem:[%s10203_s18 + $0x3e0] sm:$0xff] }
 0x3d0   : > { %7005 = vst [vmem:[%s10530_s6 + $0x11a8] sm:$0xff] %v7004_v44  ;;  %7007 = vst [vmem:[%s10530_s6 + $0x11b0] sm:$0xff] %v7006_v43  ;;  %v7064_v63 = vld [vmem:[%s10203_s18 + $0x3e8] sm:$0xff]  ;;  %v7066_v22 = vld [vmem:[%s10203_s18 + $0x3f0] sm:$0xff] }
 0x3d1   : > { %7009 = vst [vmem:[%s10530_s6 + $0x11b8] sm:$0xff] %v7008_v16  ;;  %7011 = vst [vmem:[%s10530_s6 + $0x11c0] sm:$0xff] %v7010_v13  ;;  %v7068_v51 = vld [vmem:[%s10203_s18 + $0x3f8] sm:$0xff]  ;;  %v7070_v21 = vld [vmem:[%s10203_s18 + $0x400] sm:$0xff] }
 0x3d2   : > { %7013 = vst [vmem:[%s10530_s6 + $0x11c8] sm:$0xff] %v7012_v41  ;;  %7015 = vst [vmem:[%s10530_s6 + $0x11d0] sm:$0xff] %v7014_v18  ;;  %v7072_v5 = vld [vmem:[%s10203_s18 + $0x408] sm:$0xff]  ;;  %v7074_v56 = vld [vmem:[%s10203_s18 + $0x410] sm:$0xff] }
 0x3d3   : > { %7017 = vst [vmem:[%s10530_s6 + $0x11d8] sm:$0xff] %v7016_v17  ;;  %7019 = vst [vmem:[%s10530_s6 + $0x11e0] sm:$0xff] %v7018_v52  ;;  %v7076_v60 = vld [vmem:[%s10203_s18 + $0x418] sm:$0xff]  ;;  %v7078_v61 = vld [vmem:[%s10203_s18 + $0x420] sm:$0xff] }
 0x3d4   : > { %7021 = vst [vmem:[%s10530_s6 + $0x11e8] sm:$0xff] %v7020_v39  ;;  %7023 = vst [vmem:[%s10530_s6 + $0x11f0] sm:$0xff] %v7022_v50  ;;  %v7080_v46 = vld [vmem:[%s10203_s18 + $0x428] sm:$0xff]  ;;  %v7082_v34 = vld [vmem:[%s10203_s18 + $0x430] sm:$0xff] }
 0x3d5   : > { %7025 = vst [vmem:[%s10530_s6 + $0x11f8] sm:$0xff] %v7024_v25  ;;  %7027 = vst [vmem:[%s10530_s6 + $0x1200] sm:$0xff] %v7026_v23  ;;  %v7084_v47 = vld [vmem:[%s10203_s18 + $0x438] sm:$0xff]  ;;  %v7086_v53 = vld [vmem:[%s10203_s18 + $0x440] sm:$0xff] }
 0x3d6   : > { %7029 = vst [vmem:[%s10530_s6 + $0x1208] sm:$0xff] %v7028_v24  ;;  %7031 = vst [vmem:[%s10530_s6 + $0x1210] sm:$0xff] %v7030_v37  ;;  %v7088_v55 = vld [vmem:[%s10203_s18 + $0x448] sm:$0xff]  ;;  %v7090_v31 = vld [vmem:[%s10203_s18 + $0x450] sm:$0xff] }
 0x3d7   : > { %7033 = vst [vmem:[%s10530_s6 + $0x1218] sm:$0xff] %v7032_v7  ;;  %7035 = vst [vmem:[%s10530_s6 + $0x1220] sm:$0xff] %v7034_v62  ;;  %v7092_v19 = vld [vmem:[%s10203_s18 + $0x458] sm:$0xff]  ;;  %v7094_v45 = vld [vmem:[%s10203_s18 + $0x460] sm:$0xff] }
 0x3d8   : > { %7037 = vst [vmem:[%s10530_s6 + $0x1228] sm:$0xff] %v7036_v26  ;;  %7039 = vst [vmem:[%s10530_s6 + $0x1230] sm:$0xff] %v7038_v9 }
 0x3d9   : > { %7041 = vst [vmem:[%s10530_s6 + $0x1238] sm:$0xff] %v7040_v35  ;;  %7043 = vst [vmem:[%s10530_s6 + $0x1240] sm:$0xff] %v7042_v3 }
 0x3da   : > { %7045 = vst [vmem:[%s10530_s6 + $0x1248] sm:$0xff] %v7044_v20  ;;  %7047 = vst [vmem:[%s10530_s6 + $0x1250] sm:$0xff] %v7046_v36 }
 0x3db   : > { %7049 = vst [vmem:[%s10530_s6 + $0x1258] sm:$0xff] %v7048_v58  ;;  %7051 = vst [vmem:[%s10530_s6 + $0x1260] sm:$0xff] %v7050_v11 }
 0x3dc   : > { %7053 = vst [vmem:[%s10530_s6 + $0x1268] sm:$0xff] %v7052_v40  ;;  %7055 = vst [vmem:[%s10530_s6 + $0x1270] sm:$0xff] %v7054_v27 }
 0x3dd   : > { %7057 = vst [vmem:[%s10530_s6 + $0x1278] sm:$0xff] %v7056_v2  ;;  %7059 = vst [vmem:[%s10530_s6 + $0x1280] sm:$0xff] %v7058_v1 }
 0x3de   : > { %7061 = vst [vmem:[%s10530_s6 + $0x1288] sm:$0xff] %v7060_v0  ;;  %7063 = vst [vmem:[%s10530_s6 + $0x1290] sm:$0xff] %v7062_v33 }
 0x3df   : > { %7065 = vst [vmem:[%s10530_s6 + $0x1298] sm:$0xff] %v7064_v63  ;;  %7067 = vst [vmem:[%s10530_s6 + $0x12a0] sm:$0xff] %v7066_v22 }
 0x3e0   : > { %7069 = vst [vmem:[%s10530_s6 + $0x12a8] sm:$0xff] %v7068_v51  ;;  %7071 = vst [vmem:[%s10530_s6 + $0x12b0] sm:$0xff] %v7070_v21 }
 0x3e1   : > { %7073 = vst [vmem:[%s10530_s6 + $0x12b8] sm:$0xff] %v7072_v5  ;;  %7075 = vst [vmem:[%s10530_s6 + $0x12c0] sm:$0xff] %v7074_v56 }
 0x3e2   : > { %7077 = vst [vmem:[%s10530_s6 + $0x12c8] sm:$0xff] %v7076_v60  ;;  %7079 = vst [vmem:[%s10530_s6 + $0x12d0] sm:$0xff] %v7078_v61 }
 0x3e3   : > { %7081 = vst [vmem:[%s10530_s6 + $0x12d8] sm:$0xff] %v7080_v46  ;;  %7083 = vst [vmem:[%s10530_s6 + $0x12e0] sm:$0xff] %v7082_v34 }
 0x3e4   : > { %7085 = vst [vmem:[%s10530_s6 + $0x12e8] sm:$0xff] %v7084_v47  ;;  %7087 = vst [vmem:[%s10530_s6 + $0x12f0] sm:$0xff] %v7086_v53 }
 0x3e5   : > { %7089 = vst [vmem:[%s10530_s6 + $0x12f8] sm:$0xff] %v7088_v55  ;;  %7091 = vst [vmem:[%s10530_s6 + $0x1300] sm:$0xff] %v7090_v31 }
 0x3e6   : > { %7093 = vst [vmem:[%s10530_s6 + $0x1308] sm:$0xff] %v7092_v19  ;;  %7095 = vst [vmem:[%s10530_s6 + $0x1310] sm:$0xff] %v7094_v45 }
 0x3e7 PF: > { %s15_s24 = sadd.s32 1, %s7990_s24   ;;  %s11162_s18 = smov %s7970_s19 }
 0x3e8   : > { %p12_p12 = scmp.ge.s32.totalorder %s15_s24, 14   ;;  %s11163_s19 = smov %s8081_s8 }
 0x3e9   : > { %s11164_s20 = smov %s7982_s22  ;;  %s11165_s21 = smov %s7986_s23 }
 0x3ea   : > { %s11166_s22 = smov %s11169_s25  ;;  %s11167_s23 = smov %s11173_s26 }
 0x3eb   :  { %14 = sbr.rel (!%p12_p12) target bundleno = 4 (0x4), region = 130 }

</bundles_post_ra>
